<compile_context>
chip_gen: v7x
topology: tpu7x:2x2x1
jax: 0.10.0
libtpu: 0.0.40
codegen_flags: <defaults>
</compile_context>

<pallas_src>
import math

import jax
import jax.numpy as jnp
from jax.experimental import pallas as pl
from jax.experimental.pallas import tpu as pltpu

EPS = 1e-10
THETA_MAX = 1e6

# ----------------------------------------------------------------------------
# Rational Lanczos lgamma (strictly positive arguments only, which is all this
# loss ever needs).  A(z) = c0 + sum_k c_k/(z+k) == P(z)/Q(z).
# ----------------------------------------------------------------------------
_LANCZOS_G = 7.0
_LANCZOS_C0 = 0.99999999999980993
_LANCZOS_COEFS = (
    676.5203681218851, -1259.1392167224028, 771.32342877765313,
    -176.61502916214059, 12.507343278686905, -0.13857109526572012,
    9.9843695780195716e-6, 1.5056327351493116e-7,
)
_HALF_LOG_2PI = 0.5 * math.log(2.0 * math.pi)


def _build_lanczos_rational():
    """Ascending-order coefficients of P, Q with P(z)/Q(z) == c0 + sum_k c_k/(z+k),
    Q(z) = prod_{k=1..8} (z+k).  Built in float64 at import time."""
    def mul_linear(p, k):                      # p(z) * (z + k), ascending coeffs
        out = [0.0] * (len(p) + 1)
        for i, c in enumerate(p):
            out[i] += c * k
            out[i + 1] += c
        return out

    q = [1.0]
    for k in range(1, 9):
        q = mul_linear(q, float(k))
    p = [_LANCZOS_C0 * c for c in q]           # degree 8
    for idx, ck in enumerate(_LANCZOS_COEFS):
        k = idx + 1
        qk = [1.0]                             # Q(z)/(z+k), degree 7
        for j in range(1, 9):
            if j != k:
                qk = mul_linear(qk, float(j))
        for i, c in enumerate(qk):
            p[i] += ck * c
    return tuple(p), tuple(q)


_LP_ASC, _LQ_ASC = _build_lanczos_rational()
_LP_DESC = tuple(reversed(_LP_ASC))
_LQ_DESC = tuple(reversed(_LQ_ASC))


def _horner(x, coefs_desc):
    acc = x * coefs_desc[0] + coefs_desc[1]
    for c in coefs_desc[2:]:
        acc = acc * x + c
    return acc


def _lanczos_series(z):
    """c0 + sum_k c_k/(z+k) with a single divide.  For z > 1 the same rational is
    evaluated in w = 1/z (reversed coefficients) so the Horner chains cannot
    overflow f32 even for theta at the 1e6 clamp."""
    z_lo = jnp.minimum(z, 1.0)
    num_lo = _horner(z_lo, _LP_DESC)
    den_lo = _horner(z_lo, _LQ_DESC)
    w = 1.0 / jnp.maximum(z, 1.0)
    num_hi = _horner(w, _LP_ASC)               # P(z)/z^8
    den_hi = _horner(w, _LQ_ASC)               # Q(z)/z^8
    big = z > 1.0
    num = jnp.where(big, num_hi, num_lo)
    den = jnp.where(big, den_hi, den_lo)
    return num / den


def _lgamma_pos(x):
    """log(Gamma(x)) for x > 0 (no reflection path needed in this loss)."""
    z = x - 1.0
    t = z + (_LANCZOS_G + 0.5)
    return _HALF_LOG_2PI + (z + 0.5) * jnp.log(t) - t + jnp.log(_lanczos_series(z))


# ----------------------------------------------------------------------------
# Element-wise loss bodies (run inside the kernel on (tb, tf) f32 tiles).
# ----------------------------------------------------------------------------
def _nb_core(y_pred, theta_c, y_true, log_theta_eps):
    """dca-style NB NLL; theta_c is pre-clamped, log(theta_c+EPS) is shared by the
    caller, and the module-default scale_factor=1.0 has been folded out."""
    t1 = (_lgamma_pos(theta_c + EPS) + _lgamma_pos(y_true + 1.0)
          - _lgamma_pos(y_true + theta_c + EPS))
    # keep the log(1 + ratio) form (do NOT split into log differences)
    t2 = ((theta_c + y_true) * jnp.log(1.0 + y_pred / (theta_c + EPS))
          + y_true * (log_theta_eps - jnp.log(y_pred + EPS)))
    return t1 + t2


def _nb_loss_elem(m, th, y):
    theta_c = jnp.minimum(th, THETA_MAX)
    return _nb_core(m, theta_c, y, jnp.log(theta_c + EPS))


def _zinb_loss_elem(m, th, pi, y):
    theta_c = jnp.minimum(th, THETA_MAX)
    log_theta_eps = jnp.log(theta_c + EPS)
    one_minus_pi = 1.0 - pi
    nb_case = _nb_core(m, theta_c, y, log_theta_eps) - jnp.log(one_minus_pi + EPS)
    # zero-inflation branch; theta == 0 guarded so pow(0, 0) -> 1 like torch.pow
    log_ratio = jnp.log(theta_c / (theta_c + m + EPS))
    zero_nb = jnp.where(theta_c > 0.0, jnp.exp(theta_c * log_ratio), 1.0)
    zero_case = -jnp.log(pi + one_minus_pi * zero_nb + EPS)
    # ridge_lambda = tv_lambda = 0 with module defaults -> those terms vanish.
    return jnp.where(y < 1e-8, zero_case, nb_case)


def _absdiff_elem(a, b):
    return jnp.abs(a - b)


# ----------------------------------------------------------------------------
# Generic tiled masked-sum reduction kernel factory + wrapper.
# ----------------------------------------------------------------------------
def _make_sum_kernel(elem_fn, n_in, tb, tf, nrows, ncols):
    need_mask = (nrows % tb != 0) or (ncols % tf != 0)

    def kernel(*refs):
        in_refs, out_ref = refs[:n_in], refs[n_in]
        fi = pl.program_id(1)

        @pl.when(fi == 0)
        def _init():
            out_ref[...] = jnp.zeros_like(out_ref)

        xs = [r[...].astype(jnp.float32) for r in in_refs]   # cast in VMEM
        elem = elem_fn(*xs)
        if need_mask:
            bi = pl.program_id(0)
            row = jax.lax.broadcasted_iota(jnp.int32, (tb, tf), 0) + bi * tb
            col = jax.lax.broadcasted_iota(jnp.int32, (tb, tf), 1) + fi * tf
            elem = jnp.where((row < nrows) & (col < ncols), elem, 0.0)
        part = jnp.sum(elem, axis=1, keepdims=True)
        part = jnp.sum(part, axis=0, keepdims=True)          # (1, 1) tile sum
        r8 = jax.lax.broadcasted_iota(jnp.int32, (8, 128), 0)
        c128 = jax.lax.broadcasted_iota(jnp.int32, (8, 128), 1)
        out_ref[...] += jnp.where((r8 == 0) & (c128 == 0), part, 0.0)

    return kernel


def _round_up(x, m):
    return ((x + m - 1) // m) * m


def _tiled_mean(elem_fn, arrays, *, transc_per_elem=0, flops_per_elem=4):
    """mean(elem_fn(*arrays)) over same-shape 2-D (batch, features) arrays via a
    tiled Pallas reduction; final 1/N scaling is a multiply on the host."""
    nrows, ncols = arrays[0].shape
    for a in arrays:
        assert a.shape == (nrows, ncols)

    tb = min(_round_up(nrows, 8), 128)
    tf_cap = max(128, ((1 << 18) // tb) // 128 * 128)        # ~1 MiB f32 per tile
    tf = min(_round_up(ncols, 128), 2048, tf_cap)
    n_bt = -(-nrows // tb)
    n_ft = -(-ncols // tf)

    n_in = len(arrays)
    kernel = _make_sum_kernel(elem_fn, n_in, tb, tf, nrows, ncols)
    bytes_in = sum(int(a.size) * a.dtype.itemsize for a in arrays)

    partials = pl.pallas_call(
        kernel,
        out_shape=jax.ShapeDtypeStruct((n_bt * 8, 128), jnp.float32),
        grid=(n_bt, n_ft),
        in_specs=[pl.BlockSpec((tb, tf), lambda bi, fi: (bi, fi))
                  for _ in range(n_in)],
        out_specs=pl.BlockSpec((8, 128), lambda bi, fi: (bi, 0)),
        compiler_params=pltpu.CompilerParams(
            dimension_semantics=("parallel", "arbitrary"),
            vmem_limit_bytes=32 * 1024 * 1024),
        cost_estimate=pl.CostEstimate(
            flops=int(flops_per_elem) * nrows * ncols,
            transcendentals=int(transc_per_elem) * nrows * ncols,
            bytes_accessed=bytes_in + n_bt * 8 * 128 * 4),
    )(*arrays)
    return jnp.sum(partials) * (1.0 / (nrows * ncols))


def paired_loss_pallas(link_weight, m1, th1, y1, m2, th2, pi2, y2, e1, e2):
    """loss1 (NB mean) + loss2 (ZINB mean) + link_weight * mean|e1 - e2|.
    `link_weight` is a host-side Python float (sigmoid warmup value); when it is 0
    the link kernel and its DMA are skipped entirely (same gate as the torch code)."""
    loss1 = _tiled_mean(_nb_loss_elem, (m1, th1, y1),
                        transc_per_elem=16, flops_per_elem=240)
    loss2 = _tiled_mean(_zinb_loss_elem, (m2, th2, pi2, y2),
                        transc_per_elem=21, flops_per_elem=280)
    total = loss1 + loss2
    if float(link_weight) > 0.0:
        d = _tiled_mean(_absdiff_elem, (e1, e2),
                        transc_per_elem=0, flops_per_elem=2)
        total = total + link_weight * d
    return total


# ----------------------------------------------------------------------------
# Host-side module mirror (warmup state / tuple unpacking is glue, not compute).
# ----------------------------------------------------------------------------
class SigmoidWarmup:
    """maximum * sigmoid(scale * (t - midpoint)); t increments on each next()."""

    def __init__(self, midpoint=1000, scale=0.01, maximum=1.0):
        self.midpoint, self.scale, self.maximum = midpoint, scale, maximum
        self.t = 0

    def __iter__(self):
        return self

    def __next__(self):
        v = self.maximum / (1.0 + math.exp(-self.scale * (self.t - self.midpoint)))
        self.t += 1
        return v


class PairedLossPallas:
    """Mirror of PairedLoss(NegativeBinomialLoss, ZeroInflatedNegativeBinomialLoss)
    with module-default hyper-parameters (ridge/tv/l1 lambdas are all 0)."""

    def __init__(self, link_strength=0.001):
        self.link = link_strength
        self.warmup = SigmoidWarmup(midpoint=1000, maximum=link_strength)

    def __call__(self, preds, target):
        preds1, preds2 = preds
        target1, target2 = target
        m1, th1 = preds1[0], preds1[1]
        enc1 = preds1[-1]
        y1 = target1[0]                       # NegativeBinomialLoss uses batch[0]
        m2, th2, pi2 = preds2[0], preds2[1], preds2[2]
        enc2 = preds2[-1]
        y2 = target2                          # ZINB loss gets the tensor directly
        link_w = 0.0
        if self.link > 0:
            l = next(self.warmup)
            if l > 1e-6:                      # skipped on early steps, exactly as torch
                link_w = l
        return paired_loss_pallas(link_w, m1, th1, y1, m2, th2, pi2, y2, enc1, enc2)


# ----------------------------------------------------------------------------
# Pure-JAX reference (correctness check only).
# ----------------------------------------------------------------------------
def _ref_nb(preds, theta, truth):
    from jax.scipy.special import gammaln
    theta = jnp.minimum(theta, THETA_MAX)
    t1 = gammaln(theta + EPS) + gammaln(truth + 1.0) - gammaln(truth + theta + EPS)
    t2 = ((theta + truth) * jnp.log1p(preds / (theta + EPS))
          + truth * (jnp.log(theta + EPS) - jnp.log(preds + EPS)))
    return t1 + t2


def _ref_paired(link_w, m1, th1, y1, m2, th2, pi2, y2, e1, e2):
    loss1 = jnp.mean(_ref_nb(m1, th1, y1))
    nb_case = _ref_nb(m2, th2, y2) - jnp.log(1.0 - pi2 + EPS)
    theta = jnp.minimum(th2, THETA_MAX)
    zero_nb = jnp.power(theta / (theta + m2 + EPS), theta)
    zero_case = -jnp.log(pi2 + (1.0 - pi2) * zero_nb + EPS)
    loss2 = jnp.mean(jnp.where(y2 < 1e-8, zero_case, nb_case))
    d = jnp.mean(jnp.abs(e1 - e2))
    return loss1 + loss2 + link_w * d


if __name__ == "__main__":
    # Small but non-trivial shapes: multi-feature-tile grids + masked partial tiles.
    B, G1, G2, H = 6, 2500, 3000, 200
    key = jax.random.PRNGKey(0)
    k = jax.random.split(key, 11)

    m1 = jax.random.uniform(k[0], (B, G1), jnp.float32, 0.1, 5.0)
    th1 = jax.random.uniform(k[1], (B, G1), jnp.float32, 0.5, 3.0)
    y1 = jnp.floor(jax.random.uniform(k[2], (B, G1), jnp.float32, 0.0, 6.0))

    m2 = jax.random.uniform(k[3], (B, G2), jnp.float32, 0.1, 5.0)
    th2 = jax.random.uniform(k[4], (B, G2), jnp.float32, 0.5, 3.0)
    pi2 = jax.random.uniform(k[5], (B, G2), jnp.float32, 0.01, 0.95)
    y2 = jnp.floor(jax.random.uniform(k[6], (B, G2), jnp.float32, 0.0, 3.0))

    e1 = jax.random.normal(k[7], (B, H), jnp.float32)
    e2 = jax.random.normal(k[8], (B, H), jnp.float32)

    preds = ((m1, th1, e1), (m2, th2, pi2, e2))
    target = ((y1,), y2)

    # 1) Fresh module: warmup weight ~4.5e-8 <= 1e-6 -> link term skipped (like torch).
    mod = PairedLossPallas(link_strength=0.001)
    out0 = jax.block_until_ready(mod(preds, target))
    ref0 = jax.block_until_ready(_ref_paired(0.0, m1, th1, y1, m2, th2, pi2, y2, e1, e2))
    assert jnp.isfinite(out0), out0
    assert abs(float(out0) - float(ref0)) <= 2e-3 * (1.0 + abs(float(ref0))), (out0, ref0)

    # 2) Warmed-up module: link weight active -> link kernel exercised too.
    mod2 = PairedLossPallas(link_strength=0.001)
    mod2.warmup.t = 5000
    lw = 0.001 / (1.0 + math.exp(-0.01 * (5000 - 1000)))
    out1 = jax.block_until_ready(mod2(preds, target))
    ref1 = jax.block_until_ready(_ref_paired(lw, m1, th1, y1, m2, th2, pi2, y2, e1, e2))
    assert abs(float(out1) - float(ref1)) <= 2e-3 * (1.0 + abs(float(ref1))), (out1, ref1)

    # 3) Multi-batch-tile path (n_bt > 1, 'parallel' axis) of the generic reduction.
    xa = jax.random.normal(k[9], (160, 300), jnp.float32)
    xb = jax.random.normal(k[10], (160, 300), jnp.float32)
    got = jax.block_until_ready(_tiled_mean(_absdiff_elem, (xa, xb)))
    want = jnp.mean(jnp.abs(xa - xb))
    assert abs(float(got) - float(want)) <= 1e-4 * (1.0 + abs(float(want))), (got, want)

    # 4a) Larger-dispersion accuracy check (deep in the reciprocal-variable branch).
    thM = jax.random.uniform(k[1], (8, 256), jnp.float32, 50.0, 500.0)
    mM = jax.random.uniform(k[0], (8, 256), jnp.float32, 0.1, 5.0)
    yM = jnp.floor(jax.random.uniform(k[2], (8, 256), jnp.float32, 0.0, 6.0))
    gotM = jax.block_until_ready(_tiled_mean(_nb_loss_elem, (mM, thM, yM),
                                             transc_per_elem=16, flops_per_elem=240))
    wantM = jax.block_until_ready(jnp.mean(_ref_nb(mM, thM, yM)))
    assert abs(float(gotM) - float(wantM)) <= 1e-2 * (1.0 + abs(float(wantM))), (gotM, wantM)

    # 4b) Theta near the 1e6 clamp: the rational form must stay finite (no f32
    #     overflow / NaN).  No tight value comparison here: at theta ~ 1e6 any f32
    #     implementation (torch included) loses the small loss value to lgamma
    #     cancellation, so only finiteness is meaningful.
    thL = jnp.full((8, 256), 9.0e5, jnp.float32)
    gotL = jax.block_until_ready(_tiled_mean(_nb_loss_elem, (mM, thL, yM),
                                             transc_per_elem=16, flops_per_elem=240))
    assert jnp.isfinite(gotL), gotL

    print("KERNEL_OK")
</pallas_src>

<mosaic_0001>
module attributes {stable_mosaic.version = 11 : i64} {
  func.func @kernel(%arg0: i32, %arg1: i32, %arg2: memref<8x2048xf32, #tpu.memory_space<vmem>>, %arg3: memref<8x2048xf32, #tpu.memory_space<vmem>>, %arg4: memref<8x2048xf32, #tpu.memory_space<vmem>>, %arg5: memref<8x128xf32, #tpu.memory_space<vmem>>) attributes {dimension_semantics = [#tpu.dimension_semantics<parallel>, #tpu.dimension_semantics<arbitrary>], iteration_bounds = array<i64: 1, 2>, scalar_prefetch = 0 : i64, scratch_operands = 0 : i64, tpu.core_type = #tpu.core_type<tc>, window_params = [{transform_indices = @transform_0, window_bounds = array<i64: 8, 2048>}, {transform_indices = @transform_1, window_bounds = array<i64: 8, 2048>}, {transform_indices = @transform_2, window_bounds = array<i64: 8, 2048>}, {transform_indices = @transform_3, window_bounds = array<i64: 8, 128>}]} {
    %c0_i32 = arith.constant 0 : i32
    %0 = arith.cmpi eq, %arg1, %c0_i32 : i32
    %1 = arith.extui %0 : i1 to i32
    %c0_i32_0 = arith.constant 0 : i32
    %2 = arith.cmpi ne, %1, %c0_i32_0 : i32
    scf.if %2 {
      %cst_155 = arith.constant 0.000000e+00 : f32
      %440 = vector.broadcast %cst_155 : f32 to vector<8x128xf32>
      %c0_156 = arith.constant 0 : index
      %c0_157 = arith.constant 0 : index
      %441 = vector.load %arg5[%c0_156, %c0_157] : memref<8x128xf32, #tpu.memory_space<vmem>>, vector<8x128xf32>
      tpu.vector_store %arg5[%c0_156, %c0_157], %440 {strides = array<i32>} : memref<8x128xf32, #tpu.memory_space<vmem>>, vector<8x128xf32>,
    } else {
    }
    %c0 = arith.constant 0 : index
    %c0_1 = arith.constant 0 : index
    %3 = vector.load %arg2[%c0, %c0_1] : memref<8x2048xf32, #tpu.memory_space<vmem>>, vector<8x2048xf32>
    %c0_2 = arith.constant 0 : index
    %c0_3 = arith.constant 0 : index
    %4 = vector.load %arg3[%c0_2, %c0_3] : memref<8x2048xf32, #tpu.memory_space<vmem>>, vector<8x2048xf32>
    %c0_4 = arith.constant 0 : index
    %c0_5 = arith.constant 0 : index
    %5 = vector.load %arg4[%c0_4, %c0_5] : memref<8x2048xf32, #tpu.memory_space<vmem>>, vector<8x2048xf32>
    %cst = arith.constant 1.000000e+06 : f32
    %6 = vector.broadcast %cst : f32 to vector<8x2048xf32>
    %7 = arith.minimumf %4, %6 : vector<8x2048xf32>
    %cst_6 = arith.constant 1.000000e-10 : f32
    %8 = vector.broadcast %cst_6 : f32 to vector<8x2048xf32>
    %9 = arith.addf %7, %8 : vector<8x2048xf32>
    %10 = math.log %9 : vector<8x2048xf32>
    %cst_7 = arith.constant 1.000000e-10 : f32
    %11 = vector.broadcast %cst_7 : f32 to vector<8x2048xf32>
    %12 = arith.addf %7, %11 : vector<8x2048xf32>
    %cst_8 = arith.constant 1.000000e+00 : f32
    %13 = vector.broadcast %cst_8 : f32 to vector<8x2048xf32>
    %14 = arith.subf %12, %13 : vector<8x2048xf32>
    %cst_9 = arith.constant 7.500000e+00 : f32
    %15 = vector.broadcast %cst_9 : f32 to vector<8x2048xf32>
    %16 = arith.addf %14, %15 : vector<8x2048xf32>
    %cst_10 = arith.constant 5.000000e-01 : f32
    %17 = vector.broadcast %cst_10 : f32 to vector<8x2048xf32>
    %18 = arith.addf %14, %17 : vector<8x2048xf32>
    %19 = math.log %16 : vector<8x2048xf32>
    %20 = arith.mulf %18, %19 : vector<8x2048xf32>
    %cst_11 = arith.constant 0.918938517 : f32
    %21 = vector.broadcast %cst_11 : f32 to vector<8x2048xf32>
    %22 = arith.addf %21, %20 : vector<8x2048xf32>
    %23 = arith.subf %22, %16 : vector<8x2048xf32>
    %cst_12 = arith.constant 1.000000e+00 : f32
    %24 = vector.broadcast %cst_12 : f32 to vector<8x2048xf32>
    %25 = arith.minimumf %14, %24 : vector<8x2048xf32>
    %cst_13 = arith.constant 1.000000e+00 : f32
    %26 = vector.broadcast %cst_13 : f32 to vector<8x2048xf32>
    %27 = arith.mulf %25, %26 : vector<8x2048xf32>
    %cst_14 = arith.constant 60.4583321 : f32
    %28 = vector.broadcast %cst_14 : f32 to vector<8x2048xf32>
    %29 = arith.addf %27, %28 : vector<8x2048xf32>
    %30 = arith.mulf %29, %25 : vector<8x2048xf32>
    %cst_15 = arith.constant 1599.04248 : f32
    %31 = vector.broadcast %cst_15 : f32 to vector<8x2048xf32>
    %32 = arith.addf %30, %31 : vector<8x2048xf32>
    %33 = arith.mulf %32, %25 : vector<8x2048xf32>
    %cst_16 = arith.constant 24165.5098 : f32
    %34 = vector.broadcast %cst_16 : f32 to vector<8x2048xf32>
    %35 = arith.addf %33, %34 : vector<8x2048xf32>
    %36 = arith.mulf %35, %25 : vector<8x2048xf32>
    %cst_17 = arith.constant 228235.219 : f32
    %37 = vector.broadcast %cst_17 : f32 to vector<8x2048xf32>
    %38 = arith.addf %36, %37 : vector<8x2048xf32>
    %39 = arith.mulf %38, %25 : vector<8x2048xf32>
    %cst_18 = arith.constant 1379496.25 : f32
    %40 = vector.broadcast %cst_18 : f32 to vector<8x2048xf32>
    %41 = arith.addf %39, %40 : vector<8x2048xf32>
    %42 = arith.mulf %41, %25 : vector<8x2048xf32>
    %cst_19 = arith.constant 0x4A9F05EA : f32
    %43 = vector.broadcast %cst_19 : f32 to vector<8x2048xf32>
    %44 = arith.addf %42, %43 : vector<8x2048xf32>
    %45 = arith.mulf %44, %25 : vector<8x2048xf32>
    %cst_20 = arith.constant 0x4B2B9D51 : f32
    %46 = vector.broadcast %cst_20 : f32 to vector<8x2048xf32>
    %47 = arith.addf %45, %46 : vector<8x2048xf32>
    %48 = arith.mulf %47, %25 : vector<8x2048xf32>
    %cst_21 = arith.constant 0x4B220ADA : f32
    %49 = vector.broadcast %cst_21 : f32 to vector<8x2048xf32>
    %50 = arith.addf %48, %49 : vector<8x2048xf32>
    %cst_22 = arith.constant 1.000000e+00 : f32
    %51 = vector.broadcast %cst_22 : f32 to vector<8x2048xf32>
    %52 = arith.mulf %25, %51 : vector<8x2048xf32>
    %cst_23 = arith.constant 3.600000e+01 : f32
    %53 = vector.broadcast %cst_23 : f32 to vector<8x2048xf32>
    %54 = arith.addf %52, %53 : vector<8x2048xf32>
    %55 = arith.mulf %54, %25 : vector<8x2048xf32>
    %cst_24 = arith.constant 5.460000e+02 : f32
    %56 = vector.broadcast %cst_24 : f32 to vector<8x2048xf32>
    %57 = arith.addf %55, %56 : vector<8x2048xf32>
    %58 = arith.mulf %57, %25 : vector<8x2048xf32>
    %cst_25 = arith.constant 4.536000e+03 : f32
    %59 = vector.broadcast %cst_25 : f32 to vector<8x2048xf32>
    %60 = arith.addf %58, %59 : vector<8x2048xf32>
    %61 = arith.mulf %60, %25 : vector<8x2048xf32>
    %cst_26 = arith.constant 2.244900e+04 : f32
    %62 = vector.broadcast %cst_26 : f32 to vector<8x2048xf32>
    %63 = arith.addf %61, %62 : vector<8x2048xf32>
    %64 = arith.mulf %63, %25 : vector<8x2048xf32>
    %cst_27 = arith.constant 6.728400e+04 : f32
    %65 = vector.broadcast %cst_27 : f32 to vector<8x2048xf32>
    %66 = arith.addf %64, %65 : vector<8x2048xf32>
    %67 = arith.mulf %66, %25 : vector<8x2048xf32>
    %cst_28 = arith.constant 1.181240e+05 : f32
    %68 = vector.broadcast %cst_28 : f32 to vector<8x2048xf32>
    %69 = arith.addf %67, %68 : vector<8x2048xf32>
    %70 = arith.mulf %69, %25 : vector<8x2048xf32>
    %cst_29 = arith.constant 1.095840e+05 : f32
    %71 = vector.broadcast %cst_29 : f32 to vector<8x2048xf32>
    %72 = arith.addf %70, %71 : vector<8x2048xf32>
    %73 = arith.mulf %72, %25 : vector<8x2048xf32>
    %cst_30 = arith.constant 4.032000e+04 : f32
    %74 = vector.broadcast %cst_30 : f32 to vector<8x2048xf32>
    %75 = arith.addf %73, %74 : vector<8x2048xf32>
    %cst_31 = arith.constant 1.000000e+00 : f32
    %76 = vector.broadcast %cst_31 : f32 to vector<8x2048xf32>
    %77 = arith.maximumf %14, %76 : vector<8x2048xf32>
    %cst_32 = arith.constant 1.000000e+00 : f32
    %78 = vector.broadcast %cst_32 : f32 to vector<8x2048xf32>
    %79 = arith.divf %78, %77 : vector<8x2048xf32>
    %cst_33 = arith.constant 0x4B220ADA : f32
    %80 = vector.broadcast %cst_33 : f32 to vector<8x2048xf32>
    %81 = arith.mulf %79, %80 : vector<8x2048xf32>
    %cst_34 = arith.constant 0x4B2B9D51 : f32
    %82 = vector.broadcast %cst_34 : f32 to vector<8x2048xf32>
    %83 = arith.addf %81, %82 : vector<8x2048xf32>
    %84 = arith.mulf %83, %79 : vector<8x2048xf32>
    %cst_35 = arith.constant 0x4A9F05EA : f32
    %85 = vector.broadcast %cst_35 : f32 to vector<8x2048xf32>
    %86 = arith.addf %84, %85 : vector<8x2048xf32>
    %87 = arith.mulf %86, %79 : vector<8x2048xf32>
    %cst_36 = arith.constant 1379496.25 : f32
    %88 = vector.broadcast %cst_36 : f32 to vector<8x2048xf32>
    %89 = arith.addf %87, %88 : vector<8x2048xf32>
    %90 = arith.mulf %89, %79 : vector<8x2048xf32>
    %cst_37 = arith.constant 228235.219 : f32
    %91 = vector.broadcast %cst_37 : f32 to vector<8x2048xf32>
    %92 = arith.addf %90, %91 : vector<8x2048xf32>
    %93 = arith.mulf %92, %79 : vector<8x2048xf32>
    %cst_38 = arith.constant 24165.5098 : f32
    %94 = vector.broadcast %cst_38 : f32 to vector<8x2048xf32>
    %95 = arith.addf %93, %94 : vector<8x2048xf32>
    %96 = arith.mulf %95, %79 : vector<8x2048xf32>
    %cst_39 = arith.constant 1599.04248 : f32
    %97 = vector.broadcast %cst_39 : f32 to vector<8x2048xf32>
    %98 = arith.addf %96, %97 : vector<8x2048xf32>
    %99 = arith.mulf %98, %79 : vector<8x2048xf32>
    %cst_40 = arith.constant 60.4583321 : f32
    %100 = vector.broadcast %cst_40 : f32 to vector<8x2048xf32>
    %101 = arith.addf %99, %100 : vector<8x2048xf32>
    %102 = arith.mulf %101, %79 : vector<8x2048xf32>
    %cst_41 = arith.constant 1.000000e+00 : f32
    %103 = vector.broadcast %cst_41 : f32 to vector<8x2048xf32>
    %104 = arith.addf %102, %103 : vector<8x2048xf32>
    %cst_42 = arith.constant 4.032000e+04 : f32
    %105 = vector.broadcast %cst_42 : f32 to vector<8x2048xf32>
    %106 = arith.mulf %79, %105 : vector<8x2048xf32>
    %cst_43 = arith.constant 1.095840e+05 : f32
    %107 = vector.broadcast %cst_43 : f32 to vector<8x2048xf32>
    %108 = arith.addf %106, %107 : vector<8x2048xf32>
    %109 = arith.mulf %108, %79 : vector<8x2048xf32>
    %cst_44 = arith.constant 1.181240e+05 : f32
    %110 = vector.broadcast %cst_44 : f32 to vector<8x2048xf32>
    %111 = arith.addf %109, %110 : vector<8x2048xf32>
    %112 = arith.mulf %111, %79 : vector<8x2048xf32>
    %cst_45 = arith.constant 6.728400e+04 : f32
    %113 = vector.broadcast %cst_45 : f32 to vector<8x2048xf32>
    %114 = arith.addf %112, %113 : vector<8x2048xf32>
    %115 = arith.mulf %114, %79 : vector<8x2048xf32>
    %cst_46 = arith.constant 2.244900e+04 : f32
    %116 = vector.broadcast %cst_46 : f32 to vector<8x2048xf32>
    %117 = arith.addf %115, %116 : vector<8x2048xf32>
    %118 = arith.mulf %117, %79 : vector<8x2048xf32>
    %cst_47 = arith.constant 4.536000e+03 : f32
    %119 = vector.broadcast %cst_47 : f32 to vector<8x2048xf32>
    %120 = arith.addf %118, %119 : vector<8x2048xf32>
    %121 = arith.mulf %120, %79 : vector<8x2048xf32>
    %cst_48 = arith.constant 5.460000e+02 : f32
    %122 = vector.broadcast %cst_48 : f32 to vector<8x2048xf32>
    %123 = arith.addf %121, %122 : vector<8x2048xf32>
    %124 = arith.mulf %123, %79 : vector<8x2048xf32>
    %cst_49 = arith.constant 3.600000e+01 : f32
    %125 = vector.broadcast %cst_49 : f32 to vector<8x2048xf32>
    %126 = arith.addf %124, %125 : vector<8x2048xf32>
    %127 = arith.mulf %126, %79 : vector<8x2048xf32>
    %cst_50 = arith.constant 1.000000e+00 : f32
    %128 = vector.broadcast %cst_50 : f32 to vector<8x2048xf32>
    %129 = arith.addf %127, %128 : vector<8x2048xf32>
    %cst_51 = arith.constant 1.000000e+00 : f32
    %130 = vector.broadcast %cst_51 : f32 to vector<8x2048xf32>
    %131 = arith.cmpf ogt, %14, %130 : vector<8x2048xf32>
    %132 = arith.select %131, %104, %50 : vector<8x2048xi1>, vector<8x2048xf32>
    %133 = arith.select %131, %129, %75 : vector<8x2048xi1>, vector<8x2048xf32>
    %134 = arith.divf %132, %133 : vector<8x2048xf32>
    %135 = math.log %134 : vector<8x2048xf32>
    %136 = arith.addf %23, %135 : vector<8x2048xf32>
    %cst_52 = arith.constant 1.000000e+00 : f32
    %137 = vector.broadcast %cst_52 : f32 to vector<8x2048xf32>
    %138 = arith.addf %5, %137 : vector<8x2048xf32>
    %cst_53 = arith.constant 1.000000e+00 : f32
    %139 = vector.broadcast %cst_53 : f32 to vector<8x2048xf32>
    %140 = arith.subf %138, %139 : vector<8x2048xf32>
    %cst_54 = arith.constant 7.500000e+00 : f32
    %141 = vector.broadcast %cst_54 : f32 to vector<8x2048xf32>
    %142 = arith.addf %140, %141 : vector<8x2048xf32>
    %cst_55 = arith.constant 5.000000e-01 : f32
    %143 = vector.broadcast %cst_55 : f32 to vector<8x2048xf32>
    %144 = arith.addf %140, %143 : vector<8x2048xf32>
    %145 = math.log %142 : vector<8x2048xf32>
    %146 = arith.mulf %144, %145 : vector<8x2048xf32>
    %cst_56 = arith.constant 0.918938517 : f32
    %147 = vector.broadcast %cst_56 : f32 to vector<8x2048xf32>
    %148 = arith.addf %147, %146 : vector<8x2048xf32>
    %149 = arith.subf %148, %142 : vector<8x2048xf32>
    %cst_57 = arith.constant 1.000000e+00 : f32
    %150 = vector.broadcast %cst_57 : f32 to vector<8x2048xf32>
    %151 = arith.minimumf %140, %150 : vector<8x2048xf32>
    %cst_58 = arith.constant 1.000000e+00 : f32
    %152 = vector.broadcast %cst_58 : f32 to vector<8x2048xf32>
    %153 = arith.mulf %151, %152 : vector<8x2048xf32>
    %cst_59 = arith.constant 60.4583321 : f32
    %154 = vector.broadcast %cst_59 : f32 to vector<8x2048xf32>
    %155 = arith.addf %153, %154 : vector<8x2048xf32>
    %156 = arith.mulf %155, %151 : vector<8x2048xf32>
    %cst_60 = arith.constant 1599.04248 : f32
    %157 = vector.broadcast %cst_60 : f32 to vector<8x2048xf32>
    %158 = arith.addf %156, %157 : vector<8x2048xf32>
    %159 = arith.mulf %158, %151 : vector<8x2048xf32>
    %cst_61 = arith.constant 24165.5098 : f32
    %160 = vector.broadcast %cst_61 : f32 to vector<8x2048xf32>
    %161 = arith.addf %159, %160 : vector<8x2048xf32>
    %162 = arith.mulf %161, %151 : vector<8x2048xf32>
    %cst_62 = arith.constant 228235.219 : f32
    %163 = vector.broadcast %cst_62 : f32 to vector<8x2048xf32>
    %164 = arith.addf %162, %163 : vector<8x2048xf32>
    %165 = arith.mulf %164, %151 : vector<8x2048xf32>
    %cst_63 = arith.constant 1379496.25 : f32
    %166 = vector.broadcast %cst_63 : f32 to vector<8x2048xf32>
    %167 = arith.addf %165, %166 : vector<8x2048xf32>
    %168 = arith.mulf %167, %151 : vector<8x2048xf32>
    %cst_64 = arith.constant 0x4A9F05EA : f32
    %169 = vector.broadcast %cst_64 : f32 to vector<8x2048xf32>
    %170 = arith.addf %168, %169 : vector<8x2048xf32>
    %171 = arith.mulf %170, %151 : vector<8x2048xf32>
    %cst_65 = arith.constant 0x4B2B9D51 : f32
    %172 = vector.broadcast %cst_65 : f32 to vector<8x2048xf32>
    %173 = arith.addf %171, %172 : vector<8x2048xf32>
    %174 = arith.mulf %173, %151 : vector<8x2048xf32>
    %cst_66 = arith.constant 0x4B220ADA : f32
    %175 = vector.broadcast %cst_66 : f32 to vector<8x2048xf32>
    %176 = arith.addf %174, %175 : vector<8x2048xf32>
    %cst_67 = arith.constant 1.000000e+00 : f32
    %177 = vector.broadcast %cst_67 : f32 to vector<8x2048xf32>
    %178 = arith.mulf %151, %177 : vector<8x2048xf32>
    %cst_68 = arith.constant 3.600000e+01 : f32
    %179 = vector.broadcast %cst_68 : f32 to vector<8x2048xf32>
    %180 = arith.addf %178, %179 : vector<8x2048xf32>
    %181 = arith.mulf %180, %151 : vector<8x2048xf32>
    %cst_69 = arith.constant 5.460000e+02 : f32
    %182 = vector.broadcast %cst_69 : f32 to vector<8x2048xf32>
    %183 = arith.addf %181, %182 : vector<8x2048xf32>
    %184 = arith.mulf %183, %151 : vector<8x2048xf32>
    %cst_70 = arith.constant 4.536000e+03 : f32
    %185 = vector.broadcast %cst_70 : f32 to vector<8x2048xf32>
    %186 = arith.addf %184, %185 : vector<8x2048xf32>
    %187 = arith.mulf %186, %151 : vector<8x2048xf32>
    %cst_71 = arith.constant 2.244900e+04 : f32
    %188 = vector.broadcast %cst_71 : f32 to vector<8x2048xf32>
    %189 = arith.addf %187, %188 : vector<8x2048xf32>
    %190 = arith.mulf %189, %151 : vector<8x2048xf32>
    %cst_72 = arith.constant 6.728400e+04 : f32
    %191 = vector.broadcast %cst_72 : f32 to vector<8x2048xf32>
    %192 = arith.addf %190, %191 : vector<8x2048xf32>
    %193 = arith.mulf %192, %151 : vector<8x2048xf32>
    %cst_73 = arith.constant 1.181240e+05 : f32
    %194 = vector.broadcast %cst_73 : f32 to vector<8x2048xf32>
    %195 = arith.addf %193, %194 : vector<8x2048xf32>
    %196 = arith.mulf %195, %151 : vector<8x2048xf32>
    %cst_74 = arith.constant 1.095840e+05 : f32
    %197 = vector.broadcast %cst_74 : f32 to vector<8x2048xf32>
    %198 = arith.addf %196, %197 : vector<8x2048xf32>
    %199 = arith.mulf %198, %151 : vector<8x2048xf32>
    %cst_75 = arith.constant 4.032000e+04 : f32
    %200 = vector.broadcast %cst_75 : f32 to vector<8x2048xf32>
    %201 = arith.addf %199, %200 : vector<8x2048xf32>
    %cst_76 = arith.constant 1.000000e+00 : f32
    %202 = vector.broadcast %cst_76 : f32 to vector<8x2048xf32>
    %203 = arith.maximumf %140, %202 : vector<8x2048xf32>
    %cst_77 = arith.constant 1.000000e+00 : f32
    %204 = vector.broadcast %cst_77 : f32 to vector<8x2048xf32>
    %205 = arith.divf %204, %203 : vector<8x2048xf32>
    %cst_78 = arith.constant 0x4B220ADA : f32
    %206 = vector.broadcast %cst_78 : f32 to vector<8x2048xf32>
    %207 = arith.mulf %205, %206 : vector<8x2048xf32>
    %cst_79 = arith.constant 0x4B2B9D51 : f32
    %208 = vector.broadcast %cst_79 : f32 to vector<8x2048xf32>
    %209 = arith.addf %207, %208 : vector<8x2048xf32>
    %210 = arith.mulf %209, %205 : vector<8x2048xf32>
    %cst_80 = arith.constant 0x4A9F05EA : f32
    %211 = vector.broadcast %cst_80 : f32 to vector<8x2048xf32>
    %212 = arith.addf %210, %211 : vector<8x2048xf32>
    %213 = arith.mulf %212, %205 : vector<8x2048xf32>
    %cst_81 = arith.constant 1379496.25 : f32
    %214 = vector.broadcast %cst_81 : f32 to vector<8x2048xf32>
    %215 = arith.addf %213, %214 : vector<8x2048xf32>
    %216 = arith.mulf %215, %205 : vector<8x2048xf32>
    %cst_82 = arith.constant 228235.219 : f32
    %217 = vector.broadcast %cst_82 : f32 to vector<8x2048xf32>
    %218 = arith.addf %216, %217 : vector<8x2048xf32>
    %219 = arith.mulf %218, %205 : vector<8x2048xf32>
    %cst_83 = arith.constant 24165.5098 : f32
    %220 = vector.broadcast %cst_83 : f32 to vector<8x2048xf32>
    %221 = arith.addf %219, %220 : vector<8x2048xf32>
    %222 = arith.mulf %221, %205 : vector<8x2048xf32>
    %cst_84 = arith.constant 1599.04248 : f32
    %223 = vector.broadcast %cst_84 : f32 to vector<8x2048xf32>
    %224 = arith.addf %222, %223 : vector<8x2048xf32>
    %225 = arith.mulf %224, %205 : vector<8x2048xf32>
    %cst_85 = arith.constant 60.4583321 : f32
    %226 = vector.broadcast %cst_85 : f32 to vector<8x2048xf32>
    %227 = arith.addf %225, %226 : vector<8x2048xf32>
    %228 = arith.mulf %227, %205 : vector<8x2048xf32>
    %cst_86 = arith.constant 1.000000e+00 : f32
    %229 = vector.broadcast %cst_86 : f32 to vector<8x2048xf32>
    %230 = arith.addf %228, %229 : vector<8x2048xf32>
    %cst_87 = arith.constant 4.032000e+04 : f32
    %231 = vector.broadcast %cst_87 : f32 to vector<8x2048xf32>
    %232 = arith.mulf %205, %231 : vector<8x2048xf32>
    %cst_88 = arith.constant 1.095840e+05 : f32
    %233 = vector.broadcast %cst_88 : f32 to vector<8x2048xf32>
    %234 = arith.addf %232, %233 : vector<8x2048xf32>
    %235 = arith.mulf %234, %205 : vector<8x2048xf32>
    %cst_89 = arith.constant 1.181240e+05 : f32
    %236 = vector.broadcast %cst_89 : f32 to vector<8x2048xf32>
    %237 = arith.addf %235, %236 : vector<8x2048xf32>
    %238 = arith.mulf %237, %205 : vector<8x2048xf32>
    %cst_90 = arith.constant 6.728400e+04 : f32
    %239 = vector.broadcast %cst_90 : f32 to vector<8x2048xf32>
    %240 = arith.addf %238, %239 : vector<8x2048xf32>
    %241 = arith.mulf %240, %205 : vector<8x2048xf32>
    %cst_91 = arith.constant 2.244900e+04 : f32
    %242 = vector.broadcast %cst_91 : f32 to vector<8x2048xf32>
    %243 = arith.addf %241, %242 : vector<8x2048xf32>
    %244 = arith.mulf %243, %205 : vector<8x2048xf32>
    %cst_92 = arith.constant 4.536000e+03 : f32
    %245 = vector.broadcast %cst_92 : f32 to vector<8x2048xf32>
    %246 = arith.addf %244, %245 : vector<8x2048xf32>
    %247 = arith.mulf %246, %205 : vector<8x2048xf32>
    %cst_93 = arith.constant 5.460000e+02 : f32
    %248 = vector.broadcast %cst_93 : f32 to vector<8x2048xf32>
    %249 = arith.addf %247, %248 : vector<8x2048xf32>
    %250 = arith.mulf %249, %205 : vector<8x2048xf32>
    %cst_94 = arith.constant 3.600000e+01 : f32
    %251 = vector.broadcast %cst_94 : f32 to vector<8x2048xf32>
    %252 = arith.addf %250, %251 : vector<8x2048xf32>
    %253 = arith.mulf %252, %205 : vector<8x2048xf32>
    %cst_95 = arith.constant 1.000000e+00 : f32
    %254 = vector.broadcast %cst_95 : f32 to vector<8x2048xf32>
    %255 = arith.addf %253, %254 : vector<8x2048xf32>
    %cst_96 = arith.constant 1.000000e+00 : f32
    %256 = vector.broadcast %cst_96 : f32 to vector<8x2048xf32>
    %257 = arith.cmpf ogt, %140, %256 : vector<8x2048xf32>
    %258 = arith.select %257, %230, %176 : vector<8x2048xi1>, vector<8x2048xf32>
    %259 = arith.select %257, %255, %201 : vector<8x2048xi1>, vector<8x2048xf32>
    %260 = arith.divf %258, %259 : vector<8x2048xf32>
    %261 = math.log %260 : vector<8x2048xf32>
    %262 = arith.addf %149, %261 : vector<8x2048xf32>
    %263 = arith.addf %136, %262 : vector<8x2048xf32>
    %264 = arith.addf %5, %7 : vector<8x2048xf32>
    %cst_97 = arith.constant 1.000000e-10 : f32
    %265 = vector.broadcast %cst_97 : f32 to vector<8x2048xf32>
    %266 = arith.addf %264, %265 : vector<8x2048xf32>
    %cst_98 = arith.constant 1.000000e+00 : f32
    %267 = vector.broadcast %cst_98 : f32 to vector<8x2048xf32>
    %268 = arith.subf %266, %267 : vector<8x2048xf32>
    %cst_99 = arith.constant 7.500000e+00 : f32
    %269 = vector.broadcast %cst_99 : f32 to vector<8x2048xf32>
    %270 = arith.addf %268, %269 : vector<8x2048xf32>
    %cst_100 = arith.constant 5.000000e-01 : f32
    %271 = vector.broadcast %cst_100 : f32 to vector<8x2048xf32>
    %272 = arith.addf %268, %271 : vector<8x2048xf32>
    %273 = math.log %270 : vector<8x2048xf32>
    %274 = arith.mulf %272, %273 : vector<8x2048xf32>
    %cst_101 = arith.constant 0.918938517 : f32
    %275 = vector.broadcast %cst_101 : f32 to vector<8x2048xf32>
    %276 = arith.addf %275, %274 : vector<8x2048xf32>
    %277 = arith.subf %276, %270 : vector<8x2048xf32>
    %cst_102 = arith.constant 1.000000e+00 : f32
    %278 = vector.broadcast %cst_102 : f32 to vector<8x2048xf32>
    %279 = arith.minimumf %268, %278 : vector<8x2048xf32>
    %cst_103 = arith.constant 1.000000e+00 : f32
    %280 = vector.broadcast %cst_103 : f32 to vector<8x2048xf32>
    %281 = arith.mulf %279, %280 : vector<8x2048xf32>
    %cst_104 = arith.constant 60.4583321 : f32
    %282 = vector.broadcast %cst_104 : f32 to vector<8x2048xf32>
    %283 = arith.addf %281, %282 : vector<8x2048xf32>
    %284 = arith.mulf %283, %279 : vector<8x2048xf32>
    %cst_105 = arith.constant 1599.04248 : f32
    %285 = vector.broadcast %cst_105 : f32 to vector<8x2048xf32>
    %286 = arith.addf %284, %285 : vector<8x2048xf32>
    %287 = arith.mulf %286, %279 : vector<8x2048xf32>
    %cst_106 = arith.constant 24165.5098 : f32
    %288 = vector.broadcast %cst_106 : f32 to vector<8x2048xf32>
    %289 = arith.addf %287, %288 : vector<8x2048xf32>
    %290 = arith.mulf %289, %279 : vector<8x2048xf32>
    %cst_107 = arith.constant 228235.219 : f32
    %291 = vector.broadcast %cst_107 : f32 to vector<8x2048xf32>
    %292 = arith.addf %290, %291 : vector<8x2048xf32>
    %293 = arith.mulf %292, %279 : vector<8x2048xf32>
    %cst_108 = arith.constant 1379496.25 : f32
    %294 = vector.broadcast %cst_108 : f32 to vector<8x2048xf32>
    %295 = arith.addf %293, %294 : vector<8x2048xf32>
    %296 = arith.mulf %295, %279 : vector<8x2048xf32>
    %cst_109 = arith.constant 0x4A9F05EA : f32
    %297 = vector.broadcast %cst_109 : f32 to vector<8x2048xf32>
    %298 = arith.addf %296, %297 : vector<8x2048xf32>
    %299 = arith.mulf %298, %279 : vector<8x2048xf32>
    %cst_110 = arith.constant 0x4B2B9D51 : f32
    %300 = vector.broadcast %cst_110 : f32 to vector<8x2048xf32>
    %301 = arith.addf %299, %300 : vector<8x2048xf32>
    %302 = arith.mulf %301, %279 : vector<8x2048xf32>
    %cst_111 = arith.constant 0x4B220ADA : f32
    %303 = vector.broadcast %cst_111 : f32 to vector<8x2048xf32>
    %304 = arith.addf %302, %303 : vector<8x2048xf32>
    %cst_112 = arith.constant 1.000000e+00 : f32
    %305 = vector.broadcast %cst_112 : f32 to vector<8x2048xf32>
    %306 = arith.mulf %279, %305 : vector<8x2048xf32>
    %cst_113 = arith.constant 3.600000e+01 : f32
    %307 = vector.broadcast %cst_113 : f32 to vector<8x2048xf32>
    %308 = arith.addf %306, %307 : vector<8x2048xf32>
    %309 = arith.mulf %308, %279 : vector<8x2048xf32>
    %cst_114 = arith.constant 5.460000e+02 : f32
    %310 = vector.broadcast %cst_114 : f32 to vector<8x2048xf32>
    %311 = arith.addf %309, %310 : vector<8x2048xf32>
    %312 = arith.mulf %311, %279 : vector<8x2048xf32>
    %cst_115 = arith.constant 4.536000e+03 : f32
    %313 = vector.broadcast %cst_115 : f32 to vector<8x2048xf32>
    %314 = arith.addf %312, %313 : vector<8x2048xf32>
    %315 = arith.mulf %314, %279 : vector<8x2048xf32>
    %cst_116 = arith.constant 2.244900e+04 : f32
    %316 = vector.broadcast %cst_116 : f32 to vector<8x2048xf32>
    %317 = arith.addf %315, %316 : vector<8x2048xf32>
    %318 = arith.mulf %317, %279 : vector<8x2048xf32>
    %cst_117 = arith.constant 6.728400e+04 : f32
    %319 = vector.broadcast %cst_117 : f32 to vector<8x2048xf32>
    %320 = arith.addf %318, %319 : vector<8x2048xf32>
    %321 = arith.mulf %320, %279 : vector<8x2048xf32>
    %cst_118 = arith.constant 1.181240e+05 : f32
    %322 = vector.broadcast %cst_118 : f32 to vector<8x2048xf32>
    %323 = arith.addf %321, %322 : vector<8x2048xf32>
    %324 = arith.mulf %323, %279 : vector<8x2048xf32>
    %cst_119 = arith.constant 1.095840e+05 : f32
    %325 = vector.broadcast %cst_119 : f32 to vector<8x2048xf32>
    %326 = arith.addf %324, %325 : vector<8x2048xf32>
    %327 = arith.mulf %326, %279 : vector<8x2048xf32>
    %cst_120 = arith.constant 4.032000e+04 : f32
    %328 = vector.broadcast %cst_120 : f32 to vector<8x2048xf32>
    %329 = arith.addf %327, %328 : vector<8x2048xf32>
    %cst_121 = arith.constant 1.000000e+00 : f32
    %330 = vector.broadcast %cst_121 : f32 to vector<8x2048xf32>
    %331 = arith.maximumf %268, %330 : vector<8x2048xf32>
    %cst_122 = arith.constant 1.000000e+00 : f32
    %332 = vector.broadcast %cst_122 : f32 to vector<8x2048xf32>
    %333 = arith.divf %332, %331 : vector<8x2048xf32>
    %cst_123 = arith.constant 0x4B220ADA : f32
    %334 = vector.broadcast %cst_123 : f32 to vector<8x2048xf32>
    %335 = arith.mulf %333, %334 : vector<8x2048xf32>
    %cst_124 = arith.constant 0x4B2B9D51 : f32
    %336 = vector.broadcast %cst_124 : f32 to vector<8x2048xf32>
    %337 = arith.addf %335, %336 : vector<8x2048xf32>
    %338 = arith.mulf %337, %333 : vector<8x2048xf32>
    %cst_125 = arith.constant 0x4A9F05EA : f32
    %339 = vector.broadcast %cst_125 : f32 to vector<8x2048xf32>
    %340 = arith.addf %338, %339 : vector<8x2048xf32>
    %341 = arith.mulf %340, %333 : vector<8x2048xf32>
    %cst_126 = arith.constant 1379496.25 : f32
    %342 = vector.broadcast %cst_126 : f32 to vector<8x2048xf32>
    %343 = arith.addf %341, %342 : vector<8x2048xf32>
    %344 = arith.mulf %343, %333 : vector<8x2048xf32>
    %cst_127 = arith.constant 228235.219 : f32
    %345 = vector.broadcast %cst_127 : f32 to vector<8x2048xf32>
    %346 = arith.addf %344, %345 : vector<8x2048xf32>
    %347 = arith.mulf %346, %333 : vector<8x2048xf32>
    %cst_128 = arith.constant 24165.5098 : f32
    %348 = vector.broadcast %cst_128 : f32 to vector<8x2048xf32>
    %349 = arith.addf %347, %348 : vector<8x2048xf32>
    %350 = arith.mulf %349, %333 : vector<8x2048xf32>
    %cst_129 = arith.constant 1599.04248 : f32
    %351 = vector.broadcast %cst_129 : f32 to vector<8x2048xf32>
    %352 = arith.addf %350, %351 : vector<8x2048xf32>
    %353 = arith.mulf %352, %333 : vector<8x2048xf32>
    %cst_130 = arith.constant 60.4583321 : f32
    %354 = vector.broadcast %cst_130 : f32 to vector<8x2048xf32>
    %355 = arith.addf %353, %354 : vector<8x2048xf32>
    %356 = arith.mulf %355, %333 : vector<8x2048xf32>
    %cst_131 = arith.constant 1.000000e+00 : f32
    %357 = vector.broadcast %cst_131 : f32 to vector<8x2048xf32>
    %358 = arith.addf %356, %357 : vector<8x2048xf32>
    %cst_132 = arith.constant 4.032000e+04 : f32
    %359 = vector.broadcast %cst_132 : f32 to vector<8x2048xf32>
    %360 = arith.mulf %333, %359 : vector<8x2048xf32>
    %cst_133 = arith.constant 1.095840e+05 : f32
    %361 = vector.broadcast %cst_133 : f32 to vector<8x2048xf32>
    %362 = arith.addf %360, %361 : vector<8x2048xf32>
    %363 = arith.mulf %362, %333 : vector<8x2048xf32>
    %cst_134 = arith.constant 1.181240e+05 : f32
    %364 = vector.broadcast %cst_134 : f32 to vector<8x2048xf32>
    %365 = arith.addf %363, %364 : vector<8x2048xf32>
    %366 = arith.mulf %365, %333 : vector<8x2048xf32>
    %cst_135 = arith.constant 6.728400e+04 : f32
    %367 = vector.broadcast %cst_135 : f32 to vector<8x2048xf32>
    %368 = arith.addf %366, %367 : vector<8x2048xf32>
    %369 = arith.mulf %368, %333 : vector<8x2048xf32>
    %cst_136 = arith.constant 2.244900e+04 : f32
    %370 = vector.broadcast %cst_136 : f32 to vector<8x2048xf32>
    %371 = arith.addf %369, %370 : vector<8x2048xf32>
    %372 = arith.mulf %371, %333 : vector<8x2048xf32>
    %cst_137 = arith.constant 4.536000e+03 : f32
    %373 = vector.broadcast %cst_137 : f32 to vector<8x2048xf32>
    %374 = arith.addf %372, %373 : vector<8x2048xf32>
    %375 = arith.mulf %374, %333 : vector<8x2048xf32>
    %cst_138 = arith.constant 5.460000e+02 : f32
    %376 = vector.broadcast %cst_138 : f32 to vector<8x2048xf32>
    %377 = arith.addf %375, %376 : vector<8x2048xf32>
    %378 = arith.mulf %377, %333 : vector<8x2048xf32>
    %cst_139 = arith.constant 3.600000e+01 : f32
    %379 = vector.broadcast %cst_139 : f32 to vector<8x2048xf32>
    %380 = arith.addf %378, %379 : vector<8x2048xf32>
    %381 = arith.mulf %380, %333 : vector<8x2048xf32>
    %cst_140 = arith.constant 1.000000e+00 : f32
    %382 = vector.broadcast %cst_140 : f32 to vector<8x2048xf32>
    %383 = arith.addf %381, %382 : vector<8x2048xf32>
    %cst_141 = arith.constant 1.000000e+00 : f32
    %384 = vector.broadcast %cst_141 : f32 to vector<8x2048xf32>
    %385 = arith.cmpf ogt, %268, %384 : vector<8x2048xf32>
    %386 = arith.select %385, %358, %304 : vector<8x2048xi1>, vector<8x2048xf32>
    %387 = arith.select %385, %383, %329 : vector<8x2048xi1>, vector<8x2048xf32>
    %388 = arith.divf %386, %387 : vector<8x2048xf32>
    %389 = math.log %388 : vector<8x2048xf32>
    %390 = arith.addf %277, %389 : vector<8x2048xf32>
    %391 = arith.subf %263, %390 : vector<8x2048xf32>
    %392 = arith.addf %7, %5 : vector<8x2048xf32>
    %cst_142 = arith.constant 1.000000e-10 : f32
    %393 = vector.broadcast %cst_142 : f32 to vector<8x2048xf32>
    %394 = arith.addf %7, %393 : vector<8x2048xf32>
    %395 = arith.divf %3, %394 : vector<8x2048xf32>
    %cst_143 = arith.constant 1.000000e+00 : f32
    %396 = vector.broadcast %cst_143 : f32 to vector<8x2048xf32>
    %397 = arith.addf %396, %395 : vector<8x2048xf32>
    %398 = math.log %397 : vector<8x2048xf32>
    %399 = arith.mulf %392, %398 : vector<8x2048xf32>
    %cst_144 = arith.constant 1.000000e-10 : f32
    %400 = vector.broadcast %cst_144 : f32 to vector<8x2048xf32>
    %401 = arith.addf %3, %400 : vector<8x2048xf32>
    %402 = math.log %401 : vector<8x2048xf32>
    %403 = arith.subf %10, %402 : vector<8x2048xf32>
    %404 = arith.mulf %5, %403 : vector<8x2048xf32>
    %405 = arith.addf %399, %404 : vector<8x2048xf32>
    %406 = arith.addf %391, %405 : vector<8x2048xf32>
    %407 = tpu.iota {dimensions = array<i32: 0>} : vector<8x2048xi32>
    %c8_i32 = arith.constant 8 : i32
    %408 = arith.muli %arg0, %c8_i32 : i32
    %409 = vector.broadcast %408 : i32 to vector<8x2048xi32>
    %410 = arith.addi %407, %409 : vector<8x2048xi32>
    %411 = tpu.iota {dimensions = array<i32: 1>} : vector<8x2048xi32>
    %c2048_i32 = arith.constant 2048 : i32
    %412 = arith.muli %arg1, %c2048_i32 : i32
    %413 = vector.broadcast %412 : i32 to vector<8x2048xi32>
    %414 = arith.addi %411, %413 : vector<8x2048xi32>
    %c6_i32 = arith.constant 6 : i32
    %415 = vector.broadcast %c6_i32 : i32 to vector<8x2048xi32>
    %416 = arith.cmpi slt, %410, %415 : vector<8x2048xi32>
    %c2500_i32 = arith.constant 2500 : i32
    %417 = vector.broadcast %c2500_i32 : i32 to vector<8x2048xi32>
    %418 = arith.cmpi slt, %414, %417 : vector<8x2048xi32>
    %419 = arith.andi %416, %418 : vector<8x2048xi1>
    %cst_145 = arith.constant 0.000000e+00 : f32
    %420 = vector.broadcast %cst_145 : f32 to vector<8x2048xf32>
    %421 = arith.select %419, %406, %420 : vector<8x2048xi1>, vector<8x2048xf32>
    %cst_146 = arith.constant dense<0.000000e+00> : vector<8xf32>
    %422 = vector.multi_reduction <add>, %421, %cst_146 [1] : vector<8x2048xf32> to vector<8xf32>
    %423 = vector.shape_cast %422 : vector<8xf32> to vector<8x1xf32>
    %cst_147 = arith.constant dense<0.000000e+00> : vector<1xf32>
    %424 = vector.multi_reduction <add>, %423, %cst_147 [0] : vector<8x1xf32> to vector<1xf32>
    %425 = vector.shape_cast %424 : vector<1xf32> to vector<1x1xf32>
    %426 = tpu.iota {dimensions = array<i32: 0>} : vector<8x128xi32>
    %427 = tpu.iota {dimensions = array<i32: 1>} : vector<8x128xi32>
    %c0_148 = arith.constant 0 : index
    %c0_149 = arith.constant 0 : index
    %428 = vector.load %arg5[%c0_148, %c0_149] : memref<8x128xf32, #tpu.memory_space<vmem>>, vector<8x128xf32>
    %c0_i32_150 = arith.constant 0 : i32
    %429 = vector.broadcast %c0_i32_150 : i32 to vector<8x128xi32>
    %430 = arith.cmpi eq, %426, %429 : vector<8x128xi32>
    %c0_i32_151 = arith.constant 0 : i32
    %431 = vector.broadcast %c0_i32_151 : i32 to vector<8x128xi32>
    %432 = arith.cmpi eq, %427, %431 : vector<8x128xi32>
    %433 = arith.andi %430, %432 : vector<8x128xi1>
    %cst_152 = arith.constant 0.000000e+00 : f32
    %434 = vector.shape_cast %425 : vector<1x1xf32> to vector<1x1xf32>
    %435 = vector.broadcast %434 : vector<1x1xf32> to vector<8x128xf32>
    %436 = vector.broadcast %cst_152 : f32 to vector<8x128xf32>
    %437 = arith.select %433, %435, %436 : vector<8x128xi1>, vector<8x128xf32>
    %438 = arith.addf %428, %437 : vector<8x128xf32>
    %c0_153 = arith.constant 0 : index
    %c0_154 = arith.constant 0 : index
    %439 = vector.load %arg5[%c0_153, %c0_154] : memref<8x128xf32, #tpu.memory_space<vmem>>, vector<8x128xf32>
    tpu.vector_store %arg5[%c0_153, %c0_154], %438 {strides = array<i32>} : memref<8x128xf32, #tpu.memory_space<vmem>>, vector<8x128xf32>,
    return
  }
  func.func @transform_0(%arg0: i32, %arg1: i32) -> (i32, i32) {
    %c0_i32 = arith.constant 0 : i32
    return %arg0, %arg1 : i32, i32
  }
  func.func @transform_1(%arg0: i32, %arg1: i32) -> (i32, i32) {
    %c0_i32 = arith.constant 0 : i32
    return %arg0, %arg1 : i32, i32
  }
  func.func @transform_2(%arg0: i32, %arg1: i32) -> (i32, i32) {
    %c0_i32 = arith.constant 0 : i32
    return %arg0, %arg1 : i32, i32
  }
  func.func @transform_3(%arg0: i32, %arg1: i32) -> (i32, i32) {
    %c0_i32 = arith.constant 0 : i32
    %c0_i32_0 = arith.constant 0 : i32
    return %arg0, %c0_i32 : i32, i32
  }
}

</mosaic_0001>

<bundles_post_ra>
// kernel: tpu_custom_call.1
= control target key start
LH: loop header
LB: loop body
LE: loop exit
PB: predicated region body
PF: predicated region fallthrough
CT: control target
= control target key end

     0   :  { %8 = vsyncpa [#allocation3], 0  ;;  %s10409_s0 = inlined_call_operand.hbm [shape: f32[6,2500], index: 0, kind: input, shape index: {}]   ;;  %s10410_s1 = inlined_call_operand.hbm [shape: f32[6,2500], index: 1, kind: input, shape index: {}]   ;;  %s10411_s2 = inlined_call_operand.hbm [shape: f32[6,2500], index: 2, kind: input, shape index: {}]   ;;  %s10412_s3 = inlined_call_operand.hbm [shape: f32[8,128], index: 3, kind: output, shape index: {}]  }
   0x1   :  { %10 = vsyncpa [#allocation3 + $0x1], 0 }
   0x2   :  { %11 = vsyncpa [#allocation6], 0 }
   0x3   :  { %13 = vsyncpa [#allocation6 + $0x1], 0 }
   0x4   :  { %14 = vsyncpa [#allocation4], 0  ;;  %s5775_s12 = smov 0   ;;  %s5777_s13 = smov 0  }
   0x5   :  { %s5779_s14 = smov 0   ;;  %s5781_s15 = smov 0  }
   0x6   :  { %s5783_s16 = smov 0   ;;  %s5785_s17 = smov 0  }
   0x7 LB: > { %s5804_s18 = sadd.s32 4294967295, %s5748_s17   ;;  %s29_s19 = sadd.s32 1, %s5744_s16  ;;  %s5748_s17 = sphi %s5785_s17, %s20_s17   ;;  %s5744_s16 = sphi %s5783_s16, %s11795_s16   ;;  %s5740_s15 = sphi %s5781_s15, %s11794_s15   ;;  %s5736_s14 = sphi %s5779_s14, %s11793_s14   ;;  %s5732_s13 = sphi %s5777_s13, %s11792_s13   ;;  %s5728_s12 = sphi %s5775_s12, %s11791_s12  }
   0x8   : > { %p30_p0 = scmp.ge.s32.totalorder %s29_s19, 2  ;;  %s41_s20 = sadd.s32 1, %s5736_s14 }
   0x9   : > { %p48_p1 = scmp.ne.s32.totalorder %s5736_s14, %s5732_s13  ;;  %p49_p2 = scmp.eq.s32.totalorder %s5748_s17, 0 }
   0xa   : > { %s11797_s19 = smov (%p30_p0, %s29_s19), 0  ;;  %p54_p4 = scmp.ne.s32.totalorder %s5732_s13, %s5728_s12 }
   0xb   : > { %p5813_p3 = por %p49_p2, %p48_p1  ;;  %s37_s22 = ssub.s32 %s5744_s16, %s11797_s19 }
   0xc   : > { %p55_p5 = scmp.eq.s32.totalorder %s5804_s18, 0  ;;  %p39_p6 = scmp.eq.s32.totalorder %s37_s22, 0 }
   0xd   : > { %s10751_s21 = scalar_select %p5813_p3, 1, 0 }
   0xe   : > { %p5821_p7 = por %p55_p5, %p54_p4  ;;  %p4894_p8 = scmp.ge.s32.totalorder %s5748_s17, 2 }
   0xf   : > { %s5826_s24 = scalar_select %p39_p6, %s5736_s14, %s41_s20  }
  0x10   : > { %s10752_s23 = scalar_select %p5821_p7, 1, 0 }
  0x11   : > { %156 = sbr.rel (%p4894_p8) target bundleno = 130 (0x82), region = 16 }
  0x18   : > { %159 = sbr.rel (!%p5813_p3) target bundleno = 58 (0x3a), region = 20  ;;  %s160_s25 = sand.u32 (%p5813_p3), 1, %s5736_s14  }
  0x19   : > { %s4896_s26 = sshll.u32 (%p5813_p3), %s5744_s16, 4  ;;  %s4895_s27 = sshll.u32 (%p5813_p3), %s160_s25, 7 }
  0x1a   : > { %s166_s28 = ssub.s32 (%p5813_p3), 20, %s4896_s26  ;;  %s5836_s4 = scalar_lea.sflag (%p5813_p3), [#allocation3], %s160_s25 }
  0x1b   : > { %p167_p9 = scmp.lt.s32.totalorder (%p5813_p3), %s166_s28, 16  ;;  %s164_s5 = scalar_lea.vmem (%p5813_p3), [#allocation2], %s4895_s27 }
  0x1f   : > { %s11799_s28 = smov (!%p167_p9, %s166_s28), 16 }
  0x20   : > { %s5833_s29 = sshll.u32 %s11799_s28, 7 }
  0x21   : > { %s171_s30 = ssub.s32 2048, %s5833_s29 }
  0x22   : > { %172 = vsyncadd %s5836_s4, %s171_s30  ;;  %p4898_p10 = scmp.ne.s32.totalorder %s5833_s29, 0  ;;  %s4974_s6 = sshll.u32 %s5744_s16, 11 }
  0x23   : > { %s5844_s9 = scalar_lea.hbm %s10409_s0, %s4974_s6  ;;  %s180_s10 = sshll.u32 %s164_s5, 4  ;;  %s181_s10 = int_to_ptr.vmem [resolvable:$true] %s180_s10 }
  0x24   : > { %s5580_s11 = scalar_lea.hbm %s5844_s9, %s5833_s29  ;;  %s5584_s22 = scalar_lea.hbm %s10409_s0, 2560 }
  0x25   : > { %p5581_p11 = scmp.ne.s32.totalorder %s5844_s9, %s5580_s11  ;;  %p5585_p0 = scmp.lt.u32.totalorder %s5844_s9, %s10409_s0 }
  0x26   : > { %p5586_p1 = scmp.lt.u32.totalorder %s5584_s22, %s5580_s11  ;;  %p5588_p4 = scmp.lt.u32.totalorder %s5580_s11, %s5844_s9 }
  0x27   : > { %p5582_p12 = pnand %p5581_p11, %p4898_p10 }
  0x28   : > { %p5587_p2 = por %p5586_p1, %p5585_p0 }
  0x29   : > { %p5583_p13 = pneg %p5582_p12 }
  0x2a   : > { %p5589_p5 = por %p5588_p4, %p5587_p2 }
  0x2c   : > { %p5590_p6 = pnand %p5589_p5, %p5583_p13 }
  0x2e   : > { %5593 = shalt.err (!%p5590_p6)
}
  0x2f   : > { %s5594_s27 = scalar_lea.vmem %s181_s10, %s5833_s29  ;;  %s5750_s28 = smov [#allocation2]  }
  0x30   : > { %p5595_p8 = scmp.ne.s32.totalorder %s181_s10, %s5594_s27  ;;  %s5598_s30 = sshll.u32 %s5750_s28, 4  ;;  %s5599_s30 = int_to_ptr.vmem [resolvable:$false] %s5598_s30 }
  0x31   : > { %s5600_s5 = scalar_lea.vmem %s5599_s30, 4096  ;;  %p5601_p12 = scmp.lt.s32.totalorder %s181_s10, %s5599_s30 }
  0x32   : > { %p5596_p9 = pnand %p5595_p8, %p4898_p10  ;;  %p5602_p7 = scmp.lt.s32.totalorder %s5600_s5, %s5594_s27 }
  0x34   : > { %p5597_p11 = pneg %p5596_p9  ;;  %p5603_p3 = por %p5602_p7, %p5601_p12 }
  0x36   : > { %p5604_p0 = pnand %p5603_p3, %p5597_p11 }
  0x38   : > { %5607 = shalt.err (!%p5604_p0)
}
  0x39   : > { %183 = dma.hbm_to_vmem [thread:$0]  (%p4898_p10), %s5844_s9, %s5833_s29, %s181_s10, %s5836_s4  }
  0x3a PF: > { %p10753_p13 = scmp.ne.s32.totalorder %s10751_s21, 0 }
  0x3b   : > { %s187_s6 = sand.u32 (%p10753_p13), 1, %s5748_s17   ;;  %s189_s7 = sand.u32 (%p10753_p13), 1, %s5736_s14  }
  0x3c   : > { %186 = sbr.rel (!%p10753_p13) target bundleno = 94 (0x5e), region = 24  ;;  %s4902_s8 = sshll.u32 (%p10753_p13), %s189_s7, 7 }
  0x3d   : > { %s4903_s11 = sshll.u32 (%p10753_p13), %s5744_s16, 4  ;;  %s5875_s25 = scalar_lea.sflag (%p10753_p13), [#allocation6], %s187_s6 }
  0x3e   : > { %s193_s12 = ssub.s32 (%p10753_p13), 20, %s4903_s11  ;;  %s191_s29 = scalar_lea.vmem (%p10753_p13), [#allocation5], %s4902_s8 }
  0x3f   : > { %p194_p3 = scmp.lt.s32.totalorder (%p10753_p13), %s193_s12, 16 }
  0x43   : > { %s11801_s12 = smov (!%p194_p3, %s193_s12), 16 }
  0x44   : > { %s5872_s20 = sshll.u32 %s11801_s12, 7 }
  0x45   : > { %s198_s22 = ssub.s32 2048, %s5872_s20 }
  0x46   : > { %199 = vsyncadd %s5875_s25, %s198_s22  ;;  %p4905_p7 = scmp.ne.s32.totalorder %s5872_s20, 0  ;;  %s4975_s4 = sshll.u32 %s5744_s16, 11 }
  0x47   : > { %s5883_s26 = scalar_lea.hbm %s10410_s1, %s4975_s4  ;;  %s207_s27 = sshll.u32 %s191_s29, 4  ;;  %s208_s27 = int_to_ptr.vmem [resolvable:$true] %s207_s27 }
  0x48   : > { %s5608_s28 = scalar_lea.hbm %s5883_s26, %s5872_s20  ;;  %s5612_s6 = scalar_lea.hbm %s10410_s1, 2560 }
  0x49   : > { %p5609_p10 = scmp.ne.s32.totalorder %s5883_s26, %s5608_s28  ;;  %p5613_p4 = scmp.lt.u32.totalorder %s5883_s26, %s10410_s1 }
  0x4a   : > { %p5614_p5 = scmp.lt.u32.totalorder %s5612_s6, %s5608_s28  ;;  %p5616_p8 = scmp.lt.u32.totalorder %s5608_s28, %s5883_s26 }
  0x4b   : > { %p5610_p1 = pnand %p5609_p10, %p4905_p7 }
  0x4c   : > { %p5615_p6 = por %p5614_p5, %p5613_p4 }
  0x4d   : > { %p5611_p2 = pneg %p5610_p1 }
  0x4e   : > { %p5617_p9 = por %p5616_p8, %p5615_p6 }
  0x50   : > { %p5618_p11 = pnand %p5617_p9, %p5611_p2 }
  0x52   : > { %5621 = shalt.err (!%p5618_p11)
}
  0x53   : > { %s5622_s11 = scalar_lea.vmem %s208_s27, %s5872_s20  ;;  %s5751_s12 = smov [#allocation5]  }
  0x54   : > { %p5623_p12 = scmp.ne.s32.totalorder %s208_s27, %s5622_s11  ;;  %s5626_s22 = sshll.u32 %s5751_s12, 4  ;;  %s5627_s22 = int_to_ptr.vmem [resolvable:$false] %s5626_s22 }
  0x55   : > { %s5628_s29 = scalar_lea.vmem %s5627_s22, 4096  ;;  %p5629_p3 = scmp.lt.s32.totalorder %s208_s27, %s5627_s22 }
  0x56   : > { %p5624_p0 = pnand %p5623_p12, %p4905_p7  ;;  %p5630_p10 = scmp.lt.s32.totalorder %s5628_s29, %s5622_s11 }
  0x58   : > { %p5625_p13 = pneg %p5624_p0  ;;  %p5631_p1 = por %p5630_p10, %p5629_p3 }
  0x5a   : > { %p5632_p4 = pnand %p5631_p1, %p5625_p13 }
  0x5c   : > { %5635 = shalt.err (!%p5632_p4)
}
  0x5d   : > { %210 = dma.hbm_to_vmem [thread:$0]  (%p4905_p7), %s5883_s26, %s5872_s20, %s208_s27, %s5875_s25  }
  0x5e PF: > { %p10754_p2 = scmp.ne.s32.totalorder %s10751_s21, 0 }
  0x5f   : > { %s214_s4 = sand.u32 (%p10754_p2), 1, %s5748_s17   ;;  %s216_s9 = sand.u32 (%p10754_p2), 1, %s5736_s14  }
  0x60   : > { %213 = sbr.rel (!%p10754_p2) target bundleno = 130 (0x82), region = 28  ;;  %s4909_s10 = sshll.u32 (%p10754_p2), %s216_s9, 7 }
  0x61   : > { %s4910_s28 = sshll.u32 (%p10754_p2), %s5744_s16, 4  ;;  %s5914_s7 = scalar_lea.sflag (%p10754_p2), [#allocation6], %s214_s4 }
  0x62   : > { %s220_s30 = ssub.s32 (%p10754_p2), 20, %s4910_s28  ;;  %s218_s20 = scalar_lea.vmem (%p10754_p2), [#allocation7], %s4909_s10 }
  0x63   : > { %p221_p5 = scmp.lt.s32.totalorder (%p10754_p2), %s220_s30, 16 }
  0x67   : > { %s11803_s30 = smov (!%p221_p5, %s220_s30), 16 }
  0x68   : > { %s5911_s5 = sshll.u32 %s11803_s30, 7 }
  0x69   : > { %s225_s6 = ssub.s32 2048, %s5911_s5 }
  0x6a   : > { %226 = vsyncadd %s5914_s7, %s225_s6  ;;  %p4912_p7 = scmp.ne.s32.totalorder %s5911_s5, 0  ;;  %s4976_s21 = sshll.u32 %s5744_s16, 11 }
  0x6b   : > { %s5922_s27 = scalar_lea.hbm %s10411_s2, %s4976_s21  ;;  %s234_s8 = sshll.u32 %s218_s20, 4  ;;  %s235_s8 = int_to_ptr.vmem [resolvable:$true] %s234_s8 }
  0x6c   : > { %s5636_s11 = scalar_lea.hbm %s5922_s27, %s5911_s5  ;;  %s5640_s29 = scalar_lea.hbm %s10411_s2, 2560 }
  0x6d   : > { %p5637_p6 = scmp.ne.s32.totalorder %s5922_s27, %s5636_s11  ;;  %p5641_p11 = scmp.lt.u32.totalorder %s5922_s27, %s10411_s2 }
  0x6e   : > { %p5642_p12 = scmp.lt.u32.totalorder %s5640_s29, %s5636_s11  ;;  %p5644_p13 = scmp.lt.u32.totalorder %s5636_s11, %s5922_s27 }
  0x6f   : > { %p5638_p8 = pnand %p5637_p6, %p4912_p7 }
  0x70   : > { %p5643_p0 = por %p5642_p12, %p5641_p11 }
  0x71   : > { %p5639_p9 = pneg %p5638_p8 }
  0x72   : > { %p5645_p3 = por %p5644_p13, %p5643_p0 }
  0x74   : > { %p5646_p10 = pnand %p5645_p3, %p5639_p9 }
  0x76   : > { %5649 = shalt.err (!%p5646_p10)
}
  0x77   : > { %s5650_s10 = scalar_lea.vmem %s235_s8, %s5911_s5  ;;  %s5752_s28 = smov [#allocation7]  }
  0x78   : > { %p5651_p1 = scmp.ne.s32.totalorder %s235_s8, %s5650_s10  ;;  %s5654_s30 = sshll.u32 %s5752_s28, 4  ;;  %s5655_s30 = int_to_ptr.vmem [resolvable:$false] %s5654_s30 }
  0x79   : > { %s5656_s6 = scalar_lea.vmem %s5655_s30, 4096  ;;  %p5657_p5 = scmp.lt.s32.totalorder %s235_s8, %s5655_s30 }
  0x7a   : > { %p5652_p4 = pnand %p5651_p1, %p4912_p7  ;;  %p5658_p6 = scmp.lt.s32.totalorder %s5656_s6, %s5650_s10 }
  0x7c   : > { %p5653_p2 = pneg %p5652_p4  ;;  %p5659_p8 = por %p5658_p6, %p5657_p5 }
  0x7e   : > { %p5660_p11 = pnand %p5659_p8, %p5653_p2 }
  0x80   : > { %5663 = shalt.err (!%p5660_p11)
}
  0x81   : > { %237 = dma.hbm_to_vmem [thread:$0]  (%p4912_p7), %s5922_s27, %s5911_s5, %s235_s8, %s5914_s7  }
  0x82 PF: > { %p4916_p9 = scmp.ge.s32.totalorder %s5748_s17, 1  ;;  %p239_p12 = scmp.lt.s32.totalorder %s5748_s17, 3 }
  0x84   : > { %p240_p0 = pnand %p4916_p9, %p239_p12 }
  0x86   : > { %243 = sbr.rel (%p240_p0) target bundleno = 1464 (0x5b8), region = 32 }
  0x8d   : > { %s245_s20 = sand.u32 1, %s5732_s13   ;;  %p10755_p13 = scmp.ne.s32.totalorder %s10752_s23, 0 }
  0x8e   : > { %s4917_s21 = sshll.u32 %s245_s20, 7  ;;  %s246_s25 = scalar_lea.sflag [#allocation3], %s245_s20 }
  0x8f   : > { %s5948_s26 = scalar_lea.vmem [#allocation2], %s4917_s21 }
  0x90   : > { %5715 = dma.done.wait (%p10755_p13), %s246_s25, 2048  }
  0x91   : > { %5717 = vsyncadd (%p10755_p13), %s246_s25, 4294965248  ;;  %s254_s5 = sand.u32 1, %s5804_s18   ;;  %s258_s27 = scalar_lea.vmem [#allocation5], %s4917_s21 }
  0x92   : > { %s255_s7 = scalar_lea.sflag [#allocation6], %s254_s5 }
  0x93   : > { %5719 = dma.done.wait (%p10755_p13), %s255_s7, 4096  }
  0x94   : > { %5721 = vsyncadd (%p10755_p13), %s255_s7, 4294963200  ;;  %s5959_s8 = scalar_lea.vmem [#allocation7], %s4917_s21  ;;  %p4920_p7 = scmp.ne.s32.totalorder %s5740_s15, 0 }
  0x95   : > { %v5753_v0 = vmov (!%p4920_p7), 0.0  }
  0x96   : > { %313 = sbr.rel (%p4920_p7) target bundleno = 157 (0x9d), region = 48  ;;  %314 = vst [vmem:[#allocation8] sm:$0xff] (!%p4920_p7), %v5753_v0 }
  0x9d PF: > { %v5962_v1 = vld [vmem:[%s258_s27] sm:$0xff]  ;;  %v5964_v2 = vld [vmem:[%s258_s27 + $0x8] sm:$0xff]  ;;  %v5966_v3 = vld [vmem:[%s258_s27 + $0x10] sm:$0xff]  ;;  %s4969_s23 = sshll.u32 %s5740_s15, 11  ;;  %s5754_s15 = smov [#allocation8]  }
  0x9e   : > { %10756 = vst [vmem:[#allocation12_spill] sm:$0xff] %v5962_v1  ;;  %10757 = vst [vmem:[#allocation13_spill] sm:$0xff] %v5964_v2  ;;  %v5968_v4 = vld [vmem:[%s258_s27 + $0x18] sm:$0xff]  ;;  %v5970_v5 = vld [vmem:[%s258_s27 + $0x20] sm:$0xff]  ;;  %v10430_v9 = vmin.f32 %v5962_v1, 1000000.0 }
  0x9f   : > { %10758 = vst [vmem:[#allocation14_spill] sm:$0xff] %v5966_v3  ;;  %10759 = vst [vmem:[#allocation15_spill] sm:$0xff] %v5968_v4  ;;  %v5972_v6 = vld [vmem:[%s258_s27 + $0x28] sm:$0xff]  ;;  %v5974_v7 = vld [vmem:[%s258_s27 + $0x30] sm:$0xff]  ;;  %v10429_v13 = vmin.f32 %v5964_v2, 1000000.0 }
  0xa0   : > { %10760 = vst [vmem:[#allocation16_spill] sm:$0xff] %v5970_v5  ;;  %10761 = vst [vmem:[#allocation17_spill] sm:$0xff] %v5972_v6  ;;  %v5976_v8 = vld [vmem:[%s258_s27 + $0x38] sm:$0xff]  ;;  %v5979_v10 = vld [vmem:[%s258_s27 + $0x40] sm:$0xff]  ;;  %v10428_v17 = vmin.f32 %v5966_v3, 1000000.0 }
  0xa1   : > { %10762 = vst [vmem:[#allocation18_spill] sm:$0xff] %v5974_v7  ;;  %10763 = vst [vmem:[#allocation19_spill] sm:$0xff] %v5976_v8  ;;  %v5981_v11 = vld [vmem:[%s258_s27 + $0x48] sm:$0xff]  ;;  %v5983_v12 = vld [vmem:[%s258_s27 + $0x50] sm:$0xff]  ;;  %v10427_v20 = vmin.f32 %v5968_v4, 1000000.0 }
  0xa2   : > { %10764 = vst [vmem:[#allocation20_spill] sm:$0xff] %v5979_v10  ;;  %10765 = vst [vmem:[#allocation21_spill] sm:$0xff] %v5981_v11  ;;  %v5986_v14 = vld [vmem:[%s258_s27 + $0x58] sm:$0xff]  ;;  %v5988_v15 = vld [vmem:[%s258_s27 + $0x60] sm:$0xff]  ;;  %v10426_v21 = vmin.f32 %v5970_v5, 1000000.0 }
  0xa3   : > { %10766 = vst [vmem:[#allocation22_spill] sm:$0xff] %v5983_v12  ;;  %10767 = vst [vmem:[#allocation23_spill] sm:$0xff] %v5986_v14  ;;  %v5990_v16 = vld [vmem:[%s258_s27 + $0x68] sm:$0xff]  ;;  %v5993_v18 = vld [vmem:[%s258_s27 + $0x70] sm:$0xff]  ;;  %v10425_v22 = vmin.f32 %v5972_v6, 1000000.0 }
  0xa4   : > { %10768 = vst [vmem:[#allocation24_spill] sm:$0xff] %v5988_v15  ;;  %10769 = vst [vmem:[#allocation25_spill] sm:$0xff] %v5990_v16  ;;  %v5995_v19 = vld [vmem:[%s258_s27 + $0x78] sm:$0xff]  ;;  %v10424_v23 = vmin.f32 %v5974_v7, 1000000.0  ;;  %s4779_s11 = sshll.u32 %s5754_s15, 4  ;;  %s4780_s11 = int_to_ptr.vmem [resolvable:$true] %s4779_s11 }
  0xa5   : > { %10770 = vst [vmem:[#allocation26_spill] sm:$0xff] %v5993_v18  ;;  %10771 = vst [vmem:[#allocation27_spill] sm:$0xff] %v5995_v19  ;;  %v10423_v24 = vmin.f32 %v5976_v8, 1000000.0  ;;  %v10422_v25 = vmin.f32 %v5979_v10, 1000000.0  ;;  %p5671_p2 = scmp.lt.s32.totalorder %s4780_s11, %s4780_s11 }
  0xa6   : > { %v10421_v26 = vmin.f32 %v5981_v11, 1000000.0  ;;  %v10420_v27 = vmin.f32 %v5983_v12, 1000000.0  ;;  %v10419_v28 = vmin.f32 %v5986_v14, 1000000.0 }
  0xa7   : > { %v10418_v29 = vmin.f32 %v5988_v15, 1000000.0  ;;  %v6009_v30 = vadd.f32 1e-10, %v10430_v9  ;;  %v10417_v31 = vmin.f32 %v5990_v16, 1000000.0 }
  0xa8   : > { %v10416_v32 = vmin.f32 %v5993_v18, 1000000.0  ;;  %v6015_v33 = vadd.f32 1e-10, %v10429_v13  ;;  %v10415_v34 = vmin.f32 %v5995_v19, 1000000.0 }
  0xa9   : > { %10772 = vst [vmem:[#allocation28_spill] sm:$0xff] %v6009_v30  ;;  %v6020_v35 = vadd.f32 1e-10, %v10428_v17  ;;  %v6024_v36 = vadd.f32 1e-10, %v10427_v20  ;;  %v6047_v42 = vadd.f32 -1.0, %v6009_v30 }
  0xaa   : > { %10773 = vst [vmem:[#allocation29_spill] sm:$0xff] %v6015_v33  ;;  %v6028_v37 = vadd.f32 1e-10, %v10426_v21  ;;  %v6032_v38 = vadd.f32 1e-10, %v10425_v22  ;;  %v6058_v45 = vadd.f32 -1.0, %v6015_v33 }
  0xab   : > { %10774 = vst [vmem:[#allocation30_spill] sm:$0xff] %v6020_v35  ;;  %10775 = vst [vmem:[#allocation31_spill] sm:$0xff] %v6024_v36  ;;  %v6036_v39 = vadd.f32 1e-10, %v10424_v23  ;;  %v6040_v40 = vadd.f32 1e-10, %v10423_v24 }
  0xac   : > { %10776 = vst [vmem:[#allocation32_spill] sm:$0xff] %v6028_v37  ;;  %10777 = vst [vmem:[#allocation33_spill] sm:$0xff] %v6032_v38  ;;  %v6044_v41 = vadd.f32 1e-10, %v10422_v25  ;;  %v6051_v43 = vadd.f32 1e-10, %v10421_v26 }
  0xad   : > { %10778 = vst [vmem:[#allocation34_spill] sm:$0xff] %v6036_v39  ;;  %10779 = vst [vmem:[#allocation35_spill] sm:$0xff] %v6040_v40  ;;  %v6055_v44 = vadd.f32 1e-10, %v10420_v27  ;;  %v6062_v46 = vadd.f32 1e-10, %v10419_v28 }
  0xae   : > { %10780 = vst [vmem:[#allocation36_spill] sm:$0xff] %v6044_v41  ;;  %10781 = vst [vmem:[#allocation37_spill] sm:$0xff] %v6047_v42  ;;  %v6066_v47 = vadd.f32 1e-10, %v10418_v29  ;;  %v6069_v48 = vadd.f32 -1.0, %v6020_v35  ;;  %v6072_v49 = vadd.f32 7.5, %v6047_v42 }
  0xaf   : > { %10782 = vst [vmem:[#allocation38_spill] sm:$0xff] %v6051_v43  ;;  %10783 = vst [vmem:[#allocation39_spill] sm:$0xff] %v6055_v44  ;;  %v6076_v50 = vadd.f32 1e-10, %v10417_v31  ;;  %v6080_v51 = vadd.f32 1e-10, %v10416_v32 }
  0xb0   : > { %10784 = vst [vmem:[#allocation40_spill] sm:$0xff] %v6058_v45  ;;  %10785 = vst [vmem:[#allocation41_spill] sm:$0xff] %v6062_v46  ;;  %v6083_v52 = vadd.f32 -1.0, %v6024_v36  ;;  %v6086_v53 = vadd.f32 7.5, %v6058_v45  ;;  %v6090_v54 = vadd.f32 1e-10, %v10415_v34  ;;  %5036 = vlog2.f32 %v6072_v49 }
  0xb1   : > { %10786 = vst [vmem:[#allocation42_spill] sm:$0xff] %v6066_v47  ;;  %10787 = vst [vmem:[#allocation43_spill] sm:$0xff] %v6069_v48  ;;  %v6093_v55 = vadd.f32 -1.0, %v6028_v37  ;;  %v6096_v56 = vadd.f32 -1.0, %v6032_v38  ;;  %v6099_v57 = vadd.f32 7.5, %v6069_v48  ;;  %v6102_v58 = vadd.f32 -1.0, %v6036_v39 }
  0xb2   : > { %10788 = vst [vmem:[#allocation44_spill] sm:$0xff] %v6072_v49  ;;  %10789 = vst [vmem:[#allocation45_spill] sm:$0xff] %v6076_v50  ;;  %v6105_v59 = vadd.f32 -1.0, %v6040_v40  ;;  %v6108_v60 = vadd.f32 -1.0, %v6044_v41  ;;  %v6111_v61 = vadd.f32 7.5, %v6083_v52  ;;  %v6114_v62 = vadd.f32 -1.0, %v6051_v43 }
  0xb3   : > { %10790 = vst [vmem:[#allocation46_spill] sm:$0xff] %v6080_v51  ;;  %10791 = vst [vmem:[#allocation47_spill] sm:$0xff] %v6083_v52  ;;  %v6117_v63 = vadd.f32 -1.0, %v6055_v44  ;;  %v6120_v0 = vadd.f32 7.5, %v6093_v55  ;;  %v6124_v34 = vadd.f32 -1.0, %v6062_v46  ;;  %v6127_v32 = vadd.f32 -1.0, %v6066_v47 }
  0xb4   : > { %10792 = vst [vmem:[#allocation48_spill] sm:$0xff] %v6086_v53  ;;  %10793 = vst [vmem:[#allocation49_spill] sm:$0xff] %v6090_v54  ;;  %v6130_v31 = vadd.f32 7.5, %v6096_v56  ;;  %5038 = vlog2.f32 %v6086_v53  ;;  %v6134_v29 = vadd.f32 -1.0, %v6076_v50  ;;  %v6137_v28 = vadd.f32 -1.0, %v6080_v51  ;;  %p4984_p3 = scmp.eq.s32.totalorder %s5804_s18, 1 }
  0xb5   : > { %10794 = vst [vmem:[#allocation50_spill] sm:$0xff] %v6093_v55  ;;  %10795 = vst [vmem:[#allocation51_spill] sm:$0xff] %v6096_v56  ;;  %v6140_v27 = vadd.f32 7.5, %v6102_v58  ;;  %5040 = vlog2.f32 %v6099_v57  ;;  %v6144_v26 = vadd.f32 -1.0, %v6090_v54  ;;  %v6147_v25 = vadd.f32 7.5, %v6105_v59  ;;  %s5664_s12 = scalar_lea.vmem %s4780_s11, 128 }
  0xb6   : > { %10796 = vst [vmem:[#allocation52_spill] sm:$0xff] %v6099_v57  ;;  %10797 = vst [vmem:[#allocation53_spill] sm:$0xff] %v6102_v58  ;;  %v6150_v24 = vadd.f32 7.5, %v6108_v60  ;;  %5042 = vlog2.f32 %v6111_v61  ;;  %v6154_v23 = vadd.f32 7.5, %v6114_v62  ;;  %v6157_v22 = vadd.f32 7.5, %v6117_v63  ;;  %p5665_p10 = scmp.ne.s32.totalorder %s4780_s11, %s5664_s12  ;;  %p5672_p5 = scmp.lt.s32.totalorder %s5664_s12, %s5664_s12 }
  0xb7   : > { %10798 = vst [vmem:[#allocation54_spill] sm:$0xff] %v6105_v59  ;;  %10799 = vst [vmem:[#allocation55_spill] sm:$0xff] %v6108_v60  ;;  %v6160_v21 = vadd.f32 7.5, %v6124_v34  ;;  %5044 = vlog2.f32 %v6120_v0  ;;  %v6164_v20 = vadd.f32 7.5, %v6127_v32  ;;  %v6167_v17 = vadd.f32 7.5, %v6134_v29 }
  0xb8   : > { %10800 = vst [vmem:[#allocation56_spill] sm:$0xff] %v6111_v61  ;;  %10801 = vst [vmem:[#allocation57_spill] sm:$0xff] %v6114_v62  ;;  %v6170_v13 = vadd.f32 7.5, %v6137_v28  ;;  %5046 = vlog2.f32 %v6130_v31  ;;  %v6174_v9 = vadd.f32 7.5, %v6144_v26  ;;  %v6177_v54 = vadd.f32 0.5, %v6047_v42  ;;  %p5666_p1 = pnand %p5665_p10, %p4984_p3  ;;  %p5673_p6 = por %p5672_p5, %p5671_p2 }
  0xb9   : > { %10802 = vst [vmem:[#allocation58_spill] sm:$0xff] %v6117_v63  ;;  %10803 = vst [vmem:[#allocation59_spill] sm:$0xff] %v6120_v0  ;;  %v6180_v51 = vadd.f32 0.5, %v6058_v45  ;;  %5048 = vlog2.f32 %v6140_v27  ;;  %v6184_v50 = vadd.f32 0.5, %v6069_v48  ;;  %v6187_v47 = vadd.f32 0.5, %v6083_v52 }
  0xba   : > { %10804 = vst [vmem:[#allocation60_spill] sm:$0xff] %v6124_v34  ;;  %10805 = vst [vmem:[#allocation61_spill] sm:$0xff] %v6127_v32  ;;  %v6190_v46 = vadd.f32 0.5, %v6093_v55  ;;  %5050 = vlog2.f32 %v6147_v25  ;;  %v6194_v44 = vadd.f32 0.5, %v6096_v56  ;;  %v6197_v43 = vadd.f32 0.5, %v6102_v58  ;;  %v5037_v37 = vpop.eup %5036  ;;  %p5667_p4 = pneg %p5666_p1 }
  0xbb   : > { %10806 = vst [vmem:[#allocation62_spill] sm:$0xff] %v6130_v31  ;;  %10807 = vst [vmem:[#allocation63_spill] sm:$0xff] %v6134_v29  ;;  %v6200_v41 = vadd.f32 0.5, %v6105_v59  ;;  %5052 = vlog2.f32 %v6150_v24  ;;  %v6204_v40 = vadd.f32 0.5, %v6108_v60  ;;  %v6207_v39 = vadd.f32 0.5, %v6114_v62 }
  0xbc   : > { %10808 = vst [vmem:[#allocation64_spill] sm:$0xff] %v6137_v28  ;;  %10809 = vst [vmem:[#allocation65_spill] sm:$0xff] %v6140_v27  ;;  %v6210_v38 = vadd.f32 0.5, %v6117_v63  ;;  %5054 = vlog2.f32 %v6154_v23  ;;  %v6214_v36 = vadd.f32 0.5, %v6124_v34  ;;  %v6217_v35 = vadd.f32 0.5, %v6127_v32  ;;  %p5674_p8 = pnand %p5673_p6, %p5667_p4 }
  0xbd   : > { %10810 = vst [vmem:[#allocation66_spill] sm:$0xff] %v6144_v26  ;;  %10811 = vst [vmem:[#allocation67_spill] sm:$0xff] %v6147_v25  ;;  %v6220_v19 = vadd.f32 0.5, %v6134_v29  ;;  %5056 = vlog2.f32 %v6157_v22  ;;  %v6224_v16 = vadd.f32 0.5, %v6137_v28  ;;  %v6227_v15 = vadd.f32 0.5, %v6144_v26 }
  0xbe   : > { %10812 = vst [vmem:[#allocation68_spill] sm:$0xff] %v6150_v24  ;;  %10813 = vst [vmem:[#allocation69_spill] sm:$0xff] %v6154_v23  ;;  %v5039_v18 = vpop.eup %5038  ;;  %5058 = vlog2.f32 %v6160_v21  ;;  %v6231_v14 = vmin.f32 %v6047_v42, 1.0  ;;  %v6235_v11 = vmin.f32 %v6058_v45, 1.0  ;;  %v6238_v10 = vmin.f32 %v6069_v48, 1.0 }
  0xbf   : > { %10814 = vst [vmem:[#allocation70_spill] sm:$0xff] %v6157_v22  ;;  %10815 = vst [vmem:[#allocation71_spill] sm:$0xff] %v6160_v21  ;;  %v5041_v12 = vpop.eup %5040  ;;  %5060 = vlog2.f32 %v6164_v20  ;;  %v6241_v8 = vmin.f32 %v6083_v52, 1.0  ;;  %v6245_v33 = vmin.f32 %v6093_v55, 1.0  ;;  %v6248_v6 = vmin.f32 %v6096_v56, 1.0 }
  0xc0   : > { %10816 = vst [vmem:[#allocation72_spill] sm:$0xff] %v6164_v20  ;;  %10817 = vst [vmem:[#allocation73_spill] sm:$0xff] %v6167_v17  ;;  %v5043_v7 = vpop.eup %5042  ;;  %5062 = vlog2.f32 %v6167_v17  ;;  %v6251_v30 = vmin.f32 %v6102_v58, 1.0  ;;  %v6255_v4 = vmin.f32 %v6105_v59, 1.0  ;;  %v6258_v3 = vmin.f32 %v6108_v60, 1.0 }
  0xc1   : > { %10818 = vst [vmem:[#allocation74_spill] sm:$0xff] %v6170_v13  ;;  %10819 = vst [vmem:[#allocation75_spill] sm:$0xff] %v6174_v9  ;;  %v5045_v5 = vpop.eup %5044  ;;  %5064 = vlog2.f32 %v6170_v13  ;;  %v6261_v2 = vmin.f32 %v6114_v62, 1.0  ;;  %v6265_v17 = vmin.f32 %v6117_v63, 1.0  ;;  %v6268_v20 = vmin.f32 %v6124_v34, 1.0 }
  0xc2   : > { %v5047_v1 = vpop.eup %5046  ;;  %5066 = vlog2.f32 %v6174_v9  ;;  %v6271_v13 = vmin.f32 %v6127_v32, 1.0  ;;  %v6274_v22 = vmin.f32 %v6134_v29, 1.0  ;;  %v6277_v23 = vmin.f32 %v6137_v28, 1.0 }
  0xc3   : > { %10820 = vst [vmem:[#allocation76_spill] sm:$0xff] %v6261_v2  ;;  %10821 = vst [vmem:[#allocation77_spill] sm:$0xff] %v6265_v17  ;;  %v5049_v21 = vpop.eup %5048  ;;  %v6280_v24 = vmin.f32 %v6144_v26, 1.0  ;;  %v571_v9 = vadd.f32 60.458332, %v6231_v14 }
  0xc4   : > { %10822 = vst [vmem:[#allocation78_spill] sm:$0xff] %v6268_v20  ;;  %10823 = vst [vmem:[#allocation79_spill] sm:$0xff] %v6271_v13  ;;  %v5051_v25 = vpop.eup %5050  ;;  %v6284_v27 = vadd.f32 60.458332, %v6235_v11  ;;  %v6287_v31 = vadd.f32 60.458332, %v6238_v10 }
  0xc5   : > { %10824 = vst [vmem:[#allocation80_spill] sm:$0xff] %v6274_v22  ;;  %10825 = vst [vmem:[#allocation81_spill] sm:$0xff] %v6277_v23  ;;  %v6290_v0 = vadd.f32 60.458332, %v6241_v8  ;;  %v5053_v61 = vpop.eup %5052  ;;  %v6293_v29 = vadd.f32 60.458332, %v6245_v33 }
  0xc6   : > { %v6296_v28 = vadd.f32 60.458332, %v6248_v6  ;;  %v6299_v26 = vadd.f32 60.458332, %v6251_v30  ;;  %v5055_v32 = vpop.eup %5054  ;;  %v6302_v34 = vadd.f32 60.458332, %v6255_v4 }
  0xc7   : > { %v6305_v63 = vadd.f32 60.458332, %v6258_v3  ;;  %v6308_v62 = vadd.f32 60.458332, %v6261_v2  ;;  %v5057_v60 = vpop.eup %5056  ;;  %v476_v59 = vmul.f32 0.6931472, %v5037_v37 }
  0xc8   : > { %v6311_v58 = vadd.f32 60.458332, %v6265_v17  ;;  %v6314_v56 = vadd.f32 60.458332, %v6268_v20  ;;  %v5059_v55 = vpop.eup %5058  ;;  %v478_v52 = vmul.f32 0.6931472, %v5039_v18 }
  0xc9   : > { %10826 = vst [vmem:[#allocation82_spill] sm:$0xff] %v6305_v63  ;;  %10827 = vst [vmem:[#allocation83_spill] sm:$0xff] %v6308_v62  ;;  %v6317_v48 = vadd.f32 60.458332, %v6271_v13  ;;  %v6320_v45 = vadd.f32 60.458332, %v6274_v22  ;;  %v5061_v42 = vpop.eup %5060 }
  0xca   : > { %10828 = vst [vmem:[#allocation84_spill] sm:$0xff] %v6311_v58  ;;  %10829 = vst [vmem:[#allocation85_spill] sm:$0xff] %v6314_v56  ;;  %v480_v57 = vmul.f32 0.6931472, %v5041_v12  ;;  %v6323_v53 = vadd.f32 60.458332, %v6277_v23  ;;  %v5063_v49 = vpop.eup %5062  ;;  %v508_v23 = vmul.f32 %v478_v52, %v6180_v51  ;;  %v591_v52 = vmul.f32 %v6293_v29, %v6245_v33 }
  0xcb   : > { %10830 = vst [vmem:[#allocation86_spill] sm:$0xff] %v6317_v48  ;;  %10831 = vst [vmem:[#allocation87_spill] sm:$0xff] %v6320_v45  ;;  %v6326_v37 = vadd.f32 60.458332, %v6280_v24  ;;  %v482_v58 = vmul.f32 0.6931472, %v5043_v7  ;;  %v5065_v17 = vpop.eup %5064  ;;  %v507_v48 = vmul.f32 %v476_v59, %v6177_v54  ;;  %v587_v7 = vmul.f32 %v571_v9, %v6231_v14 }
  0xcc   : > { %10832 = vst [vmem:[#allocation88_spill] sm:$0xff] %v6323_v53  ;;  %v484_v20 = vmul.f32 0.6931472, %v5045_v5  ;;  %v486_v56 = vmul.f32 0.6931472, %v5047_v1  ;;  %v5067_v22 = vpop.eup %5066  ;;  %v10851_v59 = vld [vmem:[#allocation76_spill] sm:$0xff] }
  0xcd   : > { %10833 = vst [vmem:[#allocation89_spill] sm:$0xff] %v6326_v37  ;;  %v488_v18 = vmul.f32 0.6931472, %v5049_v21  ;;  %v490_v62 = vmul.f32 0.6931472, %v5051_v25  ;;  %v509_v37 = vmul.f32 %v480_v57, %v6184_v50  ;;  %v510_v1 = vmul.f32 %v482_v58, %v6187_v47 }
  0xce   : > { %v492_v13 = vmul.f32 0.6931472, %v5053_v61  ;;  %v494_v45 = vmul.f32 0.6931472, %v5055_v32  ;;  %v496_v2 = vmul.f32 0.6931472, %v5057_v60  ;;  %v511_v21 = vmul.f32 %v484_v20, %v6190_v46 }
  0xcf   : > { %v498_v12 = vmul.f32 0.6931472, %v5059_v55  ;;  %v500_v53 = vmul.f32 0.6931472, %v5061_v42  ;;  %v502_v63 = vmul.f32 0.6931472, %v5063_v49  ;;  %v512_v25 = vmul.f32 %v486_v56, %v6194_v44 }
  0xd0   : > { %v504_v5 = vmul.f32 0.6931472, %v5065_v17  ;;  %v506_v54 = vmul.f32 0.6931472, %v5067_v22  ;;  %v513_v32 = vmul.f32 %v488_v18, %v6197_v43  ;;  %v514_v55 = vmul.f32 %v490_v62, %v6200_v41  ;;  %v10852_v60 = vld [vmem:[#allocation83_spill] sm:$0xff]  ;;  %v10853_v62 = vld [vmem:[#allocation77_spill] sm:$0xff] }
  0xd1   : > { %v515_v51 = vmul.f32 %v492_v13, %v6204_v40  ;;  %v516_v42 = vmul.f32 %v494_v45, %v6207_v39  ;;  %v517_v49 = vmul.f32 %v496_v2, %v6210_v38  ;;  %v518_v9 = vmul.f32 %v498_v12, %v6214_v36  ;;  %v10857_v18 = vld [vmem:[#allocation79_spill] sm:$0xff] }
  0xd2   : > { %v6341_v17 = vadd.f32 0.9189385, %v507_v48  ;;  %v519_v47 = vmul.f32 %v500_v53, %v6217_v35  ;;  %v520_v20 = vmul.f32 %v502_v63, %v6220_v19  ;;  %v6345_v44 = vadd.f32 0.9189385, %v508_v23  ;;  %v10854_v63 = vld [vmem:[#allocation84_spill] sm:$0xff]  ;;  %v10858_v12 = vld [vmem:[#allocation86_spill] sm:$0xff] }
  0xd3   : > { %v6347_v22 = vadd.f32 0.9189385, %v509_v37  ;;  %v521_v41 = vmul.f32 %v504_v5, %v6224_v16  ;;  %v6350_v43 = vadd.f32 0.9189385, %v510_v1  ;;  %v6352_v13 = vadd.f32 0.9189385, %v511_v21 }
  0xd4   : > { %10834 = vst [vmem:[#allocation90_spill] sm:$0xff] %v6341_v17  ;;  %10835 = vst [vmem:[#allocation91_spill] sm:$0xff] %v6345_v44  ;;  %v6354_v39 = vadd.f32 0.9189385, %v512_v25  ;;  %v522_v2 = vmul.f32 %v506_v54, %v6227_v15  ;;  %v6357_v36 = vadd.f32 0.9189385, %v513_v32  ;;  %v588_v16 = vmul.f32 %v6284_v27, %v6235_v11 }
  0xd5   : > { %10836 = vst [vmem:[#allocation92_spill] sm:$0xff] %v6347_v22  ;;  %10837 = vst [vmem:[#allocation93_spill] sm:$0xff] %v6350_v43  ;;  %v6359_v38 = vadd.f32 0.9189385, %v514_v55  ;;  %v6361_v35 = vadd.f32 0.9189385, %v515_v51  ;;  %v589_v15 = vmul.f32 %v6287_v31, %v6238_v10  ;;  %v590_v48 = vmul.f32 %v6290_v0, %v6241_v8 }
  0xd6   : > { %10838 = vst [vmem:[#allocation94_spill] sm:$0xff] %v6352_v13  ;;  %10839 = vst [vmem:[#allocation95_spill] sm:$0xff] %v6354_v39  ;;  %v6363_v19 = vadd.f32 0.9189385, %v516_v42  ;;  %v6365_v23 = vadd.f32 0.9189385, %v517_v49  ;;  %v592_v53 = vmul.f32 %v6296_v28, %v6248_v6  ;;  %v593_v27 = vmul.f32 %v6299_v26, %v6251_v30 }
  0xd7   : > { %10840 = vst [vmem:[#allocation96_spill] sm:$0xff] %v6357_v36  ;;  %10841 = vst [vmem:[#allocation97_spill] sm:$0xff] %v6359_v38  ;;  %v6367_v40 = vadd.f32 0.9189385, %v518_v9  ;;  %v6371_v45 = vadd.f32 0.9189385, %v519_v47  ;;  %v594_v57 = vmul.f32 %v6302_v34, %v6255_v4  ;;  %v596_v61 = vmul.f32 %v10852_v60, %v10851_v59 }
  0xd8   : > { %10842 = vst [vmem:[#allocation98_spill] sm:$0xff] %v6361_v35  ;;  %10843 = vst [vmem:[#allocation99_spill] sm:$0xff] %v6363_v19  ;;  %v6373_v46 = vadd.f32 0.9189385, %v520_v20  ;;  %v6379_v50 = vadd.f32 0.9189385, %v521_v41  ;;  %v597_v29 = vmul.f32 %v10854_v63, %v10853_v62  ;;  %v599_v26 = vmul.f32 %v10858_v12, %v10857_v18 }
  0xd9   : > { %10844 = vst [vmem:[#allocation100_spill] sm:$0xff] %v6365_v23  ;;  %10845 = vst [vmem:[#allocation101_spill] sm:$0xff] %v6367_v40  ;;  %v6387_v56 = vadd.f32 0.9189385, %v522_v2  ;;  %v10850_v31 = vld [vmem:[#allocation82_spill] sm:$0xff]  ;;  %v10856_v37 = vld [vmem:[#allocation85_spill] sm:$0xff] }
  0xda   : > { %10846 = vst [vmem:[#allocation102_spill] sm:$0xff] %v6371_v45  ;;  %10847 = vst [vmem:[#allocation103_spill] sm:$0xff] %v6373_v46  ;;  %v595_v58 = vmul.f32 %v10850_v31, %v6258_v3  ;;  %v10855_v0 = vld [vmem:[#allocation78_spill] sm:$0xff]  ;;  %v603_v5 = vadd.f32 1599.0425, %v587_v7  ;;  %v10859_v1 = vld [vmem:[#allocation80_spill] sm:$0xff] }
  0xdb   : > { %10848 = vst [vmem:[#allocation104_spill] sm:$0xff] %v6379_v50  ;;  %10849 = vst [vmem:[#allocation105_spill] sm:$0xff] %v6387_v56  ;;  %v598_v28 = vmul.f32 %v10856_v37, %v10855_v0  ;;  %v10860_v21 = vld [vmem:[#allocation87_spill] sm:$0xff]  ;;  %v604_v34 = vadd.f32 1599.0425, %v588_v16  ;;  %v10861_v55 = vld [vmem:[#allocation81_spill] sm:$0xff] }
  0xdc   : > { %v600_v25 = vmul.f32 %v10860_v21, %v10859_v1  ;;  %v605_v54 = vadd.f32 1599.0425, %v589_v15  ;;  %v606_v32 = vadd.f32 1599.0425, %v590_v48  ;;  %v10862_v51 = vld [vmem:[#allocation88_spill] sm:$0xff]  ;;  %v10863_v20 = vld [vmem:[#allocation89_spill] sm:$0xff]  ;;  %v619_v12 = vmul.f32 %v603_v5, %v6231_v14 }
  0xdd   : > { %v601_v42 = vmul.f32 %v10862_v51, %v10861_v55  ;;  %v607_v49 = vadd.f32 1599.0425, %v591_v52  ;;  %v608_v9 = vadd.f32 1599.0425, %v592_v53  ;;  %v609_v47 = vadd.f32 1599.0425, %v593_v27 }
  0xde   : > { %v602_v41 = vmul.f32 %v10863_v20, %v6280_v24  ;;  %v610_v2 = vadd.f32 1599.0425, %v594_v57  ;;  %v611_v31 = vadd.f32 1599.0425, %v595_v58  ;;  %v612_v60 = vadd.f32 1599.0425, %v596_v61 }
  0xdf   : > { %v613_v63 = vadd.f32 1599.0425, %v597_v29  ;;  %v614_v7 = vadd.f32 1599.0425, %v598_v28  ;;  %v615_v37 = vadd.f32 1599.0425, %v599_v26  ;;  %v620_v15 = vmul.f32 %v604_v34, %v6235_v11 }
  0xe0   : > { %v616_v16 = vadd.f32 1599.0425, %v600_v25  ;;  %v621_v48 = vmul.f32 %v605_v54, %v6238_v10  ;;  %v622_v52 = vmul.f32 %v606_v32, %v6241_v8  ;;  %v617_v53 = vadd.f32 1599.0425, %v601_v42  ;;  %v10914_v22 = vld [vmem:[#allocation66_spill] sm:$0xff]  ;;  %v356_v17 = vld [vmem:[%s5959_s8 + $0x48] sm:$0xff] }
  0xe1   : > { %v623_v27 = vmul.f32 %v607_v49, %v6245_v33  ;;  %v624_v21 = vmul.f32 %v608_v9, %v6248_v6  ;;  %v625_v57 = vmul.f32 %v609_v47, %v6251_v30  ;;  %v618_v58 = vadd.f32 1599.0425, %v602_v41 }
  0xe2   : > { %v626_v61 = vmul.f32 %v610_v2, %v6255_v4  ;;  %v627_v29 = vmul.f32 %v611_v31, %v6258_v3  ;;  %v628_v28 = vmul.f32 %v612_v60, %v10851_v59  ;;  %v629_v26 = vmul.f32 %v613_v63, %v10853_v62 }
  0xe3   : > { %v630_v5 = vmul.f32 %v614_v7, %v10855_v0  ;;  %v631_v25 = vmul.f32 %v615_v37, %v10857_v18  ;;  %v635_v34 = vadd.f32 24165.51, %v619_v12  ;;  %v632_v54 = vmul.f32 %v616_v16, %v10859_v1 }
  0xe4   : > { %v636_v32 = vadd.f32 24165.51, %v620_v15  ;;  %v637_v51 = vadd.f32 24165.51, %v621_v48  ;;  %v638_v42 = vadd.f32 24165.51, %v622_v52  ;;  %v633_v49 = vmul.f32 %v617_v53, %v10861_v55 }
  0xe5   : > { %v639_v9 = vadd.f32 24165.51, %v623_v27  ;;  %v640_v47 = vadd.f32 24165.51, %v624_v21  ;;  %v641_v20 = vadd.f32 24165.51, %v625_v57  ;;  %v634_v41 = vmul.f32 %v618_v58, %v6280_v24 }
  0xe6   : > { %v642_v2 = vadd.f32 24165.51, %v626_v61  ;;  %v643_v31 = vadd.f32 24165.51, %v627_v29  ;;  %v644_v60 = vadd.f32 24165.51, %v628_v28  ;;  %v651_v37 = vmul.f32 %v635_v34, %v6231_v14 }
  0xe7   : > { %v645_v63 = vadd.f32 24165.51, %v629_v26  ;;  %v646_v7 = vadd.f32 24165.51, %v630_v5  ;;  %v647_v56 = vadd.f32 24165.51, %v631_v25  ;;  %v652_v16 = vmul.f32 %v636_v32, %v6235_v11 }
  0xe8   : > { %v648_v12 = vadd.f32 24165.51, %v632_v54  ;;  %v653_v15 = vmul.f32 %v637_v51, %v6238_v10  ;;  %v654_v48 = vmul.f32 %v638_v42, %v6241_v8  ;;  %v649_v52 = vadd.f32 24165.51, %v633_v49 }
  0xe9   : > { %v655_v53 = vmul.f32 %v639_v9, %v6245_v33  ;;  %v656_v27 = vmul.f32 %v640_v47, %v6248_v6  ;;  %v657_v21 = vmul.f32 %v641_v20, %v6251_v30  ;;  %v650_v57 = vadd.f32 24165.51, %v634_v41 }
  0xea   : > { %v658_v58 = vmul.f32 %v642_v2, %v6255_v4  ;;  %v659_v61 = vmul.f32 %v643_v31, %v6258_v3  ;;  %v660_v29 = vmul.f32 %v644_v60, %v10851_v59  ;;  %v661_v28 = vmul.f32 %v645_v63, %v10853_v62 }
  0xeb   : > { %v662_v26 = vmul.f32 %v646_v7, %v10855_v0  ;;  %v663_v5 = vmul.f32 %v647_v56, %v10857_v18  ;;  %v667_v25 = vadd.f32 228235.22, %v651_v37  ;;  %v664_v34 = vmul.f32 %v648_v12, %v10859_v1 }
  0xec   : > { %v668_v54 = vadd.f32 228235.22, %v652_v16  ;;  %v669_v32 = vadd.f32 228235.22, %v653_v15  ;;  %v670_v51 = vadd.f32 228235.22, %v654_v48  ;;  %v665_v42 = vmul.f32 %v649_v52, %v10861_v55 }
  0xed   : > { %v671_v49 = vadd.f32 228235.22, %v655_v53  ;;  %v672_v9 = vadd.f32 228235.22, %v656_v27  ;;  %v673_v47 = vadd.f32 228235.22, %v657_v21  ;;  %v666_v20 = vmul.f32 %v650_v57, %v6280_v24 }
  0xee   : > { %v674_v41 = vadd.f32 228235.22, %v658_v58  ;;  %v675_v2 = vadd.f32 228235.22, %v659_v61  ;;  %v676_v31 = vadd.f32 228235.22, %v660_v29  ;;  %v683_v56 = vmul.f32 %v667_v25, %v6231_v14 }
  0xef   : > { %v677_v60 = vadd.f32 228235.22, %v661_v28  ;;  %v678_v63 = vadd.f32 228235.22, %v662_v26  ;;  %v679_v7 = vadd.f32 228235.22, %v663_v5  ;;  %v684_v12 = vmul.f32 %v668_v54, %v6235_v11 }
  0xf0   : > { %v680_v37 = vadd.f32 228235.22, %v664_v34  ;;  %v685_v16 = vmul.f32 %v669_v32, %v6238_v10  ;;  %v686_v15 = vmul.f32 %v670_v51, %v6241_v8  ;;  %v681_v48 = vadd.f32 228235.22, %v665_v42 }
  0xf1   : > { %v687_v52 = vmul.f32 %v671_v49, %v6245_v33  ;;  %v688_v53 = vmul.f32 %v672_v9, %v6248_v6  ;;  %v689_v27 = vmul.f32 %v673_v47, %v6251_v30  ;;  %v682_v21 = vadd.f32 228235.22, %v666_v20 }
  0xf2   : > { %v690_v57 = vmul.f32 %v674_v41, %v6255_v4  ;;  %v691_v58 = vmul.f32 %v675_v2, %v6258_v3  ;;  %v692_v61 = vmul.f32 %v676_v31, %v10851_v59  ;;  %v693_v29 = vmul.f32 %v677_v60, %v10853_v62 }
  0xf3   : > { %v694_v28 = vmul.f32 %v678_v63, %v10855_v0  ;;  %v695_v26 = vmul.f32 %v679_v7, %v10857_v18  ;;  %v699_v5 = vadd.f32 1379496.3, %v683_v56  ;;  %v696_v25 = vmul.f32 %v680_v37, %v10859_v1 }
  0xf4   : > { %v700_v34 = vadd.f32 1379496.3, %v684_v12  ;;  %v701_v54 = vadd.f32 1379496.3, %v685_v16  ;;  %v702_v32 = vadd.f32 1379496.3, %v686_v15  ;;  %v697_v51 = vmul.f32 %v681_v48, %v10861_v55 }
  0xf5   : > { %v703_v42 = vadd.f32 1379496.3, %v687_v52  ;;  %v704_v49 = vadd.f32 1379496.3, %v688_v53  ;;  %v705_v9 = vadd.f32 1379496.3, %v689_v27  ;;  %v698_v47 = vmul.f32 %v682_v21, %v6280_v24 }
  0xf6   : > { %v706_v20 = vadd.f32 1379496.3, %v690_v57  ;;  %v707_v41 = vadd.f32 1379496.3, %v691_v58  ;;  %v708_v2 = vadd.f32 1379496.3, %v692_v61  ;;  %v715_v7 = vmul.f32 %v699_v5, %v6231_v14 }
  0xf7   : > { %v709_v31 = vadd.f32 1379496.3, %v693_v29  ;;  %v710_v60 = vadd.f32 1379496.3, %v694_v28  ;;  %v711_v63 = vadd.f32 1379496.3, %v695_v26  ;;  %v716_v37 = vmul.f32 %v700_v34, %v6235_v11 }
  0xf8   : > { %v712_v56 = vadd.f32 1379496.3, %v696_v25  ;;  %v717_v12 = vmul.f32 %v701_v54, %v6238_v10  ;;  %v718_v16 = vmul.f32 %v702_v32, %v6241_v8  ;;  %v713_v15 = vadd.f32 1379496.3, %v697_v51 }
  0xf9   : > { %v719_v48 = vmul.f32 %v703_v42, %v6245_v33  ;;  %v720_v52 = vmul.f32 %v704_v49, %v6248_v6  ;;  %v721_v53 = vmul.f32 %v705_v9, %v6251_v30  ;;  %v714_v27 = vadd.f32 1379496.3, %v698_v47 }
  0xfa   : > { %v722_v21 = vmul.f32 %v706_v20, %v6255_v4  ;;  %v723_v57 = vmul.f32 %v707_v41, %v6258_v3  ;;  %v724_v58 = vmul.f32 %v708_v2, %v10851_v59  ;;  %v725_v61 = vmul.f32 %v709_v31, %v10853_v62 }
  0xfb   : > { %v726_v29 = vmul.f32 %v710_v60, %v10855_v0  ;;  %v727_v28 = vmul.f32 %v711_v63, %v10857_v18  ;;  %v731_v26 = vadd.f32 5210869.0, %v715_v7  ;;  %v728_v5 = vmul.f32 %v712_v56, %v10859_v1 }
  0xfc   : > { %v732_v25 = vadd.f32 5210869.0, %v716_v37  ;;  %v733_v34 = vadd.f32 5210869.0, %v717_v12  ;;  %v734_v54 = vadd.f32 5210869.0, %v718_v16  ;;  %v729_v32 = vmul.f32 %v713_v15, %v10861_v55 }
  0xfd   : > { %v735_v51 = vadd.f32 5210869.0, %v719_v48  ;;  %v736_v42 = vadd.f32 5210869.0, %v720_v52  ;;  %v737_v49 = vadd.f32 5210869.0, %v721_v53  ;;  %v730_v9 = vmul.f32 %v714_v27, %v6280_v24 }
  0xfe   : > { %v738_v47 = vadd.f32 5210869.0, %v722_v21  ;;  %v739_v20 = vadd.f32 5210869.0, %v723_v57  ;;  %v740_v41 = vadd.f32 5210869.0, %v724_v58  ;;  %v747_v63 = vmul.f32 %v731_v26, %v6231_v14 }
  0xff   : > { %v741_v2 = vadd.f32 5210869.0, %v725_v61  ;;  %v742_v31 = vadd.f32 5210869.0, %v726_v29  ;;  %v743_v60 = vadd.f32 5210869.0, %v727_v28  ;;  %v748_v56 = vmul.f32 %v732_v25, %v6235_v11 }
 0x100   : > { %v744_v7 = vadd.f32 5210869.0, %v728_v5  ;;  %v749_v37 = vmul.f32 %v733_v34, %v6238_v10  ;;  %v750_v12 = vmul.f32 %v734_v54, %v6241_v8  ;;  %v745_v16 = vadd.f32 5210869.0, %v729_v32 }
 0x101   : > { %v751_v15 = vmul.f32 %v735_v51, %v6245_v33  ;;  %v752_v48 = vmul.f32 %v736_v42, %v6248_v6  ;;  %v753_v52 = vmul.f32 %v737_v49, %v6251_v30  ;;  %v746_v53 = vadd.f32 5210869.0, %v730_v9 }
 0x102   : > { %v754_v27 = vmul.f32 %v738_v47, %v6255_v4  ;;  %v755_v21 = vmul.f32 %v739_v20, %v6258_v3  ;;  %v756_v57 = vmul.f32 %v740_v41, %v10851_v59  ;;  %v757_v58 = vmul.f32 %v741_v2, %v10853_v62 }
 0x103   : > { %v758_v61 = vmul.f32 %v742_v31, %v10855_v0  ;;  %v759_v29 = vmul.f32 %v743_v60, %v10857_v18  ;;  %v763_v28 = vadd.f32 11246929.0, %v747_v63  ;;  %v760_v26 = vmul.f32 %v744_v7, %v10859_v1 }
 0x104   : > { %v764_v5 = vadd.f32 11246929.0, %v748_v56  ;;  %v765_v25 = vadd.f32 11246929.0, %v749_v37  ;;  %v766_v34 = vadd.f32 11246929.0, %v750_v12  ;;  %v761_v54 = vmul.f32 %v745_v16, %v10861_v55 }
 0x105   : > { %v767_v32 = vadd.f32 11246929.0, %v751_v15  ;;  %v768_v51 = vadd.f32 11246929.0, %v752_v48  ;;  %v769_v42 = vadd.f32 11246929.0, %v753_v52  ;;  %v762_v49 = vmul.f32 %v746_v53, %v6280_v24 }
 0x106   : > { %v770_v9 = vadd.f32 11246929.0, %v754_v27  ;;  %v771_v47 = vadd.f32 11246929.0, %v755_v21  ;;  %v772_v20 = vadd.f32 11246929.0, %v756_v57  ;;  %v779_v63 = vmul.f32 %v763_v28, %v6231_v14 }
 0x107   : > { %v773_v41 = vadd.f32 11246929.0, %v757_v58  ;;  %v774_v2 = vadd.f32 11246929.0, %v758_v61  ;;  %v775_v31 = vadd.f32 11246929.0, %v759_v29  ;;  %v780_v7 = vmul.f32 %v764_v5, %v6235_v11 }
 0x108   : > { %v776_v60 = vadd.f32 11246929.0, %v760_v26  ;;  %v781_v56 = vmul.f32 %v765_v25, %v6238_v10  ;;  %v777_v37 = vadd.f32 11246929.0, %v761_v54  ;;  %v782_v12 = vmul.f32 %v766_v34, %v6241_v8 }
 0x109   : > { %v783_v16 = vmul.f32 %v767_v32, %v6245_v33  ;;  %v784_v15 = vmul.f32 %v768_v51, %v6248_v6  ;;  %v778_v48 = vadd.f32 11246929.0, %v762_v49  ;;  %v785_v52 = vmul.f32 %v769_v42, %v6251_v30 }
 0x10a   : > { %v786_v53 = vmul.f32 %v770_v9, %v6255_v4  ;;  %v787_v27 = vmul.f32 %v771_v47, %v6258_v3  ;;  %v788_v21 = vmul.f32 %v772_v20, %v10851_v59  ;;  %v789_v57 = vmul.f32 %v773_v41, %v10853_v62 }
 0x10b   : > { %v790_v58 = vmul.f32 %v774_v2, %v10855_v0  ;;  %v791_v61 = vmul.f32 %v775_v31, %v10857_v18  ;;  %v792_v29 = vmul.f32 %v776_v60, %v10859_v1  ;;  %v6501_v28 = vadd.f32 10619610.0, %v779_v63 }
 0x10c   : > { %v6503_v26 = vadd.f32 10619610.0, %v780_v7  ;;  %v6505_v5 = vadd.f32 10619610.0, %v781_v56  ;;  %v793_v25 = vmul.f32 %v777_v37, %v10861_v55  ;;  %v6508_v34 = vadd.f32 10619610.0, %v782_v12 }
 0x10d   : > { %10864 = vst [vmem:[#allocation82_spill] sm:$0xff] %v6501_v28  ;;  %v6510_v54 = vadd.f32 10619610.0, %v783_v16  ;;  %v6512_v32 = vadd.f32 10619610.0, %v784_v15  ;;  %v794_v51 = vmul.f32 %v778_v48, %v6280_v24  ;;  %v811_v60 = vadd.f32 36.0, %v6231_v14 }
 0x10e   : > { %10865 = vst [vmem:[#allocation76_spill] sm:$0xff] %v6503_v26  ;;  %10866 = vst [vmem:[#allocation83_spill] sm:$0xff] %v6505_v5  ;;  %v6515_v42 = vadd.f32 10619610.0, %v785_v52  ;;  %v6517_v49 = vadd.f32 10619610.0, %v786_v53 }
 0x10f   : > { %10867 = vst [vmem:[#allocation77_spill] sm:$0xff] %v6508_v34  ;;  %10868 = vst [vmem:[#allocation84_spill] sm:$0xff] %v6510_v54  ;;  %v6519_v9 = vadd.f32 10619610.0, %v787_v27  ;;  %v6521_v47 = vadd.f32 10619610.0, %v788_v21 }
 0x110   : > { %10869 = vst [vmem:[#allocation78_spill] sm:$0xff] %v6512_v32  ;;  %10870 = vst [vmem:[#allocation85_spill] sm:$0xff] %v6515_v42  ;;  %v6523_v20 = vadd.f32 10619610.0, %v789_v57  ;;  %v6525_v41 = vadd.f32 10619610.0, %v790_v58 }
 0x111   : > { %10871 = vst [vmem:[#allocation79_spill] sm:$0xff] %v6517_v49  ;;  %10872 = vst [vmem:[#allocation86_spill] sm:$0xff] %v6519_v9  ;;  %v6527_v2 = vadd.f32 10619610.0, %v791_v61  ;;  %v6529_v31 = vadd.f32 10619610.0, %v792_v29  ;;  %v827_v29 = vmul.f32 %v811_v60, %v6231_v14 }
 0x112   : > { %10873 = vst [vmem:[#allocation80_spill] sm:$0xff] %v6521_v47  ;;  %10874 = vst [vmem:[#allocation87_spill] sm:$0xff] %v6523_v20  ;;  %v812_v63 = vadd.f32 36.0, %v6235_v11  ;;  %v6533_v7 = vadd.f32 10619610.0, %v793_v25  ;;  %v813_v56 = vadd.f32 36.0, %v6238_v10 }
 0x113   : > { %10875 = vst [vmem:[#allocation81_spill] sm:$0xff] %v6525_v41  ;;  %10876 = vst [vmem:[#allocation88_spill] sm:$0xff] %v6527_v2  ;;  %v814_v37 = vadd.f32 36.0, %v6241_v8  ;;  %v815_v12 = vadd.f32 36.0, %v6245_v33  ;;  %v6538_v16 = vadd.f32 10619610.0, %v794_v51 }
 0x114   : > { %10877 = vst [vmem:[#allocation89_spill] sm:$0xff] %v6529_v31  ;;  %10878 = vst [vmem:[#allocation106_spill] sm:$0xff] %v6533_v7  ;;  %v816_v15 = vadd.f32 36.0, %v6248_v6  ;;  %v817_v48 = vadd.f32 36.0, %v6251_v30  ;;  %v818_v52 = vadd.f32 36.0, %v6255_v4  ;;  %v819_v53 = vadd.f32 36.0, %v6258_v3 }
 0x115   : > { %10879 = vst [vmem:[#allocation107_spill] sm:$0xff] %v6538_v16  ;;  %v820_v27 = vadd.f32 36.0, %v10851_v59  ;;  %v821_v21 = vadd.f32 36.0, %v10853_v62  ;;  %v822_v57 = vadd.f32 36.0, %v10855_v0  ;;  %v823_v58 = vadd.f32 36.0, %v10857_v18 }
 0x116   : > { %v824_v61 = vadd.f32 36.0, %v10859_v1  ;;  %v828_v25 = vmul.f32 %v812_v63, %v6235_v11  ;;  %v825_v51 = vadd.f32 36.0, %v10861_v55  ;;  %v829_v16 = vmul.f32 %v813_v56, %v6238_v10 }
 0x117   : > { %v830_v7 = vmul.f32 %v814_v37, %v6241_v8  ;;  %v831_v31 = vmul.f32 %v815_v12, %v6245_v33  ;;  %v826_v2 = vadd.f32 36.0, %v6280_v24  ;;  %v832_v41 = vmul.f32 %v816_v15, %v6248_v6 }
 0x118   : > { %v833_v20 = vmul.f32 %v817_v48, %v6251_v30  ;;  %v834_v47 = vmul.f32 %v818_v52, %v6255_v4  ;;  %v835_v60 = vmul.f32 %v819_v53, %v6258_v3  ;;  %v836_v63 = vmul.f32 %v820_v27, %v10851_v59 }
 0x119   : > { %v837_v9 = vmul.f32 %v821_v21, %v10853_v62  ;;  %v838_v56 = vmul.f32 %v822_v57, %v10855_v0  ;;  %v839_v37 = vmul.f32 %v823_v58, %v10857_v18  ;;  %v840_v12 = vmul.f32 %v824_v61, %v10859_v1 }
 0x11a   : > { %v843_v49 = vadd.f32 546.0, %v827_v29  ;;  %v844_v42 = vadd.f32 546.0, %v828_v25  ;;  %v841_v15 = vmul.f32 %v825_v51, %v10861_v55  ;;  %v845_v32 = vadd.f32 546.0, %v829_v16 }
 0x11b   : > { %v846_v48 = vadd.f32 546.0, %v830_v7  ;;  %v847_v54 = vadd.f32 546.0, %v831_v31  ;;  %v842_v52 = vmul.f32 %v826_v2, %v6280_v24  ;;  %v848_v53 = vadd.f32 546.0, %v832_v41 }
 0x11c   : > { %v849_v34 = vadd.f32 546.0, %v833_v20  ;;  %v850_v27 = vadd.f32 546.0, %v834_v47  ;;  %v851_v5 = vadd.f32 546.0, %v835_v60  ;;  %v852_v21 = vadd.f32 546.0, %v836_v63 }
 0x11d   : > { %v853_v26 = vadd.f32 546.0, %v837_v9  ;;  %v854_v57 = vadd.f32 546.0, %v838_v56  ;;  %v855_v28 = vadd.f32 546.0, %v839_v37  ;;  %v856_v58 = vadd.f32 546.0, %v840_v12 }
 0x11e   : > { %v859_v61 = vmul.f32 %v843_v49, %v6231_v14  ;;  %v860_v29 = vmul.f32 %v844_v42, %v6235_v11  ;;  %v857_v25 = vadd.f32 546.0, %v841_v15  ;;  %v861_v16 = vmul.f32 %v845_v32, %v6238_v10 }
 0x11f   : > { %v862_v31 = vmul.f32 %v846_v48, %v6241_v8  ;;  %v863_v2 = vmul.f32 %v847_v54, %v6245_v33  ;;  %v858_v41 = vadd.f32 546.0, %v842_v52  ;;  %v864_v47 = vmul.f32 %v848_v53, %v6248_v6 }
 0x120   : > { %v865_v20 = vmul.f32 %v849_v34, %v6251_v30  ;;  %v866_v9 = vmul.f32 %v850_v27, %v6255_v4  ;;  %v867_v7 = vmul.f32 %v851_v5, %v6258_v3  ;;  %v868_v49 = vmul.f32 %v852_v21, %v10851_v59 }
 0x121   : > { %v869_v42 = vmul.f32 %v853_v26, %v10853_v62  ;;  %v870_v51 = vmul.f32 %v854_v57, %v10855_v0  ;;  %v871_v32 = vmul.f32 %v855_v28, %v10857_v18  ;;  %v872_v60 = vmul.f32 %v856_v58, %v10859_v1 }
 0x122   : > { %v875_v54 = vadd.f32 4536.0, %v859_v61  ;;  %v876_v63 = vadd.f32 4536.0, %v860_v29  ;;  %v873_v56 = vmul.f32 %v857_v25, %v10861_v55  ;;  %v877_v37 = vadd.f32 4536.0, %v861_v16 }
 0x123   : > { %v878_v34 = vadd.f32 4536.0, %v862_v31  ;;  %v879_v12 = vadd.f32 4536.0, %v863_v2  ;;  %v874_v15 = vmul.f32 %v858_v41, %v6280_v24  ;;  %v880_v5 = vadd.f32 4536.0, %v864_v47 }
 0x124   : > { %v881_v48 = vadd.f32 4536.0, %v865_v20  ;;  %v882_v52 = vadd.f32 4536.0, %v866_v9  ;;  %v883_v53 = vadd.f32 4536.0, %v867_v7  ;;  %v884_v26 = vadd.f32 4536.0, %v868_v49 }
 0x125   : > { %v885_v27 = vadd.f32 4536.0, %v869_v42  ;;  %v886_v21 = vadd.f32 4536.0, %v870_v51  ;;  %v887_v57 = vadd.f32 4536.0, %v871_v32  ;;  %v888_v28 = vadd.f32 4536.0, %v872_v60 }
 0x126   : > { %v891_v58 = vmul.f32 %v875_v54, %v6231_v14  ;;  %v892_v61 = vmul.f32 %v876_v63, %v6235_v11  ;;  %v889_v29 = vadd.f32 4536.0, %v873_v56  ;;  %v893_v25 = vmul.f32 %v877_v37, %v6238_v10 }
 0x127   : > { %v894_v16 = vmul.f32 %v878_v34, %v6241_v8  ;;  %v895_v31 = vmul.f32 %v879_v12, %v6245_v33  ;;  %v890_v2 = vadd.f32 4536.0, %v874_v15  ;;  %v896_v41 = vmul.f32 %v880_v5, %v6248_v6 }
 0x128   : > { %v897_v47 = vmul.f32 %v881_v48, %v6251_v30  ;;  %v898_v20 = vmul.f32 %v882_v52, %v6255_v4  ;;  %v899_v9 = vmul.f32 %v883_v53, %v6258_v3  ;;  %v900_v7 = vmul.f32 %v884_v26, %v10851_v59 }
 0x129   : > { %v901_v49 = vmul.f32 %v885_v27, %v10853_v62  ;;  %v902_v42 = vmul.f32 %v886_v21, %v10855_v0  ;;  %v903_v51 = vmul.f32 %v887_v57, %v10857_v18  ;;  %v904_v32 = vmul.f32 %v888_v28, %v10859_v1 }
 0x12a   : > { %v907_v60 = vadd.f32 22449.0, %v891_v58  ;;  %v908_v54 = vadd.f32 22449.0, %v892_v61  ;;  %v905_v63 = vmul.f32 %v889_v29, %v10861_v55  ;;  %v909_v56 = vadd.f32 22449.0, %v893_v25 }
 0x12b   : > { %v910_v37 = vadd.f32 22449.0, %v894_v16  ;;  %v911_v34 = vadd.f32 22449.0, %v895_v31  ;;  %v906_v12 = vmul.f32 %v890_v2, %v6280_v24  ;;  %v912_v15 = vadd.f32 22449.0, %v896_v41 }
 0x12c   : > { %v913_v5 = vadd.f32 22449.0, %v897_v47  ;;  %v914_v48 = vadd.f32 22449.0, %v898_v20  ;;  %v915_v52 = vadd.f32 22449.0, %v899_v9  ;;  %v923_v28 = vmul.f32 %v907_v60, %v6231_v14 }
 0x12d   : > { %v916_v53 = vadd.f32 22449.0, %v900_v7  ;;  %v917_v26 = vadd.f32 22449.0, %v901_v49  ;;  %v918_v27 = vadd.f32 22449.0, %v902_v42  ;;  %v924_v61 = vmul.f32 %v908_v54, %v6235_v11 }
 0x12e   : > { %v919_v21 = vadd.f32 22449.0, %v903_v51  ;;  %v920_v57 = vadd.f32 22449.0, %v904_v32  ;;  %v921_v58 = vadd.f32 22449.0, %v905_v63  ;;  %v925_v29 = vmul.f32 %v909_v56, %v6238_v10 }
 0x12f   : > { %v926_v25 = vmul.f32 %v910_v37, %v6241_v8  ;;  %v922_v16 = vadd.f32 22449.0, %v906_v12  ;;  %v927_v31 = vmul.f32 %v911_v34, %v6245_v33  ;;  %v928_v2 = vmul.f32 %v912_v15, %v6248_v6 }
 0x130   : > { %v929_v41 = vmul.f32 %v913_v5, %v6251_v30  ;;  %v930_v47 = vmul.f32 %v914_v48, %v6255_v4  ;;  %v931_v20 = vmul.f32 %v915_v52, %v6258_v3  ;;  %v932_v9 = vmul.f32 %v916_v53, %v10851_v59 }
 0x131   : > { %v933_v7 = vmul.f32 %v917_v26, %v10853_v62  ;;  %v934_v49 = vmul.f32 %v918_v27, %v10855_v0  ;;  %v935_v42 = vmul.f32 %v919_v21, %v10857_v18  ;;  %v936_v51 = vmul.f32 %v920_v57, %v10859_v1 }
 0x132   : > { %v939_v32 = vadd.f32 67284.0, %v923_v28  ;;  %v937_v60 = vmul.f32 %v921_v58, %v10861_v55  ;;  %v940_v54 = vadd.f32 67284.0, %v924_v61  ;;  %v941_v63 = vadd.f32 67284.0, %v925_v29 }
 0x133   : > { %v942_v56 = vadd.f32 67284.0, %v926_v25  ;;  %v938_v37 = vmul.f32 %v922_v16, %v6280_v24  ;;  %v943_v34 = vadd.f32 67284.0, %v927_v31  ;;  %v944_v12 = vadd.f32 67284.0, %v928_v2 }
 0x134   : > { %v945_v15 = vadd.f32 67284.0, %v929_v41  ;;  %v946_v52 = vadd.f32 67284.0, %v930_v47  ;;  %v947_v53 = vadd.f32 67284.0, %v931_v20  ;;  %v955_v28 = vmul.f32 %v939_v32, %v6231_v14 }
 0x135   : > { %v948_v26 = vadd.f32 67284.0, %v932_v9  ;;  %v949_v27 = vadd.f32 67284.0, %v933_v7  ;;  %v950_v21 = vadd.f32 67284.0, %v934_v49  ;;  %v956_v29 = vmul.f32 %v940_v54, %v6235_v11 }
 0x136   : > { %v951_v57 = vadd.f32 67284.0, %v935_v42  ;;  %v952_v58 = vadd.f32 67284.0, %v936_v51  ;;  %v953_v61 = vadd.f32 67284.0, %v937_v60  ;;  %v957_v25 = vmul.f32 %v941_v63, %v6238_v10 }
 0x137   : > { %v954_v16 = vadd.f32 67284.0, %v938_v37  ;;  %v958_v31 = vmul.f32 %v942_v56, %v6241_v8  ;;  %v959_v2 = vmul.f32 %v943_v34, %v6245_v33  ;;  %v960_v41 = vmul.f32 %v944_v12, %v6248_v6 }
 0x138   : > { %v961_v47 = vmul.f32 %v945_v15, %v6251_v30  ;;  %v962_v20 = vmul.f32 %v946_v52, %v6255_v4  ;;  %v963_v9 = vmul.f32 %v947_v53, %v6258_v3  ;;  %v964_v7 = vmul.f32 %v948_v26, %v10851_v59 }
 0x139   : > { %v965_v49 = vmul.f32 %v949_v27, %v10853_v62  ;;  %v966_v42 = vmul.f32 %v950_v21, %v10855_v0  ;;  %v967_v51 = vmul.f32 %v951_v57, %v10857_v18  ;;  %v971_v32 = vadd.f32 118124.0, %v955_v28 }
 0x13a   : > { %v968_v60 = vmul.f32 %v952_v58, %v10859_v1  ;;  %v969_v54 = vmul.f32 %v953_v61, %v10861_v55  ;;  %v972_v63 = vadd.f32 118124.0, %v956_v29  ;;  %v973_v56 = vadd.f32 118124.0, %v957_v25 }
 0x13b   : > { %v970_v37 = vmul.f32 %v954_v16, %v6280_v24  ;;  %v974_v34 = vadd.f32 118124.0, %v958_v31  ;;  %v975_v12 = vadd.f32 118124.0, %v959_v2  ;;  %v976_v15 = vadd.f32 118124.0, %v960_v41 }
 0x13c   : > { %v977_v26 = vadd.f32 118124.0, %v961_v47  ;;  %v978_v27 = vadd.f32 118124.0, %v962_v20  ;;  %v979_v21 = vadd.f32 118124.0, %v963_v9  ;;  %v987_v58 = vmul.f32 %v971_v32, %v6231_v14 }
 0x13d   : > { %v980_v48 = vadd.f32 118124.0, %v964_v7  ;;  %v981_v57 = vadd.f32 118124.0, %v965_v49  ;;  %v982_v28 = vadd.f32 118124.0, %v966_v42  ;;  %v988_v25 = vmul.f32 %v972_v63, %v6235_v11 }
 0x13e   : > { %v983_v5 = vadd.f32 118124.0, %v967_v51  ;;  %v984_v61 = vadd.f32 118124.0, %v968_v60  ;;  %v985_v29 = vadd.f32 118124.0, %v969_v54  ;;  %v989_v31 = vmul.f32 %v973_v56, %v6238_v10 }
 0x13f   : > { %v986_v16 = vadd.f32 118124.0, %v970_v37  ;;  %v990_v2 = vmul.f32 %v974_v34, %v6241_v8  ;;  %v991_v41 = vmul.f32 %v975_v12, %v6245_v33  ;;  %v992_v47 = vmul.f32 %v976_v15, %v6248_v6 }
 0x140   : > { %v993_v20 = vmul.f32 %v977_v26, %v6251_v30  ;;  %v994_v9 = vmul.f32 %v978_v27, %v6255_v4  ;;  %v995_v7 = vmul.f32 %v979_v21, %v6258_v3  ;;  %v996_v49 = vmul.f32 %v980_v48, %v10851_v59 }
 0x141   : > { %v997_v42 = vmul.f32 %v981_v57, %v10853_v62  ;;  %v998_v51 = vmul.f32 %v982_v28, %v10855_v0  ;;  %v1003_v32 = vadd.f32 109584.0, %v987_v58  ;;  %v999_v60 = vmul.f32 %v983_v5, %v10857_v18 }
 0x142   : > { %v1000_v54 = vmul.f32 %v984_v61, %v10859_v1  ;;  %v1001_v63 = vmul.f32 %v985_v29, %v10861_v55  ;;  %v1004_v56 = vadd.f32 109584.0, %v988_v25  ;;  %v1002_v37 = vmul.f32 %v986_v16, %v6280_v24 }
 0x143   : > { %v1005_v34 = vadd.f32 109584.0, %v989_v31  ;;  %v1006_v12 = vadd.f32 109584.0, %v990_v2  ;;  %v1007_v15 = vadd.f32 109584.0, %v991_v41  ;;  %v1019_v5 = vmul.f32 %v1003_v32, %v6231_v14 }
 0x144   : > { %v1008_v27 = vadd.f32 109584.0, %v992_v47  ;;  %v1009_v21 = vadd.f32 109584.0, %v993_v20  ;;  %v1010_v57 = vadd.f32 109584.0, %v994_v9  ;;  %v1020_v25 = vmul.f32 %v1004_v56, %v6235_v11 }
 0x145   : > { %v1011_v28 = vadd.f32 109584.0, %v995_v7  ;;  %v1012_v58 = vadd.f32 109584.0, %v996_v49  ;;  %v1013_v53 = vadd.f32 109584.0, %v997_v42  ;;  %v1021_v2 = vmul.f32 %v1005_v34, %v6238_v10 }
 0x146   : > { %v1014_v61 = vadd.f32 109584.0, %v998_v51  ;;  %v1015_v52 = vadd.f32 109584.0, %v999_v60  ;;  %v1016_v29 = vadd.f32 109584.0, %v1000_v54  ;;  %v1022_v41 = vmul.f32 %v1006_v12, %v6241_v8 }
 0x147   : > { %v1017_v16 = vadd.f32 109584.0, %v1001_v63  ;;  %v1018_v31 = vadd.f32 109584.0, %v1002_v37  ;;  %v1023_v47 = vmul.f32 %v1007_v15, %v6245_v33  ;;  %v1024_v20 = vmul.f32 %v1008_v27, %v6248_v6  ;;  %v10883_v42 = vld [vmem:[#allocation37_spill] sm:$0xff]  ;;  %v10884_v32 = vld [vmem:[#allocation40_spill] sm:$0xff] }
 0x148   : > { %v1025_v9 = vmul.f32 %v1009_v21, %v6251_v30  ;;  %v1026_v7 = vmul.f32 %v1010_v57, %v6255_v4  ;;  %v1027_v14 = vmul.f32 %v1011_v28, %v6258_v3  ;;  %v1028_v49 = vmul.f32 %v1012_v58, %v10851_v59  ;;  %v10886_v3 = vld [vmem:[#allocation43_spill] sm:$0xff]  ;;  %v10893_v63 = vld [vmem:[#allocation50_spill] sm:$0xff]  ;;  %v10899_v27 = vld [vmem:[#allocation53_spill] sm:$0xff] }
 0x149   : > { %v1029_v11 = vmul.f32 %v1013_v53, %v10853_v62  ;;  %v1051_v51 = vmax.f32 %v10883_v42, 1.0  ;;  %v1030_v10 = vmul.f32 %v1014_v61, %v10855_v0  ;;  %v1031_v8 = vmul.f32 %v1015_v52, %v10857_v18  ;;  %v10890_v0 = vld [vmem:[#allocation47_spill] sm:$0xff]  ;;  %v10902_v58 = vld [vmem:[#allocation54_spill] sm:$0xff] }
 0x14a   : > { %v1032_v33 = vmul.f32 %v1016_v29, %v10859_v1  ;;  %v1052_v6 = vmax.f32 %v10884_v32, 1.0  ;;  %v1033_v30 = vmul.f32 %v1017_v16, %v10861_v55  ;;  %v1034_v4 = vmul.f32 %v1018_v31, %v6280_v24  ;;  %v10896_v37 = vld [vmem:[#allocation51_spill] sm:$0xff] }
 0x14b   : > { %v6671_v60 = vadd.f32 40320.0, %v1019_v5  ;;  %v1053_v59 = vmax.f32 %v10886_v3, 1.0  ;;  %v6674_v54 = vadd.f32 40320.0, %v1020_v25  ;;  %v6676_v62 = vadd.f32 40320.0, %v1021_v2  ;;  %v10905_v25 = vld [vmem:[#allocation55_spill] sm:$0xff]  ;;  %v348_v2 = vld [vmem:[%s5959_s8 + $0x8] sm:$0xff] }
 0x14c   : > { %v6678_v53 = vadd.f32 40320.0, %v1022_v41  ;;  %v1054_v18 = vmax.f32 %v10890_v0, 1.0  ;;  %v6681_v52 = vadd.f32 40320.0, %v1023_v47  ;;  %v6683_v1 = vadd.f32 40320.0, %v1024_v20  ;;  %v347_v31 = vld [vmem:[%s5959_s8] sm:$0xff]  ;;  %v349_v41 = vld [vmem:[%s5959_s8 + $0x10] sm:$0xff] }
 0x14d   : > { %10885 = vst [vmem:[#allocation37_spill] sm:$0xff] %v6671_v60  ;;  %10887 = vst [vmem:[#allocation40_spill] sm:$0xff] %v6674_v54  ;;  %v1055_v55 = vmax.f32 %v10893_v63, 1.0  ;;  %5068 = vrcp.f32 %v1051_v51  ;;  %v6686_v24 = vadd.f32 40320.0, %v1025_v9  ;;  %v6688_v56 = vadd.f32 40320.0, %v1026_v7  ;;  %v10908_v9 = vld [vmem:[#allocation57_spill] sm:$0xff] }
 0x14e   : > { %10888 = vst [vmem:[#allocation43_spill] sm:$0xff] %v6676_v62  ;;  %10889 = vst [vmem:[#allocation108_spill] sm:$0xff] %v6678_v53  ;;  %v1056_v34 = vmax.f32 %v10896_v37, 1.0  ;;  %5070 = vrcp.f32 %v1052_v6  ;;  %v6691_v12 = vadd.f32 40320.0, %v1027_v14  ;;  %v6693_v15 = vadd.f32 40320.0, %v1028_v49  ;;  %v350_v14 = vld [vmem:[%s5959_s8 + $0x18] sm:$0xff] }
 0x14f   : > { %10891 = vst [vmem:[#allocation109_spill] sm:$0xff] %v6681_v52  ;;  %10892 = vst [vmem:[#allocation110_spill] sm:$0xff] %v6683_v1  ;;  %v1057_v21 = vmax.f32 %v10899_v27, 1.0  ;;  %5072 = vrcp.f32 %v1053_v59  ;;  %v6696_v57 = vadd.f32 40320.0, %v1029_v11  ;;  %v6698_v28 = vadd.f32 40320.0, %v1030_v10  ;;  %v351_v49 = vld [vmem:[%s5959_s8 + $0x20] sm:$0xff] }
 0x150   : > { %10894 = vst [vmem:[#allocation111_spill] sm:$0xff] %v6686_v24  ;;  %10895 = vst [vmem:[#allocation112_spill] sm:$0xff] %v6688_v56  ;;  %v1058_v5 = vmax.f32 %v10902_v58, 1.0  ;;  %5074 = vrcp.f32 %v1054_v18  ;;  %v6701_v61 = vadd.f32 40320.0, %v1031_v8  ;;  %v6703_v29 = vadd.f32 40320.0, %v1032_v33  ;;  %v352_v11 = vld [vmem:[%s5959_s8 + $0x28] sm:$0xff] }
 0x151   : > { %10897 = vst [vmem:[#allocation113_spill] sm:$0xff] %v6691_v12  ;;  %10898 = vst [vmem:[#allocation114_spill] sm:$0xff] %v6693_v15  ;;  %v1059_v16 = vmax.f32 %v10905_v25, 1.0  ;;  %5076 = vrcp.f32 %v1055_v55  ;;  %v6709_v47 = vadd.f32 40320.0, %v1033_v30  ;;  %v6711_v20 = vadd.f32 40320.0, %v1034_v4  ;;  %v10909_v51 = vld [vmem:[#allocation58_spill] sm:$0xff] }
 0x152   : > { %10900 = vst [vmem:[#allocation115_spill] sm:$0xff] %v6696_v57  ;;  %10901 = vst [vmem:[#allocation116_spill] sm:$0xff] %v6698_v28  ;;  %v1060_v7 = vmax.f32 %v10908_v9, 1.0  ;;  %5078 = vrcp.f32 %v1056_v34  ;;  %v1061_v10 = vmax.f32 %v10909_v51, 1.0  ;;  %v10910_v8 = vld [vmem:[#allocation60_spill] sm:$0xff]  ;;  %v10911_v6 = vld [vmem:[#allocation61_spill] sm:$0xff] }
 0x153   : > { %10903 = vst [vmem:[#allocation117_spill] sm:$0xff] %v6701_v61  ;;  %10904 = vst [vmem:[#allocation118_spill] sm:$0xff] %v6703_v29  ;;  %v1062_v33 = vmax.f32 %v10910_v8, 1.0  ;;  %v1063_v59 = vmax.f32 %v10911_v6, 1.0  ;;  %5080 = vrcp.f32 %v1057_v21  ;;  %v353_v30 = vld [vmem:[%s5959_s8 + $0x30] sm:$0xff]  ;;  %v354_v4 = vld [vmem:[%s5959_s8 + $0x38] sm:$0xff] }
 0x154   : > { %10906 = vst [vmem:[#allocation119_spill] sm:$0xff] %v6709_v47  ;;  %10907 = vst [vmem:[#allocation120_spill] sm:$0xff] %v6711_v20  ;;  %v355_v18 = vld [vmem:[%s5959_s8 + $0x40] sm:$0xff]  ;;  %v10913_v34 = vld [vmem:[#allocation64_spill] sm:$0xff]  ;;  %v1066_v44 = vmax.f32 %v10914_v22, 1.0  ;;  %5082 = vrcp.f32 %v1058_v5  ;;  %v1739_v29 = vadd.f32 1.0, %v347_v31 }
 0x155   : > { %v10912_v55 = vld [vmem:[#allocation63_spill] sm:$0xff]  ;;  %v1065_v26 = vmax.f32 %v10913_v34, 1.0  ;;  %v357_v20 = vld [vmem:[%s5959_s8 + $0x50] sm:$0xff]  ;;  %v358_v47 = vld [vmem:[%s5959_s8 + $0x58] sm:$0xff]  ;;  %5084 = vrcp.f32 %v1059_v16  ;;  %v1740_v61 = vadd.f32 1.0, %v348_v2  ;;  %v1741_v28 = vadd.f32 1.0, %v349_v41 }
 0x156   : > { %v1064_v48 = vmax.f32 %v10912_v55, 1.0  ;;  %v359_v21 = vld [vmem:[%s5959_s8 + $0x60] sm:$0xff]  ;;  %v360_v57 = vld [vmem:[%s5959_s8 + $0x68] sm:$0xff]  ;;  %5086 = vrcp.f32 %v1060_v7  ;;  %v1742_v15 = vadd.f32 1.0, %v350_v14  ;;  %v1743_v6 = vadd.f32 1.0, %v351_v49  ;;  %v361_v16 = vld [vmem:[%s5959_s8 + $0x70] sm:$0xff] }
 0x157   : > { %v1744_v55 = vadd.f32 1.0, %v352_v11  ;;  %v6731_v12 = vpop.eup %5068  ;;  %5088 = vrcp.f32 %v1061_v10  ;;  %v1745_v22 = vadd.f32 1.0, %v353_v30  ;;  %v1746_v5 = vadd.f32 1.0, %v354_v4  ;;  %v362_v7 = vld [vmem:[%s5959_s8 + $0x78] sm:$0xff] }
 0x158   : > { %v1747_v34 = vadd.f32 1.0, %v355_v18  ;;  %v6733_v8 = vpop.eup %5070  ;;  %5090 = vrcp.f32 %v1062_v33  ;;  %v1748_v31 = vadd.f32 1.0, %v356_v17  ;;  %v1749_v2 = vadd.f32 1.0, %v357_v20 }
 0x159   : > { %v1750_v41 = vadd.f32 1.0, %v358_v47  ;;  %v6736_v56 = vpop.eup %5072  ;;  %5092 = vrcp.f32 %v1063_v59  ;;  %v1751_v14 = vadd.f32 1.0, %v359_v21  ;;  %v1752_v49 = vadd.f32 1.0, %v360_v57 }
 0x15a   : > { %v6739_v11 = vadd.f32 -1.0, %v1739_v29  ;;  %v6741_v51 = vpop.eup %5074  ;;  %5094 = vrcp.f32 %v1064_v48  ;;  %v6743_v10 = vadd.f32 -1.0, %v1740_v61  ;;  %v6745_v30 = vadd.f32 -1.0, %v1741_v28 }
 0x15b   : > { %v6747_v4 = vadd.f32 -1.0, %v1742_v15  ;;  %v6749_v17 = vpop.eup %5076  ;;  %5096 = vrcp.f32 %v1065_v26  ;;  %v1753_v47 = vadd.f32 1.0, %v361_v16  ;;  %v6751_v20 = vadd.f32 -1.0, %v1743_v6 }
 0x15c   : > { %10915 = vst [vmem:[#allocation121_spill] sm:$0xff] %v6739_v11  ;;  %10916 = vst [vmem:[#allocation122_spill] sm:$0xff] %v6743_v10  ;;  %v6753_v33 = vadd.f32 -1.0, %v1744_v55  ;;  %v6755_v57 = vpop.eup %5078  ;;  %5098 = vrcp.f32 %v1066_v44  ;;  %v1099_v29 = vmul.f32 10619610.0, %v6731_v12  ;;  %v1754_v61 = vadd.f32 1.0, %v362_v7 }
 0x15d   : > { %10917 = vst [vmem:[#allocation123_spill] sm:$0xff] %v6745_v30  ;;  %10918 = vst [vmem:[#allocation124_spill] sm:$0xff] %v6747_v4  ;;  %v1100_v48 = vmul.f32 10619610.0, %v6733_v8  ;;  %v6759_v28 = vpop.eup %5080  ;;  %v6761_v15 = vadd.f32 -1.0, %v1745_v22  ;;  %v6763_v59 = vadd.f32 -1.0, %v1746_v5 }
 0x15e   : > { %10919 = vst [vmem:[#allocation125_spill] sm:$0xff] %v6751_v20  ;;  %10920 = vst [vmem:[#allocation126_spill] sm:$0xff] %v6753_v33  ;;  %v6765_v26 = vadd.f32 -1.0, %v1747_v34  ;;  %v6767_v6 = vadd.f32 -1.0, %v1748_v31  ;;  %v6769_v18 = vpop.eup %5082  ;;  %v1101_v55 = vmul.f32 10619610.0, %v6736_v56 }
 0x15f   : > { %10921 = vst [vmem:[#allocation127_spill] sm:$0xff] %v6761_v15  ;;  %10922 = vst [vmem:[#allocation128_spill] sm:$0xff] %v6763_v59  ;;  %v6772_v44 = vadd.f32 -1.0, %v1749_v2  ;;  %v6774_v21 = vadd.f32 -1.0, %v1750_v41  ;;  %v6776_v16 = vadd.f32 -1.0, %v1751_v14  ;;  %v6778_v7 = vpop.eup %5084  ;;  %v6782_v5 = vmul.f32 40320.0, %v6731_v12 }
 0x160   : > { %10923 = vst [vmem:[#allocation129_spill] sm:$0xff] %v6765_v26  ;;  %10924 = vst [vmem:[#allocation130_spill] sm:$0xff] %v6767_v6  ;;  %v1102_v22 = vmul.f32 10619610.0, %v6741_v51  ;;  %v6784_v34 = vadd.f32 -1.0, %v1752_v49  ;;  %v6786_v31 = vadd.f32 -1.0, %v1753_v47  ;;  %v6788_v6 = vpop.eup %5086 }
 0x161   : > { %10925 = vst [vmem:[#allocation131_spill] sm:$0xff] %v6772_v44  ;;  %10926 = vst [vmem:[#allocation132_spill] sm:$0xff] %v6774_v21  ;;  %v1115_v26 = vadd.f32 11246929.0, %v1099_v29  ;;  %v1116_v2 = vadd.f32 11246929.0, %v1100_v48 }
 0x162   : > { %10927 = vst [vmem:[#allocation133_spill] sm:$0xff] %v6776_v16  ;;  %10928 = vst [vmem:[#allocation134_spill] sm:$0xff] %v6784_v34  ;;  %v6791_v41 = vmul.f32 40320.0, %v6733_v8  ;;  %v6793_v14 = vadd.f32 -1.0, %v1754_v61  ;;  %v6795_v16 = vpop.eup %5088  ;;  %v1103_v21 = vmul.f32 10619610.0, %v6749_v17 }
 0x163   : > { %10929 = vst [vmem:[#allocation135_spill] sm:$0xff] %v6786_v31  ;;  %v1104_v44 = vmul.f32 10619610.0, %v6755_v57  ;;  %v6800_v49 = vmul.f32 40320.0, %v6736_v56  ;;  %v6803_v47 = vmul.f32 40320.0, %v6741_v51  ;;  %v6805_v31 = vpop.eup %5090  ;;  %v1131_v62 = vmul.f32 %v6731_v12, %v1115_v26 }
 0x164   : > { %10930 = vst [vmem:[#allocation136_spill] sm:$0xff] %v6793_v14  ;;  %v1105_v61 = vmul.f32 10619610.0, %v6759_v28  ;;  %v1106_v14 = vmul.f32 10619610.0, %v6769_v18  ;;  %v6811_v59 = vpop.eup %5092  ;;  %v6840_v25 = vmul.f32 40320.0, %v6749_v17 }
 0x165   : > { %v1117_v34 = vadd.f32 11246929.0, %v1101_v55  ;;  %v1107_v20 = vmul.f32 10619610.0, %v6778_v7  ;;  %v1108_v4 = vmul.f32 10619610.0, %v6788_v6  ;;  %v6817_v10 = vpop.eup %5094 }
 0x166   : > { %v1118_v30 = vadd.f32 11246929.0, %v1102_v22  ;;  %v1109_v29 = vmul.f32 10619610.0, %v6795_v16  ;;  %v1110_v43 = vmul.f32 10619610.0, %v6805_v31  ;;  %v6824_v24 = vpop.eup %5096 }
 0x167   : > { %v1111_v55 = vmul.f32 10619610.0, %v6811_v59  ;;  %v1112_v15 = vmul.f32 10619610.0, %v6817_v10  ;;  %v1119_v13 = vadd.f32 11246929.0, %v1103_v21  ;;  %v6829_v1 = vpop.eup %5098  ;;  %v1133_v37 = vmul.f32 %v6736_v56, %v1117_v34 }
 0x168   : > { %v1120_v22 = vadd.f32 11246929.0, %v1104_v44  ;;  %v1113_v11 = vmul.f32 10619610.0, %v6824_v24  ;;  %v1121_v39 = vadd.f32 11246929.0, %v1105_v61  ;;  %v1132_v44 = vmul.f32 %v6733_v8, %v1116_v2 }
 0x169   : > { %v1122_v52 = vadd.f32 11246929.0, %v1106_v14  ;;  %v1114_v58 = vmul.f32 10619610.0, %v6829_v1  ;;  %v1123_v53 = vadd.f32 11246929.0, %v1107_v20  ;;  %v1134_v48 = vmul.f32 %v6741_v51, %v1118_v30 }
 0x16a   : > { %v1124_v27 = vadd.f32 11246929.0, %v1108_v4  ;;  %v1125_v33 = vadd.f32 11246929.0, %v1109_v29  ;;  %v1126_v9 = vadd.f32 11246929.0, %v1110_v43  ;;  %v1135_v61 = vmul.f32 %v6749_v17, %v1119_v13 }
 0x16b   : > { %v1127_v36 = vadd.f32 11246929.0, %v1111_v55  ;;  %v1128_v21 = vadd.f32 11246929.0, %v1112_v15  ;;  %v1129_v14 = vadd.f32 11246929.0, %v1113_v11  ;;  %v1136_v4 = vmul.f32 %v6755_v57, %v1120_v22 }
 0x16c   : > { %v1137_v20 = vmul.f32 %v6759_v28, %v1121_v39  ;;  %v1130_v26 = vadd.f32 11246929.0, %v1114_v58  ;;  %v1138_v43 = vmul.f32 %v6769_v18, %v1122_v52  ;;  %v1139_v2 = vmul.f32 %v6778_v7, %v1123_v53 }
 0x16d   : > { %v1140_v15 = vmul.f32 %v6788_v6, %v1124_v27  ;;  %v1141_v34 = vmul.f32 %v6795_v16, %v1125_v33  ;;  %v1142_v30 = vmul.f32 %v6805_v31, %v1126_v9  ;;  %v1143_v29 = vmul.f32 %v6811_v59, %v1127_v36 }
 0x16e   : > { %v1147_v11 = vadd.f32 5210869.0, %v1131_v62  ;;  %v1144_v13 = vmul.f32 %v6817_v10, %v1128_v21  ;;  %v1148_v55 = vadd.f32 5210869.0, %v1132_v44  ;;  %v1149_v22 = vadd.f32 5210869.0, %v1133_v37 }
 0x16f   : > { %v1150_v38 = vadd.f32 5210869.0, %v1134_v48  ;;  %v1145_v39 = vmul.f32 %v6824_v24, %v1129_v14  ;;  %v1151_v58 = vadd.f32 5210869.0, %v1135_v61  ;;  %v1152_v52 = vadd.f32 5210869.0, %v1136_v4 }
 0x170   : > { %v1153_v54 = vadd.f32 5210869.0, %v1137_v20  ;;  %v1146_v53 = vmul.f32 %v6829_v1, %v1130_v26  ;;  %v1154_v27 = vadd.f32 5210869.0, %v1138_v43  ;;  %v1155_v63 = vadd.f32 5210869.0, %v1139_v2 }
 0x171   : > { %v1156_v33 = vadd.f32 5210869.0, %v1140_v15  ;;  %v1157_v60 = vadd.f32 5210869.0, %v1141_v34  ;;  %v1158_v9 = vadd.f32 5210869.0, %v1142_v30  ;;  %v1163_v36 = vmul.f32 %v6731_v12, %v1147_v11 }
 0x172   : > { %v1159_v0 = vadd.f32 5210869.0, %v1143_v29  ;;  %v1160_v62 = vadd.f32 5210869.0, %v1144_v13  ;;  %v1164_v44 = vmul.f32 %v6733_v8, %v1148_v55  ;;  %v1165_v37 = vmul.f32 %v6736_v56, %v1149_v22 }
 0x173   : > { %v1166_v48 = vmul.f32 %v6741_v51, %v1150_v38  ;;  %v1161_v21 = vadd.f32 5210869.0, %v1145_v39  ;;  %v1167_v14 = vmul.f32 %v6749_v17, %v1151_v58  ;;  %v1168_v61 = vmul.f32 %v6755_v57, %v1152_v52 }
 0x174   : > { %v1169_v4 = vmul.f32 %v6759_v28, %v1153_v54  ;;  %v1162_v20 = vadd.f32 5210869.0, %v1146_v53  ;;  %v1170_v26 = vmul.f32 %v6769_v18, %v1154_v27  ;;  %v1171_v43 = vmul.f32 %v6778_v7, %v1155_v63 }
 0x175   : > { %v1172_v2 = vmul.f32 %v6788_v6, %v1156_v33  ;;  %v1173_v15 = vmul.f32 %v6795_v16, %v1157_v60  ;;  %v1174_v34 = vmul.f32 %v6805_v31, %v1158_v9  ;;  %v1175_v38 = vmul.f32 %v6811_v59, %v1159_v0 }
 0x176   : > { %v1179_v30 = vadd.f32 1379496.3, %v1163_v36  ;;  %v1176_v29 = vmul.f32 %v6817_v10, %v1160_v62  ;;  %v1180_v11 = vadd.f32 1379496.3, %v1164_v44  ;;  %v1181_v13 = vadd.f32 1379496.3, %v1165_v37 }
 0x177   : > { %v1182_v55 = vadd.f32 1379496.3, %v1166_v48  ;;  %v1177_v54 = vmul.f32 %v6824_v24, %v1161_v21  ;;  %v1183_v22 = vadd.f32 1379496.3, %v1167_v14  ;;  %v1184_v39 = vadd.f32 1379496.3, %v1168_v61 }
 0x178   : > { %v1185_v58 = vadd.f32 1379496.3, %v1169_v4  ;;  %v1178_v63 = vmul.f32 %v6829_v1, %v1162_v20  ;;  %v1186_v52 = vadd.f32 1379496.3, %v1170_v26  ;;  %v1187_v53 = vadd.f32 1379496.3, %v1171_v43 }
 0x179   : > { %v1188_v60 = vadd.f32 1379496.3, %v1172_v2  ;;  %v1189_v27 = vadd.f32 1379496.3, %v1173_v15  ;;  %v1190_v33 = vadd.f32 1379496.3, %v1174_v34  ;;  %v1195_v0 = vmul.f32 %v6731_v12, %v1179_v30 }
 0x17a   : > { %v1191_v9 = vadd.f32 1379496.3, %v1175_v38  ;;  %v1192_v36 = vadd.f32 1379496.3, %v1176_v29  ;;  %v1196_v62 = vmul.f32 %v6733_v8, %v1180_v11  ;;  %v1197_v44 = vmul.f32 %v6736_v56, %v1181_v13 }
 0x17b   : > { %v1198_v37 = vmul.f32 %v6741_v51, %v1182_v55  ;;  %v1193_v48 = vadd.f32 1379496.3, %v1177_v54  ;;  %v1199_v21 = vmul.f32 %v6749_v17, %v1183_v22  ;;  %v1200_v14 = vmul.f32 %v6755_v57, %v1184_v39 }
 0x17c   : > { %v1201_v61 = vmul.f32 %v6759_v28, %v1185_v58  ;;  %v1194_v4 = vadd.f32 1379496.3, %v1178_v63  ;;  %v1202_v20 = vmul.f32 %v6769_v18, %v1186_v52  ;;  %v1203_v26 = vmul.f32 %v6778_v7, %v1187_v53 }
 0x17d   : > { %v1204_v43 = vmul.f32 %v6788_v6, %v1188_v60  ;;  %v1205_v2 = vmul.f32 %v6795_v16, %v1189_v27  ;;  %v1206_v15 = vmul.f32 %v6805_v31, %v1190_v33  ;;  %v1207_v34 = vmul.f32 %v6811_v59, %v1191_v9 }
 0x17e   : > { %v1211_v38 = vadd.f32 228235.22, %v1195_v0  ;;  %v1208_v30 = vmul.f32 %v6817_v10, %v1192_v36  ;;  %v1212_v29 = vadd.f32 228235.22, %v1196_v62  ;;  %v1213_v11 = vadd.f32 228235.22, %v1197_v44 }
 0x17f   : > { %v1214_v13 = vadd.f32 228235.22, %v1198_v37  ;;  %v1209_v55 = vmul.f32 %v6824_v24, %v1193_v48  ;;  %v1215_v54 = vadd.f32 228235.22, %v1199_v21  ;;  %v1216_v22 = vadd.f32 228235.22, %v1200_v14 }
 0x180   : > { %v1217_v39 = vadd.f32 228235.22, %v1201_v61  ;;  %v1210_v58 = vmul.f32 %v6829_v1, %v1194_v4  ;;  %v1218_v63 = vadd.f32 228235.22, %v1202_v20  ;;  %v1219_v52 = vadd.f32 228235.22, %v1203_v26 }
 0x181   : > { %v1220_v53 = vadd.f32 228235.22, %v1204_v43  ;;  %v1221_v33 = vadd.f32 228235.22, %v1205_v2  ;;  %v1222_v9 = vadd.f32 228235.22, %v1206_v15  ;;  %v1227_v62 = vmul.f32 %v6731_v12, %v1211_v38 }
 0x182   : > { %v1223_v0 = vadd.f32 228235.22, %v1207_v34  ;;  %v1224_v36 = vadd.f32 228235.22, %v1208_v30  ;;  %v1228_v44 = vmul.f32 %v6733_v8, %v1212_v29  ;;  %v1229_v37 = vmul.f32 %v6736_v56, %v1213_v11 }
 0x183   : > { %v1225_v48 = vadd.f32 228235.22, %v1209_v55  ;;  %v1230_v21 = vmul.f32 %v6741_v51, %v1214_v13  ;;  %v1231_v14 = vmul.f32 %v6749_v17, %v1215_v54  ;;  %v1232_v61 = vmul.f32 %v6755_v57, %v1216_v22 }
 0x184   : > { %v1226_v4 = vadd.f32 228235.22, %v1210_v58  ;;  %v1233_v20 = vmul.f32 %v6759_v28, %v1217_v39  ;;  %v1234_v26 = vmul.f32 %v6769_v18, %v1218_v63  ;;  %v1235_v43 = vmul.f32 %v6778_v7, %v1219_v52 }
 0x185   : > { %v1236_v2 = vmul.f32 %v6788_v6, %v1220_v53  ;;  %v1237_v15 = vmul.f32 %v6795_v16, %v1221_v33  ;;  %v1238_v34 = vmul.f32 %v6805_v31, %v1222_v9  ;;  %v1239_v38 = vmul.f32 %v6811_v59, %v1223_v0 }
 0x186   : > { %v1240_v30 = vmul.f32 %v6817_v10, %v1224_v36  ;;  %v1243_v29 = vadd.f32 24165.51, %v1227_v62  ;;  %v1244_v11 = vadd.f32 24165.51, %v1228_v44  ;;  %v1245_v13 = vadd.f32 24165.51, %v1229_v37 }
 0x187   : > { %v1241_v55 = vmul.f32 %v6824_v24, %v1225_v48  ;;  %v1246_v54 = vadd.f32 24165.51, %v1230_v21  ;;  %v1247_v22 = vadd.f32 24165.51, %v1231_v14  ;;  %v1248_v39 = vadd.f32 24165.51, %v1232_v61 }
 0x188   : > { %v1242_v58 = vmul.f32 %v6829_v1, %v1226_v4  ;;  %v1249_v63 = vadd.f32 24165.51, %v1233_v20  ;;  %v1250_v52 = vadd.f32 24165.51, %v1234_v26  ;;  %v1251_v53 = vadd.f32 24165.51, %v1235_v43 }
 0x189   : > { %v1252_v27 = vadd.f32 24165.51, %v1236_v2  ;;  %v1253_v0 = vadd.f32 24165.51, %v1237_v15  ;;  %v1254_v60 = vadd.f32 24165.51, %v1238_v34  ;;  %v1259_v44 = vmul.f32 %v6731_v12, %v1243_v29 }
 0x18a   : > { %v1255_v36 = vadd.f32 24165.51, %v1239_v38  ;;  %v1256_v62 = vadd.f32 24165.51, %v1240_v30  ;;  %v1260_v37 = vmul.f32 %v6733_v8, %v1244_v11  ;;  %v1257_v48 = vadd.f32 24165.51, %v1241_v55 }
 0x18b   : > { %v1261_v21 = vmul.f32 %v6736_v56, %v1245_v13  ;;  %v1262_v14 = vmul.f32 %v6741_v51, %v1246_v54  ;;  %v1263_v61 = vmul.f32 %v6749_v17, %v1247_v22  ;;  %v1258_v4 = vadd.f32 24165.51, %v1242_v58 }
 0x18c   : > { %v1264_v20 = vmul.f32 %v6755_v57, %v1248_v39  ;;  %v1265_v26 = vmul.f32 %v6759_v28, %v1249_v63  ;;  %v1266_v43 = vmul.f32 %v6769_v18, %v1250_v52  ;;  %v1267_v2 = vmul.f32 %v6778_v7, %v1251_v53 }
 0x18d   : > { %v1268_v15 = vmul.f32 %v6788_v6, %v1252_v27  ;;  %v1269_v34 = vmul.f32 %v6795_v16, %v1253_v0  ;;  %v1270_v38 = vmul.f32 %v6805_v31, %v1254_v60  ;;  %v1271_v30 = vmul.f32 %v6811_v59, %v1255_v36 }
 0x18e   : > { %v1272_v29 = vmul.f32 %v6817_v10, %v1256_v62  ;;  %v1275_v11 = vadd.f32 1599.0425, %v1259_v44  ;;  %v1276_v13 = vadd.f32 1599.0425, %v1260_v37  ;;  %v1273_v55 = vmul.f32 %v6824_v24, %v1257_v48 }
 0x18f   : > { %v1277_v54 = vadd.f32 1599.0425, %v1261_v21  ;;  %v1278_v22 = vadd.f32 1599.0425, %v1262_v14  ;;  %v1279_v39 = vadd.f32 1599.0425, %v1263_v61  ;;  %v1274_v58 = vmul.f32 %v6829_v1, %v1258_v4 }
 0x190   : > { %v1280_v63 = vadd.f32 1599.0425, %v1264_v20  ;;  %v1281_v52 = vadd.f32 1599.0425, %v1265_v26  ;;  %v1282_v27 = vadd.f32 1599.0425, %v1266_v43  ;;  %v1291_v14 = vmul.f32 %v6731_v12, %v1275_v11 }
 0x191   : > { %v1283_v60 = vadd.f32 1599.0425, %v1267_v2  ;;  %v1284_v9 = vadd.f32 1599.0425, %v1268_v15  ;;  %v1285_v36 = vadd.f32 1599.0425, %v1269_v34  ;;  %v1292_v61 = vmul.f32 %v6733_v8, %v1276_v13 }
 0x192   : > { %v1286_v44 = vadd.f32 1599.0425, %v1270_v38  ;;  %v1287_v37 = vadd.f32 1599.0425, %v1271_v30  ;;  %v1288_v48 = vadd.f32 1599.0425, %v1272_v29  ;;  %v1293_v4 = vmul.f32 %v6736_v56, %v1277_v54 }
 0x193   : > { %v1289_v21 = vadd.f32 1599.0425, %v1273_v55  ;;  %v1290_v20 = vadd.f32 1599.0425, %v1274_v58  ;;  %v1294_v26 = vmul.f32 %v6741_v51, %v1278_v22  ;;  %v1295_v43 = vmul.f32 %v6749_v17, %v1279_v39 }
 0x194   : > { %v1296_v2 = vmul.f32 %v6755_v57, %v1280_v63  ;;  %v1297_v15 = vmul.f32 %v6759_v28, %v1281_v52  ;;  %v1298_v34 = vmul.f32 %v6769_v18, %v1282_v27  ;;  %v1299_v38 = vmul.f32 %v6778_v7, %v1283_v60 }
 0x195   : > { %v1300_v30 = vmul.f32 %v6788_v6, %v1284_v9  ;;  %v1301_v29 = vmul.f32 %v6795_v16, %v1285_v36  ;;  %v1302_v11 = vmul.f32 %v6805_v31, %v1286_v44  ;;  %v1303_v13 = vmul.f32 %v6811_v59, %v1287_v37 }
 0x196   : > { %v1304_v55 = vmul.f32 %v6817_v10, %v1288_v48  ;;  %v1305_v54 = vmul.f32 %v6824_v24, %v1289_v21  ;;  %v1307_v22 = vadd.f32 60.458332, %v1291_v14  ;;  %v1308_v39 = vadd.f32 60.458332, %v1292_v61 }
 0x197   : > { %v1309_v58 = vadd.f32 60.458332, %v1293_v4  ;;  %v1306_v63 = vmul.f32 %v6829_v1, %v1290_v20  ;;  %v1310_v52 = vadd.f32 60.458332, %v1294_v26  ;;  %v1311_v27 = vadd.f32 60.458332, %v1295_v43 }
 0x198   : > { %v1312_v60 = vadd.f32 60.458332, %v1296_v2  ;;  %v1313_v36 = vadd.f32 60.458332, %v1297_v15  ;;  %v1314_v0 = vadd.f32 60.458332, %v1298_v34  ;;  %v1323_v2 = vmul.f32 %v6731_v12, %v1307_v22 }
 0x199   : > { %v1315_v44 = vadd.f32 60.458332, %v1299_v38  ;;  %v1316_v48 = vadd.f32 60.458332, %v1300_v30  ;;  %v1317_v40 = vadd.f32 60.458332, %v1301_v29  ;;  %v1324_v9 = vmul.f32 %v6733_v8, %v1308_v39 }
 0x19a   : > { %v1318_v21 = vadd.f32 60.458332, %v1302_v11  ;;  %v1319_v4 = vadd.f32 60.458332, %v1303_v13  ;;  %v1320_v20 = vadd.f32 60.458332, %v1304_v55  ;;  %v1325_v15 = vmul.f32 %v6736_v56, %v1309_v58 }
 0x19b   : > { %v1321_v26 = vadd.f32 60.458332, %v1305_v54  ;;  %v1322_v43 = vadd.f32 60.458332, %v1306_v63  ;;  %v1326_v34 = vmul.f32 %v6741_v51, %v1310_v52  ;;  %v1327_v38 = vmul.f32 %v6749_v17, %v1311_v27 }
 0x19c   : > { %v1328_v30 = vmul.f32 %v6755_v57, %v1312_v60  ;;  %v1329_v29 = vmul.f32 %v6759_v28, %v1313_v36  ;;  %v1330_v11 = vmul.f32 %v6769_v18, %v1314_v0  ;;  %v1331_v13 = vmul.f32 %v6778_v7, %v1315_v44 }
 0x19d   : > { %v1332_v55 = vmul.f32 %v6788_v6, %v1316_v48  ;;  %v1333_v54 = vmul.f32 %v6795_v16, %v1317_v40  ;;  %v1334_v22 = vmul.f32 %v6805_v31, %v1318_v21  ;;  %v1335_v39 = vmul.f32 %v6811_v59, %v1319_v4 }
 0x19e   : > { %v6962_v58 = vmul.f32 %v6817_v10, %v1320_v20  ;;  %v6965_v63 = vmul.f32 %v6824_v24, %v1321_v26  ;;  %v6968_v52 = vmul.f32 %v6829_v1, %v1322_v43  ;;  %v6970_v0 = vadd.f32 1.0, %v1323_v2 }
 0x19f   : > { %v6972_v27 = vadd.f32 1.0, %v1324_v9  ;;  %v6974_v60 = vadd.f32 1.0, %v1325_v15  ;;  %v6976_v40 = vadd.f32 1.0, %v1326_v34  ;;  %v6978_v36 = vadd.f32 1.0, %v1327_v38 }
 0x1a0   : > { %v6980_v44 = vadd.f32 1.0, %v1328_v30  ;;  %v6982_v48 = vadd.f32 1.0, %v1329_v29  ;;  %v6984_v21 = vadd.f32 1.0, %v1330_v11  ;;  %v6986_v4 = vadd.f32 1.0, %v1331_v13 }
 0x1a1   : > { %v6988_v20 = vadd.f32 1.0, %v1332_v55  ;;  %v6990_v26 = vadd.f32 1.0, %v1333_v54  ;;  %v6992_v9 = vadd.f32 1.0, %v1334_v22  ;;  %v6994_v43 = vadd.f32 1.0, %v1335_v39 }
 0x1a2   : > { %v1360_v2 = vmul.f32 40320.0, %v6755_v57  ;;  %v1371_v15 = vadd.f32 109584.0, %v6782_v5  ;;  %v1361_v34 = vmul.f32 40320.0, %v6759_v28  ;;  %v1362_v38 = vmul.f32 40320.0, %v6769_v18 }
 0x1a3   : > { %10943 = vst [vmem:[#allocation137_spill] sm:$0xff] %v6990_v26  ;;  %10944 = vst [vmem:[#allocation138_spill] sm:$0xff] %v6992_v9  ;;  %v1363_v30 = vmul.f32 40320.0, %v6778_v7  ;;  %v1372_v29 = vadd.f32 109584.0, %v6791_v41  ;;  %v1364_v11 = vmul.f32 40320.0, %v6788_v6 }
 0x1a4   : > { %10945 = vst [vmem:[#allocation139_spill] sm:$0xff] %v6994_v43  ;;  %v1365_v13 = vmul.f32 40320.0, %v6795_v16  ;;  %v1366_v55 = vmul.f32 40320.0, %v6805_v31  ;;  %v1373_v54 = vadd.f32 109584.0, %v6800_v49  ;;  %v1367_v22 = vmul.f32 40320.0, %v6811_v59 }
 0x1a5   : > { %v1368_v5 = vmul.f32 40320.0, %v6817_v10  ;;  %v1369_v39 = vmul.f32 40320.0, %v6824_v24  ;;  %v1374_v61 = vadd.f32 109584.0, %v6803_v47  ;;  %v1370_v37 = vmul.f32 40320.0, %v6829_v1 }
 0x1a6   : > { %v1375_v41 = vadd.f32 109584.0, %v6840_v25  ;;  %v1376_v14 = vadd.f32 109584.0, %v1360_v2  ;;  %v1387_v50 = vmul.f32 %v6731_v12, %v1371_v15  ;;  %v1377_v33 = vadd.f32 109584.0, %v1361_v34 }
 0x1a7   : > { %v1378_v46 = vadd.f32 109584.0, %v1362_v38  ;;  %v1379_v62 = vadd.f32 109584.0, %v1363_v30  ;;  %v1388_v49 = vmul.f32 %v6733_v8, %v1372_v29  ;;  %v1380_v45 = vadd.f32 109584.0, %v1364_v11 }
 0x1a8   : > { %v1381_v53 = vadd.f32 109584.0, %v1365_v13  ;;  %v1382_v23 = vadd.f32 109584.0, %v1366_v55  ;;  %v1389_v19 = vmul.f32 %v6736_v56, %v1373_v54  ;;  %v1383_v35 = vadd.f32 109584.0, %v1367_v22 }
 0x1a9   : > { %v1384_v43 = vadd.f32 109584.0, %v1368_v5  ;;  %v1385_v47 = vadd.f32 109584.0, %v1369_v39  ;;  %v1390_v9 = vmul.f32 %v6741_v51, %v1374_v61  ;;  %v1386_v26 = vadd.f32 109584.0, %v1370_v37 }
 0x1aa   : > { %v1391_v25 = vmul.f32 %v6749_v17, %v1375_v41  ;;  %v1392_v2 = vmul.f32 %v6755_v57, %v1376_v14  ;;  %v1403_v15 = vadd.f32 118124.0, %v1387_v50  ;;  %v1393_v34 = vmul.f32 %v6759_v28, %v1377_v33 }
 0x1ab   : > { %v1394_v38 = vmul.f32 %v6769_v18, %v1378_v46  ;;  %v1395_v30 = vmul.f32 %v6778_v7, %v1379_v62  ;;  %v1404_v29 = vadd.f32 118124.0, %v1388_v49  ;;  %v1396_v11 = vmul.f32 %v6788_v6, %v1380_v45 }
 0x1ac   : > { %v1397_v13 = vmul.f32 %v6795_v16, %v1381_v53  ;;  %v1398_v55 = vmul.f32 %v6805_v31, %v1382_v23  ;;  %v1405_v61 = vadd.f32 118124.0, %v1389_v19  ;;  %v1399_v37 = vmul.f32 %v6811_v59, %v1383_v35 }
 0x1ad   : > { %v1400_v54 = vmul.f32 %v6817_v10, %v1384_v43  ;;  %v1401_v50 = vmul.f32 %v6824_v24, %v1385_v47  ;;  %v1406_v14 = vadd.f32 118124.0, %v1390_v9  ;;  %v1402_v33 = vmul.f32 %v6829_v1, %v1386_v26 }
 0x1ae   : > { %v1407_v46 = vadd.f32 118124.0, %v1391_v25  ;;  %v1408_v22 = vadd.f32 118124.0, %v1392_v2  ;;  %v1419_v62 = vmul.f32 %v6731_v12, %v1403_v15  ;;  %v1409_v5 = vadd.f32 118124.0, %v1393_v34 }
 0x1af   : > { %v1410_v45 = vadd.f32 118124.0, %v1394_v38  ;;  %v1411_v39 = vadd.f32 118124.0, %v1395_v30  ;;  %v1420_v53 = vmul.f32 %v6733_v8, %v1404_v29  ;;  %v1412_v23 = vadd.f32 118124.0, %v1396_v11 }
 0x1b0   : > { %v1413_v19 = vadd.f32 118124.0, %v1397_v13  ;;  %v1414_v41 = vadd.f32 118124.0, %v1398_v55  ;;  %v1421_v35 = vmul.f32 %v6736_v56, %v1405_v61  ;;  %v1415_v43 = vadd.f32 118124.0, %v1399_v37 }
 0x1b1   : > { %v1416_v49 = vadd.f32 118124.0, %v1400_v54  ;;  %v1417_v47 = vadd.f32 118124.0, %v1401_v50  ;;  %v1422_v9 = vmul.f32 %v6741_v51, %v1406_v14  ;;  %v1418_v26 = vadd.f32 118124.0, %v1402_v33 }
 0x1b2   : > { %v1423_v25 = vmul.f32 %v6749_v17, %v1407_v46  ;;  %v1424_v2 = vmul.f32 %v6755_v57, %v1408_v22  ;;  %v1435_v15 = vadd.f32 67284.0, %v1419_v62  ;;  %v1425_v34 = vmul.f32 %v6759_v28, %v1409_v5 }
 0x1b3   : > { %v1426_v38 = vmul.f32 %v6769_v18, %v1410_v45  ;;  %v1427_v30 = vmul.f32 %v6778_v7, %v1411_v39  ;;  %v1436_v29 = vadd.f32 67284.0, %v1420_v53  ;;  %v1428_v11 = vmul.f32 %v6788_v6, %v1412_v23 }
 0x1b4   : > { %v1429_v13 = vmul.f32 %v6795_v16, %v1413_v19  ;;  %v1430_v55 = vmul.f32 %v6805_v31, %v1414_v41  ;;  %v1437_v61 = vadd.f32 67284.0, %v1421_v35  ;;  %v1431_v37 = vmul.f32 %v6811_v59, %v1415_v43 }
 0x1b5   : > { %v1432_v54 = vmul.f32 %v6817_v10, %v1416_v49  ;;  %v1433_v50 = vmul.f32 %v6824_v24, %v1417_v47  ;;  %v1438_v14 = vadd.f32 67284.0, %v1422_v9  ;;  %v1434_v33 = vmul.f32 %v6829_v1, %v1418_v26 }
 0x1b6   : > { %v1439_v46 = vadd.f32 67284.0, %v1423_v25  ;;  %v1440_v22 = vadd.f32 67284.0, %v1424_v2  ;;  %v1451_v62 = vmul.f32 %v6731_v12, %v1435_v15  ;;  %v1441_v5 = vadd.f32 67284.0, %v1425_v34 }
 0x1b7   : > { %v1442_v45 = vadd.f32 67284.0, %v1426_v38  ;;  %v1443_v39 = vadd.f32 67284.0, %v1427_v30  ;;  %v1452_v53 = vmul.f32 %v6733_v8, %v1436_v29  ;;  %v1444_v23 = vadd.f32 67284.0, %v1428_v11 }
 0x1b8   : > { %v1445_v19 = vadd.f32 67284.0, %v1429_v13  ;;  %v1446_v41 = vadd.f32 67284.0, %v1430_v55  ;;  %v1453_v35 = vmul.f32 %v6736_v56, %v1437_v61  ;;  %v1447_v43 = vadd.f32 67284.0, %v1431_v37 }
 0x1b9   : > { %v1448_v49 = vadd.f32 67284.0, %v1432_v54  ;;  %v1449_v47 = vadd.f32 67284.0, %v1433_v50  ;;  %v1454_v9 = vmul.f32 %v6741_v51, %v1438_v14  ;;  %v1450_v26 = vadd.f32 67284.0, %v1434_v33 }
 0x1ba   : > { %v1455_v25 = vmul.f32 %v6749_v17, %v1439_v46  ;;  %v1456_v2 = vmul.f32 %v6755_v57, %v1440_v22  ;;  %v1467_v15 = vadd.f32 22449.0, %v1451_v62  ;;  %v1457_v34 = vmul.f32 %v6759_v28, %v1441_v5 }
 0x1bb   : > { %v1458_v38 = vmul.f32 %v6769_v18, %v1442_v45  ;;  %v1459_v30 = vmul.f32 %v6778_v7, %v1443_v39  ;;  %v1468_v29 = vadd.f32 22449.0, %v1452_v53  ;;  %v1460_v11 = vmul.f32 %v6788_v6, %v1444_v23 }
 0x1bc   : > { %v1461_v13 = vmul.f32 %v6795_v16, %v1445_v19  ;;  %v1462_v55 = vmul.f32 %v6805_v31, %v1446_v41  ;;  %v1469_v61 = vadd.f32 22449.0, %v1453_v35  ;;  %v1463_v37 = vmul.f32 %v6811_v59, %v1447_v43 }
 0x1bd   : > { %v1464_v54 = vmul.f32 %v6817_v10, %v1448_v49  ;;  %v1465_v50 = vmul.f32 %v6824_v24, %v1449_v47  ;;  %v1470_v14 = vadd.f32 22449.0, %v1454_v9  ;;  %v1466_v33 = vmul.f32 %v6829_v1, %v1450_v26 }
 0x1be   : > { %v1471_v46 = vadd.f32 22449.0, %v1455_v25  ;;  %v1472_v22 = vadd.f32 22449.0, %v1456_v2  ;;  %v1483_v62 = vmul.f32 %v6731_v12, %v1467_v15  ;;  %v1473_v5 = vadd.f32 22449.0, %v1457_v34 }
 0x1bf   : > { %v1474_v45 = vadd.f32 22449.0, %v1458_v38  ;;  %v1475_v39 = vadd.f32 22449.0, %v1459_v30  ;;  %v1484_v53 = vmul.f32 %v6733_v8, %v1468_v29  ;;  %v1476_v23 = vadd.f32 22449.0, %v1460_v11 }
 0x1c0   : > { %v1477_v19 = vadd.f32 22449.0, %v1461_v13  ;;  %v1478_v41 = vadd.f32 22449.0, %v1462_v55  ;;  %v1485_v35 = vmul.f32 %v6736_v56, %v1469_v61  ;;  %v1479_v43 = vadd.f32 22449.0, %v1463_v37 }
 0x1c1   : > { %v1480_v49 = vadd.f32 22449.0, %v1464_v54  ;;  %v1481_v47 = vadd.f32 22449.0, %v1465_v50  ;;  %v1486_v9 = vmul.f32 %v6741_v51, %v1470_v14  ;;  %v1482_v26 = vadd.f32 22449.0, %v1466_v33 }
 0x1c2   : > { %v1487_v25 = vmul.f32 %v6749_v17, %v1471_v46  ;;  %v1488_v2 = vmul.f32 %v6755_v57, %v1472_v22  ;;  %v1499_v15 = vadd.f32 4536.0, %v1483_v62  ;;  %v1489_v34 = vmul.f32 %v6759_v28, %v1473_v5 }
 0x1c3   : > { %v1490_v38 = vmul.f32 %v6769_v18, %v1474_v45  ;;  %v1491_v30 = vmul.f32 %v6778_v7, %v1475_v39  ;;  %v1500_v29 = vadd.f32 4536.0, %v1484_v53  ;;  %v1492_v11 = vmul.f32 %v6788_v6, %v1476_v23 }
 0x1c4   : > { %v1493_v13 = vmul.f32 %v6795_v16, %v1477_v19  ;;  %v1494_v55 = vmul.f32 %v6805_v31, %v1478_v41  ;;  %v1501_v61 = vadd.f32 4536.0, %v1485_v35  ;;  %v1495_v37 = vmul.f32 %v6811_v59, %v1479_v43 }
 0x1c5   : > { %v1496_v54 = vmul.f32 %v6817_v10, %v1480_v49  ;;  %v1497_v50 = vmul.f32 %v6824_v24, %v1481_v47  ;;  %v1502_v14 = vadd.f32 4536.0, %v1486_v9  ;;  %v1498_v33 = vmul.f32 %v6829_v1, %v1482_v26 }
 0x1c6   : > { %v1503_v46 = vadd.f32 4536.0, %v1487_v25  ;;  %v1504_v22 = vadd.f32 4536.0, %v1488_v2  ;;  %v1515_v62 = vmul.f32 %v6731_v12, %v1499_v15  ;;  %v1505_v5 = vadd.f32 4536.0, %v1489_v34 }
 0x1c7   : > { %v1506_v45 = vadd.f32 4536.0, %v1490_v38  ;;  %v1507_v39 = vadd.f32 4536.0, %v1491_v30  ;;  %v1516_v53 = vmul.f32 %v6733_v8, %v1500_v29  ;;  %v1508_v23 = vadd.f32 4536.0, %v1492_v11 }
 0x1c8   : > { %v1509_v19 = vadd.f32 4536.0, %v1493_v13  ;;  %v1510_v41 = vadd.f32 4536.0, %v1494_v55  ;;  %v1517_v35 = vmul.f32 %v6736_v56, %v1501_v61  ;;  %v1511_v43 = vadd.f32 4536.0, %v1495_v37 }
 0x1c9   : > { %v1512_v49 = vadd.f32 4536.0, %v1496_v54  ;;  %v1513_v47 = vadd.f32 4536.0, %v1497_v50  ;;  %v1518_v9 = vmul.f32 %v6741_v51, %v1502_v14  ;;  %v1514_v26 = vadd.f32 4536.0, %v1498_v33 }
 0x1ca   : > { %v1519_v25 = vmul.f32 %v6749_v17, %v1503_v46  ;;  %v1520_v2 = vmul.f32 %v6755_v57, %v1504_v22  ;;  %v1531_v15 = vadd.f32 546.0, %v1515_v62  ;;  %v1521_v34 = vmul.f32 %v6759_v28, %v1505_v5 }
 0x1cb   : > { %v1522_v38 = vmul.f32 %v6769_v18, %v1506_v45  ;;  %v1523_v30 = vmul.f32 %v6778_v7, %v1507_v39  ;;  %v1532_v29 = vadd.f32 546.0, %v1516_v53  ;;  %v1524_v11 = vmul.f32 %v6788_v6, %v1508_v23 }
 0x1cc   : > { %v1525_v13 = vmul.f32 %v6795_v16, %v1509_v19  ;;  %v1526_v55 = vmul.f32 %v6805_v31, %v1510_v41  ;;  %v1533_v61 = vadd.f32 546.0, %v1517_v35  ;;  %v1527_v37 = vmul.f32 %v6811_v59, %v1511_v43 }
 0x1cd   : > { %v1528_v54 = vmul.f32 %v6817_v10, %v1512_v49  ;;  %v1529_v50 = vmul.f32 %v6824_v24, %v1513_v47  ;;  %v1534_v14 = vadd.f32 546.0, %v1518_v9  ;;  %v1530_v33 = vmul.f32 %v6829_v1, %v1514_v26 }
 0x1ce   : > { %v1535_v46 = vadd.f32 546.0, %v1519_v25  ;;  %v1536_v22 = vadd.f32 546.0, %v1520_v2  ;;  %v1547_v62 = vmul.f32 %v6731_v12, %v1531_v15  ;;  %v1537_v5 = vadd.f32 546.0, %v1521_v34 }
 0x1cf   : > { %v1538_v45 = vadd.f32 546.0, %v1522_v38  ;;  %v1539_v39 = vadd.f32 546.0, %v1523_v30  ;;  %v1548_v53 = vmul.f32 %v6733_v8, %v1532_v29  ;;  %v1540_v23 = vadd.f32 546.0, %v1524_v11 }
 0x1d0   : > { %v1541_v19 = vadd.f32 546.0, %v1525_v13  ;;  %v1542_v41 = vadd.f32 546.0, %v1526_v55  ;;  %v1549_v35 = vmul.f32 %v6736_v56, %v1533_v61  ;;  %v1543_v43 = vadd.f32 546.0, %v1527_v37 }
 0x1d1   : > { %v1544_v49 = vadd.f32 546.0, %v1528_v54  ;;  %v1545_v47 = vadd.f32 546.0, %v1529_v50  ;;  %v1550_v9 = vmul.f32 %v6741_v51, %v1534_v14  ;;  %v1546_v26 = vadd.f32 546.0, %v1530_v33 }
 0x1d2   : > { %v1551_v25 = vmul.f32 %v6749_v17, %v1535_v46  ;;  %v1552_v2 = vmul.f32 %v6755_v57, %v1536_v22  ;;  %v1563_v15 = vadd.f32 36.0, %v1547_v62  ;;  %v1553_v34 = vmul.f32 %v6759_v28, %v1537_v5 }
 0x1d3   : > { %v1554_v38 = vmul.f32 %v6769_v18, %v1538_v45  ;;  %v1555_v30 = vmul.f32 %v6778_v7, %v1539_v39  ;;  %v1564_v29 = vadd.f32 36.0, %v1548_v53  ;;  %vm1611_vm0 = vcmp.gt.f32.partialorder %v10883_v42, 1.0 }
 0x1d4   : > { %v1556_v11 = vmul.f32 %v6788_v6, %v1540_v23  ;;  %v1557_v13 = vmul.f32 %v6795_v16, %v1541_v19  ;;  %v1558_v55 = vmul.f32 %v6805_v31, %v1542_v41  ;;  %v1565_v61 = vadd.f32 36.0, %v1549_v35 }
 0x1d5   : > { %v1559_v37 = vmul.f32 %v6811_v59, %v1543_v43  ;;  %v1560_v54 = vmul.f32 %v6817_v10, %v1544_v49  ;;  %v1561_v50 = vmul.f32 %v6824_v24, %v1545_v47  ;;  %v1566_v14 = vadd.f32 36.0, %v1550_v9 }
 0x1d6   : > { %v1562_v33 = vmul.f32 %v6829_v1, %v1546_v26  ;;  %v1567_v46 = vadd.f32 36.0, %v1551_v25  ;;  %v1568_v22 = vadd.f32 36.0, %v1552_v2  ;;  %v1579_v62 = vmul.f32 %v6731_v12, %v1563_v15 }
 0x1d7   : > { %v1569_v5 = vadd.f32 36.0, %v1553_v34  ;;  %v1570_v45 = vadd.f32 36.0, %v1554_v38  ;;  %v1571_v39 = vadd.f32 36.0, %v1555_v30  ;;  %v1580_v53 = vmul.f32 %v6733_v8, %v1564_v29 }
 0x1d8   : > { %v1572_v23 = vadd.f32 36.0, %v1556_v11  ;;  %v1573_v19 = vadd.f32 36.0, %v1557_v13  ;;  %v1574_v41 = vadd.f32 36.0, %v1558_v55  ;;  %v1581_v35 = vmul.f32 %v6736_v56, %v1565_v61  ;;  %v10946_v11 = vld [vmem:[#allocation47_spill] sm:$0xff]  ;;  %v10948_v55 = vld [vmem:[#allocation50_spill] sm:$0xff] }
 0x1d9   : > { %v1575_v43 = vadd.f32 36.0, %v1559_v37  ;;  %v1576_v49 = vadd.f32 36.0, %v1560_v54  ;;  %v1577_v47 = vadd.f32 36.0, %v1561_v50  ;;  %v1582_v9 = vmul.f32 %v6741_v51, %v1566_v14  ;;  %v10951_v54 = vld [vmem:[#allocation43_spill] sm:$0xff] }
 0x1da   : > { %v1578_v26 = vadd.f32 36.0, %v1562_v33  ;;  %v1583_v25 = vmul.f32 %v6749_v17, %v1567_v46  ;;  %v1584_v12 = vmul.f32 %v6755_v57, %v1568_v22  ;;  %v1595_v2 = vadd.f32 1.0, %v1579_v62  ;;  %v10952_v33 = vld [vmem:[#allocation53_spill] sm:$0xff]  ;;  %v10954_v62 = vld [vmem:[#allocation54_spill] sm:$0xff] }
 0x1db   : > { %v1585_v15 = vmul.f32 %v6759_v28, %v1569_v5  ;;  %v1586_v8 = vmul.f32 %v6769_v18, %v1570_v45  ;;  %v1587_v34 = vmul.f32 %v6778_v7, %v1571_v39  ;;  %v1596_v38 = vadd.f32 1.0, %v1580_v53  ;;  %v10947_v7 = vld [vmem:[#allocation37_spill] sm:$0xff]  ;;  %v10956_v39 = vld [vmem:[#allocation55_spill] sm:$0xff]  ;;  %v10957_v53 = vld [vmem:[#allocation110_spill] sm:$0xff] }
 0x1dc   : > { %v1588_v56 = vmul.f32 %v6788_v6, %v1572_v23  ;;  %v1589_v30 = vmul.f32 %v6795_v16, %v1573_v19  ;;  %v1597_v29 = vadd.f32 1.0, %v1581_v35  ;;  %vm1612_vm1 = vcmp.gt.f32.partialorder %v10884_v32, 1.0  ;;  %v10955_v5 = vld [vmem:[#allocation109_spill] sm:$0xff]  ;;  %v10959_v35 = vld [vmem:[#allocation111_spill] sm:$0xff] }
 0x1dd   : > { %v1590_v51 = vmul.f32 %v6805_v31, %v1574_v41  ;;  %v1591_v17 = vmul.f32 %v6811_v59, %v1575_v43  ;;  %v1598_v57 = vadd.f32 1.0, %v1582_v9  ;;  %vm1613_vm2 = vcmp.gt.f32.partialorder %v10886_v3, 1.0  ;;  %v10949_v31 = vld [vmem:[#allocation40_spill] sm:$0xff]  ;;  %v10958_v41 = vld [vmem:[#allocation57_spill] sm:$0xff] }
 0x1de   : > { %v1592_v28 = vmul.f32 %v6817_v10, %v1576_v49  ;;  %v1599_v18 = vadd.f32 1.0, %v1583_v25  ;;  %vm1614_vm3 = vcmp.gt.f32.partialorder %v10946_v11, 1.0  ;;  %v1643_v6 = vsel %vm1611_vm0, %v1595_v2, %v10947_v7  ;;  %v10950_v10 = vld [vmem:[#allocation51_spill] sm:$0xff]  ;;  %v10961_v9 = vld [vmem:[#allocation112_spill] sm:$0xff]  ;;  %v10963_v2 = vld [vmem:[#allocation113_spill] sm:$0xff] }
 0x1df   : > { %v1593_v16 = vmul.f32 %v6824_v24, %v1577_v47  ;;  %v1600_v13 = vadd.f32 1.0, %v1584_v12  ;;  %vm1615_vm4 = vcmp.gt.f32.partialorder %v10948_v55, 1.0  ;;  %v1644_v59 = vsel %vm1612_vm1, %v1596_v38, %v10949_v31  ;;  %v10953_v24 = vld [vmem:[#allocation108_spill] sm:$0xff]  ;;  %v10960_v47 = vld [vmem:[#allocation58_spill] sm:$0xff] }
 0x1e0   : > { %v1594_v61 = vmul.f32 %v6829_v1, %v1578_v26  ;;  %v1601_v37 = vadd.f32 1.0, %v1585_v15  ;;  %vm1616_vm5 = vcmp.gt.f32.partialorder %v10950_v10, 1.0  ;;  %v1645_v50 = vsel %vm1613_vm2, %v1597_v29, %v10951_v54  ;;  %v10962_v12 = vld [vmem:[#allocation60_spill] sm:$0xff]  ;;  %v10965_v38 = vld [vmem:[#allocation114_spill] sm:$0xff]  ;;  %v10966_v29 = vld [vmem:[#allocation63_spill] sm:$0xff] }
 0x1e1   : > { %v1602_v14 = vadd.f32 1.0, %v1586_v8  ;;  %vm1617_vm6 = vcmp.gt.f32.partialorder %v10952_v33, 1.0  ;;  %v1646_v46 = vsel %vm1614_vm3, %v1598_v57, %v10953_v24  ;;  %5100 = vrcp.f32 %v1643_v6  ;;  %v10969_v7 = vld [vmem:[#allocation116_spill] sm:$0xff] }
 0x1e2   : > { %v1603_v22 = vadd.f32 1.0, %v1587_v34  ;;  %vm1618_vm7 = vcmp.gt.f32.partialorder %v10954_v62, 1.0  ;;  %v1647_v1 = vsel %vm1615_vm4, %v1599_v18, %v10955_v5  ;;  %5102 = vrcp.f32 %v1644_v59  ;;  %v10964_v34 = vld [vmem:[#allocation61_spill] sm:$0xff]  ;;  %v10968_v18 = vld [vmem:[#allocation64_spill] sm:$0xff]  ;;  %v10975_v5 = vld [vmem:[#allocation119_spill] sm:$0xff] }
 0x1e3   : > { %v1604_v45 = vadd.f32 1.0, %v1588_v56  ;;  %vm1619_vm8 = vcmp.gt.f32.partialorder %v10956_v39, 1.0  ;;  %v1648_v23 = vsel %vm1616_vm5, %v1600_v13, %v10957_v53  ;;  %5104 = vrcp.f32 %v1645_v50  ;;  %v10970_v13 = vld [vmem:[#allocation66_spill] sm:$0xff]  ;;  %v10978_v53 = vld [vmem:[#allocation120_spill] sm:$0xff]  ;;  %v10987_v62 = vld [vmem:[#allocation81_spill] sm:$0xff] }
 0x1e4   : > { %v1605_v19 = vadd.f32 1.0, %v1589_v30  ;;  %vm1620_vm9 = vcmp.gt.f32.partialorder %v10958_v41, 1.0  ;;  %v1649_v43 = vsel %vm1617_vm6, %v1601_v37, %v10959_v35  ;;  %5106 = vrcp.f32 %v1646_v46  ;;  %v10973_v50 = vld [vmem:[#allocation118_spill] sm:$0xff]  ;;  %v10974_v46 = vld [vmem:[#allocation76_spill] sm:$0xff] }
 0x1e5   : > { %v1606_v49 = vadd.f32 1.0, %v1590_v51  ;;  %vm1621_vm10 = vcmp.gt.f32.partialorder %v10960_v47, 1.0  ;;  %v1650_v26 = vsel %vm1618_vm7, %v1602_v14, %v10961_v9  ;;  %5108 = vrcp.f32 %v1647_v1  ;;  %v10967_v51 = vld [vmem:[#allocation115_spill] sm:$0xff]  ;;  %v10980_v35 = vld [vmem:[#allocation78_spill] sm:$0xff]  ;;  %v10984_v10 = vld [vmem:[#allocation80_spill] sm:$0xff] }
 0x1e6   : > { %v1607_v25 = vadd.f32 1.0, %v1591_v17  ;;  %vm1622_vm11 = vcmp.gt.f32.partialorder %v10962_v12, 1.0  ;;  %v1651_v15 = vsel %vm1619_vm8, %v1603_v22, %v10963_v2  ;;  %5110 = vrcp.f32 %v1648_v23  ;;  %v10979_v23 = vld [vmem:[#allocation84_spill] sm:$0xff]  ;;  %v10985_v2 = vld [vmem:[#allocation87_spill] sm:$0xff] }
 0x1e7   : > { %v1608_v8 = vadd.f32 1.0, %v1592_v28  ;;  %vm1623_vm12 = vcmp.gt.f32.partialorder %v10964_v34, 1.0  ;;  %v1652_v56 = vsel %vm1620_vm9, %v1604_v45, %v10965_v38  ;;  %5112 = vrcp.f32 %v1649_v43  ;;  %v10977_v45 = vld [vmem:[#allocation77_spill] sm:$0xff]  ;;  %v10989_v39 = vld [vmem:[#allocation88_spill] sm:$0xff]  ;;  %v10993_v12 = vld [vmem:[#allocation107_spill] sm:$0xff] }
 0x1e8   : > { %v1609_v30 = vadd.f32 1.0, %v1593_v16  ;;  %vm1624_vm13 = vcmp.gt.f32.partialorder %v10966_v29, 1.0  ;;  %v1653_v17 = vsel %vm1621_vm10, %v1605_v19, %v10967_v51  ;;  %5114 = vrcp.f32 %v1650_v26  ;;  %v10971_v16 = vld [vmem:[#allocation117_spill] sm:$0xff]  ;;  %v10983_v26 = vld [vmem:[#allocation86_spill] sm:$0xff] }
 0x1e9   : > { %v1610_v57 = vadd.f32 1.0, %v1594_v61  ;;  %vm1625_vm14 = vcmp.gt.f32.partialorder %v10968_v18, 1.0  ;;  %v1654_v28 = vsel %vm1622_vm11, %v1606_v49, %v10969_v7  ;;  %5116 = vrcp.f32 %v1651_v15  ;;  %v10972_v61 = vld [vmem:[#allocation82_spill] sm:$0xff]  ;;  %v10982_v49 = vld [vmem:[#allocation79_spill] sm:$0xff]  ;;  %v10986_v15 = vld [vmem:[#allocation137_spill] sm:$0xff] }
 0x1ea   : > { %v1352_v6 = vadd.f32 1.0, %v6962_v58  ;;  %vm1626_vm15 = vcmp.gt.f32.partialorder %v10970_v13, 1.0  ;;  %v1655_v31 = vsel %vm1623_vm12, %v1607_v25, %v10971_v16  ;;  %5118 = vrcp.f32 %v1652_v56  ;;  %v10994_v34 = vld [vmem:[#allocation121_spill] sm:$0xff]  ;;  %v10996_v29 = vld [vmem:[#allocation122_spill] sm:$0xff]  ;;  %v10998_v18 = vld [vmem:[#allocation123_spill] sm:$0xff] }
 0x1eb   : > { %v5101_v59 = vpop.eup %5100  ;;  %v1353_v37 = vadd.f32 1.0, %v6965_v63  ;;  %v1627_v54 = vsel %vm1611_vm0, %v6970_v0, %v10972_v61  ;;  %v1656_v14 = vsel %vm1624_vm13, %v1608_v8, %v10973_v50  ;;  %5120 = vrcp.f32 %v1653_v17  ;;  %v10976_v0 = vld [vmem:[#allocation83_spill] sm:$0xff]  ;;  %v10988_v8 = vld [vmem:[#allocation138_spill] sm:$0xff] }
 0x1ec   : > { %v5103_v58 = vpop.eup %5102  ;;  %v1354_v24 = vadd.f32 1.0, %v6968_v52  ;;  %v1628_v22 = vsel %vm1612_vm1, %v6972_v27, %v10974_v46  ;;  %v1657_v63 = vsel %vm1625_vm14, %v1609_v30, %v10975_v5  ;;  %5122 = vrcp.f32 %v1654_v28  ;;  %v10991_v30 = vld [vmem:[#allocation89_spill] sm:$0xff]  ;;  %v10992_v17 = vld [vmem:[#allocation106_spill] sm:$0xff] }
 0x1ed   : > { %v5105_v42 = vpop.eup %5104  ;;  %v1629_v1 = vsel %vm1613_vm2, %v6974_v60, %v10976_v0  ;;  %v1630_v52 = vsel %vm1614_vm3, %v6976_v40, %v10977_v45  ;;  %v1658_v32 = vsel %vm1626_vm15, %v1610_v57, %v10978_v53  ;;  %5124 = vrcp.f32 %v1655_v31  ;;  %v10981_v40 = vld [vmem:[#allocation85_spill] sm:$0xff]  ;;  %v11004_v5 = vld [vmem:[#allocation126_spill] sm:$0xff] }
 0x1ee   : > { %v5107_v27 = vpop.eup %5106  ;;  %v1631_v19 = vsel %vm1615_vm4, %v6978_v36, %v10979_v23  ;;  %v1632_v3 = vsel %vm1616_vm5, %v6980_v44, %v10980_v35  ;;  %v1660_v60 = vmul.f32 %v5101_v59, %v1627_v54  ;;  %5126 = vrcp.f32 %v1656_v14  ;;  %v11000_v14 = vld [vmem:[#allocation124_spill] sm:$0xff]  ;;  %v11012_v35 = vld [vmem:[#allocation130_spill] sm:$0xff] }
 0x1ef   : > { %v5109_v11 = vpop.eup %5108  ;;  %v1633_v43 = vsel %vm1617_vm6, %v6982_v48, %v10981_v40  ;;  %v1634_v9 = vsel %vm1618_vm7, %v6984_v21, %v10982_v49  ;;  %v1662_v55 = vmul.f32 %v5103_v58, %v1628_v22  ;;  %5128 = vrcp.f32 %v1657_v63  ;;  %v11002_v58 = vld [vmem:[#allocation125_spill] sm:$0xff]  ;;  %v11016_v49 = vld [vmem:[#allocation132_spill] sm:$0xff] }
 0x1f0   : > { %v5111_v36 = vpop.eup %5110  ;;  %v1635_v44 = vsel %vm1619_vm8, %v6986_v4, %v10983_v26  ;;  %v1636_v25 = vsel %vm1620_vm9, %v6988_v20, %v10984_v10  ;;  %v1664_v33 = vmul.f32 %v5105_v42, %v1629_v1  ;;  %5130 = vrcp.f32 %v1658_v32  ;;  %v10990_v4 = vld [vmem:[#allocation139_spill] sm:$0xff]  ;;  %v11010_v32 = vld [vmem:[#allocation129_spill] sm:$0xff]  ;;  %v11020_v10 = vld [vmem:[#allocation134_spill] sm:$0xff] }
 0x1f1   : > { %v5113_v48 = vpop.eup %5112  ;;  %v1637_v21 = vsel %vm1621_vm10, %v10986_v15, %v10985_v2  ;;  %v1638_v38 = vsel %vm1622_vm11, %v10988_v8, %v10987_v62  ;;  %v1639_v56 = vsel %vm1623_vm12, %v10990_v4, %v10989_v39  ;;  %v1666_v41 = vmul.f32 %v5107_v27, %v1630_v52  ;;  %v11006_v42 = vld [vmem:[#allocation127_spill] sm:$0xff]  ;;  %v11008_v52 = vld [vmem:[#allocation128_spill] sm:$0xff] }
 0x1f2   : > { %v5115_v20 = vpop.eup %5114  ;;  %v1640_v51 = vsel %vm1624_vm13, %v1352_v6, %v10991_v30  ;;  %v1641_v47 = vsel %vm1625_vm14, %v1353_v37, %v10992_v17  ;;  %v1668_v57 = vmul.f32 %v5109_v11, %v1631_v19  ;;  %5132 = vlog2.f32 %v1660_v60  ;;  %v11014_v60 = vld [vmem:[#allocation131_spill] sm:$0xff]  ;;  %v11024_v15 = vld [vmem:[#allocation136_spill] sm:$0xff] }
 0x1f3   : > { %v5117_v7 = vpop.eup %5116  ;;  %v1642_v28 = vsel %vm1626_vm15, %v1354_v24, %v10993_v12  ;;  %v1670_v16 = vmul.f32 %v5111_v36, %v1632_v3  ;;  %5134 = vlog2.f32 %v1662_v55  ;;  %v7253_v31 = vadd.f32 7.5, %v10994_v34  ;;  %v11018_v55 = vld [vmem:[#allocation133_spill] sm:$0xff] }
 0x1f4   : > { %v5119_v59 = vpop.eup %5118  ;;  %v1672_v61 = vmul.f32 %v5113_v48, %v1633_v43  ;;  %5136 = vlog2.f32 %v1664_v33  ;;  %v7256_v6 = vadd.f32 7.5, %v10996_v29  ;;  %v7259_v37 = vadd.f32 7.5, %v10998_v18  ;;  %v11022_v33 = vld [vmem:[#allocation135_spill] sm:$0xff] }
 0x1f5   : > { %10995 = vst [vmem:[#allocation47_spill] sm:$0xff] %v7253_v31  ;;  %v5121_v54 = vpop.eup %5120  ;;  %v1674_v50 = vmul.f32 %v5115_v20, %v1634_v9  ;;  %5138 = vlog2.f32 %v1666_v41  ;;  %v7262_v13 = vadd.f32 7.5, %v11000_v14  ;;  %v7265_v24 = vadd.f32 7.5, %v11002_v58 }
 0x1f6   : > { %10997 = vst [vmem:[#allocation37_spill] sm:$0xff] %v7256_v6  ;;  %10999 = vst [vmem:[#allocation50_spill] sm:$0xff] %v7259_v37  ;;  %v5123_v46 = vpop.eup %5122  ;;  %v1676_v22 = vmul.f32 %v5117_v7, %v1635_v44  ;;  %5140 = vlog2.f32 %v1668_v57  ;;  %v7268_v63 = vadd.f32 7.5, %v11004_v5  ;;  %v7271_v0 = vadd.f32 7.5, %v11006_v42 }
 0x1f7   : > { %11001 = vst [vmem:[#allocation40_spill] sm:$0xff] %v7262_v13  ;;  %11003 = vst [vmem:[#allocation51_spill] sm:$0xff] %v7265_v24  ;;  %v5125_v1 = vpop.eup %5124  ;;  %v1678_v45 = vmul.f32 %v5119_v59, %v1636_v25  ;;  %5142 = vlog2.f32 %v1670_v16  ;;  %v7274_v53 = vadd.f32 7.5, %v11008_v52  ;;  %v7277_v27 = vadd.f32 7.5, %v11010_v32 }
 0x1f8   : > { %11005 = vst [vmem:[#allocation43_spill] sm:$0xff] %v7268_v63  ;;  %11007 = vst [vmem:[#allocation53_spill] sm:$0xff] %v7271_v0  ;;  %v5127_v23 = vpop.eup %5126  ;;  %v1680_v19 = vmul.f32 %v5121_v54, %v1637_v21  ;;  %5144 = vlog2.f32 %v1672_v61  ;;  %v7280_v3 = vadd.f32 7.5, %v11012_v35  ;;  %v7283_v11 = vadd.f32 7.5, %v11014_v60 }
 0x1f9   : > { %11009 = vst [vmem:[#allocation108_spill] sm:$0xff] %v7274_v53  ;;  %11011 = vst [vmem:[#allocation54_spill] sm:$0xff] %v7277_v27  ;;  %v5129_v40 = vpop.eup %5128  ;;  %v1682_v43 = vmul.f32 %v5123_v46, %v1638_v38  ;;  %5146 = vlog2.f32 %v1674_v50  ;;  %v7286_v9 = vadd.f32 7.5, %v11016_v49  ;;  %v7289_v36 = vadd.f32 7.5, %v11018_v55 }
 0x1fa   : > { %11013 = vst [vmem:[#allocation109_spill] sm:$0xff] %v7280_v3  ;;  %11015 = vst [vmem:[#allocation55_spill] sm:$0xff] %v7283_v11  ;;  %v5131_v26 = vpop.eup %5130  ;;  %v1684_v44 = vmul.f32 %v5125_v1, %v1639_v56  ;;  %5148 = vlog2.f32 %v1676_v22  ;;  %v7292_v25 = vadd.f32 7.5, %v11020_v10  ;;  %v7295_v48 = vadd.f32 7.5, %v11022_v33 }
 0x1fb   : > { %11017 = vst [vmem:[#allocation110_spill] sm:$0xff] %v7286_v9  ;;  %11019 = vst [vmem:[#allocation57_spill] sm:$0xff] %v7289_v36  ;;  %v1686_v2 = vmul.f32 %v5127_v23, %v1640_v51  ;;  %5150 = vlog2.f32 %v1678_v45  ;;  %v7298_v21 = vadd.f32 7.5, %v11024_v15  ;;  %v7301_v62 = vadd.f32 0.5, %v10994_v34 }
 0x1fc   : > { %11021 = vst [vmem:[#allocation111_spill] sm:$0xff] %v7292_v25  ;;  %11023 = vst [vmem:[#allocation58_spill] sm:$0xff] %v7295_v48  ;;  %v7303_v8 = vpop.eup %5132  ;;  %v1688_v38 = vmul.f32 %v5129_v40, %v1641_v47  ;;  %5152 = vlog2.f32 %v1680_v19  ;;  %v7306_v39 = vadd.f32 0.5, %v10996_v29  ;;  %v7309_v4 = vadd.f32 0.5, %v10998_v18 }
 0x1fd   : > { %11025 = vst [vmem:[#allocation112_spill] sm:$0xff] %v7298_v21  ;;  %v7311_v56 = vpop.eup %5134  ;;  %v1690_v41 = vmul.f32 %v5131_v26, %v1642_v28  ;;  %5154 = vlog2.f32 %v1682_v43  ;;  %v7314_v20 = vadd.f32 0.5, %v11000_v14  ;;  %v7317_v30 = vadd.f32 0.5, %v11002_v58 }
 0x1fe   : > { %v7319_v51 = vpop.eup %5136  ;;  %5156 = vlog2.f32 %v1684_v44  ;;  %v7322_v17 = vadd.f32 0.5, %v11004_v5  ;;  %v7325_v47 = vadd.f32 0.5, %v11006_v42  ;;  %v7328_v57 = vadd.f32 0.5, %v11008_v52 }
 0x1ff   : > { %11026 = vst [vmem:[#allocation60_spill] sm:$0xff] %v7317_v30  ;;  %v7330_v7 = vpop.eup %5138  ;;  %5158 = vlog2.f32 %v1686_v2  ;;  %v7333_v12 = vadd.f32 0.5, %v11010_v32  ;;  %v7336_v28 = vadd.f32 0.5, %v11012_v35  ;;  %v7339_v16 = vadd.f32 0.5, %v11014_v60 }
 0x200   : > { %11027 = vst [vmem:[#allocation113_spill] sm:$0xff] %v7322_v17  ;;  %11028 = vst [vmem:[#allocation61_spill] sm:$0xff] %v7325_v47  ;;  %v7341_v59 = vpop.eup %5140  ;;  %5160 = vlog2.f32 %v1688_v38  ;;  %v7344_v61 = vadd.f32 0.5, %v11016_v49  ;;  %v7347_v54 = vadd.f32 0.5, %v11018_v55  ;;  %v7350_v50 = vadd.f32 0.5, %v11020_v10 }
 0x201   : > { %11029 = vst [vmem:[#allocation114_spill] sm:$0xff] %v7328_v57  ;;  %11030 = vst [vmem:[#allocation63_spill] sm:$0xff] %v7333_v12  ;;  %v7352_v46 = vpop.eup %5142  ;;  %5162 = vlog2.f32 %v1690_v41  ;;  %v7355_v22 = vadd.f32 0.5, %v11022_v33  ;;  %v7358_v1 = vadd.f32 0.5, %v11024_v15  ;;  %v7361_v45 = vmin.f32 %v10994_v34, 1.0 }
 0x202   : > { %11031 = vst [vmem:[#allocation115_spill] sm:$0xff] %v7336_v28  ;;  %11032 = vst [vmem:[#allocation64_spill] sm:$0xff] %v7339_v16  ;;  %v7363_v23 = vpop.eup %5144  ;;  %5164 = vlog2.f32 %v7253_v31  ;;  %v7367_v19 = vmin.f32 %v10996_v29, 1.0  ;;  %v7370_v40 = vmin.f32 %v10998_v18, 1.0  ;;  %v7373_v43 = vmin.f32 %v11000_v14, 1.0  ;;  %v11051_v28 = vld [vmem:[#allocation90_spill] sm:$0xff] }
 0x203   : > { %11033 = vst [vmem:[#allocation116_spill] sm:$0xff] %v7344_v61  ;;  %11034 = vst [vmem:[#allocation66_spill] sm:$0xff] %v7347_v54  ;;  %v7375_v26 = vpop.eup %5146  ;;  %5166 = vlog2.f32 %v7256_v6  ;;  %v7379_v44 = vmin.f32 %v11002_v58, 1.0  ;;  %v7382_v2 = vmin.f32 %v11004_v5, 1.0  ;;  %v7385_v38 = vmin.f32 %v11006_v42, 1.0 }
 0x204   : > { %11035 = vst [vmem:[#allocation117_spill] sm:$0xff] %v7350_v50  ;;  %11036 = vst [vmem:[#allocation82_spill] sm:$0xff] %v7355_v22  ;;  %v7387_v41 = vpop.eup %5148  ;;  %5168 = vlog2.f32 %v7259_v37  ;;  %v7394_v22 = vmin.f32 %v11010_v32, 1.0  ;;  %v7397_v50 = vmin.f32 %v11012_v35, 1.0  ;;  %v7403_v61 = vmin.f32 %v11014_v60, 1.0 }
 0x205   : > { %11037 = vst [vmem:[#allocation118_spill] sm:$0xff] %v7358_v1  ;;  %11038 = vst [vmem:[#allocation76_spill] sm:$0xff] %v7361_v45  ;;  %v7391_v1 = vmin.f32 %v11008_v52, 1.0  ;;  %v7399_v54 = vpop.eup %5150  ;;  %5170 = vlog2.f32 %v7262_v13  ;;  %v7406_v16 = vmin.f32 %v11016_v49, 1.0  ;;  %v7409_v37 = vmin.f32 %v11018_v55, 1.0 }
 0x206   : > { %v7411_v6 = vpop.eup %5152  ;;  %5172 = vlog2.f32 %v7265_v24  ;;  %v7415_v31 = vmin.f32 %v11020_v10, 1.0  ;;  %v7418_v21 = vmin.f32 %v11022_v33, 1.0  ;;  %v7421_v13 = vmin.f32 %v11024_v15, 1.0 }
 0x207   : > { %11039 = vst [vmem:[#allocation119_spill] sm:$0xff] %v7406_v16  ;;  %11040 = vst [vmem:[#allocation83_spill] sm:$0xff] %v7409_v37  ;;  %v7423_v48 = vpop.eup %5154  ;;  %5174 = vlog2.f32 %v7268_v63  ;;  %v1899_v55 = vadd.f32 60.458332, %v7361_v45  ;;  %v1900_v49 = vadd.f32 60.458332, %v7367_v19 }
 0x208   : > { %11041 = vst [vmem:[#allocation77_spill] sm:$0xff] %v7415_v31  ;;  %11042 = vst [vmem:[#allocation120_spill] sm:$0xff] %v7418_v21  ;;  %v1901_v60 = vadd.f32 60.458332, %v7370_v40  ;;  %v5157_v24 = vpop.eup %5156  ;;  %5176 = vlog2.f32 %v7271_v0  ;;  %v1902_v10 = vadd.f32 60.458332, %v7373_v43 }
 0x209   : > { %11043 = vst [vmem:[#allocation84_spill] sm:$0xff] %v7421_v13  ;;  %v1903_v33 = vadd.f32 60.458332, %v7379_v44  ;;  %v1904_v15 = vadd.f32 60.458332, %v7382_v2  ;;  %v7433_v35 = vpop.eup %5158  ;;  %5178 = vlog2.f32 %v7274_v53 }
 0x20a   : > { %v1905_v63 = vadd.f32 60.458332, %v7385_v38  ;;  %v1906_v32 = vadd.f32 60.458332, %v7391_v1  ;;  %v1907_v52 = vadd.f32 60.458332, %v7394_v22  ;;  %v7439_v42 = vpop.eup %5160  ;;  %5180 = vlog2.f32 %v7277_v27 }
 0x20b   : > { %v1692_v0 = vmul.f32 0.6931472, %v7303_v8  ;;  %v1908_v5 = vadd.f32 60.458332, %v7397_v50  ;;  %v1909_v58 = vadd.f32 60.458332, %v7403_v61  ;;  %v5163_v14 = vpop.eup %5162  ;;  %5182 = vlog2.f32 %v7280_v3 }
 0x20c   : > { %v1694_v18 = vmul.f32 0.6931472, %v7311_v56  ;;  %v1696_v53 = vmul.f32 0.6931472, %v7319_v51  ;;  %v7449_v29 = vadd.f32 60.458332, %v7406_v16  ;;  %v5165_v34 = vpop.eup %5164  ;;  %v1915_v16 = vmul.f32 %v1899_v55, %v7361_v45 }
 0x20d   : > { %v1698_v27 = vmul.f32 0.6931472, %v7330_v7  ;;  %v7455_v57 = vadd.f32 60.458332, %v7409_v37  ;;  %v7458_v47 = vadd.f32 60.458332, %v7415_v31  ;;  %v5167_v56 = vpop.eup %5166  ;;  %v1916_v31 = vmul.f32 %v1900_v49, %v7367_v19 }
 0x20e   : > { %11044 = vst [vmem:[#allocation78_spill] sm:$0xff] %v7449_v29  ;;  %v1700_v51 = vmul.f32 0.6931472, %v7341_v59  ;;  %v7462_v3 = vadd.f32 60.458332, %v7418_v21  ;;  %v5169_v8 = vpop.eup %5168  ;;  %v11052_v7 = vld [vmem:[#allocation44_spill] sm:$0xff]  ;;  %v1918_v59 = vmul.f32 %v1902_v10, %v7373_v43  ;;  %5184 = vlog2.f32 %v7283_v11 }
 0x20f   : > { %11047 = vst [vmem:[#allocation85_spill] sm:$0xff] %v7455_v57  ;;  %11048 = vst [vmem:[#allocation79_spill] sm:$0xff] %v7458_v47  ;;  %v7465_v29 = vadd.f32 60.458332, %v7421_v13  ;;  %v11053_v12 = vsub.f32 %v11051_v28, %v11052_v7  ;;  %v1917_v47 = vmul.f32 %v1901_v60, %v7370_v40  ;;  %v5171_v57 = vpop.eup %5170  ;;  %v11055_v21 = vld [vmem:[#allocation91_spill] sm:$0xff]  ;;  %v11060_v55 = vld [vmem:[#allocation52_spill] sm:$0xff]  ;;  %5186 = vlog2.f32 %v7286_v9 }
 0x210   : > { %11049 = vst [vmem:[#allocation86_spill] sm:$0xff] %v7462_v3  ;;  %v11056_v3 = vld [vmem:[#allocation48_spill] sm:$0xff]  ;;  %v5173_v49 = vpop.eup %5172  ;;  %v1702_v60 = vmul.f32 0.6931472, %v7352_v46  ;;  %v11063_v28 = vld [vmem:[#allocation93_spill] sm:$0xff]  ;;  %5188 = vlog2.f32 %v7289_v36 }
 0x211   : > { %11050 = vst [vmem:[#allocation80_spill] sm:$0xff] %v7465_v29  ;;  %v7471_v37 = vadd.f32 %v1692_v0, %v11053_v12  ;;  %v11057_v17 = vsub.f32 %v11055_v21, %v11056_v3  ;;  %v11059_v29 = vld [vmem:[#allocation92_spill] sm:$0xff]  ;;  %v1919_v0 = vmul.f32 %v1903_v33, %v7379_v44  ;;  %v1920_v12 = vmul.f32 %v1904_v15, %v7382_v2  ;;  %v5175_v3 = vpop.eup %5174  ;;  %v11068_v33 = vld [vmem:[#allocation59_spill] sm:$0xff] }
 0x212   : > { %v11061_v45 = vsub.f32 %v11059_v29, %v11060_v55  ;;  %v11064_v10 = vld [vmem:[#allocation56_spill] sm:$0xff]  ;;  %v7497_v29 = vmul.f32 0.6931472, %v7363_v23  ;;  %v7509_v46 = vmul.f32 0.6931472, %v7375_v26  ;;  %5190 = vlog2.f32 %v7292_v25 }
 0x213   : > { %11054 = vst [vmem:[#allocation87_spill] sm:$0xff] %v7471_v37  ;;  %v7479_v13 = vadd.f32 %v1694_v18, %v11057_v17  ;;  %v11065_v7 = vsub.f32 %v11063_v28, %v11064_v10  ;;  %v1921_v18 = vmul.f32 %v1905_v63, %v7385_v38  ;;  %v7506_v17 = vmul.f32 %v1906_v32, %v7391_v1  ;;  %v11071_v10 = vld [vmem:[#allocation95_spill] sm:$0xff] }
 0x214   : > { %v7484_v30 = vadd.f32 %v1696_v53, %v11061_v45  ;;  %v11067_v53 = vld [vmem:[#allocation94_spill] sm:$0xff]  ;;  %v7512_v63 = vmul.f32 0.6931472, %v7387_v41  ;;  %v7516_v45 = vmul.f32 %v1907_v52, %v7394_v22  ;;  %v7522_v55 = vmul.f32 0.6931472, %v7411_v6 }
 0x215   : > { %11058 = vst [vmem:[#allocation137_spill] sm:$0xff] %v7479_v13  ;;  %v7492_v37 = vadd.f32 %v1698_v27, %v11065_v7  ;;  %v11069_v21 = vsub.f32 %v11067_v53, %v11068_v33  ;;  %v5177_v27 = vpop.eup %5176  ;;  %v1804_v32 = vmul.f32 0.6931472, %v5165_v34  ;;  %v7526_v28 = vmul.f32 0.6931472, %v7423_v48  ;;  %v11072_v7 = vld [vmem:[#allocation62_spill] sm:$0xff] }
 0x216   : > { %11062 = vst [vmem:[#allocation81_spill] sm:$0xff] %v7484_v30  ;;  %v5179_v23 = vpop.eup %5178  ;;  %v7528_v41 = vmul.f32 0.6931472, %v5157_v24  ;;  %v11073_v52 = vsub.f32 %v11071_v10, %v11072_v7  ;;  %v1806_v33 = vmul.f32 0.6931472, %v5167_v56  ;;  %v1924_v34 = vmul.f32 %v1908_v5, %v7397_v50  ;;  %v11103_v13 = vld [vmem:[#allocation84_spill] sm:$0xff] }
 0x217   : > { %11066 = vst [vmem:[#allocation138_spill] sm:$0xff] %v7492_v37  ;;  %v7502_v15 = vadd.f32 %v1700_v51, %v11069_v21  ;;  %v7519_v51 = vmul.f32 0.6931472, %v7399_v54  ;;  %v5181_v26 = vpop.eup %5180  ;;  %v1808_v21 = vmul.f32 0.6931472, %v5169_v8  ;;  %v1925_v24 = vmul.f32 %v1909_v58, %v7403_v61 }
 0x218   : > { %v7533_v53 = vadd.f32 %v1702_v60, %v11073_v52  ;;  %v5183_v54 = vpop.eup %5182  ;;  %v1810_v36 = vmul.f32 0.6931472, %v5171_v57  ;;  %v1812_v6 = vmul.f32 0.6931472, %v5173_v49  ;;  %v7537_v25 = vmul.f32 0.6931472, %v7433_v35 }
 0x219   : > { %11070 = vst [vmem:[#allocation88_spill] sm:$0xff] %v7502_v15  ;;  %v1814_v15 = vmul.f32 0.6931472, %v5175_v3  ;;  %v1816_v48 = vmul.f32 0.6931472, %v5177_v27  ;;  %v1835_v60 = vmul.f32 %v1804_v32, %v7301_v62  ;;  %v1836_v5 = vmul.f32 %v1806_v33, %v7306_v39  ;;  %v11075_v3 = vld [vmem:[#allocation60_spill] sm:$0xff]  ;;  %v5185_v52 = vpop.eup %5184 }
 0x21a   : > { %11074 = vst [vmem:[#allocation139_spill] sm:$0xff] %v7533_v53  ;;  %v7541_v37 = vmul.f32 0.6931472, %v7439_v42  ;;  %v1818_v10 = vmul.f32 0.6931472, %v5179_v23  ;;  %v1837_v35 = vmul.f32 %v1808_v21, %v7309_v4  ;;  %v1838_v49 = vmul.f32 %v1810_v36, %v7314_v20  ;;  %v11076_v42 = vld [vmem:[#allocation113_spill] sm:$0xff] }
 0x21b   : > { %v1931_v56 = vadd.f32 1599.0425, %v1915_v16  ;;  %v7544_v7 = vmul.f32 0.6931472, %v5163_v14  ;;  %v1820_v57 = vmul.f32 0.6931472, %v5181_v26  ;;  %v1839_v27 = vmul.f32 %v1812_v6, %v11075_v3  ;;  %v5187_v14 = vpop.eup %5186 }
 0x21c   : > { %v1822_v8 = vmul.f32 0.6931472, %v5183_v54  ;;  %v1932_v58 = vadd.f32 1599.0425, %v1916_v31  ;;  %v1840_v53 = vmul.f32 %v1814_v15, %v11076_v42  ;;  %v11077_v23 = vld [vmem:[#allocation61_spill] sm:$0xff]  ;;  %v11078_v32 = vld [vmem:[#allocation114_spill] sm:$0xff]  ;;  %v5189_v4 = vpop.eup %5188 }
 0x21d   : > { %v1841_v30 = vmul.f32 %v1816_v48, %v11077_v23  ;;  %v1933_v62 = vadd.f32 1599.0425, %v1917_v47  ;;  %v1934_v16 = vadd.f32 1599.0425, %v1918_v59  ;;  %v1842_v26 = vmul.f32 %v1818_v10, %v11078_v32  ;;  %v11080_v21 = vld [vmem:[#allocation63_spill] sm:$0xff]  ;;  %v5191_v15 = vpop.eup %5190  ;;  %v11087_v10 = vld [vmem:[#allocation78_spill] sm:$0xff] }
 0x21e   : > { %v7553_v54 = vadd.f32 0.9189385, %v1835_v60  ;;  %v1935_v39 = vadd.f32 1599.0425, %v1919_v0  ;;  %v1936_v33 = vadd.f32 1599.0425, %v1920_v12  ;;  %v1843_v36 = vmul.f32 %v1820_v57, %v11080_v21 }
 0x21f   : > { %v11081_v20 = vld [vmem:[#allocation115_spill] sm:$0xff]  ;;  %v7557_v31 = vadd.f32 0.9189385, %v1836_v5  ;;  %v1937_v3 = vadd.f32 1599.0425, %v1921_v18  ;;  %v11092_v5 = vld [vmem:[#allocation85_spill] sm:$0xff] }
 0x220   : > { %11079 = vst [vmem:[#allocation89_spill] sm:$0xff] %v7553_v54  ;;  %v1844_v6 = vmul.f32 %v1822_v8, %v11081_v20  ;;  %v7559_v42 = vadd.f32 0.9189385, %v1837_v35  ;;  %v7561_v47 = vadd.f32 0.9189385, %v1838_v49  ;;  %v11086_v48 = vld [vmem:[#allocation119_spill] sm:$0xff] }
 0x221   : > { %11082 = vst [vmem:[#allocation106_spill] sm:$0xff] %v7557_v31  ;;  %v7563_v59 = vadd.f32 0.9189385, %v1839_v27  ;;  %v1926_v60 = vmul.f32 %v11087_v10, %v11086_v48  ;;  %v7567_v0 = vmul.f32 0.6931472, %v5185_v52  ;;  %v11091_v8 = vld [vmem:[#allocation83_spill] sm:$0xff] }
 0x222   : > { %11083 = vst [vmem:[#allocation107_spill] sm:$0xff] %v7559_v42  ;;  %11084 = vst [vmem:[#allocation90_spill] sm:$0xff] %v7561_v47  ;;  %v7569_v12 = vadd.f32 0.9189385, %v1840_v53  ;;  %v7571_v57 = vadd.f32 0.9189385, %v1841_v30  ;;  %v1927_v23 = vmul.f32 %v11092_v5, %v11091_v8 }
 0x223   : > { %11085 = vst [vmem:[#allocation44_spill] sm:$0xff] %v7563_v59  ;;  %11088 = vst [vmem:[#allocation91_spill] sm:$0xff] %v7567_v0  ;;  %v7575_v18 = vmul.f32 0.6931472, %v5187_v14  ;;  %v7577_v35 = vmul.f32 0.6931472, %v5189_v4 }
 0x224   : > { %11089 = vst [vmem:[#allocation48_spill] sm:$0xff] %v7569_v12  ;;  %11090 = vst [vmem:[#allocation92_spill] sm:$0xff] %v7571_v57  ;;  %v7579_v49 = vadd.f32 0.9189385, %v1842_v26  ;;  %v11096_v27 = vld [vmem:[#allocation77_spill] sm:$0xff]  ;;  %v11097_v32 = vld [vmem:[#allocation79_spill] sm:$0xff] }
 0x225   : > { %11093 = vst [vmem:[#allocation52_spill] sm:$0xff] %v7575_v18  ;;  %11094 = vst [vmem:[#allocation93_spill] sm:$0xff] %v7577_v35  ;;  %v1928_v21 = vmul.f32 %v11097_v32, %v11096_v27  ;;  %v7583_v20 = vmul.f32 0.6931472, %v5191_v15  ;;  %v7585_v52 = vadd.f32 0.9189385, %v1843_v36 }
 0x226   : > { %11095 = vst [vmem:[#allocation56_spill] sm:$0xff] %v7579_v49  ;;  %v7587_v53 = vadd.f32 0.9189385, %v1844_v6  ;;  %v11101_v30 = vld [vmem:[#allocation120_spill] sm:$0xff]  ;;  %v11102_v10 = vld [vmem:[#allocation86_spill] sm:$0xff]  ;;  %v1948_v6 = vmul.f32 %v1932_v58, %v7367_v19 }
 0x227   : > { %11098 = vst [vmem:[#allocation94_spill] sm:$0xff] %v7583_v20  ;;  %11099 = vst [vmem:[#allocation59_spill] sm:$0xff] %v7585_v52  ;;  %v1929_v9 = vmul.f32 %v11102_v10, %v11101_v30  ;;  %v11104_v5 = vld [vmem:[#allocation80_spill] sm:$0xff]  ;;  %v1938_v4 = vadd.f32 1599.0425, %v7506_v17  ;;  %v1950_v10 = vmul.f32 %v1934_v16, %v7373_v43  ;;  %v1952_v17 = vmul.f32 %v1936_v33, %v7382_v2 }
 0x228   : > { %11100 = vst [vmem:[#allocation95_spill] sm:$0xff] %v7587_v53  ;;  %v1930_v14 = vmul.f32 %v11104_v5, %v11103_v13  ;;  %v1939_v26 = vadd.f32 1599.0425, %v7516_v45  ;;  %v1940_v11 = vadd.f32 1599.0425, %v1924_v34  ;;  %v11105_v15 = vld [vmem:[#allocation76_spill] sm:$0xff]  ;;  %v1949_v53 = vmul.f32 %v1933_v62, %v7370_v40 }
 0x229   : > { %v1941_v35 = vadd.f32 1599.0425, %v1925_v24  ;;  %v1942_v49 = vadd.f32 1599.0425, %v1926_v60  ;;  %v1943_v32 = vadd.f32 1599.0425, %v1927_v23  ;;  %v1947_v20 = vmul.f32 %v1931_v56, %v11105_v15 }
 0x22a   : > { %v1944_v36 = vadd.f32 1599.0425, %v1928_v21  ;;  %v1945_v52 = vadd.f32 1599.0425, %v1929_v9  ;;  %v1951_v5 = vmul.f32 %v1935_v39, %v7379_v44  ;;  %v1953_v45 = vmul.f32 %v1937_v3, %v7385_v38  ;;  %v11204_v54 = vld [vmem:[#allocation64_spill] sm:$0xff] }
 0x22b   : > { %v1946_v34 = vadd.f32 1599.0425, %v1930_v14  ;;  %v1954_v24 = vmul.f32 %v1938_v4, %v7391_v1  ;;  %v1955_v60 = vmul.f32 %v1939_v26, %v7394_v22  ;;  %v1956_v56 = vmul.f32 %v1940_v11, %v7397_v50 }
 0x22c   : > { %v1957_v58 = vmul.f32 %v1941_v35, %v7403_v61  ;;  %v1958_v62 = vmul.f32 %v1942_v49, %v11086_v48  ;;  %v1959_v16 = vmul.f32 %v1943_v32, %v11091_v8  ;;  %v1963_v9 = vadd.f32 24165.51, %v1947_v20 }
 0x22d   : > { %v1960_v39 = vmul.f32 %v1944_v36, %v11096_v27  ;;  %v1964_v23 = vadd.f32 24165.51, %v1948_v6  ;;  %v1965_v33 = vadd.f32 24165.51, %v1949_v53  ;;  %v1966_v21 = vadd.f32 24165.51, %v1950_v10 }
 0x22e   : > { %v1961_v3 = vmul.f32 %v1945_v52, %v11101_v30  ;;  %v1967_v14 = vadd.f32 24165.51, %v1951_v5  ;;  %v1968_v4 = vadd.f32 24165.51, %v1952_v17  ;;  %v1969_v18 = vadd.f32 24165.51, %v1953_v45 }
 0x22f   : > { %v1962_v26 = vmul.f32 %v1946_v34, %v11103_v13  ;;  %v1970_v11 = vadd.f32 24165.51, %v1954_v24  ;;  %v1971_v57 = vadd.f32 24165.51, %v1955_v60  ;;  %v1972_v35 = vadd.f32 24165.51, %v1956_v56 }
 0x230   : > { %v1973_v0 = vadd.f32 24165.51, %v1957_v58  ;;  %v1974_v49 = vadd.f32 24165.51, %v1958_v62  ;;  %v1975_v12 = vadd.f32 24165.51, %v1959_v16  ;;  %v1979_v20 = vmul.f32 %v1963_v9, %v11105_v15 }
 0x231   : > { %v1976_v32 = vadd.f32 24165.51, %v1960_v39  ;;  %v1980_v36 = vmul.f32 %v1964_v23, %v7367_v19  ;;  %v1981_v53 = vmul.f32 %v1965_v33, %v7370_v40  ;;  %v1982_v52 = vmul.f32 %v1966_v21, %v7373_v43 }
 0x232   : > { %v1977_v6 = vadd.f32 24165.51, %v1961_v3  ;;  %v1983_v10 = vmul.f32 %v1967_v14, %v7379_v44  ;;  %v1984_v5 = vmul.f32 %v1968_v4, %v7382_v2  ;;  %v1985_v17 = vmul.f32 %v1969_v18, %v7385_v38 }
 0x233   : > { %v1978_v45 = vadd.f32 24165.51, %v1962_v26  ;;  %v1986_v34 = vmul.f32 %v1970_v11, %v7391_v1  ;;  %v1987_v24 = vmul.f32 %v1971_v57, %v7394_v22  ;;  %v1988_v60 = vmul.f32 %v1972_v35, %v7397_v50 }
 0x234   : > { %v1989_v56 = vmul.f32 %v1973_v0, %v7403_v61  ;;  %v1990_v58 = vmul.f32 %v1974_v49, %v11086_v48  ;;  %v1991_v62 = vmul.f32 %v1975_v12, %v11091_v8  ;;  %v1995_v16 = vadd.f32 228235.22, %v1979_v20 }
 0x235   : > { %v1992_v9 = vmul.f32 %v1976_v32, %v11096_v27  ;;  %v1996_v39 = vadd.f32 228235.22, %v1980_v36  ;;  %v1997_v23 = vadd.f32 228235.22, %v1981_v53  ;;  %v1998_v33 = vadd.f32 228235.22, %v1982_v52 }
 0x236   : > { %v1993_v18 = vmul.f32 %v1977_v6, %v11101_v30  ;;  %v1999_v21 = vadd.f32 228235.22, %v1983_v10  ;;  %v2000_v3 = vadd.f32 228235.22, %v1984_v5  ;;  %v2001_v14 = vadd.f32 228235.22, %v1985_v17 }
 0x237   : > { %v1994_v57 = vmul.f32 %v1978_v45, %v11103_v13  ;;  %v2002_v4 = vadd.f32 228235.22, %v1986_v34  ;;  %v2003_v26 = vadd.f32 228235.22, %v1987_v24  ;;  %v2004_v0 = vadd.f32 228235.22, %v1988_v60 }
 0x238   : > { %v2005_v11 = vadd.f32 228235.22, %v1989_v56  ;;  %v2006_v35 = vadd.f32 228235.22, %v1990_v58  ;;  %v2007_v49 = vadd.f32 228235.22, %v1991_v62  ;;  %v2011_v12 = vmul.f32 %v1995_v16, %v11105_v15 }
 0x239   : > { %v2008_v20 = vadd.f32 228235.22, %v1992_v9  ;;  %v2012_v32 = vmul.f32 %v1996_v39, %v7367_v19  ;;  %v2013_v36 = vmul.f32 %v1997_v23, %v7370_v40  ;;  %v2014_v53 = vmul.f32 %v1998_v33, %v7373_v43 }
 0x23a   : > { %v2009_v52 = vadd.f32 228235.22, %v1993_v18  ;;  %v2015_v6 = vmul.f32 %v1999_v21, %v7379_v44  ;;  %v2016_v10 = vmul.f32 %v2000_v3, %v7382_v2  ;;  %v2017_v5 = vmul.f32 %v2001_v14, %v7385_v38 }
 0x23b   : > { %v2010_v17 = vadd.f32 228235.22, %v1994_v57  ;;  %v2018_v45 = vmul.f32 %v2002_v4, %v7391_v1  ;;  %v2019_v34 = vmul.f32 %v2003_v26, %v7394_v22  ;;  %v2020_v24 = vmul.f32 %v2004_v0, %v7397_v50 }
 0x23c   : > { %v2021_v60 = vmul.f32 %v2005_v11, %v7403_v61  ;;  %v2022_v56 = vmul.f32 %v2006_v35, %v11086_v48  ;;  %v2023_v58 = vmul.f32 %v2007_v49, %v11091_v8  ;;  %v2027_v62 = vadd.f32 1379496.3, %v2011_v12 }
 0x23d   : > { %v2024_v16 = vmul.f32 %v2008_v20, %v11096_v27  ;;  %v2028_v9 = vadd.f32 1379496.3, %v2012_v32  ;;  %v2029_v39 = vadd.f32 1379496.3, %v2013_v36  ;;  %v2030_v23 = vadd.f32 1379496.3, %v2014_v53 }
 0x23e   : > { %v2025_v33 = vmul.f32 %v2009_v52, %v11101_v30  ;;  %v2031_v18 = vadd.f32 1379496.3, %v2015_v6  ;;  %v2032_v21 = vadd.f32 1379496.3, %v2016_v10  ;;  %v2033_v3 = vadd.f32 1379496.3, %v2017_v5 }
 0x23f   : > { %v2026_v14 = vmul.f32 %v2010_v17, %v11103_v13  ;;  %v2034_v57 = vadd.f32 1379496.3, %v2018_v45  ;;  %v2035_v4 = vadd.f32 1379496.3, %v2019_v34  ;;  %v2036_v26 = vadd.f32 1379496.3, %v2020_v24 }
 0x240   : > { %v2037_v0 = vadd.f32 1379496.3, %v2021_v60  ;;  %v2038_v11 = vadd.f32 1379496.3, %v2022_v56  ;;  %v2039_v35 = vadd.f32 1379496.3, %v2023_v58  ;;  %v2043_v49 = vmul.f32 %v2027_v62, %v11105_v15 }
 0x241   : > { %v2040_v12 = vadd.f32 1379496.3, %v2024_v16  ;;  %v2044_v20 = vmul.f32 %v2028_v9, %v7367_v19  ;;  %v2045_v32 = vmul.f32 %v2029_v39, %v7370_v40  ;;  %v2046_v36 = vmul.f32 %v2030_v23, %v7373_v43 }
 0x242   : > { %v2041_v53 = vadd.f32 1379496.3, %v2025_v33  ;;  %v2047_v52 = vmul.f32 %v2031_v18, %v7379_v44  ;;  %v2048_v6 = vmul.f32 %v2032_v21, %v7382_v2  ;;  %v2049_v10 = vmul.f32 %v2033_v3, %v7385_v38 }
 0x243   : > { %v2042_v5 = vadd.f32 1379496.3, %v2026_v14  ;;  %v2050_v17 = vmul.f32 %v2034_v57, %v7391_v1  ;;  %v2051_v45 = vmul.f32 %v2035_v4, %v7394_v22  ;;  %v2052_v34 = vmul.f32 %v2036_v26, %v7397_v50 }
 0x244   : > { %v2053_v24 = vmul.f32 %v2037_v0, %v7403_v61  ;;  %v2054_v60 = vmul.f32 %v2038_v11, %v11086_v48  ;;  %v2055_v56 = vmul.f32 %v2039_v35, %v11091_v8  ;;  %v2059_v58 = vadd.f32 5210869.0, %v2043_v49 }
 0x245   : > { %v2056_v62 = vmul.f32 %v2040_v12, %v11096_v27  ;;  %v2060_v16 = vadd.f32 5210869.0, %v2044_v20  ;;  %v2061_v9 = vadd.f32 5210869.0, %v2045_v32  ;;  %v2062_v39 = vadd.f32 5210869.0, %v2046_v36 }
 0x246   : > { %v2057_v23 = vmul.f32 %v2041_v53, %v11101_v30  ;;  %v2063_v33 = vadd.f32 5210869.0, %v2047_v52  ;;  %v2064_v18 = vadd.f32 5210869.0, %v2048_v6  ;;  %v2065_v21 = vadd.f32 5210869.0, %v2049_v10 }
 0x247   : > { %v2058_v3 = vmul.f32 %v2042_v5, %v11103_v13  ;;  %v2066_v14 = vadd.f32 5210869.0, %v2050_v17  ;;  %v2067_v57 = vadd.f32 5210869.0, %v2051_v45  ;;  %v2068_v4 = vadd.f32 5210869.0, %v2052_v34 }
 0x248   : > { %v2069_v26 = vadd.f32 5210869.0, %v2053_v24  ;;  %v2070_v0 = vadd.f32 5210869.0, %v2054_v60  ;;  %v2071_v11 = vadd.f32 5210869.0, %v2055_v56  ;;  %v2075_v35 = vmul.f32 %v2059_v58, %v11105_v15 }
 0x249   : > { %v2072_v49 = vadd.f32 5210869.0, %v2056_v62  ;;  %v2076_v12 = vmul.f32 %v2060_v16, %v7367_v19  ;;  %v2077_v20 = vmul.f32 %v2061_v9, %v7370_v40  ;;  %v2078_v32 = vmul.f32 %v2062_v39, %v7373_v43 }
 0x24a   : > { %v2073_v36 = vadd.f32 5210869.0, %v2057_v23  ;;  %v2079_v53 = vmul.f32 %v2063_v33, %v7379_v44  ;;  %v2080_v52 = vmul.f32 %v2064_v18, %v7382_v2  ;;  %v2081_v6 = vmul.f32 %v2065_v21, %v7385_v38 }
 0x24b   : > { %v2074_v10 = vadd.f32 5210869.0, %v2058_v3  ;;  %v2082_v5 = vmul.f32 %v2066_v14, %v7391_v1  ;;  %v2083_v17 = vmul.f32 %v2067_v57, %v7394_v22  ;;  %v2084_v45 = vmul.f32 %v2068_v4, %v7397_v50  ;;  %v11106_v4 = vld [vmem:[#allocation96_spill] sm:$0xff] }
 0x24c   : > { %v2085_v34 = vmul.f32 %v2069_v26, %v7403_v61  ;;  %v2086_v24 = vmul.f32 %v2070_v0, %v11086_v48  ;;  %v2087_v60 = vmul.f32 %v2071_v11, %v11091_v8  ;;  %v2091_v56 = vadd.f32 11246929.0, %v2075_v35  ;;  %v11107_v26 = vld [vmem:[#allocation65_spill] sm:$0xff] }
 0x24d   : > { %v2088_v58 = vmul.f32 %v2072_v49, %v11096_v27  ;;  %v2092_v62 = vadd.f32 11246929.0, %v2076_v12  ;;  %v2093_v16 = vadd.f32 11246929.0, %v2077_v20  ;;  %v2094_v9 = vadd.f32 11246929.0, %v2078_v32 }
 0x24e   : > { %v2089_v39 = vmul.f32 %v2073_v36, %v11101_v30  ;;  %v2095_v23 = vadd.f32 11246929.0, %v2079_v53  ;;  %v2096_v33 = vadd.f32 11246929.0, %v2080_v52  ;;  %v2097_v18 = vadd.f32 11246929.0, %v2081_v6 }
 0x24f   : > { %v2090_v21 = vmul.f32 %v2074_v10, %v11103_v13  ;;  %v2098_v3 = vadd.f32 11246929.0, %v2082_v5  ;;  %v2099_v14 = vadd.f32 11246929.0, %v2083_v17  ;;  %v2100_v57 = vadd.f32 11246929.0, %v2084_v45 }
 0x250   : > { %v11108_v0 = vsub.f32 %v11106_v4, %v11107_v26  ;;  %v2101_v35 = vadd.f32 11246929.0, %v2085_v34  ;;  %v2102_v49 = vadd.f32 11246929.0, %v2086_v24  ;;  %v2103_v12 = vadd.f32 11246929.0, %v2087_v60 }
 0x251   : > { %v2104_v20 = vadd.f32 11246929.0, %v2088_v58  ;;  %v2107_v32 = vmul.f32 %v2091_v56, %v11105_v15  ;;  %v2108_v36 = vmul.f32 %v2092_v62, %v7367_v19  ;;  %v2109_v53 = vmul.f32 %v2093_v16, %v7370_v40  ;;  %v11119_v26 = vld [vmem:[#allocation97_spill] sm:$0xff] }
 0x252   : > { %v7679_v11 = vadd.f32 %v7497_v29, %v11108_v0  ;;  %v2105_v52 = vadd.f32 11246929.0, %v2089_v39  ;;  %v2110_v6 = vmul.f32 %v2094_v9, %v7373_v43  ;;  %v2111_v10 = vmul.f32 %v2095_v23, %v7379_v44  ;;  %v11120_v0 = vld [vmem:[#allocation67_spill] sm:$0xff] }
 0x253   : > { %v2112_v5 = vmul.f32 %v2096_v33, %v7382_v2  ;;  %v2106_v17 = vadd.f32 11246929.0, %v2090_v21  ;;  %v2113_v29 = vmul.f32 %v2097_v18, %v7385_v38  ;;  %v2114_v45 = vmul.f32 %v2098_v3, %v7391_v1 }
 0x254   : > { %11109 = vst [vmem:[#allocation62_spill] sm:$0xff] %v7679_v11  ;;  %v2115_v34 = vmul.f32 %v2099_v14, %v7394_v22  ;;  %v2116_v24 = vmul.f32 %v2100_v57, %v7397_v50  ;;  %v2117_v60 = vmul.f32 %v2101_v35, %v7403_v61  ;;  %v2118_v56 = vmul.f32 %v2102_v49, %v11086_v48 }
 0x255   : > { %v2119_v58 = vmul.f32 %v2103_v12, %v11091_v8  ;;  %v2120_v62 = vmul.f32 %v2104_v20, %v11096_v27  ;;  %v7695_v16 = vadd.f32 10619610.0, %v2107_v32  ;;  %v7697_v9 = vadd.f32 10619610.0, %v2108_v36  ;;  %v11126_v36 = vld [vmem:[#allocation98_spill] sm:$0xff] }
 0x256   : > { %v7699_v39 = vadd.f32 10619610.0, %v2109_v53  ;;  %v2121_v23 = vmul.f32 %v2105_v52, %v11101_v30  ;;  %v7702_v33 = vadd.f32 10619610.0, %v2110_v6  ;;  %v7704_v18 = vadd.f32 10619610.0, %v2111_v10 }
 0x257   : > { %11110 = vst [vmem:[#allocation60_spill] sm:$0xff] %v7695_v16  ;;  %11111 = vst [vmem:[#allocation113_spill] sm:$0xff] %v7697_v9  ;;  %v7706_v21 = vadd.f32 10619610.0, %v2112_v5  ;;  %v2122_v3 = vmul.f32 %v2106_v17, %v11103_v13  ;;  %v7709_v14 = vadd.f32 10619610.0, %v2113_v29  ;;  %v11121_v35 = vsub.f32 %v11119_v26, %v11120_v0 }
 0x258   : > { %11112 = vst [vmem:[#allocation61_spill] sm:$0xff] %v7699_v39  ;;  %11113 = vst [vmem:[#allocation114_spill] sm:$0xff] %v7702_v33  ;;  %v7711_v57 = vadd.f32 10619610.0, %v2114_v45  ;;  %v7713_v4 = vadd.f32 10619610.0, %v2115_v34 }
 0x259   : > { %11114 = vst [vmem:[#allocation63_spill] sm:$0xff] %v7704_v18  ;;  %11115 = vst [vmem:[#allocation115_spill] sm:$0xff] %v7706_v21  ;;  %v7719_v49 = vadd.f32 %v7509_v46, %v11121_v35  ;;  %v7721_v12 = vadd.f32 10619610.0, %v2116_v24  ;;  %v7723_v20 = vadd.f32 10619610.0, %v2117_v60 }
 0x25a   : > { %11116 = vst [vmem:[#allocation119_spill] sm:$0xff] %v7709_v14  ;;  %11117 = vst [vmem:[#allocation78_spill] sm:$0xff] %v7711_v57  ;;  %v7725_v32 = vadd.f32 10619610.0, %v2118_v56  ;;  %v11127_v53 = vld [vmem:[#allocation68_spill] sm:$0xff]  ;;  %v2139_v17 = vadd.f32 36.0, %v11105_v15 }
 0x25b   : > { %11118 = vst [vmem:[#allocation83_spill] sm:$0xff] %v7713_v4  ;;  %11122 = vst [vmem:[#allocation85_spill] sm:$0xff] %v7719_v49  ;;  %v11128_v52 = vsub.f32 %v11126_v36, %v11127_v53  ;;  %v7733_v10 = vadd.f32 10619610.0, %v2119_v58  ;;  %v7735_v5 = vadd.f32 10619610.0, %v2120_v62 }
 0x25c   : > { %11123 = vst [vmem:[#allocation77_spill] sm:$0xff] %v7721_v12  ;;  %11124 = vst [vmem:[#allocation79_spill] sm:$0xff] %v7723_v20  ;;  %v7738_v46 = vadd.f32 10619610.0, %v2121_v23  ;;  %v2140_v29 = vadd.f32 36.0, %v7367_v19  ;;  %v2141_v45 = vadd.f32 36.0, %v7370_v40  ;;  %v2155_v36 = vmul.f32 %v2139_v17, %v11105_v15 }
 0x25d   : > { %11125 = vst [vmem:[#allocation120_spill] sm:$0xff] %v7725_v32  ;;  %v7731_v6 = vadd.f32 %v7512_v63, %v11128_v52  ;;  %11130 = vst [vmem:[#allocation84_spill] sm:$0xff] %v7733_v10  ;;  %v2142_v34 = vadd.f32 36.0, %v7373_v43  ;;  %v7743_v24 = vadd.f32 10619610.0, %v2122_v3  ;;  %v2143_v60 = vadd.f32 36.0, %v7379_v44 }
 0x25e   : > { %11131 = vst [vmem:[#allocation80_spill] sm:$0xff] %v7735_v5  ;;  %11132 = vst [vmem:[#allocation76_spill] sm:$0xff] %v7738_v46  ;;  %v2144_v63 = vadd.f32 36.0, %v7382_v2  ;;  %v2145_v56 = vadd.f32 36.0, %v7385_v38  ;;  %v2146_v58 = vadd.f32 36.0, %v7391_v1  ;;  %v2147_v62 = vadd.f32 36.0, %v7394_v22 }
 0x25f   : > { %11129 = vst [vmem:[#allocation86_spill] sm:$0xff] %v7731_v6  ;;  %11133 = vst [vmem:[#allocation96_spill] sm:$0xff] %v7743_v24  ;;  %v2148_v23 = vadd.f32 36.0, %v7397_v50  ;;  %v2149_v26 = vadd.f32 36.0, %v7403_v61  ;;  %v2150_v0 = vadd.f32 36.0, %v11086_v48  ;;  %v2151_v35 = vadd.f32 36.0, %v11091_v8 }
 0x260   : > { %v2152_v3 = vadd.f32 36.0, %v11096_v27  ;;  %v2153_v53 = vadd.f32 36.0, %v11101_v30  ;;  %v2156_v52 = vmul.f32 %v2140_v29, %v7367_v19  ;;  %v2157_v6 = vmul.f32 %v2141_v45, %v7370_v40  ;;  %v11151_v39 = vld [vmem:[#allocation126_spill] sm:$0xff] }
 0x261   : > { %v2158_v49 = vmul.f32 %v2142_v34, %v7373_v43  ;;  %v2154_v11 = vadd.f32 36.0, %v11103_v13  ;;  %v2159_v24 = vmul.f32 %v2143_v60, %v7379_v44  ;;  %v2160_v46 = vmul.f32 %v2144_v63, %v7382_v2 }
 0x262   : > { %v2161_v5 = vmul.f32 %v2145_v56, %v7385_v38  ;;  %v2162_v10 = vmul.f32 %v2146_v58, %v7391_v1  ;;  %v2163_v17 = vmul.f32 %v2147_v62, %v7394_v22  ;;  %v2164_v32 = vmul.f32 %v2148_v23, %v7397_v50 }
 0x263   : > { %v2165_v29 = vmul.f32 %v2149_v26, %v7403_v61  ;;  %v2166_v45 = vmul.f32 %v2150_v0, %v11086_v48  ;;  %v2167_v34 = vmul.f32 %v2151_v35, %v11091_v8  ;;  %v2168_v20 = vmul.f32 %v2152_v3, %v11096_v27 }
 0x264   : > { %v2171_v12 = vadd.f32 546.0, %v2155_v36  ;;  %v2169_v60 = vmul.f32 %v2153_v53, %v11101_v30  ;;  %v2172_v63 = vadd.f32 546.0, %v2156_v52  ;;  %v2173_v4 = vadd.f32 546.0, %v2157_v6 }
 0x265   : > { %v2174_v56 = vadd.f32 546.0, %v2158_v49  ;;  %v2170_v58 = vmul.f32 %v2154_v11, %v11103_v13  ;;  %v2175_v57 = vadd.f32 546.0, %v2159_v24  ;;  %v2176_v62 = vadd.f32 546.0, %v2160_v46 }
 0x266   : > { %v2177_v14 = vadd.f32 546.0, %v2161_v5  ;;  %v2178_v23 = vadd.f32 546.0, %v2162_v10  ;;  %v2179_v21 = vadd.f32 546.0, %v2163_v17  ;;  %v2180_v26 = vadd.f32 546.0, %v2164_v32 }
 0x267   : > { %v2181_v18 = vadd.f32 546.0, %v2165_v29  ;;  %v2182_v0 = vadd.f32 546.0, %v2166_v45  ;;  %v2183_v33 = vadd.f32 546.0, %v2167_v34  ;;  %v2184_v35 = vadd.f32 546.0, %v2168_v20 }
 0x268   : > { %v2187_v3 = vmul.f32 %v2171_v12, %v11105_v15  ;;  %v2185_v36 = vadd.f32 546.0, %v2169_v60  ;;  %v2188_v53 = vmul.f32 %v2172_v63, %v7367_v19  ;;  %v2189_v6 = vmul.f32 %v2173_v4, %v7370_v40 }
 0x269   : > { %v2190_v49 = vmul.f32 %v2174_v56, %v7373_v43  ;;  %v2186_v11 = vadd.f32 546.0, %v2170_v58  ;;  %v2191_v46 = vmul.f32 %v2175_v57, %v7379_v44  ;;  %v2192_v10 = vmul.f32 %v2176_v62, %v7382_v2 }
 0x26a   : > { %v2193_v32 = vmul.f32 %v2177_v14, %v7385_v38  ;;  %v2194_v5 = vmul.f32 %v2178_v23, %v7391_v1  ;;  %v2195_v20 = vmul.f32 %v2179_v21, %v7394_v22  ;;  %v2196_v12 = vmul.f32 %v2180_v26, %v7397_v50 }
 0x26b   : > { %v2197_v24 = vmul.f32 %v2181_v18, %v7403_v61  ;;  %v2198_v52 = vmul.f32 %v2182_v0, %v11086_v48  ;;  %v2199_v4 = vmul.f32 %v2183_v33, %v11091_v8  ;;  %v2200_v17 = vmul.f32 %v2184_v35, %v11096_v27 }
 0x26c   : > { %v2203_v29 = vadd.f32 4536.0, %v2187_v3  ;;  %v2201_v57 = vmul.f32 %v2185_v36, %v11101_v30  ;;  %v2204_v45 = vadd.f32 4536.0, %v2188_v53  ;;  %v2205_v34 = vadd.f32 4536.0, %v2189_v6 }
 0x26d   : > { %v2206_v14 = vadd.f32 4536.0, %v2190_v49  ;;  %v2202_v60 = vmul.f32 %v2186_v11, %v11103_v13  ;;  %v2207_v63 = vadd.f32 4536.0, %v2191_v46  ;;  %v2208_v21 = vadd.f32 4536.0, %v2192_v10 }
 0x26e   : > { %v2209_v56 = vadd.f32 4536.0, %v2193_v32  ;;  %v2210_v58 = vadd.f32 4536.0, %v2194_v5  ;;  %v2211_v62 = vadd.f32 4536.0, %v2195_v20  ;;  %v2212_v18 = vadd.f32 4536.0, %v2196_v12 }
 0x26f   : > { %v2213_v23 = vadd.f32 4536.0, %v2197_v24  ;;  %v2214_v26 = vadd.f32 4536.0, %v2198_v52  ;;  %v2215_v0 = vadd.f32 4536.0, %v2199_v4  ;;  %v2216_v33 = vadd.f32 4536.0, %v2200_v17 }
 0x270   : > { %v2219_v35 = vmul.f32 %v2203_v29, %v11105_v15  ;;  %v2217_v3 = vadd.f32 4536.0, %v2201_v57  ;;  %v2220_v36 = vmul.f32 %v2204_v45, %v7367_v19  ;;  %v2221_v53 = vmul.f32 %v2205_v34, %v7370_v40 }
 0x271   : > { %v2222_v6 = vmul.f32 %v2206_v14, %v7373_v43  ;;  %v2218_v49 = vadd.f32 4536.0, %v2202_v60  ;;  %v2223_v11 = vmul.f32 %v2207_v63, %v7379_v44  ;;  %v2224_v46 = vmul.f32 %v2208_v21, %v7382_v2 }
 0x272   : > { %v2225_v10 = vmul.f32 %v2209_v56, %v7385_v38  ;;  %v2226_v32 = vmul.f32 %v2210_v58, %v7391_v1  ;;  %v2227_v5 = vmul.f32 %v2211_v62, %v7394_v22  ;;  %v2228_v20 = vmul.f32 %v2212_v18, %v7397_v50  ;;  %v11134_v56 = vld [vmem:[#allocation99_spill] sm:$0xff]  ;;  %v11135_v58 = vld [vmem:[#allocation69_spill] sm:$0xff] }
 0x273   : > { %v2229_v12 = vmul.f32 %v2213_v23, %v7403_v61  ;;  %v2230_v24 = vmul.f32 %v2214_v26, %v11086_v48  ;;  %v2231_v52 = vmul.f32 %v2215_v0, %v11091_v8  ;;  %v2232_v4 = vmul.f32 %v2216_v33, %v11096_v27 }
 0x274   : > { %v2235_v17 = vadd.f32 22449.0, %v2219_v35  ;;  %v2233_v29 = vmul.f32 %v2217_v3, %v11101_v30  ;;  %v2236_v57 = vadd.f32 22449.0, %v2220_v36  ;;  %v2237_v45 = vadd.f32 22449.0, %v2221_v53 }
 0x275   : > { %v2238_v34 = vadd.f32 22449.0, %v2222_v6  ;;  %v2234_v14 = vmul.f32 %v2218_v49, %v11103_v13  ;;  %v2239_v60 = vadd.f32 22449.0, %v2223_v11  ;;  %v2240_v63 = vadd.f32 22449.0, %v2224_v46 }
 0x276   : > { %v2241_v21 = vadd.f32 22449.0, %v2225_v10  ;;  %v11136_v62 = vsub.f32 %v11134_v56, %v11135_v58  ;;  %v2242_v23 = vadd.f32 22449.0, %v2226_v32  ;;  %v2243_v26 = vadd.f32 22449.0, %v2227_v5 }
 0x277   : > { %v2244_v0 = vadd.f32 22449.0, %v2228_v20  ;;  %v2245_v33 = vadd.f32 22449.0, %v2229_v12  ;;  %v2246_v35 = vadd.f32 22449.0, %v2230_v24  ;;  %v2251_v36 = vmul.f32 %v2235_v17, %v11105_v15 }
 0x278   : > { %v7809_v18 = vadd.f32 %v7519_v51, %v11136_v62  ;;  %v2247_v3 = vadd.f32 22449.0, %v2231_v52  ;;  %v2248_v53 = vadd.f32 22449.0, %v2232_v4  ;;  %v2249_v6 = vadd.f32 22449.0, %v2233_v29 }
 0x279   : > { %v2252_v49 = vmul.f32 %v2236_v57, %v7367_v19  ;;  %v2253_v11 = vmul.f32 %v2237_v45, %v7370_v40  ;;  %v2250_v46 = vadd.f32 22449.0, %v2234_v14  ;;  %v2254_v10 = vmul.f32 %v2238_v34, %v7373_v43  ;;  %v11138_v58 = vld [vmem:[#allocation100_spill] sm:$0xff]  ;;  %v11139_v62 = vld [vmem:[#allocation70_spill] sm:$0xff] }
 0x27a   : > { %11137 = vst [vmem:[#allocation65_spill] sm:$0xff] %v7809_v18  ;;  %v2255_v51 = vmul.f32 %v2239_v60, %v7379_v44  ;;  %v2256_v32 = vmul.f32 %v2240_v63, %v7382_v2  ;;  %v2257_v5 = vmul.f32 %v2241_v21, %v7385_v38  ;;  %v2258_v20 = vmul.f32 %v2242_v23, %v7391_v1 }
 0x27b   : > { %v2259_v12 = vmul.f32 %v2243_v26, %v7394_v22  ;;  %v2260_v24 = vmul.f32 %v2244_v0, %v7397_v50  ;;  %v2261_v52 = vmul.f32 %v2245_v33, %v7403_v61  ;;  %v2262_v4 = vmul.f32 %v2246_v35, %v11086_v48 }
 0x27c   : > { %v2263_v17 = vmul.f32 %v2247_v3, %v11091_v8  ;;  %v2267_v29 = vadd.f32 67284.0, %v2251_v36  ;;  %v2264_v57 = vmul.f32 %v2248_v53, %v11096_v27  ;;  %v2265_v45 = vmul.f32 %v2249_v6, %v11101_v30 }
 0x27d   : > { %v2268_v34 = vadd.f32 67284.0, %v2252_v49  ;;  %v2269_v14 = vadd.f32 67284.0, %v2253_v11  ;;  %v2266_v60 = vmul.f32 %v2250_v46, %v11103_v13  ;;  %v2270_v63 = vadd.f32 67284.0, %v2254_v10 }
 0x27e   : > { %v2271_v21 = vadd.f32 67284.0, %v2255_v51  ;;  %v2272_v56 = vadd.f32 67284.0, %v2256_v32  ;;  %v11140_v23 = vsub.f32 %v11138_v58, %v11139_v62  ;;  %v2273_v0 = vadd.f32 67284.0, %v2257_v5 }
 0x27f   : > { %v2274_v33 = vadd.f32 67284.0, %v2258_v20  ;;  %v2275_v35 = vadd.f32 67284.0, %v2259_v12  ;;  %v2276_v3 = vadd.f32 67284.0, %v2260_v24  ;;  %v2283_v6 = vmul.f32 %v2267_v29, %v11105_v15 }
 0x280   : > { %v7831_v26 = vadd.f32 %v7522_v55, %v11140_v23  ;;  %v2277_v36 = vadd.f32 67284.0, %v2261_v52  ;;  %v2278_v53 = vadd.f32 67284.0, %v2262_v4  ;;  %v2279_v49 = vadd.f32 67284.0, %v2263_v17 }
 0x281   : > { %v2280_v11 = vadd.f32 67284.0, %v2264_v57  ;;  %v2281_v46 = vadd.f32 67284.0, %v2265_v45  ;;  %v2284_v10 = vmul.f32 %v2268_v34, %v7367_v19  ;;  %v2282_v51 = vadd.f32 67284.0, %v2266_v60 }
 0x282   : > { %11141 = vst [vmem:[#allocation97_spill] sm:$0xff] %v7831_v26  ;;  %v2285_v32 = vmul.f32 %v2269_v14, %v7370_v40  ;;  %v2286_v58 = vmul.f32 %v2270_v63, %v7373_v43  ;;  %v2287_v55 = vmul.f32 %v2271_v21, %v7379_v44  ;;  %v2288_v5 = vmul.f32 %v2272_v56, %v7382_v2  ;;  %v11142_v62 = vld [vmem:[#allocation101_spill] sm:$0xff]  ;;  %v11143_v23 = vld [vmem:[#allocation71_spill] sm:$0xff] }
 0x283   : > { %v2289_v20 = vmul.f32 %v2273_v0, %v7385_v38  ;;  %v2290_v12 = vmul.f32 %v2274_v33, %v7391_v1  ;;  %v2291_v24 = vmul.f32 %v2275_v35, %v7394_v22  ;;  %v2292_v52 = vmul.f32 %v2276_v3, %v7397_v50  ;;  %v11150_v26 = vld [vmem:[#allocation125_spill] sm:$0xff] }
 0x284   : > { %v2293_v4 = vmul.f32 %v2277_v36, %v7403_v61  ;;  %v2294_v17 = vmul.f32 %v2278_v53, %v11086_v48  ;;  %v2299_v29 = vadd.f32 118124.0, %v2283_v6  ;;  %v2295_v57 = vmul.f32 %v2279_v49, %v11091_v8 }
 0x285   : > { %v2296_v45 = vmul.f32 %v2280_v11, %v11096_v27  ;;  %v2297_v34 = vmul.f32 %v2281_v46, %v11101_v30  ;;  %v2300_v14 = vadd.f32 118124.0, %v2284_v10  ;;  %v2298_v60 = vmul.f32 %v2282_v51, %v11103_v13 }
 0x286   : > { %v2301_v63 = vadd.f32 118124.0, %v2285_v32  ;;  %v2302_v21 = vadd.f32 118124.0, %v2286_v58  ;;  %v2303_v56 = vadd.f32 118124.0, %v2287_v55  ;;  %v11144_v0 = vsub.f32 %v11142_v62, %v11143_v23 }
 0x287   : > { %v2304_v35 = vadd.f32 118124.0, %v2288_v5  ;;  %v2305_v3 = vadd.f32 118124.0, %v2289_v20  ;;  %v2306_v36 = vadd.f32 118124.0, %v2290_v12  ;;  %v2315_v11 = vmul.f32 %v2299_v29, %v11105_v15 }
 0x288   : > { %v7853_v33 = vadd.f32 %v7526_v28, %v11144_v0  ;;  %v2307_v53 = vadd.f32 118124.0, %v2291_v24  ;;  %v2308_v6 = vadd.f32 118124.0, %v2292_v52  ;;  %v2309_v49 = vadd.f32 118124.0, %v2293_v4 }
 0x289   : > { %v2310_v46 = vadd.f32 118124.0, %v2294_v17  ;;  %v2311_v10 = vadd.f32 118124.0, %v2295_v57  ;;  %v2312_v51 = vadd.f32 118124.0, %v2296_v45  ;;  %v2316_v32 = vmul.f32 %v2300_v14, %v7367_v19 }
 0x28a   : > { %11145 = vst [vmem:[#allocation67_spill] sm:$0xff] %v7853_v33  ;;  %v2313_v58 = vadd.f32 118124.0, %v2297_v34  ;;  %v2314_v55 = vadd.f32 118124.0, %v2298_v60  ;;  %v2317_v62 = vmul.f32 %v2301_v63, %v7370_v40  ;;  %v2318_v28 = vmul.f32 %v2302_v21, %v7373_v43  ;;  %v11146_v29 = vld [vmem:[#allocation121_spill] sm:$0xff] }
 0x28b   : > { %v2319_v5 = vmul.f32 %v2303_v56, %v7379_v44  ;;  %v2320_v20 = vmul.f32 %v2304_v35, %v7382_v2  ;;  %v2321_v12 = vmul.f32 %v2305_v3, %v7385_v38  ;;  %v2322_v24 = vmul.f32 %v2306_v36, %v7391_v1  ;;  %v11147_v60 = vld [vmem:[#allocation122_spill] sm:$0xff]  ;;  %v11148_v0 = vld [vmem:[#allocation123_spill] sm:$0xff] }
 0x28c   : > { %v2323_v52 = vmul.f32 %v2307_v53, %v7394_v22  ;;  %v2324_v4 = vmul.f32 %v2308_v6, %v7397_v50  ;;  %v2325_v17 = vmul.f32 %v2309_v49, %v7403_v61  ;;  %v2379_v57 = vmax.f32 %v11146_v29, 1.0  ;;  %v11149_v6 = vld [vmem:[#allocation124_spill] sm:$0xff] }
 0x28d   : > { %v2326_v45 = vmul.f32 %v2310_v46, %v11086_v48  ;;  %v2327_v34 = vmul.f32 %v2311_v10, %v11091_v8  ;;  %v2328_v14 = vmul.f32 %v2312_v51, %v11096_v27  ;;  %v2380_v63 = vmax.f32 %v11147_v60, 1.0 }
 0x28e   : > { %v2329_v21 = vmul.f32 %v2313_v58, %v11101_v30  ;;  %v2331_v56 = vadd.f32 109584.0, %v2315_v11  ;;  %v2332_v23 = vadd.f32 109584.0, %v2316_v32  ;;  %v2381_v35 = vmax.f32 %v11148_v0, 1.0  ;;  %v11152_v58 = vld [vmem:[#allocation127_spill] sm:$0xff] }
 0x28f   : > { %v2330_v3 = vmul.f32 %v2314_v55, %v11103_v13  ;;  %v2333_v36 = vadd.f32 109584.0, %v2317_v62  ;;  %v2334_v53 = vadd.f32 109584.0, %v2318_v28  ;;  %v2382_v49 = vmax.f32 %v11149_v6, 1.0  ;;  %v11153_v28 = vld [vmem:[#allocation128_spill] sm:$0xff] }
 0x290   : > { %v2335_v33 = vadd.f32 109584.0, %v2319_v5  ;;  %v2336_v46 = vadd.f32 109584.0, %v2320_v20  ;;  %v2383_v10 = vmax.f32 %v11150_v26, 1.0  ;;  %5192 = vrcp.f32 %v2379_v57  ;;  %v11154_v57 = vld [vmem:[#allocation129_spill] sm:$0xff] }
 0x291   : > { %v2337_v51 = vadd.f32 109584.0, %v2321_v12  ;;  %v2338_v18 = vadd.f32 109584.0, %v2322_v24  ;;  %v2384_v9 = vmax.f32 %v11151_v39, 1.0  ;;  %5194 = vrcp.f32 %v2380_v63  ;;  %v11155_v63 = vld [vmem:[#allocation130_spill] sm:$0xff] }
 0x292   : > { %v2339_v11 = vadd.f32 109584.0, %v2323_v52  ;;  %v2347_v32 = vmul.f32 %v2331_v56, %v11105_v15  ;;  %v2385_v16 = vmax.f32 %v11152_v58, 1.0  ;;  %5196 = vrcp.f32 %v2381_v35  ;;  %v11156_v35 = vld [vmem:[#allocation131_spill] sm:$0xff] }
 0x293   : > { %v2340_v55 = vadd.f32 109584.0, %v2324_v4  ;;  %v2341_v62 = vadd.f32 109584.0, %v2325_v17  ;;  %v2386_v6 = vmax.f32 %v11153_v28, 1.0  ;;  %5198 = vrcp.f32 %v2382_v49 }
 0x294   : > { %v2342_v5 = vadd.f32 109584.0, %v2326_v45  ;;  %v2348_v20 = vmul.f32 %v2332_v23, %v7367_v19  ;;  %v2387_v12 = vmax.f32 %v11154_v57, 1.0  ;;  %5200 = vrcp.f32 %v2383_v10  ;;  %v11157_v45 = vld [vmem:[#allocation132_spill] sm:$0xff] }
 0x295   : > { %v2343_v24 = vadd.f32 109584.0, %v2327_v34  ;;  %v2344_v39 = vadd.f32 109584.0, %v2328_v14  ;;  %v2388_v52 = vmax.f32 %v11155_v63, 1.0  ;;  %5202 = vrcp.f32 %v2384_v9  ;;  %v11158_v14 = vld [vmem:[#allocation133_spill] sm:$0xff] }
 0x296   : > { %v2345_v15 = vadd.f32 109584.0, %v2329_v21  ;;  %v2349_v56 = vmul.f32 %v2333_v36, %v7370_v40  ;;  %v2389_v4 = vmax.f32 %v11156_v35, 1.0  ;;  %5204 = vrcp.f32 %v2385_v16  ;;  %v11159_v21 = vld [vmem:[#allocation134_spill] sm:$0xff] }
 0x297   : > { %v2346_v17 = vadd.f32 109584.0, %v2330_v3  ;;  %v2350_v49 = vmul.f32 %v2334_v53, %v7373_v43  ;;  %v2390_v28 = vmax.f32 %v11157_v45, 1.0  ;;  %5206 = vrcp.f32 %v2386_v6  ;;  %v11160_v53 = vld [vmem:[#allocation135_spill] sm:$0xff]  ;;  %v11161_v6 = vld [vmem:[#allocation136_spill] sm:$0xff] }
 0x298   : > { %v2351_v19 = vmul.f32 %v2335_v33, %v7379_v44  ;;  %v2352_v34 = vmul.f32 %v2336_v46, %v7382_v2  ;;  %v2391_v23 = vmax.f32 %v11158_v14, 1.0  ;;  %5208 = vrcp.f32 %v2387_v12 }
 0x299   : > { %v2353_v9 = vmul.f32 %v2337_v51, %v7385_v38  ;;  %v2354_v40 = vmul.f32 %v2338_v18, %v7391_v1  ;;  %v2392_v36 = vmax.f32 %v11159_v21, 1.0  ;;  %5210 = vrcp.f32 %v2388_v52 }
 0x29a   : > { %v7893_v16 = vpop.eup %5192  ;;  %v2355_v43 = vmul.f32 %v2339_v11, %v7394_v22  ;;  %v2356_v3 = vmul.f32 %v2340_v55, %v7397_v50  ;;  %v2393_v44 = vmax.f32 %v11160_v53, 1.0  ;;  %5212 = vrcp.f32 %v2389_v4 }
 0x29b   : > { %v7898_v2 = vpop.eup %5194  ;;  %v2357_v33 = vmul.f32 %v2341_v62, %v7403_v61  ;;  %v2358_v38 = vmul.f32 %v2342_v5, %v11086_v48  ;;  %v2394_v1 = vmax.f32 %v11161_v6, 1.0  ;;  %5214 = vrcp.f32 %v2390_v28  ;;  %v11181_v6 = vld [vmem:[#allocation103_spill] sm:$0xff] }
 0x29c   : > { %v7903_v18 = vpop.eup %5196  ;;  %v2359_v46 = vmul.f32 %v2343_v24, %v11091_v8  ;;  %v2360_v22 = vmul.f32 %v2344_v39, %v11096_v27  ;;  %v2361_v50 = vmul.f32 %v2345_v15, %v11101_v30  ;;  %5216 = vrcp.f32 %v2391_v23 }
 0x29d   : > { %v7908_v10 = vpop.eup %5198  ;;  %v2362_v51 = vmul.f32 %v2346_v17, %v11103_v13  ;;  %v7911_v11 = vadd.f32 40320.0, %v2347_v32  ;;  %v7913_v61 = vadd.f32 40320.0, %v2348_v20  ;;  %5218 = vrcp.f32 %v2392_v36 }
 0x29e   : > { %v7915_v48 = vpop.eup %5200  ;;  %v7917_v55 = vadd.f32 40320.0, %v2349_v56  ;;  %v7919_v62 = vadd.f32 40320.0, %v2350_v49  ;;  %v7921_v8 = vadd.f32 40320.0, %v2351_v19  ;;  %5220 = vrcp.f32 %v2393_v44 }
 0x29f   : > { %11162 = vst [vmem:[#allocation98_spill] sm:$0xff] %v7913_v61  ;;  %v7923_v27 = vpop.eup %5202  ;;  %v7925_v30 = vadd.f32 40320.0, %v2352_v34  ;;  %5222 = vrcp.f32 %v2394_v1  ;;  %v2427_v13 = vmul.f32 10619610.0, %v7893_v16  ;;  %v2428_v39 = vmul.f32 10619610.0, %v7898_v2 }
 0x2a0   : > { %11163 = vst [vmem:[#allocation68_spill] sm:$0xff] %v7917_v55  ;;  %11164 = vst [vmem:[#allocation99_spill] sm:$0xff] %v7919_v62  ;;  %v7929_v32 = vpop.eup %5204  ;;  %v7931_v28 = vadd.f32 40320.0, %v2353_v9  ;;  %v7933_v5 = vadd.f32 40320.0, %v2354_v40  ;;  %v7935_v20 = vadd.f32 40320.0, %v2355_v43  ;;  %v7937_v12 = vadd.f32 40320.0, %v2356_v3 }
 0x2a1   : > { %11165 = vst [vmem:[#allocation69_spill] sm:$0xff] %v7921_v8  ;;  %11166 = vst [vmem:[#allocation100_spill] sm:$0xff] %v7925_v30  ;;  %v7939_v24 = vpop.eup %5206  ;;  %v7941_v52 = vadd.f32 40320.0, %v2357_v33  ;;  %v7943_v15 = vadd.f32 40320.0, %v2358_v38  ;;  %v7945_v56 = vadd.f32 40320.0, %v2359_v46  ;;  %v7950_v49 = vadd.f32 40320.0, %v2360_v22 }
 0x2a2   : > { %11167 = vst [vmem:[#allocation70_spill] sm:$0xff] %v7931_v28  ;;  %11168 = vst [vmem:[#allocation101_spill] sm:$0xff] %v7933_v5  ;;  %v2429_v4 = vmul.f32 10619610.0, %v7903_v18  ;;  %v7948_v17 = vpop.eup %5208  ;;  %v7952_v19 = vadd.f32 40320.0, %v2361_v50  ;;  %v7954_v34 = vadd.f32 40320.0, %v2362_v51 }
 0x2a3   : > { %11169 = vst [vmem:[#allocation71_spill] sm:$0xff] %v7935_v20  ;;  %11170 = vst [vmem:[#allocation121_spill] sm:$0xff] %v7937_v12  ;;  %v2430_v23 = vmul.f32 10619610.0, %v7908_v10  ;;  %v7957_v9 = vpop.eup %5210  ;;  %v2443_v40 = vadd.f32 11246929.0, %v2427_v13 }
 0x2a4   : > { %11171 = vst [vmem:[#allocation122_spill] sm:$0xff] %v7941_v52  ;;  %11172 = vst [vmem:[#allocation123_spill] sm:$0xff] %v7943_v15  ;;  %v2444_v36 = vadd.f32 11246929.0, %v2428_v39  ;;  %v7960_v43 = vmul.f32 40320.0, %v7893_v16  ;;  %v7963_v3 = vmul.f32 40320.0, %v7898_v2  ;;  %v7965_v44 = vpop.eup %5212 }
 0x2a5   : > { %11173 = vst [vmem:[#allocation125_spill] sm:$0xff] %v7945_v56  ;;  %11174 = vst [vmem:[#allocation140_spill] sm:$0xff] %v7950_v49  ;;  %v2431_v33 = vmul.f32 10619610.0, %v7915_v48  ;;  %v2432_v38 = vmul.f32 10619610.0, %v7923_v27  ;;  %v7975_v22 = vpop.eup %5214 }
 0x2a6   : > { %11175 = vst [vmem:[#allocation141_spill] sm:$0xff] %v7952_v19  ;;  %11176 = vst [vmem:[#allocation142_spill] sm:$0xff] %v7954_v34  ;;  %v7970_v1 = vmul.f32 40320.0, %v7903_v18  ;;  %v7973_v46 = vmul.f32 40320.0, %v7908_v10  ;;  %v11177_v50 = vld [vmem:[#allocation102_spill] sm:$0xff]  ;;  %v11178_v51 = vld [vmem:[#allocation72_spill] sm:$0xff]  ;;  %v7985_v56 = vpop.eup %5216 }
 0x2a7   : > { %v11179_v13 = vsub.f32 %v11177_v50, %v11178_v51  ;;  %v2433_v34 = vmul.f32 10619610.0, %v7929_v32  ;;  %v2434_v19 = vmul.f32 10619610.0, %v7939_v24  ;;  %v2445_v49 = vadd.f32 11246929.0, %v2429_v4 }
 0x2a8   : > { %v11182_v15 = vld [vmem:[#allocation73_spill] sm:$0xff]  ;;  %v2435_v21 = vmul.f32 10619610.0, %v7948_v17  ;;  %v2436_v50 = vmul.f32 10619610.0, %v7957_v9  ;;  %v8025_v57 = vmul.f32 40320.0, %v7915_v48 }
 0x2a9   : > { %v7981_v39 = vadd.f32 %v7528_v41, %v11179_v13  ;;  %v11183_v53 = vsub.f32 %v11181_v6, %v11182_v15  ;;  %v2446_v51 = vadd.f32 11246929.0, %v2430_v23  ;;  %v7995_v41 = vpop.eup %5218  ;;  %v11185_v13 = vld [vmem:[#allocation104_spill] sm:$0xff]  ;;  %v2437_v14 = vmul.f32 10619610.0, %v7965_v44  ;;  %v11189_v15 = vld [vmem:[#allocation105_spill] sm:$0xff] }
 0x2aa   : > { %v2438_v6 = vmul.f32 10619610.0, %v7975_v22  ;;  %v2440_v45 = vmul.f32 10619610.0, %v7995_v41  ;;  %v2449_v5 = vadd.f32 11246929.0, %v2433_v34 }
 0x2ab   : > { %11180 = vst [vmem:[#allocation102_spill] sm:$0xff] %v7981_v39  ;;  %v7991_v52 = vadd.f32 %v7537_v25, %v11183_v53  ;;  %v11186_v39 = vld [vmem:[#allocation74_spill] sm:$0xff]  ;;  %v2439_v25 = vmul.f32 10619610.0, %v7985_v56  ;;  %v8006_v53 = vpop.eup %5220  ;;  %v2450_v35 = vadd.f32 11246929.0, %v2434_v19 }
 0x2ac   : > { %v11187_v12 = vsub.f32 %v11185_v13, %v11186_v39  ;;  %v2447_v39 = vadd.f32 11246929.0, %v2431_v33  ;;  %v2448_v13 = vadd.f32 11246929.0, %v2432_v38  ;;  %v2451_v63 = vadd.f32 11246929.0, %v2435_v21 }
 0x2ad   : > { %11184 = vst [vmem:[#allocation72_spill] sm:$0xff] %v7991_v52  ;;  %v11190_v52 = vld [vmem:[#allocation75_spill] sm:$0xff]  ;;  %v2452_v30 = vadd.f32 11246929.0, %v2436_v50  ;;  %v2460_v33 = vmul.f32 %v7898_v2, %v2444_v36  ;;  %v2456_v38 = vadd.f32 11246929.0, %v2440_v45  ;;  %v2466_v50 = vmul.f32 %v7939_v24, %v2450_v35 }
 0x2ae   : > { %v8001_v4 = vadd.f32 %v7541_v37, %v11187_v12  ;;  %v11191_v20 = vsub.f32 %v11189_v15, %v11190_v52  ;;  %v8015_v37 = vpop.eup %5222  ;;  %v11193_v12 = vld [vmem:[#allocation58_spill] sm:$0xff]  ;;  %v2459_v52 = vmul.f32 %v7893_v16, %v2443_v40  ;;  %v2455_v15 = vadd.f32 11246929.0, %v2439_v25 }
 0x2af   : > { %5224 = vlog2.f32 %v11193_v12  ;;  %v2442_v28 = vmul.f32 10619610.0, %v8015_v37  ;;  %v2462_v12 = vmul.f32 %v7908_v10, %v2446_v51  ;;  %v2463_v34 = vmul.f32 %v7915_v48, %v2447_v39 }
 0x2b0   : > { %11188 = vst [vmem:[#allocation103_spill] sm:$0xff] %v8001_v4  ;;  %v8012_v23 = vadd.f32 %v7544_v7, %v11191_v20  ;;  %v2441_v4 = vmul.f32 10619610.0, %v8006_v53  ;;  %v2453_v7 = vadd.f32 11246929.0, %v2437_v14  ;;  %v2464_v21 = vmul.f32 %v7923_v27, %v2448_v13 }
 0x2b1   : > { %v2454_v20 = vadd.f32 11246929.0, %v2438_v6  ;;  %v2465_v40 = vmul.f32 %v7929_v32, %v2449_v5  ;;  %v2458_v14 = vadd.f32 11246929.0, %v2442_v28  ;;  %v2467_v36 = vmul.f32 %v7948_v17, %v2451_v63 }
 0x2b2   : > { %11192 = vst [vmem:[#allocation73_spill] sm:$0xff] %v8012_v23  ;;  %v2461_v23 = vmul.f32 %v7903_v18, %v2445_v49  ;;  %v2457_v19 = vadd.f32 11246929.0, %v2441_v4  ;;  %v2468_v45 = vmul.f32 %v7957_v9, %v2452_v30  ;;  %v2469_v49 = vmul.f32 %v7965_v44, %v2453_v7 }
 0x2b3   : > { %v2470_v51 = vmul.f32 %v7975_v22, %v2454_v20  ;;  %v2471_v6 = vmul.f32 %v7985_v56, %v2455_v15  ;;  %v2475_v4 = vadd.f32 5210869.0, %v2459_v52  ;;  %v2472_v25 = vmul.f32 %v7995_v41, %v2456_v38 }
 0x2b4   : > { %v2476_v39 = vadd.f32 5210869.0, %v2460_v33  ;;  %v2477_v13 = vadd.f32 5210869.0, %v2461_v23  ;;  %v2478_v8 = vadd.f32 5210869.0, %v2462_v12  ;;  %v2473_v28 = vmul.f32 %v8006_v53, %v2457_v19 }
 0x2b5   : > { %v2479_v5 = vadd.f32 5210869.0, %v2463_v34  ;;  %v2480_v35 = vadd.f32 5210869.0, %v2464_v21  ;;  %v2481_v62 = vadd.f32 5210869.0, %v2465_v40  ;;  %v2474_v63 = vmul.f32 %v8015_v37, %v2458_v14 }
 0x2b6   : > { %v2482_v30 = vadd.f32 5210869.0, %v2466_v50  ;;  %v2483_v58 = vadd.f32 5210869.0, %v2467_v36  ;;  %v2484_v7 = vadd.f32 5210869.0, %v2468_v45  ;;  %v2491_v38 = vmul.f32 %v7893_v16, %v2475_v4 }
 0x2b7   : > { %v2485_v20 = vadd.f32 5210869.0, %v2469_v49  ;;  %v2486_v15 = vadd.f32 5210869.0, %v2470_v51  ;;  %v2487_v52 = vadd.f32 5210869.0, %v2471_v6  ;;  %v2492_v23 = vmul.f32 %v7898_v2, %v2476_v39 }
 0x2b8   : > { %v2488_v33 = vadd.f32 5210869.0, %v2472_v25  ;;  %v2493_v12 = vmul.f32 %v7903_v18, %v2477_v13  ;;  %v2494_v19 = vmul.f32 %v7908_v10, %v2478_v8  ;;  %v2489_v34 = vadd.f32 5210869.0, %v2473_v28 }
 0x2b9   : > { %v8039_v55 = vpop.eup %5224  ;;  %v2495_v21 = vmul.f32 %v7915_v48, %v2479_v5  ;;  %v2496_v40 = vmul.f32 %v7923_v27, %v2480_v35  ;;  %v2497_v14 = vmul.f32 %v7929_v32, %v2481_v62  ;;  %v2490_v50 = vadd.f32 5210869.0, %v2474_v63 }
 0x2ba   : > { %11194 = vst [vmem:[#allocation104_spill] sm:$0xff] %v8039_v55  ;;  %v2498_v36 = vmul.f32 %v7939_v24, %v2482_v30  ;;  %v2499_v45 = vmul.f32 %v7948_v17, %v2483_v58  ;;  %v2500_v49 = vmul.f32 %v7957_v9, %v2484_v7  ;;  %v2501_v51 = vmul.f32 %v7965_v44, %v2485_v20  ;;  %v11195_v55 = vld [vmem:[#allocation112_spill] sm:$0xff] }
 0x2bb   : > { %v2502_v6 = vmul.f32 %v7975_v22, %v2486_v15  ;;  %v2503_v8 = vmul.f32 %v7985_v56, %v2487_v52  ;;  %v2507_v4 = vadd.f32 1379496.3, %v2491_v38  ;;  %v2504_v25 = vmul.f32 %v7995_v41, %v2488_v33 }
 0x2bc   : > { %v2508_v39 = vadd.f32 1379496.3, %v2492_v23  ;;  %v2509_v13 = vadd.f32 1379496.3, %v2493_v12  ;;  %v2510_v28 = vadd.f32 1379496.3, %v2494_v19  ;;  %v2505_v62 = vmul.f32 %v8006_v53, %v2489_v34 }
 0x2bd   : > { %v2511_v5 = vadd.f32 1379496.3, %v2495_v21  ;;  %v2512_v35 = vadd.f32 1379496.3, %v2496_v40  ;;  %v2513_v63 = vadd.f32 1379496.3, %v2497_v14  ;;  %v2506_v58 = vmul.f32 %v8015_v37, %v2490_v50 }
 0x2be   : > { %v2514_v30 = vadd.f32 1379496.3, %v2498_v36  ;;  %v2515_v7 = vadd.f32 1379496.3, %v2499_v45  ;;  %v2516_v20 = vadd.f32 1379496.3, %v2500_v49  ;;  %5226 = vlog2.f32 %v11195_v55 }
 0x2bf   : > { %v2517_v15 = vadd.f32 1379496.3, %v2501_v51  ;;  %v2518_v52 = vadd.f32 1379496.3, %v2502_v6  ;;  %v2519_v38 = vadd.f32 1379496.3, %v2503_v8  ;;  %v2523_v33 = vmul.f32 %v7893_v16, %v2507_v4 }
 0x2c0   : > { %v2520_v61 = vadd.f32 1379496.3, %v2504_v25  ;;  %v2524_v23 = vmul.f32 %v7898_v2, %v2508_v39  ;;  %v2525_v12 = vmul.f32 %v7903_v18, %v2509_v13  ;;  %v2521_v19 = vadd.f32 1379496.3, %v2505_v62 }
 0x2c1   : > { %v2526_v34 = vmul.f32 %v7908_v10, %v2510_v28  ;;  %v2527_v21 = vmul.f32 %v7915_v48, %v2511_v5  ;;  %v2528_v40 = vmul.f32 %v7923_v27, %v2512_v35  ;;  %v2522_v14 = vadd.f32 1379496.3, %v2506_v58 }
 0x2c2   : > { %v2529_v50 = vmul.f32 %v7929_v32, %v2513_v63  ;;  %v2530_v36 = vmul.f32 %v7939_v24, %v2514_v30  ;;  %v2531_v45 = vmul.f32 %v7948_v17, %v2515_v7  ;;  %v2532_v49 = vmul.f32 %v7957_v9, %v2516_v20 }
 0x2c3   : > { %v2533_v51 = vmul.f32 %v7965_v44, %v2517_v15  ;;  %v2534_v6 = vmul.f32 %v7975_v22, %v2518_v52  ;;  %v2535_v8 = vmul.f32 %v7985_v56, %v2519_v38  ;;  %v2536_v4 = vmul.f32 %v7995_v41, %v2520_v61  ;;  %v11210_v15 = vld [vmem:[#allocation52_spill] sm:$0xff] }
 0x2c4   : > { %v2539_v25 = vadd.f32 228235.22, %v2523_v33  ;;  %v2540_v39 = vadd.f32 228235.22, %v2524_v23  ;;  %v2541_v13 = vadd.f32 228235.22, %v2525_v12  ;;  %v2537_v28 = vmul.f32 %v8006_v53, %v2521_v19 }
 0x2c5   : > { %v2542_v62 = vadd.f32 228235.22, %v2526_v34  ;;  %v2543_v5 = vadd.f32 228235.22, %v2527_v21  ;;  %v2544_v35 = vadd.f32 228235.22, %v2528_v40  ;;  %v2538_v63 = vmul.f32 %v8015_v37, %v2522_v14 }
 0x2c6   : > { %v2545_v58 = vadd.f32 228235.22, %v2529_v50  ;;  %v2546_v30 = vadd.f32 228235.22, %v2530_v36  ;;  %v2547_v7 = vadd.f32 228235.22, %v2531_v45  ;;  %v2555_v23 = vmul.f32 %v7893_v16, %v2539_v25 }
 0x2c7   : > { %v2548_v52 = vadd.f32 228235.22, %v2532_v49  ;;  %v2549_v38 = vadd.f32 228235.22, %v2533_v51  ;;  %v2550_v55 = vadd.f32 228235.22, %v2534_v6  ;;  %v2556_v12 = vmul.f32 %v7898_v2, %v2540_v39 }
 0x2c8   : > { %v2551_v61 = vadd.f32 228235.22, %v2535_v8  ;;  %v2552_v33 = vadd.f32 228235.22, %v2536_v4  ;;  %v8078_v19 = vpop.eup %5226  ;;  %v2553_v34 = vadd.f32 228235.22, %v2537_v28  ;;  %v2557_v21 = vmul.f32 %v7903_v18, %v2541_v13 }
 0x2c9   : > { %11197 = vst [vmem:[#allocation74_spill] sm:$0xff] %v8078_v19  ;;  %v2558_v40 = vmul.f32 %v7908_v10, %v2542_v62  ;;  %v2559_v14 = vmul.f32 %v7915_v48, %v2543_v5  ;;  %v2554_v50 = vadd.f32 228235.22, %v2538_v63  ;;  %v2560_v36 = vmul.f32 %v7923_v27, %v2544_v35 }
 0x2ca   : > { %v2561_v45 = vmul.f32 %v7929_v32, %v2545_v58  ;;  %v2562_v49 = vmul.f32 %v7939_v24, %v2546_v30  ;;  %v2563_v51 = vmul.f32 %v7948_v17, %v2547_v7  ;;  %v2564_v6 = vmul.f32 %v7957_v9, %v2548_v52 }
 0x2cb   : > { %v2565_v8 = vmul.f32 %v7965_v44, %v2549_v38  ;;  %v2566_v4 = vmul.f32 %v7975_v22, %v2550_v55  ;;  %v2567_v25 = vmul.f32 %v7985_v56, %v2551_v61  ;;  %v2568_v39 = vmul.f32 %v7995_v41, %v2552_v33 }
 0x2cc   : > { %v2571_v13 = vadd.f32 24165.51, %v2555_v23  ;;  %v2572_v28 = vadd.f32 24165.51, %v2556_v12  ;;  %v2569_v62 = vmul.f32 %v8006_v53, %v2553_v34  ;;  %v2573_v5 = vadd.f32 24165.51, %v2557_v21 }
 0x2cd   : > { %v2574_v35 = vadd.f32 24165.51, %v2558_v40  ;;  %v2575_v63 = vadd.f32 24165.51, %v2559_v14  ;;  %v2570_v58 = vmul.f32 %v8015_v37, %v2554_v50  ;;  %v2576_v30 = vadd.f32 24165.51, %v2560_v36 }
 0x2ce   : > { %v2577_v7 = vadd.f32 24165.51, %v2561_v45  ;;  %v2578_v52 = vadd.f32 24165.51, %v2562_v49  ;;  %v2579_v55 = vadd.f32 24165.51, %v2563_v51  ;;  %v2587_v40 = vmul.f32 %v7893_v16, %v2571_v13 }
 0x2cf   : > { %v2580_v20 = vadd.f32 24165.51, %v2564_v6  ;;  %v2581_v61 = vadd.f32 24165.51, %v2565_v8  ;;  %v2582_v23 = vadd.f32 24165.51, %v2566_v4  ;;  %v2588_v14 = vmul.f32 %v7898_v2, %v2572_v28 }
 0x2d0   : > { %v2583_v12 = vadd.f32 24165.51, %v2567_v25  ;;  %v2584_v34 = vadd.f32 24165.51, %v2568_v39  ;;  %v2585_v21 = vadd.f32 24165.51, %v2569_v62  ;;  %v2589_v50 = vmul.f32 %v7903_v18, %v2573_v5 }
 0x2d1   : > { %v2586_v36 = vadd.f32 24165.51, %v2570_v58  ;;  %v2590_v45 = vmul.f32 %v7908_v10, %v2574_v35  ;;  %v2591_v49 = vmul.f32 %v7915_v48, %v2575_v63  ;;  %v2592_v51 = vmul.f32 %v7923_v27, %v2576_v30 }
 0x2d2   : > { %v2593_v6 = vmul.f32 %v7929_v32, %v2577_v7  ;;  %v2594_v8 = vmul.f32 %v7939_v24, %v2578_v52  ;;  %v2595_v4 = vmul.f32 %v7948_v17, %v2579_v55  ;;  %v2596_v25 = vmul.f32 %v7957_v9, %v2580_v20 }
 0x2d3   : > { %v2597_v39 = vmul.f32 %v7965_v44, %v2581_v61  ;;  %v2598_v13 = vmul.f32 %v7975_v22, %v2582_v23  ;;  %v2599_v28 = vmul.f32 %v7985_v56, %v2583_v12  ;;  %v2600_v62 = vmul.f32 %v7995_v41, %v2584_v34 }
 0x2d4   : > { %v2601_v5 = vmul.f32 %v8006_v53, %v2585_v21  ;;  %v2603_v35 = vadd.f32 1599.0425, %v2587_v40  ;;  %v2604_v63 = vadd.f32 1599.0425, %v2588_v14  ;;  %v2605_v58 = vadd.f32 1599.0425, %v2589_v50 }
 0x2d5   : > { %v2602_v30 = vmul.f32 %v8015_v37, %v2586_v36  ;;  %v2606_v7 = vadd.f32 1599.0425, %v2590_v45  ;;  %v2607_v52 = vadd.f32 1599.0425, %v2591_v49  ;;  %v2608_v55 = vadd.f32 1599.0425, %v2592_v51 }
 0x2d6   : > { %v2609_v61 = vadd.f32 1599.0425, %v2593_v6  ;;  %v2610_v38 = vadd.f32 1599.0425, %v2594_v8  ;;  %v2611_v23 = vadd.f32 1599.0425, %v2595_v4  ;;  %v2619_v36 = vmul.f32 %v7893_v16, %v2603_v35 }
 0x2d7   : > { %v2612_v34 = vadd.f32 1599.0425, %v2596_v25  ;;  %v2613_v42 = vadd.f32 1599.0425, %v2597_v39  ;;  %v2614_v21 = vadd.f32 1599.0425, %v2598_v13  ;;  %v2620_v49 = vmul.f32 %v7898_v2, %v2604_v63 }
 0x2d8   : > { %v2615_v40 = vadd.f32 1599.0425, %v2599_v28  ;;  %v2616_v14 = vadd.f32 1599.0425, %v2600_v62  ;;  %v2617_v50 = vadd.f32 1599.0425, %v2601_v5  ;;  %v2621_v51 = vmul.f32 %v7903_v18, %v2605_v58 }
 0x2d9   : > { %v2618_v45 = vadd.f32 1599.0425, %v2602_v30  ;;  %v2622_v6 = vmul.f32 %v7908_v10, %v2606_v7  ;;  %v2623_v8 = vmul.f32 %v7915_v48, %v2607_v52  ;;  %v2624_v4 = vmul.f32 %v7923_v27, %v2608_v55 }
 0x2da   : > { %v2625_v25 = vmul.f32 %v7929_v32, %v2609_v61  ;;  %v2626_v39 = vmul.f32 %v7939_v24, %v2610_v38  ;;  %v2627_v13 = vmul.f32 %v7948_v17, %v2611_v23  ;;  %v2628_v28 = vmul.f32 %v7957_v9, %v2612_v34 }
 0x2db   : > { %v2629_v62 = vmul.f32 %v7965_v44, %v2613_v42  ;;  %v2630_v5 = vmul.f32 %v7975_v22, %v2614_v21  ;;  %v2631_v35 = vmul.f32 %v7985_v56, %v2615_v40  ;;  %v2632_v63 = vmul.f32 %v7995_v41, %v2616_v14  ;;  %v11205_v21 = vld [vmem:[#allocation91_spill] sm:$0xff] }
 0x2dc   : > { %v2633_v58 = vmul.f32 %v8006_v53, %v2617_v50  ;;  %v2635_v30 = vadd.f32 60.458332, %v2619_v36  ;;  %v2634_v7 = vmul.f32 %v8015_v37, %v2618_v45  ;;  %v2636_v52 = vadd.f32 60.458332, %v2620_v49 }
 0x2dd   : > { %v2637_v55 = vadd.f32 60.458332, %v2621_v51  ;;  %v2638_v38 = vadd.f32 60.458332, %v2622_v6  ;;  %v2639_v34 = vadd.f32 60.458332, %v2623_v8  ;;  %v8138_v59 = vmul.f32 %v11205_v21, %v11204_v54 }
 0x2de   : > { %v2640_v20 = vadd.f32 60.458332, %v2624_v4  ;;  %v2641_v42 = vadd.f32 60.458332, %v2625_v25  ;;  %v2642_v40 = vadd.f32 60.458332, %v2626_v39  ;;  %v2651_v12 = vmul.f32 %v7893_v16, %v2635_v30 }
 0x2df   : > { %11206 = vst [vmem:[#allocation105_spill] sm:$0xff] %v8138_v59  ;;  %v2643_v14 = vadd.f32 60.458332, %v2627_v13  ;;  %v2644_v33 = vadd.f32 60.458332, %v2628_v28  ;;  %v11209_v6 = vld [vmem:[#allocation116_spill] sm:$0xff]  ;;  %v2652_v54 = vmul.f32 %v7898_v2, %v2636_v52  ;;  %v2653_v39 = vmul.f32 %v7903_v18, %v2637_v55 }
 0x2e0   : > { %v2645_v45 = vadd.f32 60.458332, %v2629_v62  ;;  %v2646_v49 = vadd.f32 60.458332, %v2630_v5  ;;  %v2647_v51 = vadd.f32 60.458332, %v2631_v35  ;;  %v8144_v31 = vmul.f32 %v11210_v15, %v11209_v6 }
 0x2e1   : > { %v2648_v8 = vadd.f32 60.458332, %v2632_v63  ;;  %v2649_v4 = vadd.f32 60.458332, %v2633_v58  ;;  %v2650_v25 = vadd.f32 60.458332, %v2634_v7  ;;  %v2654_v13 = vmul.f32 %v7908_v10, %v2638_v38 }
 0x2e2   : > { %11211 = vst [vmem:[#allocation75_spill] sm:$0xff] %v8144_v31  ;;  %v2655_v28 = vmul.f32 %v7915_v48, %v2639_v34  ;;  %v2656_v62 = vmul.f32 %v7923_v27, %v2640_v20  ;;  %v8153_v5 = vmul.f32 %v7929_v32, %v2641_v42  ;;  %v8156_v15 = vmul.f32 %v7939_v24, %v2642_v40 }
 0x2e3   : > { %v8159_v35 = vmul.f32 %v7948_v17, %v2643_v14  ;;  %v8162_v63 = vmul.f32 %v7957_v9, %v2644_v33  ;;  %v8165_v58 = vmul.f32 %v7965_v44, %v2645_v45  ;;  %v8168_v30 = vmul.f32 %v7975_v22, %v2646_v49 }
 0x2e4   : > { %v8171_v20 = vmul.f32 %v7985_v56, %v2647_v51  ;;  %v8174_v7 = vmul.f32 %v7995_v41, %v2648_v8  ;;  %v8177_v52 = vmul.f32 %v8006_v53, %v2649_v4  ;;  %v8180_v55 = vmul.f32 %v8015_v37, %v2650_v25 }
 0x2e5   : > { %11212 = vst [vmem:[#allocation64_spill] sm:$0xff] %v8168_v30  ;;  %v8182_v33 = vadd.f32 1.0, %v2651_v12  ;;  %v8184_v38 = vadd.f32 1.0, %v2652_v54  ;;  %v8186_v34 = vadd.f32 1.0, %v2653_v39  ;;  %v8188_v42 = vadd.f32 1.0, %v2654_v13 }
 0x2e6   : > { %11213 = vst [vmem:[#allocation91_spill] sm:$0xff] %v8171_v20  ;;  %11214 = vst [vmem:[#allocation116_spill] sm:$0xff] %v8174_v7  ;;  %v8190_v21 = vadd.f32 1.0, %v2655_v28  ;;  %v8192_v40 = vadd.f32 1.0, %v2656_v62  ;;  %v2688_v14 = vmul.f32 40320.0, %v7923_v27  ;;  %v2689_v49 = vmul.f32 40320.0, %v7929_v32 }
 0x2e7   : > { %11215 = vst [vmem:[#allocation52_spill] sm:$0xff] %v8177_v52  ;;  %11216 = vst [vmem:[#allocation143_spill] sm:$0xff] %v8180_v55  ;;  %v2699_v45 = vadd.f32 109584.0, %v7960_v43  ;;  %v2690_v51 = vmul.f32 40320.0, %v7939_v24  ;;  %v2691_v12 = vmul.f32 40320.0, %v7948_v17 }
 0x2e8   : > { %v2700_v6 = vadd.f32 109584.0, %v7963_v3  ;;  %v2692_v8 = vmul.f32 40320.0, %v7957_v9  ;;  %v2693_v4 = vmul.f32 40320.0, %v7965_v44  ;;  %v2694_v25 = vmul.f32 40320.0, %v7975_v22 }
 0x2e9   : > { %v2701_v54 = vadd.f32 109584.0, %v7970_v1  ;;  %v2695_v39 = vmul.f32 40320.0, %v7985_v56  ;;  %v2696_v43 = vmul.f32 40320.0, %v7995_v41  ;;  %v2697_v13 = vmul.f32 40320.0, %v8006_v53 }
 0x2ea   : > { %v2702_v28 = vadd.f32 109584.0, %v7973_v46  ;;  %v2698_v62 = vmul.f32 40320.0, %v8015_v37  ;;  %v2703_v3 = vadd.f32 109584.0, %v8025_v57  ;;  %v2715_v50 = vmul.f32 %v7893_v16, %v2699_v45 }
 0x2eb   : > { %v2704_v47 = vadd.f32 109584.0, %v2688_v14  ;;  %v2705_v36 = vadd.f32 109584.0, %v2689_v49  ;;  %v2706_v61 = vadd.f32 109584.0, %v2690_v51  ;;  %v2716_v1 = vmul.f32 %v7898_v2, %v2700_v6 }
 0x2ec   : > { %v2707_v23 = vadd.f32 109584.0, %v2691_v12  ;;  %v2708_v31 = vadd.f32 109584.0, %v2692_v8  ;;  %v2709_v19 = vadd.f32 109584.0, %v2693_v4  ;;  %v2717_v55 = vmul.f32 %v7903_v18, %v2701_v54 }
 0x2ed   : > { %v2710_v59 = vadd.f32 109584.0, %v2694_v25  ;;  %v2711_v52 = vadd.f32 109584.0, %v2695_v39  ;;  %v2712_v7 = vadd.f32 109584.0, %v2696_v43  ;;  %v2718_v20 = vmul.f32 %v7908_v10, %v2702_v28 }
 0x2ee   : > { %v2713_v46 = vadd.f32 109584.0, %v2697_v13  ;;  %v2714_v30 = vadd.f32 109584.0, %v2698_v62  ;;  %v2719_v57 = vmul.f32 %v7915_v48, %v2703_v3  ;;  %v2720_v14 = vmul.f32 %v7923_v27, %v2704_v47 }
 0x2ef   : > { %v2731_v45 = vadd.f32 118124.0, %v2715_v50  ;;  %v2721_v49 = vmul.f32 %v7929_v32, %v2705_v36  ;;  %v2722_v51 = vmul.f32 %v7939_v24, %v2706_v61  ;;  %v2723_v12 = vmul.f32 %v7948_v17, %v2707_v23 }
 0x2f0   : > { %v2732_v6 = vadd.f32 118124.0, %v2716_v1  ;;  %v2724_v8 = vmul.f32 %v7957_v9, %v2708_v31  ;;  %v2725_v4 = vmul.f32 %v7965_v44, %v2709_v19  ;;  %v2726_v25 = vmul.f32 %v7975_v22, %v2710_v59 }
 0x2f1   : > { %v2733_v54 = vadd.f32 118124.0, %v2717_v55  ;;  %v2727_v39 = vmul.f32 %v7985_v56, %v2711_v52  ;;  %v2728_v43 = vmul.f32 %v7995_v41, %v2712_v7  ;;  %v2729_v47 = vmul.f32 %v8006_v53, %v2713_v46 }
 0x2f2   : > { %v2734_v50 = vadd.f32 118124.0, %v2718_v20  ;;  %v2730_v36 = vmul.f32 %v8015_v37, %v2714_v30  ;;  %v2735_v61 = vadd.f32 118124.0, %v2719_v57  ;;  %v2736_v13 = vadd.f32 118124.0, %v2720_v14 }
 0x2f3   : > { %v2747_v23 = vmul.f32 %v7893_v16, %v2731_v45  ;;  %v2737_v28 = vadd.f32 118124.0, %v2721_v49  ;;  %v2738_v31 = vadd.f32 118124.0, %v2722_v51  ;;  %v2739_v62 = vadd.f32 118124.0, %v2723_v12 }
 0x2f4   : > { %v2748_v19 = vmul.f32 %v7898_v2, %v2732_v6  ;;  %v2740_v59 = vadd.f32 118124.0, %v2724_v8  ;;  %v2741_v55 = vadd.f32 118124.0, %v2725_v4  ;;  %v2742_v3 = vadd.f32 118124.0, %v2726_v25 }
 0x2f5   : > { %v2749_v52 = vmul.f32 %v7903_v18, %v2733_v54  ;;  %v2743_v7 = vadd.f32 118124.0, %v2727_v39  ;;  %v2744_v1 = vadd.f32 118124.0, %v2728_v43  ;;  %v2745_v46 = vadd.f32 118124.0, %v2729_v47 }
 0x2f6   : > { %v2750_v20 = vmul.f32 %v7908_v10, %v2734_v50  ;;  %v2746_v30 = vadd.f32 118124.0, %v2730_v36  ;;  %v2751_v57 = vmul.f32 %v7915_v48, %v2735_v61  ;;  %v2752_v14 = vmul.f32 %v7923_v27, %v2736_v13 }
 0x2f7   : > { %v2763_v45 = vadd.f32 67284.0, %v2747_v23  ;;  %v2753_v49 = vmul.f32 %v7929_v32, %v2737_v28  ;;  %v2754_v51 = vmul.f32 %v7939_v24, %v2738_v31  ;;  %v2755_v12 = vmul.f32 %v7948_v17, %v2739_v62 }
 0x2f8   : > { %v2764_v6 = vadd.f32 67284.0, %v2748_v19  ;;  %v2756_v8 = vmul.f32 %v7957_v9, %v2740_v59  ;;  %v2757_v4 = vmul.f32 %v7965_v44, %v2741_v55  ;;  %v2758_v25 = vmul.f32 %v7975_v22, %v2742_v3 }
 0x2f9   : > { %v2765_v54 = vadd.f32 67284.0, %v2749_v52  ;;  %v2759_v39 = vmul.f32 %v7985_v56, %v2743_v7  ;;  %v2760_v43 = vmul.f32 %v7995_v41, %v2744_v1  ;;  %v2761_v47 = vmul.f32 %v8006_v53, %v2745_v46 }
 0x2fa   : > { %v2766_v50 = vadd.f32 67284.0, %v2750_v20  ;;  %v2762_v36 = vmul.f32 %v8015_v37, %v2746_v30  ;;  %v2767_v61 = vadd.f32 67284.0, %v2751_v57  ;;  %v2768_v13 = vadd.f32 67284.0, %v2752_v14 }
 0x2fb   : > { %v2779_v23 = vmul.f32 %v7893_v16, %v2763_v45  ;;  %v2769_v28 = vadd.f32 67284.0, %v2753_v49  ;;  %v2770_v31 = vadd.f32 67284.0, %v2754_v51  ;;  %v2771_v62 = vadd.f32 67284.0, %v2755_v12 }
 0x2fc   : > { %v2780_v19 = vmul.f32 %v7898_v2, %v2764_v6  ;;  %v2772_v59 = vadd.f32 67284.0, %v2756_v8  ;;  %v2773_v55 = vadd.f32 67284.0, %v2757_v4  ;;  %v2774_v3 = vadd.f32 67284.0, %v2758_v25 }
 0x2fd   : > { %v2781_v52 = vmul.f32 %v7903_v18, %v2765_v54  ;;  %v2775_v7 = vadd.f32 67284.0, %v2759_v39  ;;  %v2776_v1 = vadd.f32 67284.0, %v2760_v43  ;;  %v2777_v46 = vadd.f32 67284.0, %v2761_v47 }
 0x2fe   : > { %v2782_v20 = vmul.f32 %v7908_v10, %v2766_v50  ;;  %v2778_v30 = vadd.f32 67284.0, %v2762_v36  ;;  %v2783_v57 = vmul.f32 %v7915_v48, %v2767_v61  ;;  %v2784_v14 = vmul.f32 %v7923_v27, %v2768_v13 }
 0x2ff   : > { %v2795_v45 = vadd.f32 22449.0, %v2779_v23  ;;  %v2785_v49 = vmul.f32 %v7929_v32, %v2769_v28  ;;  %v2786_v51 = vmul.f32 %v7939_v24, %v2770_v31  ;;  %v2787_v12 = vmul.f32 %v7948_v17, %v2771_v62 }
 0x300   : > { %v2796_v6 = vadd.f32 22449.0, %v2780_v19  ;;  %v2788_v8 = vmul.f32 %v7957_v9, %v2772_v59  ;;  %v2789_v4 = vmul.f32 %v7965_v44, %v2773_v55  ;;  %v2790_v25 = vmul.f32 %v7975_v22, %v2774_v3 }
 0x301   : > { %v2797_v54 = vadd.f32 22449.0, %v2781_v52  ;;  %v2791_v39 = vmul.f32 %v7985_v56, %v2775_v7  ;;  %v2792_v43 = vmul.f32 %v7995_v41, %v2776_v1  ;;  %v2793_v47 = vmul.f32 %v8006_v53, %v2777_v46 }
 0x302   : > { %v2798_v50 = vadd.f32 22449.0, %v2782_v20  ;;  %v2794_v36 = vmul.f32 %v8015_v37, %v2778_v30  ;;  %v2799_v61 = vadd.f32 22449.0, %v2783_v57  ;;  %v2800_v13 = vadd.f32 22449.0, %v2784_v14 }
 0x303   : > { %v2811_v23 = vmul.f32 %v7893_v16, %v2795_v45  ;;  %v2801_v28 = vadd.f32 22449.0, %v2785_v49  ;;  %v2802_v31 = vadd.f32 22449.0, %v2786_v51  ;;  %v2803_v62 = vadd.f32 22449.0, %v2787_v12 }
 0x304   : > { %v2812_v19 = vmul.f32 %v7898_v2, %v2796_v6  ;;  %v2804_v59 = vadd.f32 22449.0, %v2788_v8  ;;  %v2805_v55 = vadd.f32 22449.0, %v2789_v4  ;;  %v2806_v3 = vadd.f32 22449.0, %v2790_v25 }
 0x305   : > { %v2813_v52 = vmul.f32 %v7903_v18, %v2797_v54  ;;  %v2807_v7 = vadd.f32 22449.0, %v2791_v39  ;;  %v2808_v1 = vadd.f32 22449.0, %v2792_v43  ;;  %v2809_v46 = vadd.f32 22449.0, %v2793_v47 }
 0x306   : > { %v2814_v20 = vmul.f32 %v7908_v10, %v2798_v50  ;;  %v2810_v30 = vadd.f32 22449.0, %v2794_v36  ;;  %v2815_v57 = vmul.f32 %v7915_v48, %v2799_v61  ;;  %v2816_v14 = vmul.f32 %v7923_v27, %v2800_v13 }
 0x307   : > { %v2827_v45 = vadd.f32 4536.0, %v2811_v23  ;;  %v2817_v49 = vmul.f32 %v7929_v32, %v2801_v28  ;;  %v2818_v51 = vmul.f32 %v7939_v24, %v2802_v31  ;;  %v2819_v12 = vmul.f32 %v7948_v17, %v2803_v62 }
 0x308   : > { %v2828_v6 = vadd.f32 4536.0, %v2812_v19  ;;  %v2820_v8 = vmul.f32 %v7957_v9, %v2804_v59  ;;  %v2821_v4 = vmul.f32 %v7965_v44, %v2805_v55  ;;  %v2822_v25 = vmul.f32 %v7975_v22, %v2806_v3 }
 0x309   : > { %v2829_v54 = vadd.f32 4536.0, %v2813_v52  ;;  %v2823_v39 = vmul.f32 %v7985_v56, %v2807_v7  ;;  %v2824_v43 = vmul.f32 %v7995_v41, %v2808_v1  ;;  %v2825_v47 = vmul.f32 %v8006_v53, %v2809_v46 }
 0x30a   : > { %v2830_v50 = vadd.f32 4536.0, %v2814_v20  ;;  %v2826_v36 = vmul.f32 %v8015_v37, %v2810_v30  ;;  %v2831_v61 = vadd.f32 4536.0, %v2815_v57  ;;  %v2832_v13 = vadd.f32 4536.0, %v2816_v14 }
 0x30b   : > { %v2843_v23 = vmul.f32 %v7893_v16, %v2827_v45  ;;  %v2833_v28 = vadd.f32 4536.0, %v2817_v49  ;;  %v2834_v31 = vadd.f32 4536.0, %v2818_v51  ;;  %v2835_v62 = vadd.f32 4536.0, %v2819_v12 }
 0x30c   : > { %v2844_v19 = vmul.f32 %v7898_v2, %v2828_v6  ;;  %v2836_v59 = vadd.f32 4536.0, %v2820_v8  ;;  %v2837_v55 = vadd.f32 4536.0, %v2821_v4  ;;  %v2838_v3 = vadd.f32 4536.0, %v2822_v25 }
 0x30d   : > { %v2845_v52 = vmul.f32 %v7903_v18, %v2829_v54  ;;  %v2839_v7 = vadd.f32 4536.0, %v2823_v39  ;;  %v2840_v1 = vadd.f32 4536.0, %v2824_v43  ;;  %v2841_v46 = vadd.f32 4536.0, %v2825_v47 }
 0x30e   : > { %v2846_v20 = vmul.f32 %v7908_v10, %v2830_v50  ;;  %v2842_v30 = vadd.f32 4536.0, %v2826_v36  ;;  %v2847_v57 = vmul.f32 %v7915_v48, %v2831_v61  ;;  %v2848_v14 = vmul.f32 %v7923_v27, %v2832_v13 }
 0x30f   : > { %v2859_v45 = vadd.f32 546.0, %v2843_v23  ;;  %v2849_v49 = vmul.f32 %v7929_v32, %v2833_v28  ;;  %v2850_v51 = vmul.f32 %v7939_v24, %v2834_v31  ;;  %v2851_v12 = vmul.f32 %v7948_v17, %v2835_v62 }
 0x310   : > { %v2860_v6 = vadd.f32 546.0, %v2844_v19  ;;  %v2852_v8 = vmul.f32 %v7957_v9, %v2836_v59  ;;  %v2853_v4 = vmul.f32 %v7965_v44, %v2837_v55  ;;  %v2854_v25 = vmul.f32 %v7975_v22, %v2838_v3 }
 0x311   : > { %v2861_v54 = vadd.f32 546.0, %v2845_v52  ;;  %v2855_v39 = vmul.f32 %v7985_v56, %v2839_v7  ;;  %v2856_v43 = vmul.f32 %v7995_v41, %v2840_v1  ;;  %v2857_v47 = vmul.f32 %v8006_v53, %v2841_v46 }
 0x312   : > { %v2862_v50 = vadd.f32 546.0, %v2846_v20  ;;  %v2858_v36 = vmul.f32 %v8015_v37, %v2842_v30  ;;  %v2863_v61 = vadd.f32 546.0, %v2847_v57  ;;  %v2864_v13 = vadd.f32 546.0, %v2848_v14 }
 0x313   : > { %v2875_v23 = vmul.f32 %v7893_v16, %v2859_v45  ;;  %v2865_v28 = vadd.f32 546.0, %v2849_v49  ;;  %v2866_v31 = vadd.f32 546.0, %v2850_v51  ;;  %v2867_v62 = vadd.f32 546.0, %v2851_v12 }
 0x314   : > { %v2876_v19 = vmul.f32 %v7898_v2, %v2860_v6  ;;  %v2868_v59 = vadd.f32 546.0, %v2852_v8  ;;  %v2869_v55 = vadd.f32 546.0, %v2853_v4  ;;  %v2870_v3 = vadd.f32 546.0, %v2854_v25 }
 0x315   : > { %v2877_v52 = vmul.f32 %v7903_v18, %v2861_v54  ;;  %v2871_v7 = vadd.f32 546.0, %v2855_v39  ;;  %v2872_v1 = vadd.f32 546.0, %v2856_v43  ;;  %v2873_v46 = vadd.f32 546.0, %v2857_v47 }
 0x316   : > { %v2878_v20 = vmul.f32 %v7908_v10, %v2862_v50  ;;  %v2874_v30 = vadd.f32 546.0, %v2858_v36  ;;  %v2879_v57 = vmul.f32 %v7915_v48, %v2863_v61  ;;  %v2880_v14 = vmul.f32 %v7923_v27, %v2864_v13 }
 0x317   : > { %v2891_v45 = vadd.f32 36.0, %v2875_v23  ;;  %v2881_v49 = vmul.f32 %v7929_v32, %v2865_v28  ;;  %v2882_v51 = vmul.f32 %v7939_v24, %v2866_v31  ;;  %v2883_v12 = vmul.f32 %v7948_v17, %v2867_v62 }
 0x318   : > { %v2892_v6 = vadd.f32 36.0, %v2876_v19  ;;  %vm2939_vm0 = vcmp.gt.f32.partialorder %v11146_v29, 1.0  ;;  %v2884_v8 = vmul.f32 %v7957_v9, %v2868_v59  ;;  %v2885_v4 = vmul.f32 %v7965_v44, %v2869_v55 }
 0x319   : > { %v2886_v25 = vmul.f32 %v7975_v22, %v2870_v3  ;;  %v2893_v54 = vadd.f32 36.0, %v2877_v52  ;;  %v2887_v39 = vmul.f32 %v7985_v56, %v2871_v7  ;;  %v2888_v43 = vmul.f32 %v7995_v41, %v2872_v1 }
 0x31a   : > { %v2889_v47 = vmul.f32 %v8006_v53, %v2873_v46  ;;  %v2894_v50 = vadd.f32 36.0, %v2878_v20  ;;  %v2890_v36 = vmul.f32 %v8015_v37, %v2874_v30  ;;  %v2895_v61 = vadd.f32 36.0, %v2879_v57 }
 0x31b   : > { %v2896_v13 = vadd.f32 36.0, %v2880_v14  ;;  %v2907_v23 = vmul.f32 %v7893_v16, %v2891_v45  ;;  %v2897_v28 = vadd.f32 36.0, %v2881_v49  ;;  %v2898_v31 = vadd.f32 36.0, %v2882_v51 }
 0x31c   : > { %v2899_v62 = vadd.f32 36.0, %v2883_v12  ;;  %v2908_v19 = vmul.f32 %v7898_v2, %v2892_v6  ;;  %v2900_v59 = vadd.f32 36.0, %v2884_v8  ;;  %v2901_v55 = vadd.f32 36.0, %v2885_v4  ;;  %v11217_v8 = vld [vmem:[#allocation124_spill] sm:$0xff] }
 0x31d   : > { %v2902_v3 = vadd.f32 36.0, %v2886_v25  ;;  %v2909_v52 = vmul.f32 %v7903_v18, %v2893_v54  ;;  %v2903_v7 = vadd.f32 36.0, %v2887_v39  ;;  %v2904_v1 = vadd.f32 36.0, %v2888_v43  ;;  %v11220_v54 = vld [vmem:[#allocation68_spill] sm:$0xff] }
 0x31e   : > { %v2905_v46 = vadd.f32 36.0, %v2889_v47  ;;  %v2910_v20 = vmul.f32 %v7908_v10, %v2894_v50  ;;  %v2906_v30 = vadd.f32 36.0, %v2890_v36  ;;  %v2911_v57 = vmul.f32 %v7915_v48, %v2895_v61  ;;  %v11223_v36 = vld [vmem:[#allocation128_spill] sm:$0xff]  ;;  %v11224_v61 = vld [vmem:[#allocation69_spill] sm:$0xff] }
 0x31f   : > { %v2912_v16 = vmul.f32 %v7923_v27, %v2896_v13  ;;  %v2923_v14 = vadd.f32 1.0, %v2907_v23  ;;  %v2913_v45 = vmul.f32 %v7929_v32, %v2897_v28  ;;  %v2914_v2 = vmul.f32 %v7939_v24, %v2898_v31  ;;  %v11225_v23 = vld [vmem:[#allocation129_spill] sm:$0xff]  ;;  %v11226_v28 = vld [vmem:[#allocation100_spill] sm:$0xff] }
 0x320   : > { %v2915_v49 = vmul.f32 %v7948_v17, %v2899_v62  ;;  %v2924_v51 = vadd.f32 1.0, %v2908_v19  ;;  %v2916_v18 = vmul.f32 %v7957_v9, %v2900_v59  ;;  %v2917_v12 = vmul.f32 %v7965_v44, %v2901_v55  ;;  %v11227_v19 = vld [vmem:[#allocation130_spill] sm:$0xff] }
 0x321   : > { %v2925_v6 = vadd.f32 1.0, %v2909_v52  ;;  %vm2940_vm1 = vcmp.gt.f32.partialorder %v11147_v60, 1.0  ;;  %v2918_v10 = vmul.f32 %v7975_v22, %v2902_v3  ;;  %v2919_v48 = vmul.f32 %v7985_v56, %v2903_v7  ;;  %v11218_v22 = vld [vmem:[#allocation98_spill] sm:$0xff]  ;;  %v11229_v52 = vld [vmem:[#allocation131_spill] sm:$0xff]  ;;  %v11230_v7 = vld [vmem:[#allocation101_spill] sm:$0xff] }
 0x322   : > { %v2926_v27 = vadd.f32 1.0, %v2910_v20  ;;  %vm2941_vm2 = vcmp.gt.f32.partialorder %v11148_v0, 1.0  ;;  %v2920_v32 = vmul.f32 %v7995_v41, %v2904_v1  ;;  %v2927_v24 = vadd.f32 1.0, %v2911_v57  ;;  %v11219_v41 = vld [vmem:[#allocation126_spill] sm:$0xff]  ;;  %v11231_v20 = vld [vmem:[#allocation132_spill] sm:$0xff] }
 0x323   : > { %vm2942_vm3 = vcmp.gt.f32.partialorder %v11217_v8, 1.0  ;;  %v2971_v17 = vsel %vm2939_vm0, %v2923_v14, %v7911_v11  ;;  %v2921_v9 = vmul.f32 %v8006_v53, %v2905_v46  ;;  %v2928_v44 = vadd.f32 1.0, %v2912_v16  ;;  %v11221_v11 = vld [vmem:[#allocation127_spill] sm:$0xff]  ;;  %v11228_v59 = vld [vmem:[#allocation70_spill] sm:$0xff]  ;;  %v11233_v14 = vld [vmem:[#allocation133_spill] sm:$0xff] }
 0x324   : > { %vm2943_vm4 = vcmp.gt.f32.partialorder %v11150_v26, 1.0  ;;  %v2972_v56 = vsel %vm2940_vm1, %v2924_v51, %v11218_v22  ;;  %v2922_v4 = vmul.f32 %v8015_v37, %v2906_v30  ;;  %v2929_v25 = vadd.f32 1.0, %v2913_v45  ;;  %v11222_v53 = vld [vmem:[#allocation99_spill] sm:$0xff]  ;;  %v11234_v45 = vld [vmem:[#allocation121_spill] sm:$0xff]  ;;  %v11235_v51 = vld [vmem:[#allocation134_spill] sm:$0xff] }
 0x325   : > { %vm2944_vm5 = vcmp.gt.f32.partialorder %v11219_v41, 1.0  ;;  %v2973_v39 = vsel %vm2941_vm2, %v2925_v6, %v11220_v54  ;;  %v2930_v43 = vadd.f32 1.0, %v2914_v2  ;;  %vm2945_vm6 = vcmp.gt.f32.partialorder %v11221_v11, 1.0  ;;  %v11232_v30 = vld [vmem:[#allocation71_spill] sm:$0xff]  ;;  %v11243_v54 = vld [vmem:[#allocation140_spill] sm:$0xff] }
 0x326   : > { %v2974_v47 = vsel %vm2942_vm3, %v2926_v27, %v11222_v53  ;;  %5228 = vrcp.f32 %v2971_v17  ;;  %v2931_v50 = vadd.f32 1.0, %v2915_v49  ;;  %vm2946_vm7 = vcmp.gt.f32.partialorder %v11223_v36, 1.0 }
 0x327   : > { %v2975_v37 = vsel %vm2943_vm4, %v2927_v24, %v11224_v61  ;;  %5230 = vrcp.f32 %v2972_v56  ;;  %v2932_v13 = vadd.f32 1.0, %v2916_v18  ;;  %vm2947_vm8 = vcmp.gt.f32.partialorder %v11225_v23, 1.0  ;;  %v11236_v18 = vld [vmem:[#allocation122_spill] sm:$0xff]  ;;  %v11240_v24 = vld [vmem:[#allocation60_spill] sm:$0xff] }
 0x328   : > { %v2976_v31 = vsel %vm2944_vm5, %v2928_v44, %v11226_v28  ;;  %5232 = vrcp.f32 %v2973_v39  ;;  %v2933_v62 = vadd.f32 1.0, %v2917_v12  ;;  %vm2948_vm9 = vcmp.gt.f32.partialorder %v11227_v19, 1.0  ;;  %v11247_v61 = vld [vmem:[#allocation142_spill] sm:$0xff] }
 0x329   : > { %v2977_v55 = vsel %vm2945_vm6, %v2929_v25, %v11228_v59  ;;  %5234 = vrcp.f32 %v2974_v47  ;;  %v2934_v3 = vadd.f32 1.0, %v2918_v10  ;;  %vm2949_vm10 = vcmp.gt.f32.partialorder %v11229_v52, 1.0  ;;  %v11237_v10 = vld [vmem:[#allocation135_spill] sm:$0xff]  ;;  %v11245_v47 = vld [vmem:[#allocation141_spill] sm:$0xff] }
 0x32a   : > { %v2978_v1 = vsel %vm2946_vm7, %v2930_v43, %v11230_v7  ;;  %5236 = vrcp.f32 %v2975_v37  ;;  %v2935_v46 = vadd.f32 1.0, %v2919_v48  ;;  %vm2950_vm11 = vcmp.gt.f32.partialorder %v11231_v20, 1.0  ;;  %v11238_v48 = vld [vmem:[#allocation123_spill] sm:$0xff]  ;;  %v11244_v43 = vld [vmem:[#allocation61_spill] sm:$0xff] }
 0x32b   : > { %v2979_v57 = vsel %vm2947_vm8, %v2931_v50, %v11232_v30  ;;  %5238 = vrcp.f32 %v2976_v31  ;;  %v2936_v16 = vadd.f32 1.0, %v2920_v32  ;;  %vm2951_vm12 = vcmp.gt.f32.partialorder %v11233_v14, 1.0  ;;  %v11239_v32 = vld [vmem:[#allocation136_spill] sm:$0xff]  ;;  %v11250_v7 = vld [vmem:[#allocation119_spill] sm:$0xff] }
 0x32c   : > { %v2980_v2 = vsel %vm2948_vm9, %v2932_v13, %v11234_v45  ;;  %5240 = vrcp.f32 %v2977_v55  ;;  %v2937_v49 = vadd.f32 1.0, %v2921_v9  ;;  %vm2952_vm13 = vcmp.gt.f32.partialorder %v11235_v51, 1.0  ;;  %v11241_v9 = vld [vmem:[#allocation125_spill] sm:$0xff] }
 0x32d   : > { %v2981_v12 = vsel %vm2949_vm10, %v2933_v62, %v11236_v18  ;;  %5242 = vrcp.f32 %v2978_v1  ;;  %v2938_v6 = vadd.f32 1.0, %v2922_v4  ;;  %vm2953_vm14 = vcmp.gt.f32.partialorder %v11237_v10, 1.0  ;;  %v11242_v4 = vld [vmem:[#allocation113_spill] sm:$0xff]  ;;  %v11255_v18 = vld [vmem:[#allocation116_spill] sm:$0xff] }
 0x32e   : > { %v2982_v27 = vsel %vm2950_vm11, %v2934_v3, %v11238_v48  ;;  %5244 = vrcp.f32 %v2979_v57  ;;  %vm2954_vm15 = vcmp.gt.f32.partialorder %v11239_v32, 1.0  ;;  %v2955_v17 = vsel %vm2939_vm0, %v8182_v33, %v11240_v24  ;;  %v11257_v24 = vld [vmem:[#allocation52_spill] sm:$0xff] }
 0x32f   : > { %v2983_v44 = vsel %vm2951_vm12, %v2935_v46, %v11241_v9  ;;  %5246 = vrcp.f32 %v2980_v2  ;;  %v2673_v56 = vadd.f32 1.0, %v8153_v5  ;;  %v2956_v25 = vsel %vm2940_vm1, %v8184_v38, %v11242_v4  ;;  %v11246_v38 = vld [vmem:[#allocation114_spill] sm:$0xff]  ;;  %v11251_v46 = vld [vmem:[#allocation64_spill] sm:$0xff]  ;;  %v11254_v2 = vld [vmem:[#allocation83_spill] sm:$0xff] }
 0x330   : > { %v5229_v22 = vpop.eup %5228  ;;  %v2984_v39 = vsel %vm2952_vm13, %v2936_v16, %v11243_v54  ;;  %5248 = vrcp.f32 %v2981_v12  ;;  %v2674_v33 = vadd.f32 1.0, %v8156_v15  ;;  %v2957_v53 = vsel %vm2941_vm2, %v8186_v34, %v11244_v43  ;;  %v11248_v34 = vld [vmem:[#allocation63_spill] sm:$0xff] }
 0x331   : > { %v5231_v29 = vpop.eup %5230  ;;  %v2985_v5 = vsel %vm2953_vm14, %v2937_v49, %v11245_v47  ;;  %5250 = vrcp.f32 %v2982_v27  ;;  %v2958_v50 = vsel %vm2942_vm3, %v8188_v42, %v11246_v38  ;;  %v2986_v15 = vsel %vm2954_vm15, %v2938_v6, %v11247_v61  ;;  %v11249_v42 = vld [vmem:[#allocation115_spill] sm:$0xff]  ;;  %v11256_v6 = vld [vmem:[#allocation77_spill] sm:$0xff] }
 0x332   : > { %v5233_v60 = vpop.eup %5232  ;;  %v2988_v37 = vmul.f32 %v5229_v22, %v2955_v17  ;;  %5252 = vrcp.f32 %v2983_v44  ;;  %v2675_v0 = vadd.f32 1.0, %v8159_v35  ;;  %v2959_v28 = vsel %vm2943_vm4, %v8190_v21, %v11248_v34  ;;  %v11253_v16 = vld [vmem:[#allocation91_spill] sm:$0xff]  ;;  %v11268_v34 = vld [vmem:[#allocation76_spill] sm:$0xff] }
 0x333   : > { %v5235_v13 = vpop.eup %5234  ;;  %v2990_v31 = vmul.f32 %v5231_v29, %v2956_v25  ;;  %5254 = vrcp.f32 %v2984_v39  ;;  %v2676_v8 = vadd.f32 1.0, %v8162_v63  ;;  %v2960_v59 = vsel %vm2944_vm5, %v8192_v40, %v11249_v42  ;;  %v11252_v63 = vld [vmem:[#allocation78_spill] sm:$0xff]  ;;  %v11258_v9 = vld [vmem:[#allocation79_spill] sm:$0xff]  ;;  %v11260_v25 = vld [vmem:[#allocation120_spill] sm:$0xff] }
 0x334   : > { %v5237_v62 = vpop.eup %5236  ;;  %v2992_v55 = vmul.f32 %v5233_v60, %v2957_v53  ;;  %5256 = vrcp.f32 %v2985_v5  ;;  %v2677_v35 = vadd.f32 1.0, %v8165_v58  ;;  %v2961_v26 = vsel %vm2945_vm6, %v2673_v56, %v11250_v7  ;;  %v11259_v56 = vld [vmem:[#allocation143_spill] sm:$0xff]  ;;  %v11261_v29 = vld [vmem:[#allocation108_spill] sm:$0xff]  ;;  %v11272_v7 = vld [vmem:[#allocation54_spill] sm:$0xff] }
 0x335   : > { %v5239_v3 = vpop.eup %5238  ;;  %v2994_v21 = vmul.f32 %v5235_v13, %v2958_v50  ;;  %5258 = vrcp.f32 %v2986_v15  ;;  %v2678_v30 = vadd.f32 1.0, %v11251_v46  ;;  %v2962_v57 = vsel %vm2946_vm7, %v2674_v33, %v11252_v63  ;;  %v11262_v33 = vld [vmem:[#allocation56_spill] sm:$0xff]  ;;  %v11267_v13 = vld [vmem:[#allocation93_spill] sm:$0xff] }
 0x336   : > { %v5241_v1 = vpop.eup %5240  ;;  %v2996_v41 = vmul.f32 %v5237_v62, %v2959_v28  ;;  %5260 = vlog2.f32 %v2988_v37  ;;  %v2679_v45 = vadd.f32 1.0, %v11253_v16  ;;  %v2963_v58 = vsel %vm2947_vm8, %v2675_v0, %v11254_v2  ;;  %v11263_v53 = vld [vmem:[#allocation84_spill] sm:$0xff]  ;;  %v11266_v37 = vld [vmem:[#allocation66_spill] sm:$0xff]  ;;  %v11269_v62 = vld [vmem:[#allocation105_spill] sm:$0xff] }
 0x337   : > { %v5243_v40 = vpop.eup %5242  ;;  %v2998_v11 = vmul.f32 %v5239_v3, %v2960_v59  ;;  %5262 = vlog2.f32 %v2990_v31  ;;  %v2680_v12 = vadd.f32 1.0, %v11255_v18  ;;  %v2964_v48 = vsel %vm2948_vm9, %v2676_v8, %v11256_v6  ;;  %v11264_v60 = vld [vmem:[#allocation104_spill] sm:$0xff]  ;;  %v11271_v3 = vld [vmem:[#allocation74_spill] sm:$0xff]  ;;  %v11274_v46 = vld [vmem:[#allocation117_spill] sm:$0xff] }
 0x338   : > { %v5245_v49 = vpop.eup %5244  ;;  %v3000_v36 = vmul.f32 %v5241_v1, %v2961_v26  ;;  %5264 = vlog2.f32 %v2992_v55  ;;  %v2681_v17 = vadd.f32 1.0, %v11257_v24  ;;  %v2965_v44 = vsel %vm2949_vm10, %v2677_v35, %v11258_v9  ;;  %v11265_v50 = vld [vmem:[#allocation80_spill] sm:$0xff]  ;;  %v11273_v26 = vld [vmem:[#allocation59_spill] sm:$0xff]  ;;  %v11277_v16 = vld [vmem:[#allocation109_spill] sm:$0xff] }
 0x339   : > { %v5247_v27 = vpop.eup %5246  ;;  %v3002_v23 = vmul.f32 %v5243_v40, %v2962_v57  ;;  %5266 = vlog2.f32 %v2994_v21  ;;  %v2682_v4 = vadd.f32 1.0, %v11259_v56  ;;  %v2966_v54 = vsel %vm2950_vm11, %v2678_v30, %v11260_v25  ;;  %v11270_v42 = vld [vmem:[#allocation96_spill] sm:$0xff]  ;;  %v11275_v30 = vld [vmem:[#allocation94_spill] sm:$0xff]  ;;  %v11276_v57 = vld [vmem:[#allocation75_spill] sm:$0xff] }
 0x33a   : > { %v5249_v22 = vpop.eup %5248  ;;  %v3004_v19 = vmul.f32 %v5245_v49, %v2963_v58  ;;  %5268 = vlog2.f32 %v2996_v41  ;;  %v1874_v43 = vsub.f32 %v11262_v33, %v11261_v29  ;;  %v2967_v52 = vsel %vm2951_vm12, %v2679_v45, %v11263_v53  ;;  %v11278_v45 = vld [vmem:[#allocation95_spill] sm:$0xff]  ;;  %v11279_v18 = vld [vmem:[#allocation82_spill] sm:$0xff]  ;;  %v11281_v9 = vld [vmem:[#allocation89_spill] sm:$0xff] }
 0x33b   : > { %v5251_v39 = vpop.eup %5250  ;;  %v3006_v47 = vmul.f32 %v5247_v27, %v2964_v48  ;;  %5270 = vlog2.f32 %v2998_v11  ;;  %v1832_v38 = vmul.f32 0.6931472, %v11264_v60  ;;  %v2968_v20 = vsel %vm2952_vm13, %v2680_v12, %v11265_v50  ;;  %v11280_v27 = vld [vmem:[#allocation55_spill] sm:$0xff] }
 0x33c   : > { %v5253_v5 = vpop.eup %5252  ;;  %v3008_v61 = vmul.f32 %v5249_v22, %v2965_v44  ;;  %5272 = vlog2.f32 %v3000_v36  ;;  %v1847_v0 = vmul.f32 %v11267_v13, %v11266_v37  ;;  %v2969_v14 = vsel %vm2953_vm14, %v2681_v17, %v11268_v34  ;;  %v11282_v44 = vld [vmem:[#allocation47_spill] sm:$0xff]  ;;  %v11293_v34 = vld [vmem:[#allocation90_spill] sm:$0xff] }
 0x33d   : > { %v5255_v15 = vpop.eup %5254  ;;  %v3010_v28 = vmul.f32 %v5251_v39, %v2966_v54  ;;  %5274 = vlog2.f32 %v3002_v23  ;;  %v8453_v8 = vadd.f32 0.9189385, %v11269_v62  ;;  %v2970_v51 = vsel %vm2954_vm15, %v2682_v4, %v11270_v42  ;;  %v11284_v4 = vld [vmem:[#allocation118_spill] sm:$0xff]  ;;  %v11286_v39 = vld [vmem:[#allocation37_spill] sm:$0xff]  ;;  %v11288_v60 = vld [vmem:[#allocation107_spill] sm:$0xff] }
 0x33e   : > { %v5257_v31 = vpop.eup %5256  ;;  %v3012_v59 = vmul.f32 %v5253_v5, %v2967_v52  ;;  %5276 = vlog2.f32 %v3004_v19  ;;  %v1834_v35 = vmul.f32 0.6931472, %v11271_v3  ;;  %v1875_v21 = vsub.f32 %v11273_v26, %v11272_v7  ;;  %v11285_v19 = vld [vmem:[#allocation106_spill] sm:$0xff]  ;;  %v11296_v62 = vld [vmem:[#allocation137_spill] sm:$0xff]  ;;  %v11299_v3 = vld [vmem:[#allocation44_spill] sm:$0xff] }
 0x33f   : > { %v5259_v55 = vpop.eup %5258  ;;  %v3014_v10 = vmul.f32 %v5255_v15, %v2968_v20  ;;  %5278 = vlog2.f32 %v3006_v47  ;;  %v1848_v63 = vmul.f32 %v11275_v30, %v11274_v46  ;;  %v8464_v41 = vadd.f32 0.9189385, %v11276_v57  ;;  %v11304_v57 = vld [vmem:[#allocation48_spill] sm:$0xff] }
 0x340   : > { %v5261_v1 = vpop.eup %5260  ;;  %v3016_v40 = vmul.f32 %v5257_v31, %v2969_v14  ;;  %5280 = vlog2.f32 %v3008_v61  ;;  %v1876_v2 = vsub.f32 %v11278_v45, %v11277_v16  ;;  %v3018_v58 = vmul.f32 %v5259_v55, %v2970_v51  ;;  %v11291_v61 = vld [vmem:[#allocation87_spill] sm:$0xff]  ;;  %v11294_v14 = vld [vmem:[#allocation40_spill] sm:$0xff]  ;;  %v11298_v51 = vld [vmem:[#allocation110_spill] sm:$0xff] }
 0x341   : > { %v5263_v32 = vpop.eup %5262  ;;  %v3020_v11 = vmul.f32 0.6931472, %v5261_v1  ;;  %5282 = vlog2.f32 %v3010_v28  ;;  %v1849_v12 = vmul.f32 %v1832_v38, %v11279_v18  ;;  %v8469_v6 = vadd.f32 0.9189385, %v1847_v0  ;;  %v11289_v38 = vld [vmem:[#allocation50_spill] sm:$0xff]  ;;  %v11309_v18 = vld [vmem:[#allocation92_spill] sm:$0xff] }
 0x342   : > { %v5265_v49 = vpop.eup %5264  ;;  %v3022_v48 = vmul.f32 0.6931472, %v5263_v32  ;;  %5284 = vlog2.f32 %v3012_v59  ;;  %v1877_v24 = vsub.f32 %v8453_v8, %v11280_v27  ;;  %v11283_v23 = vsub.f32 %v11281_v9, %v11282_v44  ;;  %v11307_v45 = vld [vmem:[#allocation138_spill] sm:$0xff] }
 0x343   : > { %v5267_v36 = vpop.eup %5266  ;;  %v3024_v17 = vmul.f32 0.6931472, %v5265_v49  ;;  %5286 = vlog2.f32 %v3014_v10  ;;  %v1850_v25 = vmul.f32 %v1834_v35, %v11284_v4  ;;  %v11287_v53 = vsub.f32 %v11285_v19, %v11286_v39  ;;  %v11300_v35 = vld [vmem:[#allocation51_spill] sm:$0xff]  ;;  %v11302_v10 = vld [vmem:[#allocation81_spill] sm:$0xff] }
 0x344   : > { %v3051_v22 = vadd.f32 %v3020_v11, %v11283_v23  ;;  %v5269_v56 = vpop.eup %5268  ;;  %v3026_v54 = vmul.f32 0.6931472, %v5267_v36  ;;  %5288 = vlog2.f32 %v3016_v40  ;;  %v11290_v50 = vsub.f32 %v11288_v60, %v11289_v38  ;;  %v11305_v40 = vld [vmem:[#allocation43_spill] sm:$0xff]  ;;  %v11320_v38 = vld [vmem:[#allocation58_spill] sm:$0xff] }
 0x345   : > { %v3052_v52 = vadd.f32 %v3022_v48, %v11287_v53  ;;  %v5271_v47 = vpop.eup %5270  ;;  %v3028_v5 = vmul.f32 0.6931472, %v5269_v56  ;;  %5290 = vlog2.f32 %v3018_v58  ;;  %v1864_v13 = vadd.f32 0.9189385, %v1848_v63  ;;  %v11310_v48 = vld [vmem:[#allocation53_spill] sm:$0xff]  ;;  %v11315_v4 = vld [vmem:[#allocation139_spill] sm:$0xff] }
 0x346   : > { %v3053_v20 = vadd.f32 %v3024_v17, %v11290_v50  ;;  %v8484_v15 = vadd.f32 %v3051_v22, %v11291_v61  ;;  %v5273_v37 = vpop.eup %5272  ;;  %v3030_v0 = vmul.f32 0.6931472, %v5271_v47  ;;  %v11295_v28 = vsub.f32 %v11293_v34, %v11294_v14  ;;  %v11312_v17 = vld [vmem:[#allocation88_spill] sm:$0xff]  ;;  %v11317_v19 = vld [vmem:[#allocation111_spill] sm:$0xff]  ;;  %v11318_v47 = vld [vmem:[#allocation62_spill] sm:$0xff] }
 0x347   : > { %v8490_v8 = vadd.f32 %v3052_v52, %v11296_v62  ;;  %v5275_v42 = vpop.eup %5274  ;;  %v1878_v59 = vsub.f32 %v8464_v41, %v11298_v51  ;;  %v3032_v55 = vmul.f32 0.6931472, %v5273_v37  ;;  %v11301_v7 = vsub.f32 %v11299_v3, %v11300_v35  ;;  %v11321_v61 = vld [vmem:[#allocation85_spill] sm:$0xff]  ;;  %v11324_v34 = vld [vmem:[#allocation86_spill] sm:$0xff]  ;;  %v11328_v51 = vld [vmem:[#allocation12_spill] sm:$0xff] }
 0x348   : > { %11292 = vst [vmem:[#allocation124_spill] sm:$0xff] %v8484_v15  ;;  %v3054_v31 = vadd.f32 %v3026_v54, %v11295_v28  ;;  %v8498_v1 = vadd.f32 %v3053_v20, %v11302_v10  ;;  %v5277_v46 = vpop.eup %5276  ;;  %v1865_v30 = vadd.f32 0.9189385, %v1849_v12  ;;  %v3034_v63 = vmul.f32 0.6931472, %v5275_v42  ;;  %v11314_v12 = vld [vmem:[#allocation57_spill] sm:$0xff] }
 0x349   : > { %11297 = vst [vmem:[#allocation98_spill] sm:$0xff] %v8490_v8  ;;  %v3055_v26 = vadd.f32 %v3028_v5, %v11301_v7  ;;  %v11306_v32 = vsub.f32 %v11304_v57, %v11305_v40  ;;  %v5279_v11 = vpop.eup %5278  ;;  %v1866_v41 = vadd.f32 0.9189385, %v1850_v25  ;;  %v3036_v49 = vmul.f32 0.6931472, %v5277_v46  ;;  %v11326_v62 = vld [vmem:[#allocation65_spill] sm:$0xff] }
 0x34a   : > { %11303 = vst [vmem:[#allocation126_spill] sm:$0xff] %v8498_v1  ;;  %v8504_v58 = vadd.f32 %v3054_v31, %v11307_v45  ;;  %v11311_v36 = vsub.f32 %v11309_v18, %v11310_v48  ;;  %v5281_v44 = vpop.eup %5280  ;;  %v1879_v23 = vsub.f32 %v8469_v6, %v11314_v12  ;;  %v3038_v22 = vmul.f32 0.6931472, %v5279_v11  ;;  %v5549_v46 = vld [vmem:[%s5959_s8 + $0x8] sm:$0xff]  ;;  %v5550_v45 = vld [vmem:[%s5959_s8 + $0x10] sm:$0xff]  ;;  %v11338_v11 = vld [vmem:[#allocation14_spill] sm:$0xff] }
 0x34b   : > { %v3056_v16 = vadd.f32 %v3030_v0, %v11306_v32  ;;  %v8510_v9 = vadd.f32 %v3055_v26, %v11312_v17  ;;  %v3058_v56 = vadd.f32 %v3034_v63, %v1874_v43  ;;  %v5283_v25 = vpop.eup %5282  ;;  %v1880_v39 = vsub.f32 %v1864_v13, %v11317_v19  ;;  %v11323_v43 = vld [vmem:[#allocation112_spill] sm:$0xff]  ;;  %v11331_v26 = vld [vmem:[#allocation97_spill] sm:$0xff]  ;;  %v11336_v32 = vld [vmem:[#allocation67_spill] sm:$0xff] }
 0x34c   : > { %11308 = vst [vmem:[#allocation68_spill] sm:$0xff] %v8504_v58  ;;  %v3057_v27 = vadd.f32 %v3032_v55, %v11311_v36  ;;  %v3040_v53 = vmul.f32 0.6931472, %v5281_v44  ;;  %v3059_v52 = vadd.f32 %v3036_v49, %v1875_v21  ;;  %v5285_v60 = vpop.eup %5284  ;;  %v1881_v6 = vsub.f32 %v1865_v30, %v11320_v38  ;;  %v11333_v30 = vld [vmem:[#allocation13_spill] sm:$0xff]  ;;  %v11341_v48 = vld [vmem:[#allocation102_spill] sm:$0xff]  ;;  %v11343_v17 = vld [vmem:[#allocation15_spill] sm:$0xff] }
 0x34d   : > { %11313 = vst [vmem:[#allocation127_spill] sm:$0xff] %v8510_v9  ;;  %v8518_v54 = vadd.f32 %v3056_v16, %v11315_v4  ;;  %v3042_v50 = vmul.f32 0.6931472, %v5283_v25  ;;  %v3060_v20 = vadd.f32 %v3038_v22, %v1876_v2  ;;  %v8526_v29 = vadd.f32 %v3058_v56, %v11321_v61  ;;  %v5287_v33 = vpop.eup %5286  ;;  %v5548_v2 = vld [vmem:[%s5959_s8] sm:$0xff]  ;;  %v11346_v22 = vld [vmem:[#allocation72_spill] sm:$0xff] }
 0x34e   : > { %v8522_v5 = vadd.f32 %v3057_v27, %v11318_v47  ;;  %v1882_v37 = vsub.f32 %v1866_v41, %v11323_v43  ;;  %v3044_v0 = vmul.f32 0.6931472, %v5285_v60  ;;  %v3061_v13 = vadd.f32 %v3040_v53, %v1877_v24  ;;  %v5289_v14 = vpop.eup %5288  ;;  %v5551_v27 = vld [vmem:[%s5959_s8 + $0x18] sm:$0xff]  ;;  %v5552_v4 = vld [vmem:[%s5959_s8 + $0x20] sm:$0xff]  ;;  %v11348_v25 = vld [vmem:[#allocation16_spill] sm:$0xff] }
 0x34f   : > { %11316 = vst [vmem:[#allocation99_spill] sm:$0xff] %v8518_v54  ;;  %11322 = vst [vmem:[#allocation69_spill] sm:$0xff] %v8526_v29  ;;  %v8530_v21 = vadd.f32 %v3059_v52, %v11324_v34  ;;  %v3046_v28 = vmul.f32 0.6931472, %v5287_v33  ;;  %v3062_v31 = vadd.f32 %v3042_v50, %v1878_v59  ;;  %v8533_v42 = vadd.f32 %v3060_v20, %v11326_v62  ;;  %v5291_v35 = vpop.eup %5290  ;;  %v11351_v52 = vld [vmem:[#allocation28_spill] sm:$0xff]  ;;  %v11352_v47 = vld [vmem:[#allocation103_spill] sm:$0xff] }
 0x350   : > { %11319 = vst [vmem:[#allocation128_spill] sm:$0xff] %v8522_v5  ;;  %v11329_v55 = vmin.f32 %v11328_v51, 1000000.0  ;;  %v3048_v7 = vmul.f32 0.6931472, %v5289_v14  ;;  %v3063_v24 = vadd.f32 %v3044_v0, %v1879_v23  ;;  %v8541_v10 = vadd.f32 %v3061_v13, %v11331_v26  ;;  %v5553_v38 = vld [vmem:[%s5959_s8 + $0x28] sm:$0xff] }
 0x351   : > { %11325 = vst [vmem:[#allocation129_spill] sm:$0xff] %v8530_v21  ;;  %11327 = vst [vmem:[#allocation100_spill] sm:$0xff] %v8533_v42  ;;  %v11334_v63 = vmin.f32 %v11333_v30, 1000000.0  ;;  %v3050_v57 = vmul.f32 0.6931472, %v5291_v35  ;;  %v3064_v40 = vadd.f32 %v3046_v28, %v1880_v39  ;;  %v8549_v16 = vadd.f32 %v3062_v31, %v11336_v32 }
 0x352   : > { %v8538_v3 = vadd.f32 %v5548_v2, %v11329_v55  ;;  %11332 = vst [vmem:[#allocation70_spill] sm:$0xff] %v8541_v10  ;;  %v11339_v41 = vmin.f32 %v11338_v11, 1000000.0  ;;  %v3065_v18 = vadd.f32 %v3048_v7, %v1881_v6  ;;  %v8557_v36 = vadd.f32 %v3063_v24, %v11341_v48  ;;  %v11354_v6 = vld [vmem:[#allocation17_spill] sm:$0xff]  ;;  %v11360_v13 = vld [vmem:[#allocation18_spill] sm:$0xff]  ;;  %v11363_v62 = vld [vmem:[#allocation19_spill] sm:$0xff] }
 0x353   : > { %v8546_v59 = vadd.f32 %v5549_v46, %v11334_v63  ;;  %11337 = vst [vmem:[#allocation101_spill] sm:$0xff] %v8549_v16  ;;  %v11344_v44 = vmin.f32 %v11343_v17, 1000000.0  ;;  %v3066_v23 = vadd.f32 %v3050_v57, %v1882_v37  ;;  %v8565_v56 = vadd.f32 %v3064_v40, %v11346_v22  ;;  %v11357_v33 = vld [vmem:[#allocation29_spill] sm:$0xff]  ;;  %v5555_v31 = vld [vmem:[%s5959_s8 + $0x38] sm:$0xff]  ;;  %v5556_v55 = vld [vmem:[%s5959_s8 + $0x40] sm:$0xff] }
 0x354   : > { %11330 = vst [vmem:[#allocation130_spill] sm:$0xff] %v8538_v3  ;;  %v8554_v49 = vadd.f32 %v5550_v45, %v11339_v41  ;;  %11342 = vst [vmem:[#allocation71_spill] sm:$0xff] %v8557_v36  ;;  %v11349_v19 = vmin.f32 %v11348_v25, 1000000.0  ;;  %v3099_v53 = vadd.f32 1e-10, %v8538_v3  ;;  %5292 = vlog2.f32 %v11351_v52 }
 0x355   : > { %11335 = vst [vmem:[#allocation131_spill] sm:$0xff] %v8546_v59  ;;  %v8562_v12 = vadd.f32 %v5551_v27, %v11344_v44  ;;  %11347 = vst [vmem:[#allocation121_spill] sm:$0xff] %v8565_v56  ;;  %v8575_v60 = vadd.f32 %v3065_v18, %v11352_v47  ;;  %v11355_v50 = vmin.f32 %v11354_v6, 1000000.0  ;;  %v3100_v61 = vadd.f32 1e-10, %v8546_v59 }
 0x356   : > { %11340 = vst [vmem:[#allocation132_spill] sm:$0xff] %v8554_v49  ;;  %v8570_v39 = vadd.f32 %v5552_v4, %v11349_v19  ;;  %5294 = vlog2.f32 %v11357_v33  ;;  %v11358_v43 = vld [vmem:[#allocation73_spill] sm:$0xff]  ;;  %v11361_v34 = vmin.f32 %v11360_v13, 1000000.0  ;;  %v3101_v28 = vadd.f32 1e-10, %v8554_v49 }
 0x357   : > { %11345 = vst [vmem:[#allocation133_spill] sm:$0xff] %v8562_v12  ;;  %11353 = vst [vmem:[#allocation122_spill] sm:$0xff] %v8575_v60  ;;  %v8580_v20 = vadd.f32 %v5553_v38, %v11355_v50  ;;  %v8585_v37 = vadd.f32 %v3066_v23, %v11358_v43  ;;  %v5554_v0 = vld [vmem:[%s5959_s8 + $0x30] sm:$0xff]  ;;  %v11364_v2 = vmin.f32 %v11363_v62, 1000000.0  ;;  %v11366_v35 = vld [vmem:[#allocation20_spill] sm:$0xff] }
 0x358   : > { %11350 = vst [vmem:[#allocation134_spill] sm:$0xff] %v8570_v39  ;;  %v8590_v14 = vadd.f32 %v5554_v0, %v11361_v34  ;;  %v11367_v7 = vmin.f32 %v11366_v35, 1000000.0  ;;  %v5557_v26 = vld [vmem:[%s5959_s8 + $0x48] sm:$0xff]  ;;  %v11369_v46 = vld [vmem:[#allocation21_spill] sm:$0xff]  ;;  %v11372_v32 = vld [vmem:[#allocation22_spill] sm:$0xff] }
 0x359   : > { %11356 = vst [vmem:[#allocation135_spill] sm:$0xff] %v8580_v20  ;;  %11359 = vst [vmem:[#allocation123_spill] sm:$0xff] %v8585_v37  ;;  %v8596_v51 = vadd.f32 %v5555_v31, %v11364_v2  ;;  %v11370_v30 = vmin.f32 %v11369_v46, 1000000.0  ;;  %v3102_v57 = vadd.f32 1e-10, %v8562_v12 }
 0x35a   : > { %11362 = vst [vmem:[#allocation136_spill] sm:$0xff] %v8590_v14  ;;  %v8601_v24 = vadd.f32 %v5556_v55, %v11367_v7  ;;  %v5558_v40 = vld [vmem:[%s5959_s8 + $0x50] sm:$0xff]  ;;  %v11373_v45 = vmin.f32 %v11372_v32, 1000000.0  ;;  %v5559_v41 = vld [vmem:[%s5959_s8 + $0x58] sm:$0xff]  ;;  %v11375_v18 = vld [vmem:[#allocation23_spill] sm:$0xff] }
 0x35b   : > { %11365 = vst [vmem:[#allocation60_spill] sm:$0xff] %v8596_v51  ;;  %v8606_v63 = vadd.f32 %v5557_v26, %v11370_v30  ;;  %v11376_v48 = vmin.f32 %v11375_v18, 1000000.0  ;;  %v3103_v17 = vadd.f32 1e-10, %v8570_v39  ;;  %v8620_v44 = vadd.f32 -1.0, %v3099_v53 }
 0x35c   : > { %11368 = vst [vmem:[#allocation125_spill] sm:$0xff] %v8601_v24  ;;  %v8612_v11 = vadd.f32 %v5558_v40, %v11373_v45  ;;  %v5560_v23 = vld [vmem:[%s5959_s8 + $0x60] sm:$0xff]  ;;  %v11378_v22 = vld [vmem:[#allocation24_spill] sm:$0xff]  ;;  %v11381_v47 = vld [vmem:[#allocation25_spill] sm:$0xff]  ;;  %v3104_v50 = vadd.f32 1e-10, %v8580_v20 }
 0x35d   : > { %11371 = vst [vmem:[#allocation113_spill] sm:$0xff] %v8606_v63  ;;  %v8617_v27 = vadd.f32 %v5559_v41, %v11376_v48  ;;  %v11379_v4 = vmin.f32 %v11378_v22, 1000000.0  ;;  %v5561_v19 = vld [vmem:[%s5959_s8 + $0x68] sm:$0xff]  ;;  %v11382_v38 = vmin.f32 %v11381_v47, 1000000.0 }
 0x35e   : > { %11374 = vst [vmem:[#allocation140_spill] sm:$0xff] %v8612_v11  ;;  %v8633_v43 = vadd.f32 -1.0, %v3100_v61  ;;  %v5562_v0 = vld [vmem:[%s5959_s8 + $0x70] sm:$0xff]  ;;  %v11384_v13 = vld [vmem:[#allocation26_spill] sm:$0xff]  ;;  %v3105_v31 = vadd.f32 1e-10, %v8590_v14 }
 0x35f   : > { %11377 = vst [vmem:[#allocation61_spill] sm:$0xff] %v8617_v27  ;;  %v8625_v25 = vadd.f32 %v5560_v23, %v11379_v4  ;;  %v8630_v6 = vadd.f32 %v5561_v19, %v11382_v38  ;;  %v11385_v34 = vmin.f32 %v11384_v13, 1000000.0  ;;  %v8641_v62 = vadd.f32 -1.0, %v3101_v28  ;;  %v5563_v40 = vld [vmem:[%s5959_s8 + $0x78] sm:$0xff]  ;;  %v11390_v32 = vld [vmem:[#allocation27_spill] sm:$0xff]  ;;  %v5293_v4 = vpop.eup %5292 }
 0x360   : > { %v8644_v2 = vadd.f32 7.5, %v8620_v44  ;;  %v3106_v55 = vadd.f32 1e-10, %v8596_v51  ;;  %v3107_v35 = vadd.f32 1e-10, %v8601_v24  ;;  %v8648_v7 = vadd.f32 -1.0, %v3102_v57 }
 0x361   : > { %11380 = vst [vmem:[#allocation141_spill] sm:$0xff] %v8625_v25  ;;  %11383 = vst [vmem:[#allocation114_spill] sm:$0xff] %v8630_v6  ;;  %v8638_v53 = vadd.f32 %v5562_v0, %v11385_v34  ;;  %v8651_v61 = vadd.f32 7.5, %v8633_v43  ;;  %v3108_v26 = vadd.f32 1e-10, %v8606_v63  ;;  %v8655_v30 = vadd.f32 -1.0, %v3103_v17 }
 0x362   : > { %11387 = vst [vmem:[#allocation63_spill] sm:$0xff] %v8644_v2  ;;  %v3109_v46 = vadd.f32 1e-10, %v8612_v11  ;;  %v8658_v28 = vadd.f32 7.5, %v8641_v62  ;;  %v11391_v45 = vmin.f32 %v11390_v32, 1000000.0  ;;  %5296 = vlog2.f32 %v8644_v2 }
 0x363   : > { %11386 = vst [vmem:[#allocation142_spill] sm:$0xff] %v8638_v53  ;;  %11388 = vst [vmem:[#allocation115_spill] sm:$0xff] %v8651_v61  ;;  %v3110_v57 = vadd.f32 1e-10, %v8617_v27  ;;  %v8666_v18 = vadd.f32 -1.0, %v3104_v50  ;;  %v8669_v48 = vadd.f32 7.5, %v8648_v7  ;;  %5298 = vlog2.f32 %v8651_v61  ;;  %v8685_v50 = vpop.eup %5294 }
 0x364   : > { %11389 = vst [vmem:[#allocation119_spill] sm:$0xff] %v8658_v28  ;;  %v8663_v41 = vadd.f32 %v5563_v40, %v11391_v45  ;;  %v3111_v23 = vadd.f32 1e-10, %v8625_v25  ;;  %v8672_v22 = vadd.f32 -1.0, %v3105_v31  ;;  %v8675_v17 = vadd.f32 7.5, %v8655_v30  ;;  %11399 = vst [vmem:[#allocation79_spill] sm:$0xff] %v8685_v50 }
 0x365   : > { %11393 = vst [vmem:[#allocation78_spill] sm:$0xff] %v8666_v18  ;;  %11394 = vst [vmem:[#allocation91_spill] sm:$0xff] %v8669_v48  ;;  %v3112_v19 = vadd.f32 1e-10, %v8630_v6  ;;  %v8679_v47 = vadd.f32 -1.0, %v3106_v55  ;;  %v8682_v38 = vadd.f32 7.5, %v8666_v18  ;;  %5300 = vlog2.f32 %v8658_v28 }
 0x366   : > { %11392 = vst [vmem:[#allocation64_spill] sm:$0xff] %v8663_v41  ;;  %11395 = vst [vmem:[#allocation83_spill] sm:$0xff] %v8672_v22  ;;  %v3113_v0 = vadd.f32 1e-10, %v8638_v53  ;;  %v8688_v13 = vadd.f32 -1.0, %v3107_v35  ;;  %v8691_v34 = vadd.f32 7.5, %v8672_v22  ;;  %5302 = vlog2.f32 %v8669_v48 }
 0x367   : > { %11396 = vst [vmem:[#allocation116_spill] sm:$0xff] %v8675_v17  ;;  %11397 = vst [vmem:[#allocation77_spill] sm:$0xff] %v8679_v47  ;;  %v3114_v31 = vadd.f32 1e-10, %v8663_v41  ;;  %v8695_v55 = vadd.f32 -1.0, %v3108_v26  ;;  %v8698_v40 = vadd.f32 7.5, %v8679_v47  ;;  %5304 = vlog2.f32 %v8675_v17 }
 0x368   : > { %11398 = vst [vmem:[#allocation52_spill] sm:$0xff] %v8682_v38  ;;  %11400 = vst [vmem:[#allocation143_spill] sm:$0xff] %v8688_v13  ;;  %v8701_v32 = vadd.f32 -1.0, %v3109_v46  ;;  %v8704_v45 = vadd.f32 7.5, %v8688_v13  ;;  %v8707_v35 = vadd.f32 -1.0, %v3110_v57  ;;  %v8709_v53 = vadd.f32 -1.0, %v3111_v23 }
 0x369   : > { %11401 = vst [vmem:[#allocation120_spill] sm:$0xff] %v8691_v34  ;;  %11402 = vst [vmem:[#allocation108_spill] sm:$0xff] %v8695_v55  ;;  %v8712_v41 = vadd.f32 7.5, %v8695_v55  ;;  %5306 = vlog2.f32 %v8682_v38  ;;  %v8715_v26 = vadd.f32 -1.0, %v3112_v19  ;;  %v8717_v6 = vadd.f32 -1.0, %v3113_v0  ;;  %v11423_v38 = vld [vmem:[#allocation30_spill] sm:$0xff] }
 0x36a   : > { %11403 = vst [vmem:[#allocation56_spill] sm:$0xff] %v8698_v40  ;;  %11404 = vst [vmem:[#allocation84_spill] sm:$0xff] %v8701_v32  ;;  %v8720_v46 = vadd.f32 7.5, %v8701_v32  ;;  %5308 = vlog2.f32 %v8691_v34  ;;  %v8723_v25 = vmul.f32 0.6931472, %v5293_v4  ;;  %v8725_v57 = vadd.f32 -1.0, %v3114_v31 }
 0x36b   : > { %11405 = vst [vmem:[#allocation104_spill] sm:$0xff] %v8704_v45  ;;  %11406 = vst [vmem:[#allocation80_spill] sm:$0xff] %v8707_v35  ;;  %v8728_v23 = vadd.f32 7.5, %v8707_v35  ;;  %5310 = vlog2.f32 %v8698_v40  ;;  %v8732_v27 = vadd.f32 7.5, %v8709_v53  ;;  %v8735_v19 = vadd.f32 7.5, %v8715_v26  ;;  %v11424_v61 = vld [vmem:[#allocation31_spill] sm:$0xff] }
 0x36c   : > { %11407 = vst [vmem:[#allocation66_spill] sm:$0xff] %v8709_v53  ;;  %11408 = vst [vmem:[#allocation93_spill] sm:$0xff] %v8712_v41  ;;  %v8738_v0 = vadd.f32 7.5, %v8717_v6  ;;  %5312 = vlog2.f32 %v8704_v45  ;;  %v8742_v4 = vadd.f32 7.5, %v8725_v57  ;;  %v8745_v31 = vadd.f32 0.5, %v8620_v44  ;;  %v5297_v63 = vpop.eup %5296 }
 0x36d   : > { %11409 = vst [vmem:[#allocation76_spill] sm:$0xff] %v8715_v26  ;;  %11410 = vst [vmem:[#allocation105_spill] sm:$0xff] %v8717_v6  ;;  %v8748_v11 = vadd.f32 0.5, %v8633_v43  ;;  %5314 = vlog2.f32 %v8712_v41  ;;  %v8752_v24 = vadd.f32 0.5, %v8641_v62  ;;  %v8755_v51 = vadd.f32 0.5, %v8648_v7  ;;  %v5299_v20 = vpop.eup %5298 }
 0x36e   : > { %11411 = vst [vmem:[#allocation96_spill] sm:$0xff] %v8720_v46  ;;  %11412 = vst [vmem:[#allocation74_spill] sm:$0xff] %v8723_v25  ;;  %v8758_v14 = vadd.f32 0.5, %v8655_v30  ;;  %5316 = vlog2.f32 %v8720_v46  ;;  %v8762_v39 = vadd.f32 0.5, %v8666_v18  ;;  %v8765_v12 = vadd.f32 0.5, %v8672_v22 }
 0x36f   : > { %11413 = vst [vmem:[#allocation54_spill] sm:$0xff] %v8725_v57  ;;  %11414 = vst [vmem:[#allocation59_spill] sm:$0xff] %v8728_v23  ;;  %v8768_v49 = vadd.f32 0.5, %v8679_v47  ;;  %v8771_v59 = vadd.f32 0.5, %v8688_v13  ;;  %v5301_v3 = vpop.eup %5300  ;;  %v8774_v25 = vadd.f32 0.5, %v8695_v55  ;;  %v8777_v37 = vadd.f32 0.5, %v8701_v32 }
 0x370   : > { %11415 = vst [vmem:[#allocation117_spill] sm:$0xff] %v8732_v27  ;;  %11416 = vst [vmem:[#allocation94_spill] sm:$0xff] %v8735_v19  ;;  %v8780_v60 = vadd.f32 0.5, %v8707_v35  ;;  %v8783_v56 = vadd.f32 0.5, %v8709_v53  ;;  %v5303_v36 = vpop.eup %5302  ;;  %v8786_v16 = vadd.f32 0.5, %v8715_v26  ;;  %v8789_v10 = vadd.f32 0.5, %v8717_v6 }
 0x371   : > { %11417 = vst [vmem:[#allocation75_spill] sm:$0xff] %v8738_v0  ;;  %11418 = vst [vmem:[#allocation109_spill] sm:$0xff] %v8742_v4  ;;  %v8792_v50 = vmin.f32 %v8620_v44, 1.0  ;;  %v8795_v42 = vmin.f32 %v8633_v43, 1.0  ;;  %v5305_v21 = vpop.eup %5304  ;;  %v8798_v29 = vmin.f32 %v8641_v62, 1.0  ;;  %v8801_v5 = vmin.f32 %v8648_v7, 1.0 }
 0x372   : > { %11419 = vst [vmem:[#allocation95_spill] sm:$0xff] %v8780_v60  ;;  %11420 = vst [vmem:[#allocation82_spill] sm:$0xff] %v8783_v56  ;;  %v8804_v54 = vmin.f32 %v8655_v30, 1.0  ;;  %v8807_v9 = vmin.f32 %v8666_v18, 1.0  ;;  %5318 = vlog2.f32 %v8728_v23  ;;  %v8811_v1 = vmin.f32 %v8672_v22, 1.0 }
 0x373   : > { %11421 = vst [vmem:[#allocation55_spill] sm:$0xff] %v8786_v16  ;;  %11422 = vst [vmem:[#allocation89_spill] sm:$0xff] %v8789_v10  ;;  %v5307_v58 = vpop.eup %5306  ;;  %v8814_v8 = vmin.f32 %v8679_v47, 1.0  ;;  %v8817_v15 = vmin.f32 %v8688_v13, 1.0  ;;  %5320 = vlog2.f32 %v8732_v27  ;;  %v8821_v41 = vmin.f32 %v8695_v55, 1.0 }
 0x374   : > { %v5309_v46 = vpop.eup %5308  ;;  %v8824_v10 = vmin.f32 %v8701_v32, 1.0  ;;  %v8827_v23 = vmin.f32 %v8707_v35, 1.0  ;;  %5322 = vlog2.f32 %v8735_v19  ;;  %v8831_v45 = vmin.f32 %v8709_v53, 1.0 }
 0x375   : > { %v5311_v16 = vpop.eup %5310  ;;  %v8834_v33 = vmin.f32 %v8715_v26, 1.0  ;;  %v8837_v27 = vmin.f32 %v8717_v6, 1.0  ;;  %v3164_v56 = vmul.f32 0.6931472, %v5297_v63  ;;  %v3166_v40 = vmul.f32 0.6931472, %v5299_v20 }
 0x376   : > { %v5313_v52 = vpop.eup %5312  ;;  %5324 = vlog2.f32 %v8738_v0  ;;  %v8841_v60 = vmin.f32 %v8725_v57, 1.0  ;;  %v3168_v19 = vmul.f32 0.6931472, %v5301_v3  ;;  %v3259_v17 = vadd.f32 60.458332, %v8792_v50  ;;  %v11425_v20 = vld [vmem:[#allocation32_spill] sm:$0xff] }
 0x377   : > { %v5315_v34 = vpop.eup %5314  ;;  %5326 = vlog2.f32 %v11423_v38  ;;  %v3260_v48 = vadd.f32 60.458332, %v8795_v42  ;;  %v3170_v2 = vmul.f32 0.6931472, %v5303_v36  ;;  %v3172_v4 = vmul.f32 0.6931472, %v5305_v21 }
 0x378   : > { %v5317_v28 = vpop.eup %5316  ;;  %5328 = vlog2.f32 %v11424_v61  ;;  %v3174_v63 = vmul.f32 0.6931472, %v5307_v58  ;;  %v3176_v0 = vmul.f32 0.6931472, %v5309_v46  ;;  %v3178_v6 = vmul.f32 0.6931472, %v5311_v16 }
 0x379   : > { %5330 = vlog2.f32 %v11425_v20  ;;  %v3261_v26 = vadd.f32 60.458332, %v8798_v29  ;;  %v3180_v53 = vmul.f32 0.6931472, %v5313_v52  ;;  %v3195_v38 = vmul.f32 %v3164_v56, %v8745_v31 }
 0x37a   : > { %v3196_v3 = vmul.f32 %v3166_v40, %v8748_v11  ;;  %v3262_v35 = vadd.f32 60.458332, %v8801_v5  ;;  %v3182_v32 = vmul.f32 0.6931472, %v5315_v34  ;;  %v3184_v55 = vmul.f32 0.6931472, %v5317_v28 }
 0x37b   : > { %v3197_v61 = vmul.f32 %v3168_v19, %v8752_v24  ;;  %v3263_v21 = vadd.f32 60.458332, %v8804_v54  ;;  %v3198_v58 = vmul.f32 %v3170_v2, %v8755_v51  ;;  %v3199_v36 = vmul.f32 %v3172_v4, %v8758_v14  ;;  %v11429_v4 = vld [vmem:[#allocation33_spill] sm:$0xff] }
 0x37c   : > { %v3200_v16 = vmul.f32 %v3174_v63, %v8762_v39  ;;  %v3264_v52 = vadd.f32 60.458332, %v8807_v9  ;;  %v5319_v46 = vpop.eup %5318  ;;  %v3201_v56 = vmul.f32 %v3176_v0, %v8765_v12  ;;  %v3202_v11 = vmul.f32 %v3178_v6, %v8768_v49  ;;  %v11434_v63 = vld [vmem:[#allocation34_spill] sm:$0xff] }
 0x37d   : > { %v3265_v34 = vadd.f32 60.458332, %v8811_v1  ;;  %v3266_v28 = vadd.f32 60.458332, %v8814_v8  ;;  %v5321_v24 = vpop.eup %5320  ;;  %v3203_v40 = vmul.f32 %v3180_v53, %v8771_v59  ;;  %v8863_v19 = vadd.f32 0.9189385, %v3195_v38 }
 0x37e   : > { %v8865_v51 = vadd.f32 0.9189385, %v3196_v3  ;;  %v3267_v39 = vadd.f32 60.458332, %v8817_v15  ;;  %v5323_v14 = vpop.eup %5322  ;;  %v3204_v2 = vmul.f32 %v3182_v32, %v8774_v25  ;;  %v3205_v12 = vmul.f32 %v3184_v55, %v8777_v37  ;;  %v11439_v32 = vld [vmem:[#allocation35_spill] sm:$0xff] }
 0x37f   : > { %11426 = vst [vmem:[#allocation47_spill] sm:$0xff] %v8863_v19  ;;  %v8870_v0 = vadd.f32 0.9189385, %v3197_v61  ;;  %v3268_v49 = vadd.f32 60.458332, %v8821_v41  ;;  %5332 = vlog2.f32 %v11429_v4  ;;  %v3281_v4 = vmul.f32 %v3265_v34, %v8811_v1 }
 0x380   : > { %11427 = vst [vmem:[#allocation118_spill] sm:$0xff] %v8865_v51  ;;  %v5325_v6 = vpop.eup %5324  ;;  %v8874_v31 = vadd.f32 0.9189385, %v3198_v58  ;;  %v8876_v59 = vadd.f32 0.9189385, %v3199_v36  ;;  %5334 = vlog2.f32 %v11434_v63  ;;  %v3280_v63 = vmul.f32 %v3264_v52, %v8807_v9 }
 0x381   : > { %11428 = vst [vmem:[#allocation106_spill] sm:$0xff] %v8870_v0  ;;  %v8878_v53 = vadd.f32 0.9189385, %v3200_v16  ;;  %v8880_v38 = vpop.eup %5326  ;;  %v8883_v25 = vmul.f32 0.6931472, %v5319_v46  ;;  %5336 = vlog2.f32 %v11439_v32  ;;  %vm4299_vm0 = vcmp.gt.f32.partialorder %v8620_v44, 1.0 }
 0x382   : > { %11430 = vst [vmem:[#allocation37_spill] sm:$0xff] %v8874_v31  ;;  %11431 = vst [vmem:[#allocation107_spill] sm:$0xff] %v8876_v59  ;;  %v8885_v37 = vadd.f32 0.9189385, %v3201_v56  ;;  %v8887_v61 = vadd.f32 0.9189385, %v3202_v11  ;;  %v8889_v55 = vpop.eup %5328 }
 0x383   : > { %11432 = vst [vmem:[#allocation50_spill] sm:$0xff] %v8878_v53  ;;  %11433 = vst [vmem:[#allocation87_spill] sm:$0xff] %v8880_v38  ;;  %v8892_v3 = vmul.f32 0.6931472, %v5321_v24  ;;  %v8894_v58 = vmul.f32 0.6931472, %v5323_v14  ;;  %v8898_v16 = vpop.eup %5330  ;;  %v3275_v14 = vmul.f32 %v3259_v17, %v8792_v50  ;;  %v3282_v17 = vmul.f32 %v3266_v28, %v8814_v8 }
 0x384   : > { %11435 = vst [vmem:[#allocation90_spill] sm:$0xff] %v8883_v25  ;;  %11436 = vst [vmem:[#allocation40_spill] sm:$0xff] %v8885_v37  ;;  %v8896_v36 = vadd.f32 0.9189385, %v3203_v40  ;;  %v11444_v38 = vld [vmem:[#allocation36_spill] sm:$0xff]  ;;  %vm4300_vm1 = vcmp.gt.f32.partialorder %v8633_v43, 1.0 }
 0x385   : > { %11437 = vst [vmem:[#allocation137_spill] sm:$0xff] %v8887_v61  ;;  %11438 = vst [vmem:[#allocation110_spill] sm:$0xff] %v8889_v55  ;;  %5338 = vlog2.f32 %v11444_v38  ;;  %v8901_v46 = vmul.f32 0.6931472, %v5325_v6  ;;  %v8903_v56 = vadd.f32 0.9189385, %v3204_v2  ;;  %v3277_v38 = vmul.f32 %v3261_v26, %v8798_v29 }
 0x386   : > { %11440 = vst [vmem:[#allocation44_spill] sm:$0xff] %v8892_v3  ;;  %11441 = vst [vmem:[#allocation51_spill] sm:$0xff] %v8894_v58  ;;  %v8905_v11 = vadd.f32 0.9189385, %v3205_v12  ;;  %v3269_v55 = vadd.f32 60.458332, %v8824_v10  ;;  %v3278_v6 = vmul.f32 %v3262_v35, %v8801_v5  ;;  %v3279_v12 = vmul.f32 %v3263_v21, %v8804_v54 }
 0x387   : > { %11442 = vst [vmem:[#allocation81_spill] sm:$0xff] %v8896_v36  ;;  %11443 = vst [vmem:[#allocation48_spill] sm:$0xff] %v8898_v16  ;;  %v3270_v32 = vadd.f32 60.458332, %v8827_v23  ;;  %v3271_v24 = vadd.f32 60.458332, %v8831_v45  ;;  %v3276_v16 = vmul.f32 %v3260_v48, %v8795_v42  ;;  %v3284_v48 = vmul.f32 %v3268_v49, %v8821_v41 }
 0x388   : > { %11445 = vst [vmem:[#allocation43_spill] sm:$0xff] %v8901_v46  ;;  %11446 = vst [vmem:[#allocation138_spill] sm:$0xff] %v8903_v56  ;;  %v3272_v40 = vadd.f32 60.458332, %v8834_v33  ;;  %v3273_v2 = vadd.f32 60.458332, %v8837_v27  ;;  %v3285_v26 = vmul.f32 %v3269_v55, %v8824_v10 }
 0x389   : > { %11447 = vst [vmem:[#allocation92_spill] sm:$0xff] %v8905_v11  ;;  %v3274_v20 = vadd.f32 60.458332, %v8841_v60  ;;  %v3283_v11 = vmul.f32 %v3267_v39, %v8817_v15  ;;  %v3286_v35 = vmul.f32 %v3270_v32, %v8827_v23  ;;  %v3287_v56 = vmul.f32 %v3271_v24, %v8831_v45  ;;  %v8927_v36 = vpop.eup %5332 }
 0x38a   : > { %v3291_v46 = vadd.f32 1599.0425, %v3275_v14  ;;  %v3288_v21 = vmul.f32 %v3272_v40, %v8834_v33  ;;  %v3292_v52 = vadd.f32 1599.0425, %v3276_v16  ;;  %v3293_v58 = vadd.f32 1599.0425, %v3277_v38  ;;  %v8930_v49 = vpop.eup %5334 }
 0x38b   : > { %v3294_v34 = vadd.f32 1599.0425, %v3278_v6  ;;  %11448 = vst [vmem:[#allocation53_spill] sm:$0xff] %v8927_v36  ;;  %v3289_v28 = vmul.f32 %v3273_v2, %v8837_v27  ;;  %v3295_v3 = vadd.f32 1599.0425, %v3279_v12  ;;  %11449 = vst [vmem:[#allocation88_spill] sm:$0xff] %v8930_v49  ;;  %v3290_v55 = vmul.f32 %v3274_v20, %v8841_v60  ;;  %v8933_v14 = vpop.eup %5336 }
 0x38c   : > { %v3296_v39 = vadd.f32 1599.0425, %v3280_v63  ;;  %v3297_v61 = vadd.f32 1599.0425, %v3281_v4  ;;  %v3298_v32 = vadd.f32 1599.0425, %v3282_v17  ;;  %v3307_v6 = vmul.f32 %v3291_v46, %v8792_v50 }
 0x38d   : > { %v3299_v25 = vadd.f32 1599.0425, %v3283_v11  ;;  %v3300_v24 = vadd.f32 1599.0425, %v3284_v48  ;;  %11450 = vst [vmem:[#allocation57_spill] sm:$0xff] %v8933_v14  ;;  %v3308_v63 = vmul.f32 %v3292_v52, %v8795_v42  ;;  %v3309_v4 = vmul.f32 %v3293_v58, %v8798_v29 }
 0x38e   : > { %v3301_v40 = vadd.f32 1599.0425, %v3285_v26  ;;  %v3302_v16 = vadd.f32 1599.0425, %v3286_v35  ;;  %v3303_v38 = vadd.f32 1599.0425, %v3287_v56  ;;  %v3310_v12 = vmul.f32 %v3294_v34, %v8801_v5 }
 0x38f   : > { %v8936_v36 = vpop.eup %5338  ;;  %v3304_v2 = vadd.f32 1599.0425, %v3288_v21  ;;  %v3305_v20 = vadd.f32 1599.0425, %v3289_v28  ;;  %v3311_v11 = vmul.f32 %v3295_v3, %v8804_v54  ;;  %v3312_v17 = vmul.f32 %v3296_v39, %v8807_v9 }
 0x390   : > { %11451 = vst [vmem:[#allocation139_spill] sm:$0xff] %v8936_v36  ;;  %v3313_v48 = vmul.f32 %v3297_v61, %v8811_v1  ;;  %v3306_v26 = vadd.f32 1599.0425, %v3290_v55  ;;  %v3314_v56 = vmul.f32 %v3298_v32, %v8814_v8  ;;  %v3315_v46 = vmul.f32 %v3299_v25, %v8817_v15 }
 0x391   : > { %v3316_v35 = vmul.f32 %v3300_v24, %v8821_v41  ;;  %v3317_v21 = vmul.f32 %v3301_v40, %v8824_v10  ;;  %v3318_v58 = vmul.f32 %v3302_v16, %v8827_v23  ;;  %v3319_v52 = vmul.f32 %v3303_v38, %v8831_v45 }
 0x392   : > { %v3323_v34 = vadd.f32 24165.51, %v3307_v6  ;;  %v3320_v3 = vmul.f32 %v3304_v2, %v8834_v33  ;;  %v3324_v28 = vadd.f32 24165.51, %v3308_v63  ;;  %v3325_v39 = vadd.f32 24165.51, %v3309_v4 }
 0x393   : > { %v3326_v36 = vadd.f32 24165.51, %v3310_v12  ;;  %v3321_v61 = vmul.f32 %v3305_v20, %v8837_v27  ;;  %v3327_v55 = vadd.f32 24165.51, %v3311_v11  ;;  %v3328_v32 = vadd.f32 24165.51, %v3312_v17 }
 0x394   : > { %v3329_v14 = vadd.f32 24165.51, %v3313_v48  ;;  %v3322_v25 = vmul.f32 %v3306_v26, %v8841_v60  ;;  %v3330_v24 = vadd.f32 24165.51, %v3314_v56  ;;  %v3331_v49 = vadd.f32 24165.51, %v3315_v46 }
 0x395   : > { %v3332_v40 = vadd.f32 24165.51, %v3316_v35  ;;  %v3333_v37 = vadd.f32 24165.51, %v3317_v21  ;;  %v3334_v16 = vadd.f32 24165.51, %v3318_v58  ;;  %v3339_v38 = vmul.f32 %v3323_v34, %v8792_v50 }
 0x396   : > { %v3335_v53 = vadd.f32 24165.51, %v3319_v52  ;;  %v3336_v6 = vadd.f32 24165.51, %v3320_v3  ;;  %v3340_v2 = vmul.f32 %v3324_v28, %v8795_v42  ;;  %v3341_v63 = vmul.f32 %v3325_v39, %v8798_v29 }
 0x397   : > { %v3342_v4 = vmul.f32 %v3326_v36, %v8801_v5  ;;  %v3337_v12 = vadd.f32 24165.51, %v3321_v61  ;;  %v3343_v20 = vmul.f32 %v3327_v55, %v8804_v54  ;;  %v3344_v11 = vmul.f32 %v3328_v32, %v8807_v9 }
 0x398   : > { %v3345_v17 = vmul.f32 %v3329_v14, %v8811_v1  ;;  %v3338_v48 = vadd.f32 24165.51, %v3322_v25  ;;  %v3346_v26 = vmul.f32 %v3330_v24, %v8814_v8  ;;  %v3347_v56 = vmul.f32 %v3331_v49, %v8817_v15 }
 0x399   : > { %v3348_v46 = vmul.f32 %v3332_v40, %v8821_v41  ;;  %v3349_v35 = vmul.f32 %v3333_v37, %v8824_v10  ;;  %v3350_v21 = vmul.f32 %v3334_v16, %v8827_v23  ;;  %v3351_v36 = vmul.f32 %v3335_v53, %v8831_v45 }
 0x39a   : > { %v3355_v58 = vadd.f32 228235.22, %v3339_v38  ;;  %v3352_v52 = vmul.f32 %v3336_v6, %v8834_v33  ;;  %v3356_v34 = vadd.f32 228235.22, %v3340_v2  ;;  %v3357_v3 = vadd.f32 228235.22, %v3341_v63 }
 0x39b   : > { %v3358_v28 = vadd.f32 228235.22, %v3342_v4  ;;  %v3353_v14 = vmul.f32 %v3337_v12, %v8837_v27  ;;  %v3359_v39 = vadd.f32 228235.22, %v3343_v20  ;;  %v3360_v61 = vadd.f32 228235.22, %v3344_v11 }
 0x39c   : > { %v3361_v55 = vadd.f32 228235.22, %v3345_v17  ;;  %v3354_v49 = vmul.f32 %v3338_v48, %v8841_v60  ;;  %v3362_v32 = vadd.f32 228235.22, %v3346_v26  ;;  %v3363_v25 = vadd.f32 228235.22, %v3347_v56 }
 0x39d   : > { %v3364_v37 = vadd.f32 228235.22, %v3348_v46  ;;  %v3365_v24 = vadd.f32 228235.22, %v3349_v35  ;;  %v3366_v40 = vadd.f32 228235.22, %v3350_v21  ;;  %v3371_v53 = vmul.f32 %v3355_v58, %v8792_v50 }
 0x39e   : > { %v3367_v16 = vadd.f32 228235.22, %v3351_v36  ;;  %v3368_v38 = vadd.f32 228235.22, %v3352_v52  ;;  %v3372_v6 = vmul.f32 %v3356_v34, %v8795_v42  ;;  %v3373_v2 = vmul.f32 %v3357_v3, %v8798_v29 }
 0x39f   : > { %v3374_v63 = vmul.f32 %v3358_v28, %v8801_v5  ;;  %v3369_v4 = vadd.f32 228235.22, %v3353_v14  ;;  %v3375_v12 = vmul.f32 %v3359_v39, %v8804_v54  ;;  %v3376_v20 = vmul.f32 %v3360_v61, %v8807_v9 }
 0x3a0   : > { %v3377_v11 = vmul.f32 %v3361_v55, %v8811_v1  ;;  %v3370_v17 = vadd.f32 228235.22, %v3354_v49  ;;  %v3378_v48 = vmul.f32 %v3362_v32, %v8814_v8  ;;  %v3379_v26 = vmul.f32 %v3363_v25, %v8817_v15 }
 0x3a1   : > { %v3380_v56 = vmul.f32 %v3364_v37, %v8821_v41  ;;  %v3381_v46 = vmul.f32 %v3365_v24, %v8824_v10  ;;  %v3382_v35 = vmul.f32 %v3366_v40, %v8827_v23  ;;  %v3383_v21 = vmul.f32 %v3367_v16, %v8831_v45 }
 0x3a2   : > { %v3387_v36 = vadd.f32 1379496.3, %v3371_v53  ;;  %v3384_v58 = vmul.f32 %v3368_v38, %v8834_v33  ;;  %v3388_v52 = vadd.f32 1379496.3, %v3372_v6  ;;  %v3389_v34 = vadd.f32 1379496.3, %v3373_v2 }
 0x3a3   : > { %v3390_v3 = vadd.f32 1379496.3, %v3374_v63  ;;  %v3385_v28 = vmul.f32 %v3369_v4, %v8837_v27  ;;  %v3391_v14 = vadd.f32 1379496.3, %v3375_v12  ;;  %v3392_v39 = vadd.f32 1379496.3, %v3376_v20 }
 0x3a4   : > { %v3393_v61 = vadd.f32 1379496.3, %v3377_v11  ;;  %v3386_v55 = vmul.f32 %v3370_v17, %v8841_v60  ;;  %v3394_v49 = vadd.f32 1379496.3, %v3378_v48  ;;  %v3395_v32 = vadd.f32 1379496.3, %v3379_v26 }
 0x3a5   : > { %v3396_v25 = vadd.f32 1379496.3, %v3380_v56  ;;  %v3397_v37 = vadd.f32 1379496.3, %v3381_v46  ;;  %v3398_v24 = vadd.f32 1379496.3, %v3382_v35  ;;  %v3403_v16 = vmul.f32 %v3387_v36, %v8792_v50 }
 0x3a6   : > { %v3399_v40 = vadd.f32 1379496.3, %v3383_v21  ;;  %v3400_v53 = vadd.f32 1379496.3, %v3384_v58  ;;  %v3404_v38 = vmul.f32 %v3388_v52, %v8795_v42  ;;  %v3405_v6 = vmul.f32 %v3389_v34, %v8798_v29 }
 0x3a7   : > { %v3406_v2 = vmul.f32 %v3390_v3, %v8801_v5  ;;  %v3401_v63 = vadd.f32 1379496.3, %v3385_v28  ;;  %v3407_v4 = vmul.f32 %v3391_v14, %v8804_v54  ;;  %v3408_v12 = vmul.f32 %v3392_v39, %v8807_v9 }
 0x3a8   : > { %v3409_v20 = vmul.f32 %v3393_v61, %v8811_v1  ;;  %v3402_v11 = vadd.f32 1379496.3, %v3386_v55  ;;  %v3410_v17 = vmul.f32 %v3394_v49, %v8814_v8  ;;  %v3411_v48 = vmul.f32 %v3395_v32, %v8817_v15 }
 0x3a9   : > { %v3412_v26 = vmul.f32 %v3396_v25, %v8821_v41  ;;  %v3413_v56 = vmul.f32 %v3397_v37, %v8824_v10  ;;  %v3414_v46 = vmul.f32 %v3398_v24, %v8827_v23  ;;  %v3415_v35 = vmul.f32 %v3399_v40, %v8831_v45 }
 0x3aa   : > { %v3419_v21 = vadd.f32 5210869.0, %v3403_v16  ;;  %v3416_v36 = vmul.f32 %v3400_v53, %v8834_v33  ;;  %v3420_v58 = vadd.f32 5210869.0, %v3404_v38  ;;  %v3421_v52 = vadd.f32 5210869.0, %v3405_v6 }
 0x3ab   : > { %v3422_v34 = vadd.f32 5210869.0, %v3406_v2  ;;  %v3417_v3 = vmul.f32 %v3401_v63, %v8837_v27  ;;  %v3423_v28 = vadd.f32 5210869.0, %v3407_v4  ;;  %v3424_v14 = vadd.f32 5210869.0, %v3408_v12 }
 0x3ac   : > { %v3425_v39 = vadd.f32 5210869.0, %v3409_v20  ;;  %v3418_v61 = vmul.f32 %v3402_v11, %v8841_v60  ;;  %v3426_v55 = vadd.f32 5210869.0, %v3410_v17  ;;  %v3427_v49 = vadd.f32 5210869.0, %v3411_v48 }
 0x3ad   : > { %v3428_v32 = vadd.f32 5210869.0, %v3412_v26  ;;  %v3429_v25 = vadd.f32 5210869.0, %v3413_v56  ;;  %v3430_v37 = vadd.f32 5210869.0, %v3414_v46  ;;  %v3435_v40 = vmul.f32 %v3419_v21, %v8792_v50 }
 0x3ae   : > { %v3431_v24 = vadd.f32 5210869.0, %v3415_v35  ;;  %v3432_v16 = vadd.f32 5210869.0, %v3416_v36  ;;  %v3436_v53 = vmul.f32 %v3420_v58, %v8795_v42  ;;  %v3437_v38 = vmul.f32 %v3421_v52, %v8798_v29 }
 0x3af   : > { %v3438_v6 = vmul.f32 %v3422_v34, %v8801_v5  ;;  %v3433_v2 = vadd.f32 5210869.0, %v3417_v3  ;;  %v3439_v63 = vmul.f32 %v3423_v28, %v8804_v54  ;;  %v3440_v4 = vmul.f32 %v3424_v14, %v8807_v9 }
 0x3b0   : > { %v3441_v12 = vmul.f32 %v3425_v39, %v8811_v1  ;;  %v3434_v20 = vadd.f32 5210869.0, %v3418_v61  ;;  %v3442_v11 = vmul.f32 %v3426_v55, %v8814_v8  ;;  %v3443_v17 = vmul.f32 %v3427_v49, %v8817_v15 }
 0x3b1   : > { %v3444_v48 = vmul.f32 %v3428_v32, %v8821_v41  ;;  %v3445_v26 = vmul.f32 %v3429_v25, %v8824_v10  ;;  %v3446_v56 = vmul.f32 %v3430_v37, %v8827_v23  ;;  %v3447_v46 = vmul.f32 %v3431_v24, %v8831_v45  ;;  %v11452_v32 = vld [vmem:[#allocation38_spill] sm:$0xff] }
 0x3b2   : > { %v3451_v35 = vadd.f32 11246929.0, %v3435_v40  ;;  %v3448_v21 = vmul.f32 %v3432_v16, %v8834_v33  ;;  %v3452_v36 = vadd.f32 11246929.0, %v3436_v53  ;;  %v3453_v58 = vadd.f32 11246929.0, %v3437_v38 }
 0x3b3   : > { %v3454_v52 = vadd.f32 11246929.0, %v3438_v6  ;;  %v3449_v34 = vmul.f32 %v3433_v2, %v8837_v27  ;;  %v3455_v3 = vadd.f32 11246929.0, %v3439_v63  ;;  %v3456_v28 = vadd.f32 11246929.0, %v3440_v4 }
 0x3b4   : > { %v3457_v14 = vadd.f32 11246929.0, %v3441_v12  ;;  %v3450_v39 = vmul.f32 %v3434_v20, %v8841_v60  ;;  %v3458_v61 = vadd.f32 11246929.0, %v3442_v11  ;;  %v3459_v55 = vadd.f32 11246929.0, %v3443_v17 }
 0x3b5   : > { %v3460_v49 = vadd.f32 11246929.0, %v3444_v48  ;;  %5340 = vlog2.f32 %v11452_v32  ;;  %v3461_v25 = vadd.f32 11246929.0, %v3445_v26  ;;  %v3462_v37 = vadd.f32 11246929.0, %v3446_v56 }
 0x3b6   : > { %v3463_v24 = vadd.f32 11246929.0, %v3447_v46  ;;  %v3464_v40 = vadd.f32 11246929.0, %v3448_v21  ;;  %v3467_v16 = vmul.f32 %v3451_v35, %v8792_v50  ;;  %v3468_v53 = vmul.f32 %v3452_v36, %v8795_v42 }
 0x3b7   : > { %v3469_v38 = vmul.f32 %v3453_v58, %v8798_v29  ;;  %v3465_v6 = vadd.f32 11246929.0, %v3449_v34  ;;  %v3470_v2 = vmul.f32 %v3454_v52, %v8801_v5  ;;  %v3471_v63 = vmul.f32 %v3455_v3, %v8804_v54 }
 0x3b8   : > { %v3472_v4 = vmul.f32 %v3456_v28, %v8807_v9  ;;  %v3466_v12 = vadd.f32 11246929.0, %v3450_v39  ;;  %v3473_v20 = vmul.f32 %v3457_v14, %v8811_v1  ;;  %v3474_v11 = vmul.f32 %v3458_v61, %v8814_v8 }
 0x3b9   : > { %v3475_v17 = vmul.f32 %v3459_v55, %v8817_v15  ;;  %v3476_v48 = vmul.f32 %v3460_v49, %v8821_v41  ;;  %v3477_v26 = vmul.f32 %v3461_v25, %v8824_v10  ;;  %v3478_v56 = vmul.f32 %v3462_v37, %v8827_v23  ;;  %v11462_v49 = vld [vmem:[#allocation39_spill] sm:$0xff] }
 0x3ba   : > { %v3479_v46 = vmul.f32 %v3463_v24, %v8831_v45  ;;  %v3480_v35 = vmul.f32 %v3464_v40, %v8834_v33  ;;  %v9032_v21 = vadd.f32 10619610.0, %v3467_v16  ;;  %v9034_v36 = vadd.f32 10619610.0, %v3468_v53 }
 0x3bb   : > { %v9036_v58 = vadd.f32 10619610.0, %v3469_v38  ;;  %v3481_v52 = vmul.f32 %v3465_v6, %v8837_v27  ;;  %v9039_v34 = vadd.f32 10619610.0, %v3470_v2  ;;  %v9041_v3 = vadd.f32 10619610.0, %v3471_v63 }
 0x3bc   : > { %11453 = vst [vmem:[#allocation111_spill] sm:$0xff] %v9032_v21  ;;  %11454 = vst [vmem:[#allocation62_spill] sm:$0xff] %v9034_v36  ;;  %v9043_v28 = vadd.f32 10619610.0, %v3472_v4  ;;  %v3482_v14 = vmul.f32 %v3466_v12, %v8841_v60  ;;  %v9046_v39 = vadd.f32 10619610.0, %v3473_v20  ;;  %5342 = vlog2.f32 %v11462_v49 }
 0x3bd   : > { %11455 = vst [vmem:[#allocation58_spill] sm:$0xff] %v9036_v58  ;;  %11456 = vst [vmem:[#allocation85_spill] sm:$0xff] %v9039_v34  ;;  %v9048_v61 = vadd.f32 10619610.0, %v3474_v11  ;;  %v9050_v55 = vadd.f32 10619610.0, %v3475_v17 }
 0x3be   : > { %11457 = vst [vmem:[#allocation112_spill] sm:$0xff] %v9041_v3  ;;  %11458 = vst [vmem:[#allocation86_spill] sm:$0xff] %v9043_v28  ;;  %v9053_v25 = vadd.f32 10619610.0, %v3476_v48  ;;  %v9055_v37 = vadd.f32 10619610.0, %v3477_v26 }
 0x3bf   : > { %11459 = vst [vmem:[#allocation65_spill] sm:$0xff] %v9046_v39  ;;  %11460 = vst [vmem:[#allocation12_spill] sm:$0xff] %v9048_v61  ;;  %v9057_v24 = vadd.f32 10619610.0, %v3478_v56  ;;  %v9060_v40 = vadd.f32 0.5, %v8725_v57  ;;  %v3499_v38 = vadd.f32 36.0, %v8792_v50  ;;  %v9067_v6 = vpop.eup %5340 }
 0x3c0   : > { %11461 = vst [vmem:[#allocation97_spill] sm:$0xff] %v9050_v55  ;;  %11463 = vst [vmem:[#allocation13_spill] sm:$0xff] %v9053_v25  ;;  %v9062_v16 = vadd.f32 10619610.0, %v3479_v46  ;;  %v9064_v53 = vadd.f32 10619610.0, %v3480_v35 }
 0x3c1   : > { %11464 = vst [vmem:[#allocation67_spill] sm:$0xff] %v9055_v37  ;;  %11465 = vst [vmem:[#allocation14_spill] sm:$0xff] %v9057_v24  ;;  %v9069_v2 = vadd.f32 10619610.0, %v3481_v52  ;;  %v3500_v63 = vadd.f32 36.0, %v8795_v42  ;;  %v3501_v4 = vadd.f32 36.0, %v8798_v29 }
 0x3c2   : > { %11466 = vst [vmem:[#allocation102_spill] sm:$0xff] %v9060_v40  ;;  %11467 = vst [vmem:[#allocation15_spill] sm:$0xff] %v9062_v16  ;;  %v3502_v12 = vadd.f32 36.0, %v8801_v5  ;;  %v9074_v20 = vadd.f32 10619610.0, %v3482_v14  ;;  %v3503_v11 = vadd.f32 36.0, %v8804_v54 }
 0x3c3   : > { %11468 = vst [vmem:[#allocation72_spill] sm:$0xff] %v9064_v53  ;;  %11469 = vst [vmem:[#allocation16_spill] sm:$0xff] %v9067_v6  ;;  %v3504_v17 = vadd.f32 36.0, %v8807_v9  ;;  %v3505_v48 = vadd.f32 36.0, %v8811_v1  ;;  %v3506_v26 = vadd.f32 36.0, %v8814_v8  ;;  %v3507_v56 = vadd.f32 36.0, %v8817_v15 }
 0x3c4   : > { %11470 = vst [vmem:[#allocation103_spill] sm:$0xff] %v9069_v2  ;;  %11471 = vst [vmem:[#allocation17_spill] sm:$0xff] %v9074_v20  ;;  %v3508_v46 = vadd.f32 36.0, %v8821_v41  ;;  %v3509_v35 = vadd.f32 36.0, %v8824_v10  ;;  %v3510_v52 = vadd.f32 36.0, %v8827_v23  ;;  %v3511_v49 = vadd.f32 36.0, %v8831_v45 }
 0x3c5   : > { %v3512_v14 = vadd.f32 36.0, %v8834_v33  ;;  %v3515_v6 = vmul.f32 %v3499_v38, %v8792_v50  ;;  %v3513_v32 = vadd.f32 36.0, %v8837_v27  ;;  %v3516_v40 = vmul.f32 %v3500_v63, %v8795_v42 }
 0x3c6   : > { %v3517_v20 = vmul.f32 %v3501_v4, %v8798_v29  ;;  %v3518_v2 = vmul.f32 %v3502_v12, %v8801_v5  ;;  %v3514_v53 = vadd.f32 36.0, %v8841_v60  ;;  %v3519_v16 = vmul.f32 %v3503_v11, %v8804_v54  ;;  %v9102_v11 = vpop.eup %5342 }
 0x3c7   : > { %v3520_v24 = vmul.f32 %v3504_v17, %v8807_v9  ;;  %v3521_v37 = vmul.f32 %v3505_v48, %v8811_v1  ;;  %v3522_v25 = vmul.f32 %v3506_v26, %v8814_v8  ;;  %v3523_v38 = vmul.f32 %v3507_v56, %v8817_v15  ;;  %11472 = vst [vmem:[#allocation73_spill] sm:$0xff] %v9102_v11 }
 0x3c8   : > { %v3524_v55 = vmul.f32 %v3508_v46, %v8821_v41  ;;  %v3525_v63 = vmul.f32 %v3509_v35, %v8824_v10  ;;  %v3526_v4 = vmul.f32 %v3510_v52, %v8827_v23  ;;  %v3527_v12 = vmul.f32 %v3511_v49, %v8831_v45 }
 0x3c9   : > { %v3528_v61 = vmul.f32 %v3512_v14, %v8834_v33  ;;  %v3531_v39 = vadd.f32 546.0, %v3515_v6  ;;  %v3529_v17 = vmul.f32 %v3513_v32, %v8837_v27  ;;  %v3532_v48 = vadd.f32 546.0, %v3516_v40 }
 0x3ca   : > { %v3533_v28 = vadd.f32 546.0, %v3517_v20  ;;  %v3534_v26 = vadd.f32 546.0, %v3518_v2  ;;  %v3530_v56 = vmul.f32 %v3514_v53, %v8841_v60  ;;  %v3535_v3 = vadd.f32 546.0, %v3519_v16 }
 0x3cb   : > { %v3536_v46 = vadd.f32 546.0, %v3520_v24  ;;  %v3537_v34 = vadd.f32 546.0, %v3521_v37  ;;  %v3538_v35 = vadd.f32 546.0, %v3522_v25  ;;  %v3539_v58 = vadd.f32 546.0, %v3523_v38 }
 0x3cc   : > { %v3540_v52 = vadd.f32 546.0, %v3524_v55  ;;  %v3541_v36 = vadd.f32 546.0, %v3525_v63  ;;  %v3542_v49 = vadd.f32 546.0, %v3526_v4  ;;  %v3543_v21 = vadd.f32 546.0, %v3527_v12 }
 0x3cd   : > { %v3544_v14 = vadd.f32 546.0, %v3528_v61  ;;  %v3547_v6 = vmul.f32 %v3531_v39, %v8792_v50  ;;  %v3545_v11 = vadd.f32 546.0, %v3529_v17  ;;  %v3548_v32 = vmul.f32 %v3532_v48, %v8795_v42 }
 0x3ce   : > { %v3549_v40 = vmul.f32 %v3533_v28, %v8798_v29  ;;  %v3550_v2 = vmul.f32 %v3534_v26, %v8801_v5  ;;  %v3546_v53 = vadd.f32 546.0, %v3530_v56  ;;  %v3551_v24 = vmul.f32 %v3535_v3, %v8804_v54 }
 0x3cf   : > { %v3552_v25 = vmul.f32 %v3536_v46, %v8807_v9  ;;  %v3553_v55 = vmul.f32 %v3537_v34, %v8811_v1  ;;  %v3554_v37 = vmul.f32 %v3538_v35, %v8814_v8  ;;  %v3555_v61 = vmul.f32 %v3539_v58, %v8817_v15 }
 0x3d0   : > { %v3556_v39 = vmul.f32 %v3540_v52, %v8821_v41  ;;  %v3557_v16 = vmul.f32 %v3541_v36, %v8824_v10  ;;  %v3558_v20 = vmul.f32 %v3542_v49, %v8827_v23  ;;  %v3559_v28 = vmul.f32 %v3543_v21, %v8831_v45 }
 0x3d1   : > { %v3560_v38 = vmul.f32 %v3544_v14, %v8834_v33  ;;  %v3563_v63 = vadd.f32 4536.0, %v3547_v6  ;;  %v3561_v3 = vmul.f32 %v3545_v11, %v8837_v27  ;;  %v3564_v4 = vadd.f32 4536.0, %v3548_v32 }
 0x3d2   : > { %v3565_v12 = vadd.f32 4536.0, %v3549_v40  ;;  %v3566_v34 = vadd.f32 4536.0, %v3550_v2  ;;  %v3562_v17 = vmul.f32 %v3546_v53, %v8841_v60  ;;  %v3567_v48 = vadd.f32 4536.0, %v3551_v24 }
 0x3d3   : > { %v3568_v58 = vadd.f32 4536.0, %v3552_v25  ;;  %v3569_v26 = vadd.f32 4536.0, %v3553_v55  ;;  %v3570_v56 = vadd.f32 4536.0, %v3554_v37  ;;  %v3571_v46 = vadd.f32 4536.0, %v3555_v61 }
 0x3d4   : > { %v3572_v36 = vadd.f32 4536.0, %v3556_v39  ;;  %v3573_v35 = vadd.f32 4536.0, %v3557_v16  ;;  %v3574_v52 = vadd.f32 4536.0, %v3558_v20  ;;  %v3575_v49 = vadd.f32 4536.0, %v3559_v28 }
 0x3d5   : > { %v3576_v21 = vadd.f32 4536.0, %v3560_v38  ;;  %v3579_v14 = vmul.f32 %v3563_v63, %v8792_v50  ;;  %v3577_v6 = vadd.f32 4536.0, %v3561_v3  ;;  %v3580_v11 = vmul.f32 %v3564_v4, %v8795_v42 }
 0x3d6   : > { %v3581_v32 = vmul.f32 %v3565_v12, %v8798_v29  ;;  %v3582_v40 = vmul.f32 %v3566_v34, %v8801_v5  ;;  %v3578_v2 = vadd.f32 4536.0, %v3562_v17  ;;  %v3583_v53 = vmul.f32 %v3567_v48, %v8804_v54 }
 0x3d7   : > { %v3584_v24 = vmul.f32 %v3568_v58, %v8807_v9  ;;  %v3585_v25 = vmul.f32 %v3569_v26, %v8811_v1  ;;  %v3586_v55 = vmul.f32 %v3570_v56, %v8814_v8  ;;  %v3587_v37 = vmul.f32 %v3571_v46, %v8817_v15  ;;  %v11473_v26 = vld [vmem:[#allocation41_spill] sm:$0xff] }
 0x3d8   : > { %v3588_v61 = vmul.f32 %v3572_v36, %v8821_v41  ;;  %v3589_v39 = vmul.f32 %v3573_v35, %v8824_v10  ;;  %v3590_v16 = vmul.f32 %v3574_v52, %v8827_v23  ;;  %v3591_v20 = vmul.f32 %v3575_v49, %v8831_v45 }
 0x3d9   : > { %v3592_v28 = vmul.f32 %v3576_v21, %v8834_v33  ;;  %v3595_v38 = vadd.f32 22449.0, %v3579_v14  ;;  %v3593_v63 = vmul.f32 %v3577_v6, %v8837_v27  ;;  %v3596_v3 = vadd.f32 22449.0, %v3580_v11 }
 0x3da   : > { %v3597_v4 = vadd.f32 22449.0, %v3581_v32  ;;  %v3598_v12 = vadd.f32 22449.0, %v3582_v40  ;;  %v3594_v34 = vmul.f32 %v3578_v2, %v8841_v60  ;;  %v3599_v17 = vadd.f32 22449.0, %v3583_v53 }
 0x3db   : > { %v3600_v48 = vadd.f32 22449.0, %v3584_v24  ;;  %v3601_v58 = vadd.f32 22449.0, %v3585_v25  ;;  %5344 = vlog2.f32 %v11473_v26  ;;  %v3602_v56 = vadd.f32 22449.0, %v3586_v55 }
 0x3dc   : > { %v3603_v46 = vadd.f32 22449.0, %v3587_v37  ;;  %v3604_v36 = vadd.f32 22449.0, %v3588_v61  ;;  %v3605_v35 = vadd.f32 22449.0, %v3589_v39  ;;  %v3611_v21 = vmul.f32 %v3595_v38, %v8792_v50 }
 0x3dd   : > { %v3606_v52 = vadd.f32 22449.0, %v3590_v16  ;;  %v3607_v49 = vadd.f32 22449.0, %v3591_v20  ;;  %v3608_v14 = vadd.f32 22449.0, %v3592_v28  ;;  %v3612_v11 = vmul.f32 %v3596_v3, %v8795_v42 }
 0x3de   : > { %v3609_v6 = vadd.f32 22449.0, %v3593_v63  ;;  %v3613_v32 = vmul.f32 %v3597_v4, %v8798_v29  ;;  %v3610_v40 = vadd.f32 22449.0, %v3594_v34  ;;  %v3614_v2 = vmul.f32 %v3598_v12, %v8801_v5 }
 0x3df   : > { %v3615_v53 = vmul.f32 %v3599_v17, %v8804_v54  ;;  %v3616_v24 = vmul.f32 %v3600_v48, %v8807_v9  ;;  %v3617_v25 = vmul.f32 %v3601_v58, %v8811_v1  ;;  %v3618_v55 = vmul.f32 %v3602_v56, %v8814_v8  ;;  %v11474_v58 = vld [vmem:[#allocation42_spill] sm:$0xff] }
 0x3e0   : > { %v3619_v37 = vmul.f32 %v3603_v46, %v8817_v15  ;;  %v3620_v61 = vmul.f32 %v3604_v36, %v8821_v41  ;;  %v3621_v39 = vmul.f32 %v3605_v35, %v8824_v10  ;;  %v3622_v16 = vmul.f32 %v3606_v52, %v8827_v23 }
 0x3e1   : > { %v3623_v20 = vmul.f32 %v3607_v49, %v8831_v45  ;;  %v3627_v28 = vadd.f32 67284.0, %v3611_v21  ;;  %v3624_v38 = vmul.f32 %v3608_v14, %v8834_v33  ;;  %v3625_v63 = vmul.f32 %v3609_v6, %v8837_v27 }
 0x3e2   : > { %v3628_v3 = vadd.f32 67284.0, %v3612_v11  ;;  %v3629_v4 = vadd.f32 67284.0, %v3613_v32  ;;  %v3626_v12 = vmul.f32 %v3610_v40, %v8841_v60  ;;  %v3630_v34 = vadd.f32 67284.0, %v3614_v2 }
 0x3e3   : > { %v3631_v17 = vadd.f32 67284.0, %v3615_v53  ;;  %v3632_v48 = vadd.f32 67284.0, %v3616_v24  ;;  %5346 = vlog2.f32 %v11474_v58  ;;  %v3633_v56 = vadd.f32 67284.0, %v3617_v25 }
 0x3e4   : > { %v3634_v46 = vadd.f32 67284.0, %v3618_v55  ;;  %v3635_v36 = vadd.f32 67284.0, %v3619_v37  ;;  %v3636_v35 = vadd.f32 67284.0, %v3620_v61  ;;  %v3643_v21 = vmul.f32 %v3627_v28, %v8792_v50 }
 0x3e5   : > { %v3637_v52 = vadd.f32 67284.0, %v3621_v39  ;;  %v3638_v49 = vadd.f32 67284.0, %v3622_v16  ;;  %v9157_v14 = vpop.eup %5344  ;;  %v3639_v6 = vadd.f32 67284.0, %v3623_v20  ;;  %v3644_v40 = vmul.f32 %v3628_v3, %v8795_v42 }
 0x3e6   : > { %11475 = vst [vmem:[#allocation18_spill] sm:$0xff] %v9157_v14  ;;  %v3640_v11 = vadd.f32 67284.0, %v3624_v38  ;;  %v3641_v32 = vadd.f32 67284.0, %v3625_v63  ;;  %v3645_v53 = vmul.f32 %v3629_v4, %v8798_v29  ;;  %v3646_v24 = vmul.f32 %v3630_v34, %v8801_v5 }
 0x3e7   : > { %v3642_v2 = vadd.f32 67284.0, %v3626_v12  ;;  %v3647_v25 = vmul.f32 %v3631_v17, %v8804_v54  ;;  %v3648_v55 = vmul.f32 %v3632_v48, %v8807_v9  ;;  %v3649_v37 = vmul.f32 %v3633_v56, %v8811_v1 }
 0x3e8   : > { %v3650_v61 = vmul.f32 %v3634_v46, %v8814_v8  ;;  %v3651_v39 = vmul.f32 %v3635_v36, %v8817_v15  ;;  %v3652_v16 = vmul.f32 %v3636_v35, %v8821_v41  ;;  %v3653_v20 = vmul.f32 %v3637_v52, %v8824_v10  ;;  %v11476_v46 = vld [vmem:[#allocation45_spill] sm:$0xff] }
 0x3e9   : > { %v3654_v28 = vmul.f32 %v3638_v49, %v8827_v23  ;;  %v3659_v38 = vadd.f32 118124.0, %v3643_v21  ;;  %v3655_v63 = vmul.f32 %v3639_v6, %v8831_v45  ;;  %v3656_v3 = vmul.f32 %v3640_v11, %v8834_v33 }
 0x3ea   : > { %v3657_v4 = vmul.f32 %v3641_v32, %v8837_v27  ;;  %v3660_v12 = vadd.f32 118124.0, %v3644_v40  ;;  %v3658_v34 = vmul.f32 %v3642_v2, %v8841_v60  ;;  %v3661_v17 = vadd.f32 118124.0, %v3645_v53 }
 0x3eb   : > { %v3662_v48 = vadd.f32 118124.0, %v3646_v24  ;;  %v3663_v56 = vadd.f32 118124.0, %v3647_v25  ;;  %5348 = vlog2.f32 %v11476_v46  ;;  %v3664_v36 = vadd.f32 118124.0, %v3648_v55 }
 0x3ec   : > { %v3665_v35 = vadd.f32 118124.0, %v3649_v37  ;;  %v3666_v52 = vadd.f32 118124.0, %v3650_v61  ;;  %v3667_v58 = vadd.f32 118124.0, %v3651_v39  ;;  %v3675_v6 = vmul.f32 %v3659_v38, %v8792_v50 }
 0x3ed   : > { %v3668_v49 = vadd.f32 118124.0, %v3652_v16  ;;  %v3669_v21 = vadd.f32 118124.0, %v3653_v20  ;;  %v9176_v14 = vpop.eup %5346  ;;  %v3670_v11 = vadd.f32 118124.0, %v3654_v28  ;;  %v3676_v2 = vmul.f32 %v3660_v12, %v8795_v42 }
 0x3ee   : > { %11477 = vst [vmem:[#allocation19_spill] sm:$0xff] %v9176_v14  ;;  %v3671_v32 = vadd.f32 118124.0, %v3655_v63  ;;  %v3672_v40 = vadd.f32 118124.0, %v3656_v3  ;;  %v3677_v25 = vmul.f32 %v3661_v17, %v8798_v29  ;;  %v3678_v55 = vmul.f32 %v3662_v48, %v8801_v5 }
 0x3ef   : > { %v3673_v53 = vadd.f32 118124.0, %v3657_v4  ;;  %v3674_v24 = vadd.f32 118124.0, %v3658_v34  ;;  %v3679_v37 = vmul.f32 %v3663_v56, %v8804_v54  ;;  %v3680_v61 = vmul.f32 %v3664_v36, %v8807_v9 }
 0x3f0   : > { %v3681_v39 = vmul.f32 %v3665_v35, %v8811_v1  ;;  %v3682_v16 = vmul.f32 %v3666_v52, %v8814_v8  ;;  %v3683_v20 = vmul.f32 %v3667_v58, %v8817_v15  ;;  %v3684_v28 = vmul.f32 %v3668_v49, %v8821_v41 }
 0x3f1   : > { %v3685_v38 = vmul.f32 %v3669_v21, %v8824_v10  ;;  %v3739_v63 = vmax.f32 %v8620_v44, 1.0  ;;  %v3686_v3 = vmul.f32 %v3670_v11, %v8827_v23  ;;  %v3687_v4 = vmul.f32 %v3671_v32, %v8831_v45 }
 0x3f2   : > { %v3688_v12 = vmul.f32 %v3672_v40, %v8834_v33  ;;  %v3740_v34 = vmax.f32 %v8633_v43, 1.0  ;;  %v3689_v17 = vmul.f32 %v3673_v53, %v8837_v27  ;;  %v3691_v48 = vadd.f32 109584.0, %v3675_v6 }
 0x3f3   : > { %v3692_v56 = vadd.f32 109584.0, %v3676_v2  ;;  %v3741_v58 = vmax.f32 %v8641_v62, 1.0  ;;  %v3690_v36 = vmul.f32 %v3674_v24, %v8841_v60  ;;  %v3693_v35 = vadd.f32 109584.0, %v3677_v25 }
 0x3f4   : > { %v3694_v52 = vadd.f32 109584.0, %v3678_v55  ;;  %v3742_v49 = vmax.f32 %v8648_v7, 1.0  ;;  %v3695_v21 = vadd.f32 109584.0, %v3679_v37  ;;  %v3743_v32 = vmax.f32 %v8655_v30, 1.0 }
 0x3f5   : > { %v3696_v11 = vadd.f32 109584.0, %v3680_v61  ;;  %5350 = vrcp.f32 %v3739_v63  ;;  %v9198_v40 = vpop.eup %5348  ;;  %v3697_v46 = vadd.f32 109584.0, %v3681_v39  ;;  %v3698_v14 = vadd.f32 109584.0, %v3682_v16 }
 0x3f6   : > { %11478 = vst [vmem:[#allocation20_spill] sm:$0xff] %v9198_v40  ;;  %v3744_v6 = vmax.f32 %v8666_v18, 1.0  ;;  %5352 = vrcp.f32 %v3740_v34  ;;  %v3699_v2 = vadd.f32 109584.0, %v3683_v20  ;;  %v3707_v53 = vmul.f32 %v3691_v48, %v8792_v50  ;;  %v11479_v34 = vld [vmem:[#allocation108_spill] sm:$0xff] }
 0x3f7   : > { %v3745_v24 = vmax.f32 %v8672_v22, 1.0  ;;  %5354 = vrcp.f32 %v3741_v58  ;;  %v3700_v25 = vadd.f32 109584.0, %v3684_v28  ;;  %v3701_v55 = vadd.f32 109584.0, %v3685_v38  ;;  %v11480_v58 = vld [vmem:[#allocation84_spill] sm:$0xff] }
 0x3f8   : > { %v3746_v37 = vmax.f32 %v8679_v47, 1.0  ;;  %5356 = vrcp.f32 %v3742_v49  ;;  %v3702_v61 = vadd.f32 109584.0, %v3686_v3  ;;  %v3708_v63 = vmul.f32 %v3692_v56, %v8795_v42  ;;  %v11481_v3 = vld [vmem:[#allocation80_spill] sm:$0xff] }
 0x3f9   : > { %v3747_v39 = vmax.f32 %v8688_v13, 1.0  ;;  %5358 = vrcp.f32 %v3743_v32  ;;  %v3703_v16 = vadd.f32 109584.0, %v3687_v4  ;;  %v3704_v40 = vadd.f32 109584.0, %v3688_v12  ;;  %v11482_v12 = vld [vmem:[#allocation66_spill] sm:$0xff] }
 0x3fa   : > { %v3748_v20 = vmax.f32 %v11479_v34, 1.0  ;;  %5360 = vrcp.f32 %v3744_v6  ;;  %v3705_v50 = vadd.f32 109584.0, %v3689_v17  ;;  %v3709_v48 = vmul.f32 %v3693_v35, %v8798_v29  ;;  %v11483_v35 = vld [vmem:[#allocation76_spill] sm:$0xff]  ;;  %v11484_v6 = vld [vmem:[#allocation105_spill] sm:$0xff] }
 0x3fb   : > { %v3749_v28 = vmax.f32 %v11480_v58, 1.0  ;;  %5362 = vrcp.f32 %v3745_v24  ;;  %v3706_v38 = vadd.f32 109584.0, %v3690_v36  ;;  %v3710_v49 = vmul.f32 %v3694_v52, %v8801_v5 }
 0x3fc   : > { %v3750_v26 = vmax.f32 %v11481_v3, 1.0  ;;  %5364 = vrcp.f32 %v3746_v37  ;;  %v3711_v42 = vmul.f32 %v3695_v21, %v8804_v54  ;;  %v3712_v4 = vmul.f32 %v3696_v11, %v8807_v9 }
 0x3fd   : > { %v3751_v56 = vmax.f32 %v11482_v12, 1.0  ;;  %5366 = vrcp.f32 %v3747_v39  ;;  %v3713_v17 = vmul.f32 %v3697_v46, %v8811_v1  ;;  %v3714_v29 = vmul.f32 %v3698_v14, %v8814_v8 }
 0x3fe   : > { %v3752_v32 = vmax.f32 %v11483_v35, 1.0  ;;  %5368 = vrcp.f32 %v3748_v20  ;;  %v3715_v5 = vmul.f32 %v3699_v2, %v8817_v15  ;;  %v3716_v52 = vmul.f32 %v3700_v25, %v8821_v41 }
 0x3ff   : > { %v9217_v36 = vpop.eup %5350  ;;  %v3753_v54 = vmax.f32 %v11484_v6, 1.0  ;;  %5370 = vrcp.f32 %v3749_v28  ;;  %v3717_v21 = vmul.f32 %v3701_v55, %v8824_v10  ;;  %v3718_v1 = vmul.f32 %v3702_v61, %v8827_v23 }
 0x400   : > { %v9222_v9 = vpop.eup %5352  ;;  %v3754_v8 = vmax.f32 %v8725_v57, 1.0  ;;  %5372 = vrcp.f32 %v3750_v26  ;;  %v3719_v46 = vmul.f32 %v3703_v16, %v8831_v45  ;;  %v3720_v15 = vmul.f32 %v3704_v40, %v8834_v33 }
 0x401   : > { %v9227_v14 = vpop.eup %5354  ;;  %v3721_v41 = vmul.f32 %v3705_v50, %v8837_v27  ;;  %5374 = vrcp.f32 %v3751_v56  ;;  %v3722_v2 = vmul.f32 %v3706_v38, %v8841_v60  ;;  %v9235_v24 = vadd.f32 40320.0, %v3707_v53 }
 0x402   : > { %v9232_v11 = vpop.eup %5356  ;;  %v9237_v10 = vadd.f32 40320.0, %v3708_v63  ;;  %5376 = vrcp.f32 %v3752_v32  ;;  %v9241_v26 = vadd.f32 40320.0, %v3709_v48  ;;  %v9243_v25 = vadd.f32 40320.0, %v3710_v49 }
 0x403   : > { %v9239_v23 = vpop.eup %5358  ;;  %v9245_v45 = vadd.f32 40320.0, %v3711_v42  ;;  %5378 = vrcp.f32 %v3753_v54  ;;  %v9249_v27 = vadd.f32 40320.0, %v3712_v4  ;;  %v3787_v60 = vmul.f32 10619610.0, %v9217_v36 }
 0x404   : > { %11485 = vst [vmem:[#allocation21_spill] sm:$0xff] %v9241_v26  ;;  %11486 = vst [vmem:[#allocation22_spill] sm:$0xff] %v9243_v25  ;;  %v9247_v33 = vpop.eup %5360  ;;  %5380 = vrcp.f32 %v3754_v8  ;;  %v3788_v40 = vmul.f32 10619610.0, %v9222_v9  ;;  %v9255_v55 = vadd.f32 40320.0, %v3713_v17  ;;  %v9257_v37 = vadd.f32 40320.0, %v3714_v29 }
 0x405   : > { %11487 = vst [vmem:[#allocation23_spill] sm:$0xff] %v9245_v45  ;;  %11488 = vst [vmem:[#allocation24_spill] sm:$0xff] %v9249_v27  ;;  %v9253_v53 = vpop.eup %5362  ;;  %v9259_v61 = vadd.f32 40320.0, %v3715_v5  ;;  %v9261_v63 = vadd.f32 40320.0, %v3716_v52  ;;  %v9265_v16 = vadd.f32 40320.0, %v3717_v21  ;;  %v9267_v20 = vadd.f32 40320.0, %v3718_v1 }
 0x406   : > { %11489 = vst [vmem:[#allocation25_spill] sm:$0xff] %v9255_v55  ;;  %11490 = vst [vmem:[#allocation26_spill] sm:$0xff] %v9257_v37  ;;  %v9263_v39 = vpop.eup %5364  ;;  %v9269_v50 = vadd.f32 40320.0, %v3719_v46  ;;  %v3789_v48 = vmul.f32 10619610.0, %v9227_v14  ;;  %v9274_v38 = vadd.f32 40320.0, %v3720_v15 }
 0x407   : > { %11491 = vst [vmem:[#allocation27_spill] sm:$0xff] %v9259_v61  ;;  %11492 = vst [vmem:[#allocation144_spill] sm:$0xff] %v9261_v63  ;;  %v9272_v28 = vpop.eup %5366  ;;  %v9276_v49 = vadd.f32 40320.0, %v3721_v41  ;;  %v9278_v42 = vadd.f32 40320.0, %v3722_v2  ;;  %v3790_v4 = vmul.f32 10619610.0, %v9232_v11 }
 0x408   : > { %11493 = vst [vmem:[#allocation145_spill] sm:$0xff] %v9265_v16  ;;  %11494 = vst [vmem:[#allocation146_spill] sm:$0xff] %v9267_v20  ;;  %v9281_v56 = vpop.eup %5368  ;;  %v3803_v17 = vadd.f32 11246929.0, %v3787_v60  ;;  %v3804_v29 = vadd.f32 11246929.0, %v3788_v40 }
 0x409   : > { %11495 = vst [vmem:[#allocation147_spill] sm:$0xff] %v9269_v50  ;;  %11496 = vst [vmem:[#allocation148_spill] sm:$0xff] %v9274_v38  ;;  %v9284_v32 = vmul.f32 40320.0, %v9217_v36  ;;  %v9287_v5 = vmul.f32 40320.0, %v9222_v9  ;;  %v9289_v52 = vpop.eup %5370  ;;  %v3791_v54 = vmul.f32 10619610.0, %v9239_v23 }
 0x40a   : > { %11497 = vst [vmem:[#allocation149_spill] sm:$0xff] %v9276_v49  ;;  %11498 = vst [vmem:[#allocation150_spill] sm:$0xff] %v9278_v42  ;;  %v3792_v21 = vmul.f32 10619610.0, %v9247_v33  ;;  %v9294_v1 = vmul.f32 40320.0, %v9227_v14  ;;  %v9297_v8 = vmul.f32 40320.0, %v9232_v11  ;;  %v9299_v46 = vpop.eup %5372  ;;  %v3819_v45 = vmul.f32 %v9217_v36, %v3803_v17 }
 0x40b   : > { %v11499_v15 = vld [vmem:[#allocation46_spill] sm:$0xff]  ;;  %v3793_v41 = vmul.f32 10619610.0, %v9253_v53  ;;  %v3794_v2 = vmul.f32 10619610.0, %v9263_v39  ;;  %v9304_v40 = vpop.eup %5374  ;;  %v11500_v42 = vld [vmem:[#allocation49_spill] sm:$0xff] }
 0x40c   : > { %5382 = vlog2.f32 %v11499_v15  ;;  %v3805_v60 = vadd.f32 11246929.0, %v3789_v48  ;;  %v3795_v49 = vmul.f32 10619610.0, %v9272_v28  ;;  %v3796_v38 = vmul.f32 10619610.0, %v9281_v56  ;;  %v9309_v57 = vpop.eup %5376 }
 0x40d   : > { %5384 = vlog2.f32 %v11500_v42  ;;  %v3806_v50 = vadd.f32 11246929.0, %v3790_v4  ;;  %v11501_v20 = vld [vmem:[#allocation109_spill] sm:$0xff]  ;;  %v3797_v15 = vmul.f32 10619610.0, %v9289_v52  ;;  %v9315_v48 = vpop.eup %5378  ;;  %v9331_v3 = vmul.f32 40320.0, %v9239_v23 }
 0x40e   : > { %5386 = vlog2.f32 %v11501_v20  ;;  %v3798_v6 = vmul.f32 10619610.0, %v9299_v46  ;;  %v3799_v16 = vmul.f32 10619610.0, %v9304_v40  ;;  %v3800_v63 = vmul.f32 10619610.0, %v9309_v57  ;;  %v9320_v4 = vpop.eup %5380 }
 0x40f   : > { %v3807_v12 = vadd.f32 11246929.0, %v3791_v54  ;;  %v3808_v61 = vadd.f32 11246929.0, %v3792_v21  ;;  %v3801_v37 = vmul.f32 10619610.0, %v9315_v48  ;;  %v3820_v54 = vmul.f32 %v9222_v9, %v3804_v29 }
 0x410   : > { %v3809_v58 = vadd.f32 11246929.0, %v3793_v41  ;;  %v3810_v55 = vadd.f32 11246929.0, %v3794_v2  ;;  %v3802_v34 = vmul.f32 10619610.0, %v9320_v4  ;;  %v3821_v47 = vmul.f32 %v9227_v14, %v3805_v60 }
 0x411   : > { %v3811_v27 = vadd.f32 11246929.0, %v3795_v49  ;;  %v3812_v13 = vadd.f32 11246929.0, %v3796_v38  ;;  %v3813_v42 = vadd.f32 11246929.0, %v3797_v15  ;;  %v3822_v20 = vmul.f32 %v9232_v11, %v3806_v50 }
 0x412   : > { %v3814_v35 = vadd.f32 11246929.0, %v3798_v6  ;;  %v3815_v19 = vadd.f32 11246929.0, %v3799_v16  ;;  %v3816_v21 = vadd.f32 11246929.0, %v3800_v63  ;;  %v3823_v2 = vmul.f32 %v9239_v23, %v3807_v12 }
 0x413   : > { %v3817_v41 = vadd.f32 11246929.0, %v3801_v37  ;;  %v3824_v38 = vmul.f32 %v9247_v33, %v3808_v61  ;;  %v3825_v49 = vmul.f32 %v9253_v53, %v3809_v58  ;;  %v3818_v17 = vadd.f32 11246929.0, %v3802_v34 }
 0x414   : > { %v3826_v6 = vmul.f32 %v9263_v39, %v3810_v55  ;;  %v3827_v16 = vmul.f32 %v9272_v28, %v3811_v27  ;;  %v3828_v63 = vmul.f32 %v9281_v56, %v3812_v13  ;;  %v3829_v50 = vmul.f32 %v9289_v52, %v3813_v42 }
 0x415   : > { %v3830_v15 = vmul.f32 %v9299_v46, %v3814_v35  ;;  %v3831_v37 = vmul.f32 %v9304_v40, %v3815_v19  ;;  %v3835_v12 = vadd.f32 5210869.0, %v3819_v45  ;;  %v3832_v58 = vmul.f32 %v9309_v57, %v3816_v21 }
 0x416   : > { %v9339_v29 = vpop.eup %5382  ;;  %v3836_v34 = vadd.f32 5210869.0, %v3820_v54  ;;  %v3837_v61 = vadd.f32 5210869.0, %v3821_v47  ;;  %v3838_v55 = vadd.f32 5210869.0, %v3822_v20  ;;  %v3833_v13 = vmul.f32 %v9315_v48, %v3817_v41 }
 0x417   : > { %11504 = vst [vmem:[#allocation151_spill] sm:$0xff] %v9339_v29  ;;  %v9344_v60 = vpop.eup %5384  ;;  %v3839_v27 = vadd.f32 5210869.0, %v3823_v2  ;;  %v3840_v29 = vadd.f32 5210869.0, %v3824_v38  ;;  %v3834_v42 = vmul.f32 %v9320_v4, %v3818_v17  ;;  %v3851_v21 = vmul.f32 %v9217_v36, %v3835_v12 }
 0x418   : > { %11505 = vst [vmem:[#allocation152_spill] sm:$0xff] %v9344_v60  ;;  %v9347_v51 = vpop.eup %5386  ;;  %v3841_v25 = vadd.f32 5210869.0, %v3825_v49  ;;  %v3842_v35 = vadd.f32 5210869.0, %v3826_v6  ;;  %v3852_v47 = vmul.f32 %v9222_v9, %v3836_v34  ;;  %v3853_v20 = vmul.f32 %v9227_v14, %v3837_v61 }
 0x419   : > { %11506 = vst [vmem:[#allocation153_spill] sm:$0xff] %v9347_v51  ;;  %v3843_v22 = vadd.f32 5210869.0, %v3827_v16  ;;  %v3844_v19 = vadd.f32 5210869.0, %v3828_v63  ;;  %v3854_v41 = vmul.f32 %v9232_v11, %v3838_v55  ;;  %v3855_v38 = vmul.f32 %v9239_v23, %v3839_v27 }
 0x41a   : > { %v3845_v45 = vadd.f32 5210869.0, %v3829_v50  ;;  %v3846_v26 = vadd.f32 5210869.0, %v3830_v15  ;;  %v3847_v60 = vadd.f32 5210869.0, %v3831_v37  ;;  %v3856_v49 = vmul.f32 %v9247_v33, %v3840_v29 }
 0x41b   : > { %v3848_v54 = vadd.f32 5210869.0, %v3832_v58  ;;  %v3849_v2 = vadd.f32 5210869.0, %v3833_v13  ;;  %v3857_v17 = vmul.f32 %v9253_v53, %v3841_v25  ;;  %v3850_v6 = vadd.f32 5210869.0, %v3834_v42 }
 0x41c   : > { %v3858_v16 = vmul.f32 %v9263_v39, %v3842_v35  ;;  %v3859_v63 = vmul.f32 %v9272_v28, %v3843_v22  ;;  %v3860_v50 = vmul.f32 %v9281_v56, %v3844_v19  ;;  %v3861_v15 = vmul.f32 %v9289_v52, %v3845_v45 }
 0x41d   : > { %v3862_v37 = vmul.f32 %v9299_v46, %v3846_v26  ;;  %v3863_v12 = vmul.f32 %v9304_v40, %v3847_v60  ;;  %v3867_v58 = vadd.f32 1379496.3, %v3851_v21  ;;  %v3864_v34 = vmul.f32 %v9309_v57, %v3848_v54 }
 0x41e   : > { %v3868_v61 = vadd.f32 1379496.3, %v3852_v47  ;;  %v3869_v29 = vadd.f32 1379496.3, %v3853_v20  ;;  %v3870_v55 = vadd.f32 1379496.3, %v3854_v41  ;;  %v3865_v25 = vmul.f32 %v9315_v48, %v3849_v2 }
 0x41f   : > { %v3871_v13 = vadd.f32 1379496.3, %v3855_v38  ;;  %v3872_v27 = vadd.f32 1379496.3, %v3856_v49  ;;  %v3873_v42 = vadd.f32 1379496.3, %v3857_v17  ;;  %v3866_v22 = vmul.f32 %v9320_v4, %v3850_v6 }
 0x420   : > { %v3874_v35 = vadd.f32 1379496.3, %v3858_v16  ;;  %v3875_v19 = vadd.f32 1379496.3, %v3859_v63  ;;  %v3876_v45 = vadd.f32 1379496.3, %v3860_v50  ;;  %v3883_v47 = vmul.f32 %v9217_v36, %v3867_v58 }
 0x421   : > { %v3877_v60 = vadd.f32 1379496.3, %v3861_v15  ;;  %v3878_v21 = vadd.f32 1379496.3, %v3862_v37  ;;  %v3879_v18 = vadd.f32 1379496.3, %v3863_v12  ;;  %v3884_v20 = vmul.f32 %v9222_v9, %v3868_v61 }
 0x422   : > { %v3880_v54 = vadd.f32 1379496.3, %v3864_v34  ;;  %v3885_v41 = vmul.f32 %v9227_v14, %v3869_v29  ;;  %v3881_v2 = vadd.f32 1379496.3, %v3865_v25  ;;  %v3886_v38 = vmul.f32 %v9232_v11, %v3870_v55 }
 0x423   : > { %v3887_v49 = vmul.f32 %v9239_v23, %v3871_v13  ;;  %v3888_v17 = vmul.f32 %v9247_v33, %v3872_v27  ;;  %v3882_v6 = vadd.f32 1379496.3, %v3866_v22  ;;  %v3889_v16 = vmul.f32 %v9253_v53, %v3873_v42 }
 0x424   : > { %v3890_v63 = vmul.f32 %v9263_v39, %v3874_v35  ;;  %v3891_v50 = vmul.f32 %v9272_v28, %v3875_v19  ;;  %v3892_v15 = vmul.f32 %v9281_v56, %v3876_v45  ;;  %v3893_v37 = vmul.f32 %v9289_v52, %v3877_v60 }
 0x425   : > { %v3894_v12 = vmul.f32 %v9299_v46, %v3878_v21  ;;  %v3895_v58 = vmul.f32 %v9304_v40, %v3879_v18  ;;  %v3896_v34 = vmul.f32 %v9309_v57, %v3880_v54  ;;  %v3899_v61 = vadd.f32 228235.22, %v3883_v47 }
 0x426   : > { %v3900_v29 = vadd.f32 228235.22, %v3884_v20  ;;  %v3901_v55 = vadd.f32 228235.22, %v3885_v41  ;;  %v3897_v25 = vmul.f32 %v9315_v48, %v3881_v2  ;;  %v3902_v13 = vadd.f32 228235.22, %v3886_v38 }
 0x427   : > { %v3903_v27 = vadd.f32 228235.22, %v3887_v49  ;;  %v3904_v42 = vadd.f32 228235.22, %v3888_v17  ;;  %v3898_v22 = vmul.f32 %v9320_v4, %v3882_v6  ;;  %v3905_v35 = vadd.f32 228235.22, %v3889_v16 }
 0x428   : > { %v3906_v19 = vadd.f32 228235.22, %v3890_v63  ;;  %v3907_v45 = vadd.f32 228235.22, %v3891_v50  ;;  %v3908_v26 = vadd.f32 228235.22, %v3892_v15  ;;  %v3915_v20 = vmul.f32 %v9217_v36, %v3899_v61 }
 0x429   : > { %v3909_v18 = vadd.f32 228235.22, %v3893_v37  ;;  %v3910_v51 = vadd.f32 228235.22, %v3894_v12  ;;  %v3911_v54 = vadd.f32 228235.22, %v3895_v58  ;;  %v3916_v41 = vmul.f32 %v9222_v9, %v3900_v29 }
 0x42a   : > { %v3912_v47 = vadd.f32 228235.22, %v3896_v34  ;;  %v3913_v2 = vadd.f32 228235.22, %v3897_v25  ;;  %v3917_v38 = vmul.f32 %v9227_v14, %v3901_v55  ;;  %v3918_v49 = vmul.f32 %v9232_v11, %v3902_v13 }
 0x42b   : > { %v3919_v17 = vmul.f32 %v9239_v23, %v3903_v27  ;;  %v3914_v6 = vadd.f32 228235.22, %v3898_v22  ;;  %v3920_v16 = vmul.f32 %v9247_v33, %v3904_v42  ;;  %v3921_v63 = vmul.f32 %v9253_v53, %v3905_v35 }
 0x42c   : > { %v3922_v50 = vmul.f32 %v9263_v39, %v3906_v19  ;;  %v3923_v15 = vmul.f32 %v9272_v28, %v3907_v45  ;;  %v3924_v37 = vmul.f32 %v9281_v56, %v3908_v26  ;;  %v3925_v12 = vmul.f32 %v9289_v52, %v3909_v18  ;;  %v11519_v18 = vld [vmem:[#allocation82_spill] sm:$0xff] }
 0x42d   : > { %v3926_v58 = vmul.f32 %v9299_v46, %v3910_v51  ;;  %v3927_v34 = vmul.f32 %v9304_v40, %v3911_v54  ;;  %v3928_v61 = vmul.f32 %v9309_v57, %v3912_v47  ;;  %v3931_v29 = vadd.f32 24165.51, %v3915_v20  ;;  %v11514_v47 = vld [vmem:[#allocation95_spill] sm:$0xff] }
 0x42e   : > { %v3932_v55 = vadd.f32 24165.51, %v3916_v41  ;;  %v3929_v25 = vmul.f32 %v9315_v48, %v3913_v2  ;;  %v3933_v13 = vadd.f32 24165.51, %v3917_v38  ;;  %v3934_v27 = vadd.f32 24165.51, %v3918_v49 }
 0x42f   : > { %v3935_v42 = vadd.f32 24165.51, %v3919_v17  ;;  %v3930_v22 = vmul.f32 %v9320_v4, %v3914_v6  ;;  %v3936_v35 = vadd.f32 24165.51, %v3920_v16  ;;  %v3937_v19 = vadd.f32 24165.51, %v3921_v63 }
 0x430   : > { %v3938_v26 = vadd.f32 24165.51, %v3922_v50  ;;  %v3939_v51 = vadd.f32 24165.51, %v3923_v15  ;;  %v3940_v21 = vadd.f32 24165.51, %v3924_v37  ;;  %v3947_v49 = vmul.f32 %v9217_v36, %v3931_v29 }
 0x431   : > { %v3941_v54 = vadd.f32 24165.51, %v3925_v12  ;;  %v3942_v41 = vadd.f32 24165.51, %v3926_v58  ;;  %v3943_v31 = vadd.f32 24165.51, %v3927_v34  ;;  %v3948_v17 = vmul.f32 %v9222_v9, %v3932_v55 }
 0x432   : > { %v3944_v2 = vadd.f32 24165.51, %v3928_v61  ;;  %v3945_v38 = vadd.f32 24165.51, %v3929_v25  ;;  %v3949_v6 = vmul.f32 %v9227_v14, %v3933_v13  ;;  %v3946_v16 = vadd.f32 24165.51, %v3930_v22 }
 0x433   : > { %v3950_v63 = vmul.f32 %v9232_v11, %v3934_v27  ;;  %v3951_v50 = vmul.f32 %v9239_v23, %v3935_v42  ;;  %v3952_v15 = vmul.f32 %v9247_v33, %v3936_v35  ;;  %v3953_v37 = vmul.f32 %v9253_v53, %v3937_v19 }
 0x434   : > { %v3954_v12 = vmul.f32 %v9263_v39, %v3938_v26  ;;  %v3955_v58 = vmul.f32 %v9272_v28, %v3939_v51  ;;  %v3956_v34 = vmul.f32 %v9281_v56, %v3940_v21  ;;  %v3957_v61 = vmul.f32 %v9289_v52, %v3941_v54 }
 0x435   : > { %v3958_v29 = vmul.f32 %v9299_v46, %v3942_v41  ;;  %v3959_v55 = vmul.f32 %v9304_v40, %v3943_v31  ;;  %v3960_v25 = vmul.f32 %v9309_v57, %v3944_v2  ;;  %v3961_v13 = vmul.f32 %v9315_v48, %v3945_v38  ;;  %v11515_v31 = vld [vmem:[#allocation90_spill] sm:$0xff] }
 0x436   : > { %v3963_v27 = vadd.f32 1599.0425, %v3947_v49  ;;  %v3964_v42 = vadd.f32 1599.0425, %v3948_v17  ;;  %v3965_v22 = vadd.f32 1599.0425, %v3949_v6  ;;  %v3962_v35 = vmul.f32 %v9320_v4, %v3946_v16 }
 0x437   : > { %v3966_v19 = vadd.f32 1599.0425, %v3950_v63  ;;  %v3967_v26 = vadd.f32 1599.0425, %v3951_v50  ;;  %v3968_v51 = vadd.f32 1599.0425, %v3952_v15  ;;  %v9427_v45 = vmul.f32 %v11515_v31, %v11514_v47 }
 0x438   : > { %v3969_v54 = vadd.f32 1599.0425, %v3953_v37  ;;  %v3970_v60 = vadd.f32 1599.0425, %v3954_v12  ;;  %v3971_v41 = vadd.f32 1599.0425, %v3955_v58  ;;  %v3979_v16 = vmul.f32 %v9217_v36, %v3963_v27 }
 0x439   : > { %11516 = vst [vmem:[#allocation95_spill] sm:$0xff] %v9427_v45  ;;  %v3972_v2 = vadd.f32 1599.0425, %v3956_v34  ;;  %v3973_v38 = vadd.f32 1599.0425, %v3957_v61  ;;  %v3980_v50 = vmul.f32 %v9222_v9, %v3964_v42  ;;  %v3981_v15 = vmul.f32 %v9227_v14, %v3965_v22  ;;  %v11523_v45 = vld [vmem:[#allocation29_spill] sm:$0xff] }
 0x43a   : > { %v3974_v49 = vadd.f32 1599.0425, %v3958_v29  ;;  %v3975_v17 = vadd.f32 1599.0425, %v3959_v55  ;;  %v3976_v6 = vadd.f32 1599.0425, %v3960_v25  ;;  %v3982_v37 = vmul.f32 %v9232_v11, %v3966_v19 }
 0x43b   : > { %v3977_v59 = vadd.f32 1599.0425, %v3961_v13  ;;  %v3978_v63 = vadd.f32 1599.0425, %v3962_v35  ;;  %v3983_v12 = vmul.f32 %v9239_v23, %v3967_v26  ;;  %v3984_v47 = vmul.f32 %v9247_v33, %v3968_v51 }
 0x43c   : > { %v3985_v58 = vmul.f32 %v9253_v53, %v3969_v54  ;;  %v3986_v34 = vmul.f32 %v9263_v39, %v3970_v60  ;;  %v3987_v61 = vmul.f32 %v9272_v28, %v3971_v41  ;;  %v3988_v29 = vmul.f32 %v9281_v56, %v3972_v2 }
 0x43d   : > { %v3989_v55 = vmul.f32 %v9289_v52, %v3973_v38  ;;  %v3990_v25 = vmul.f32 %v9299_v46, %v3974_v49  ;;  %v3991_v13 = vmul.f32 %v9304_v40, %v3975_v17  ;;  %v3992_v27 = vmul.f32 %v9309_v57, %v3976_v6  ;;  %v11520_v49 = vld [vmem:[#allocation44_spill] sm:$0xff] }
 0x43e   : > { %v3993_v42 = vmul.f32 %v9315_v48, %v3977_v59  ;;  %v3995_v22 = vadd.f32 60.458332, %v3979_v16  ;;  %v3994_v35 = vmul.f32 %v9320_v4, %v3978_v63  ;;  %v3996_v19 = vadd.f32 60.458332, %v3980_v50  ;;  %v11522_v63 = vld [vmem:[#allocation28_spill] sm:$0xff] }
 0x43f   : > { %v3997_v26 = vadd.f32 60.458332, %v3981_v15  ;;  %v3998_v60 = vadd.f32 60.458332, %v3982_v37  ;;  %v3999_v31 = vadd.f32 60.458332, %v3983_v12  ;;  %v9449_v20 = vmul.f32 %v11520_v49, %v11519_v18 }
 0x440   : > { %v4000_v2 = vadd.f32 60.458332, %v3984_v47  ;;  %v4001_v38 = vadd.f32 60.458332, %v3985_v58  ;;  %v4002_v17 = vadd.f32 60.458332, %v3986_v34  ;;  %5388 = vrcp.f32 %v11522_v63 }
 0x441   : > { %11521 = vst [vmem:[#allocation90_spill] sm:$0xff] %v9449_v20  ;;  %v4003_v6 = vadd.f32 60.458332, %v3987_v61  ;;  %v4004_v21 = vadd.f32 60.458332, %v3988_v29  ;;  %5390 = vrcp.f32 %v11523_v45  ;;  %v4011_v12 = vmul.f32 %v9217_v36, %v3995_v22 }
 0x442   : > { %v4005_v59 = vadd.f32 60.458332, %v3989_v55  ;;  %v4006_v16 = vadd.f32 60.458332, %v3990_v25  ;;  %v4007_v0 = vadd.f32 60.458332, %v3991_v13  ;;  %v4012_v47 = vmul.f32 %v9222_v9, %v3996_v19 }
 0x443   : > { %v4008_v50 = vadd.f32 60.458332, %v3992_v27  ;;  %v4009_v15 = vadd.f32 60.458332, %v3993_v42  ;;  %v4010_v37 = vadd.f32 60.458332, %v3994_v35  ;;  %v4013_v18 = vmul.f32 %v9227_v14, %v3997_v26 }
 0x444   : > { %v4014_v58 = vmul.f32 %v9232_v11, %v3998_v60  ;;  %v4015_v34 = vmul.f32 %v9239_v23, %v3999_v31  ;;  %v4016_v61 = vmul.f32 %v9247_v33, %v4000_v2  ;;  %v9460_v29 = vmul.f32 %v9253_v53, %v4001_v38 }
 0x445   : > { %v9463_v55 = vmul.f32 %v9263_v39, %v4002_v17  ;;  %v9466_v45 = vmul.f32 %v9272_v28, %v4003_v6  ;;  %v9469_v25 = vmul.f32 %v9281_v56, %v4004_v21  ;;  %v9472_v13 = vmul.f32 %v9289_v52, %v4005_v59 }
 0x446   : > { %v9475_v27 = vmul.f32 %v9299_v46, %v4006_v16  ;;  %v9478_v42 = vmul.f32 %v9304_v40, %v4007_v0  ;;  %v9481_v22 = vmul.f32 %v9309_v57, %v4008_v50  ;;  %v9484_v35 = vmul.f32 %v9315_v48, %v4009_v15 }
 0x447   : > { %11524 = vst [vmem:[#allocation82_spill] sm:$0xff] %v9472_v13  ;;  %v9487_v19 = vmul.f32 %v9320_v4, %v4010_v37  ;;  %v9489_v21 = vadd.f32 1.0, %v4011_v12  ;;  %v9491_v26 = vadd.f32 1.0, %v4012_v47  ;;  %v9493_v60 = vadd.f32 1.0, %v4013_v18 }
 0x448   : > { %11525 = vst [vmem:[#allocation44_spill] sm:$0xff] %v9475_v27  ;;  %11526 = vst [vmem:[#allocation28_spill] sm:$0xff] %v9478_v42  ;;  %v9495_v31 = vadd.f32 1.0, %v4014_v58  ;;  %v9497_v2 = vadd.f32 1.0, %v4015_v34  ;;  %v9499_v0 = vadd.f32 1.0, %v4016_v61  ;;  %v4048_v38 = vmul.f32 40320.0, %v9247_v33 }
 0x449   : > { %11527 = vst [vmem:[#allocation29_spill] sm:$0xff] %v9481_v22  ;;  %11528 = vst [vmem:[#allocation154_spill] sm:$0xff] %v9484_v35  ;;  %v4059_v49 = vadd.f32 109584.0, %v9284_v32  ;;  %v4049_v17 = vmul.f32 40320.0, %v9253_v53  ;;  %v4050_v6 = vmul.f32 40320.0, %v9263_v39 }
 0x44a   : > { %11529 = vst [vmem:[#allocation155_spill] sm:$0xff] %v9487_v19  ;;  %11530 = vst [vmem:[#allocation156_spill] sm:$0xff] %v9499_v0  ;;  %v4051_v59 = vmul.f32 40320.0, %v9272_v28  ;;  %v4060_v16 = vadd.f32 109584.0, %v9287_v5  ;;  %v4052_v63 = vmul.f32 40320.0, %v9281_v56  ;;  %v9511_v12 = vpop.eup %5388 }
 0x44b   : > { %v4053_v50 = vmul.f32 40320.0, %v9289_v52  ;;  %v4054_v15 = vmul.f32 40320.0, %v9299_v46  ;;  %v4061_v37 = vadd.f32 109584.0, %v9294_v1  ;;  %11531 = vst [vmem:[#allocation157_spill] sm:$0xff] %v9511_v12  ;;  %v4055_v32 = vmul.f32 40320.0, %v9304_v40  ;;  %v9517_v34 = vpop.eup %5390 }
 0x44c   : > { %v4056_v47 = vmul.f32 40320.0, %v9309_v57  ;;  %v4057_v18 = vmul.f32 40320.0, %v9315_v48  ;;  %v4062_v58 = vadd.f32 109584.0, %v9297_v8  ;;  %11532 = vst [vmem:[#allocation158_spill] sm:$0xff] %v9517_v34  ;;  %v4058_v5 = vmul.f32 40320.0, %v9320_v4 }
 0x44d   : > { %v4063_v61 = vadd.f32 109584.0, %v9331_v3  ;;  %v4064_v41 = vadd.f32 109584.0, %v4048_v38  ;;  %v4075_v51 = vmul.f32 %v9217_v36, %v4059_v49  ;;  %v4065_v1 = vadd.f32 109584.0, %v4049_v17 }
 0x44e   : > { %v4066_v54 = vadd.f32 109584.0, %v4050_v6  ;;  %v4067_v12 = vadd.f32 109584.0, %v4051_v59  ;;  %v4076_v20 = vmul.f32 %v9222_v9, %v4060_v16  ;;  %v4068_v19 = vadd.f32 109584.0, %v4052_v63 }
 0x44f   : > { %v4069_v35 = vadd.f32 109584.0, %v4053_v50  ;;  %v4070_v22 = vadd.f32 109584.0, %v4054_v15  ;;  %v4077_v42 = vmul.f32 %v9227_v14, %v4061_v37  ;;  %v4071_v8 = vadd.f32 109584.0, %v4055_v32 }
 0x450   : > { %v4072_v27 = vadd.f32 109584.0, %v4056_v47  ;;  %v4073_v34 = vadd.f32 109584.0, %v4057_v18  ;;  %v4078_v13 = vmul.f32 %v9232_v11, %v4062_v58  ;;  %v4074_v0 = vadd.f32 109584.0, %v4058_v5 }
 0x451   : > { %v4079_v3 = vmul.f32 %v9239_v23, %v4063_v61  ;;  %v4080_v38 = vmul.f32 %v9247_v33, %v4064_v41  ;;  %v4091_v49 = vadd.f32 118124.0, %v4075_v51  ;;  %v4081_v17 = vmul.f32 %v9253_v53, %v4065_v1 }
 0x452   : > { %v4082_v6 = vmul.f32 %v9263_v39, %v4066_v54  ;;  %v4083_v59 = vmul.f32 %v9272_v28, %v4067_v12  ;;  %v4092_v16 = vadd.f32 118124.0, %v4076_v20  ;;  %v4084_v63 = vmul.f32 %v9281_v56, %v4068_v19 }
 0x453   : > { %v4085_v50 = vmul.f32 %v9289_v52, %v4069_v35  ;;  %v4086_v15 = vmul.f32 %v9299_v46, %v4070_v22  ;;  %v4093_v37 = vadd.f32 118124.0, %v4077_v42  ;;  %v4087_v32 = vmul.f32 %v9304_v40, %v4071_v8 }
 0x454   : > { %v4088_v47 = vmul.f32 %v9309_v57, %v4072_v27  ;;  %v4089_v51 = vmul.f32 %v9315_v48, %v4073_v34  ;;  %v4094_v41 = vadd.f32 118124.0, %v4078_v13  ;;  %v4090_v18 = vmul.f32 %v9320_v4, %v4074_v0 }
 0x455   : > { %v4095_v54 = vadd.f32 118124.0, %v4079_v3  ;;  %v4096_v58 = vadd.f32 118124.0, %v4080_v38  ;;  %v4107_v20 = vmul.f32 %v9217_v36, %v4091_v49  ;;  %v4097_v12 = vadd.f32 118124.0, %v4081_v17 }
 0x456   : > { %v4098_v19 = vadd.f32 118124.0, %v4082_v6  ;;  %v4099_v5 = vadd.f32 118124.0, %v4083_v59  ;;  %v4108_v35 = vmul.f32 %v9222_v9, %v4092_v16  ;;  %v4100_v22 = vadd.f32 118124.0, %v4084_v63 }
 0x457   : > { %v4101_v42 = vadd.f32 118124.0, %v4085_v50  ;;  %v4102_v61 = vadd.f32 118124.0, %v4086_v15  ;;  %v4109_v1 = vmul.f32 %v9227_v14, %v4093_v37  ;;  %v4103_v27 = vadd.f32 118124.0, %v4087_v32 }
 0x458   : > { %v4104_v8 = vadd.f32 118124.0, %v4088_v47  ;;  %v4105_v34 = vadd.f32 118124.0, %v4089_v51  ;;  %v4110_v13 = vmul.f32 %v9232_v11, %v4094_v41  ;;  %v4106_v0 = vadd.f32 118124.0, %v4090_v18 }
 0x459   : > { %v4111_v3 = vmul.f32 %v9239_v23, %v4095_v54  ;;  %v4112_v38 = vmul.f32 %v9247_v33, %v4096_v58  ;;  %v4123_v49 = vadd.f32 67284.0, %v4107_v20  ;;  %v4113_v17 = vmul.f32 %v9253_v53, %v4097_v12 }
 0x45a   : > { %v4114_v6 = vmul.f32 %v9263_v39, %v4098_v19  ;;  %v4115_v59 = vmul.f32 %v9272_v28, %v4099_v5  ;;  %v4124_v16 = vadd.f32 67284.0, %v4108_v35  ;;  %v4116_v63 = vmul.f32 %v9281_v56, %v4100_v22 }
 0x45b   : > { %v4117_v50 = vmul.f32 %v9289_v52, %v4101_v42  ;;  %v4118_v15 = vmul.f32 %v9299_v46, %v4102_v61  ;;  %v4125_v37 = vadd.f32 67284.0, %v4109_v1  ;;  %v4119_v32 = vmul.f32 %v9304_v40, %v4103_v27 }
 0x45c   : > { %v4120_v47 = vmul.f32 %v9309_v57, %v4104_v8  ;;  %v4121_v51 = vmul.f32 %v9315_v48, %v4105_v34  ;;  %v4126_v41 = vadd.f32 67284.0, %v4110_v13  ;;  %v4122_v18 = vmul.f32 %v9320_v4, %v4106_v0 }
 0x45d   : > { %v4127_v54 = vadd.f32 67284.0, %v4111_v3  ;;  %v4128_v58 = vadd.f32 67284.0, %v4112_v38  ;;  %v4139_v20 = vmul.f32 %v9217_v36, %v4123_v49  ;;  %v4129_v12 = vadd.f32 67284.0, %v4113_v17 }
 0x45e   : > { %v4130_v19 = vadd.f32 67284.0, %v4114_v6  ;;  %v4131_v5 = vadd.f32 67284.0, %v4115_v59  ;;  %v4140_v35 = vmul.f32 %v9222_v9, %v4124_v16  ;;  %v4132_v22 = vadd.f32 67284.0, %v4116_v63 }
 0x45f   : > { %v4133_v42 = vadd.f32 67284.0, %v4117_v50  ;;  %v4134_v61 = vadd.f32 67284.0, %v4118_v15  ;;  %v4141_v1 = vmul.f32 %v9227_v14, %v4125_v37  ;;  %v4135_v27 = vadd.f32 67284.0, %v4119_v32 }
 0x460   : > { %v4136_v8 = vadd.f32 67284.0, %v4120_v47  ;;  %v4137_v34 = vadd.f32 67284.0, %v4121_v51  ;;  %v4142_v13 = vmul.f32 %v9232_v11, %v4126_v41  ;;  %v4138_v0 = vadd.f32 67284.0, %v4122_v18 }
 0x461   : > { %v4143_v3 = vmul.f32 %v9239_v23, %v4127_v54  ;;  %v4144_v38 = vmul.f32 %v9247_v33, %v4128_v58  ;;  %v4155_v49 = vadd.f32 22449.0, %v4139_v20  ;;  %v4145_v17 = vmul.f32 %v9253_v53, %v4129_v12 }
 0x462   : > { %v4146_v6 = vmul.f32 %v9263_v39, %v4130_v19  ;;  %v4147_v59 = vmul.f32 %v9272_v28, %v4131_v5  ;;  %v4156_v16 = vadd.f32 22449.0, %v4140_v35  ;;  %v4148_v63 = vmul.f32 %v9281_v56, %v4132_v22 }
 0x463   : > { %v4149_v50 = vmul.f32 %v9289_v52, %v4133_v42  ;;  %v4150_v15 = vmul.f32 %v9299_v46, %v4134_v61  ;;  %v4157_v37 = vadd.f32 22449.0, %v4141_v1  ;;  %v4151_v32 = vmul.f32 %v9304_v40, %v4135_v27 }
 0x464   : > { %v4152_v47 = vmul.f32 %v9309_v57, %v4136_v8  ;;  %v4153_v51 = vmul.f32 %v9315_v48, %v4137_v34  ;;  %v4158_v41 = vadd.f32 22449.0, %v4142_v13  ;;  %v4154_v18 = vmul.f32 %v9320_v4, %v4138_v0 }
 0x465   : > { %v4159_v54 = vadd.f32 22449.0, %v4143_v3  ;;  %v4160_v58 = vadd.f32 22449.0, %v4144_v38  ;;  %v4171_v20 = vmul.f32 %v9217_v36, %v4155_v49  ;;  %v4161_v12 = vadd.f32 22449.0, %v4145_v17 }
 0x466   : > { %v4162_v19 = vadd.f32 22449.0, %v4146_v6  ;;  %v4163_v5 = vadd.f32 22449.0, %v4147_v59  ;;  %v4172_v35 = vmul.f32 %v9222_v9, %v4156_v16  ;;  %v4164_v22 = vadd.f32 22449.0, %v4148_v63 }
 0x467   : > { %v4165_v42 = vadd.f32 22449.0, %v4149_v50  ;;  %v4166_v61 = vadd.f32 22449.0, %v4150_v15  ;;  %v4173_v1 = vmul.f32 %v9227_v14, %v4157_v37  ;;  %v4167_v27 = vadd.f32 22449.0, %v4151_v32 }
 0x468   : > { %v4168_v8 = vadd.f32 22449.0, %v4152_v47  ;;  %v4169_v34 = vadd.f32 22449.0, %v4153_v51  ;;  %v4174_v13 = vmul.f32 %v9232_v11, %v4158_v41  ;;  %v4170_v0 = vadd.f32 22449.0, %v4154_v18 }
 0x469   : > { %v4175_v3 = vmul.f32 %v9239_v23, %v4159_v54  ;;  %v4176_v38 = vmul.f32 %v9247_v33, %v4160_v58  ;;  %v4187_v49 = vadd.f32 4536.0, %v4171_v20  ;;  %v4177_v17 = vmul.f32 %v9253_v53, %v4161_v12 }
 0x46a   : > { %v4178_v6 = vmul.f32 %v9263_v39, %v4162_v19  ;;  %v4179_v59 = vmul.f32 %v9272_v28, %v4163_v5  ;;  %v4188_v16 = vadd.f32 4536.0, %v4172_v35  ;;  %v4180_v63 = vmul.f32 %v9281_v56, %v4164_v22 }
 0x46b   : > { %v4181_v50 = vmul.f32 %v9289_v52, %v4165_v42  ;;  %v4182_v15 = vmul.f32 %v9299_v46, %v4166_v61  ;;  %v4189_v37 = vadd.f32 4536.0, %v4173_v1  ;;  %v4183_v32 = vmul.f32 %v9304_v40, %v4167_v27 }
 0x46c   : > { %v4184_v47 = vmul.f32 %v9309_v57, %v4168_v8  ;;  %v4185_v51 = vmul.f32 %v9315_v48, %v4169_v34  ;;  %v4190_v41 = vadd.f32 4536.0, %v4174_v13  ;;  %v4186_v18 = vmul.f32 %v9320_v4, %v4170_v0 }
 0x46d   : > { %v4191_v54 = vadd.f32 4536.0, %v4175_v3  ;;  %v4192_v58 = vadd.f32 4536.0, %v4176_v38  ;;  %v4203_v20 = vmul.f32 %v9217_v36, %v4187_v49  ;;  %v4193_v12 = vadd.f32 4536.0, %v4177_v17 }
 0x46e   : > { %v4194_v19 = vadd.f32 4536.0, %v4178_v6  ;;  %v4195_v5 = vadd.f32 4536.0, %v4179_v59  ;;  %v4204_v35 = vmul.f32 %v9222_v9, %v4188_v16  ;;  %v4196_v22 = vadd.f32 4536.0, %v4180_v63 }
 0x46f   : > { %v4197_v42 = vadd.f32 4536.0, %v4181_v50  ;;  %v4198_v61 = vadd.f32 4536.0, %v4182_v15  ;;  %v4205_v1 = vmul.f32 %v9227_v14, %v4189_v37  ;;  %v4199_v27 = vadd.f32 4536.0, %v4183_v32 }
 0x470   : > { %v4200_v8 = vadd.f32 4536.0, %v4184_v47  ;;  %v4201_v34 = vadd.f32 4536.0, %v4185_v51  ;;  %v4206_v13 = vmul.f32 %v9232_v11, %v4190_v41  ;;  %v4202_v0 = vadd.f32 4536.0, %v4186_v18 }
 0x471   : > { %v4207_v3 = vmul.f32 %v9239_v23, %v4191_v54  ;;  %v4208_v38 = vmul.f32 %v9247_v33, %v4192_v58  ;;  %v4219_v49 = vadd.f32 546.0, %v4203_v20  ;;  %v4209_v17 = vmul.f32 %v9253_v53, %v4193_v12 }
 0x472   : > { %v4210_v6 = vmul.f32 %v9263_v39, %v4194_v19  ;;  %v4211_v59 = vmul.f32 %v9272_v28, %v4195_v5  ;;  %v4220_v16 = vadd.f32 546.0, %v4204_v35  ;;  %v4212_v63 = vmul.f32 %v9281_v56, %v4196_v22 }
 0x473   : > { %v4213_v50 = vmul.f32 %v9289_v52, %v4197_v42  ;;  %v4214_v15 = vmul.f32 %v9299_v46, %v4198_v61  ;;  %v4221_v37 = vadd.f32 546.0, %v4205_v1  ;;  %v4215_v32 = vmul.f32 %v9304_v40, %v4199_v27 }
 0x474   : > { %v4216_v47 = vmul.f32 %v9309_v57, %v4200_v8  ;;  %v4217_v51 = vmul.f32 %v9315_v48, %v4201_v34  ;;  %v4222_v41 = vadd.f32 546.0, %v4206_v13  ;;  %v4218_v18 = vmul.f32 %v9320_v4, %v4202_v0 }
 0x475   : > { %v4223_v54 = vadd.f32 546.0, %v4207_v3  ;;  %v4224_v58 = vadd.f32 546.0, %v4208_v38  ;;  %v4235_v20 = vmul.f32 %v9217_v36, %v4219_v49  ;;  %v4225_v12 = vadd.f32 546.0, %v4209_v17 }
 0x476   : > { %v4226_v19 = vadd.f32 546.0, %v4210_v6  ;;  %v4227_v5 = vadd.f32 546.0, %v4211_v59  ;;  %v4236_v35 = vmul.f32 %v9222_v9, %v4220_v16  ;;  %v4228_v22 = vadd.f32 546.0, %v4212_v63 }
 0x477   : > { %v4229_v42 = vadd.f32 546.0, %v4213_v50  ;;  %v4230_v61 = vadd.f32 546.0, %v4214_v15  ;;  %v4237_v1 = vmul.f32 %v9227_v14, %v4221_v37  ;;  %v4231_v27 = vadd.f32 546.0, %v4215_v32 }
 0x478   : > { %v4232_v8 = vadd.f32 546.0, %v4216_v47  ;;  %v4233_v34 = vadd.f32 546.0, %v4217_v51  ;;  %v4238_v13 = vmul.f32 %v9232_v11, %v4222_v41  ;;  %v4234_v0 = vadd.f32 546.0, %v4218_v18 }
 0x479   : > { %v4239_v3 = vmul.f32 %v9239_v23, %v4223_v54  ;;  %v4240_v38 = vmul.f32 %v9247_v33, %v4224_v58  ;;  %v4251_v49 = vadd.f32 36.0, %v4235_v20  ;;  %v4241_v17 = vmul.f32 %v9253_v53, %v4225_v12 }
 0x47a   : > { %v4242_v6 = vmul.f32 %v9263_v39, %v4226_v19  ;;  %v4243_v59 = vmul.f32 %v9272_v28, %v4227_v5  ;;  %v4252_v16 = vadd.f32 36.0, %v4236_v35  ;;  %v4244_v63 = vmul.f32 %v9281_v56, %v4228_v22 }
 0x47b   : > { %v4245_v50 = vmul.f32 %v9289_v52, %v4229_v42  ;;  %v4246_v15 = vmul.f32 %v9299_v46, %v4230_v61  ;;  %v4253_v37 = vadd.f32 36.0, %v4237_v1  ;;  %v4247_v32 = vmul.f32 %v9304_v40, %v4231_v27 }
 0x47c   : > { %v4248_v47 = vmul.f32 %v9309_v57, %v4232_v8  ;;  %v4249_v51 = vmul.f32 %v9315_v48, %v4233_v34  ;;  %v4254_v41 = vadd.f32 36.0, %v4238_v13  ;;  %v4250_v18 = vmul.f32 %v9320_v4, %v4234_v0 }
 0x47d   : > { %v4255_v54 = vadd.f32 36.0, %v4239_v3  ;;  %v4256_v58 = vadd.f32 36.0, %v4240_v38  ;;  %v4267_v20 = vmul.f32 %v9217_v36, %v4251_v49  ;;  %v4257_v12 = vadd.f32 36.0, %v4241_v17 }
 0x47e   : > { %v4258_v19 = vadd.f32 36.0, %v4242_v6  ;;  %v4259_v5 = vadd.f32 36.0, %v4243_v59  ;;  %v4268_v35 = vmul.f32 %v9222_v9, %v4252_v16  ;;  %v4260_v22 = vadd.f32 36.0, %v4244_v63 }
 0x47f   : > { %v4261_v42 = vadd.f32 36.0, %v4245_v50  ;;  %v4262_v61 = vadd.f32 36.0, %v4246_v15  ;;  %v4269_v1 = vmul.f32 %v9227_v14, %v4253_v37  ;;  %v4263_v27 = vadd.f32 36.0, %v4247_v32  ;;  %v11534_v50 = vld [vmem:[#allocation21_spill] sm:$0xff] }
 0x480   : > { %v4264_v8 = vadd.f32 36.0, %v4248_v47  ;;  %v4265_v34 = vadd.f32 36.0, %v4249_v51  ;;  %v4270_v13 = vmul.f32 %v9232_v11, %v4254_v41  ;;  %v4266_v0 = vadd.f32 36.0, %v4250_v18  ;;  %v11537_v51 = vld [vmem:[#allocation77_spill] sm:$0xff]  ;;  %v11539_v18 = vld [vmem:[#allocation143_spill] sm:$0xff] }
 0x481   : > { %v4271_v3 = vmul.f32 %v9239_v23, %v4255_v54  ;;  %v4272_v36 = vmul.f32 %v9247_v33, %v4256_v58  ;;  %v4283_v38 = vadd.f32 1.0, %v4267_v20  ;;  %v4273_v49 = vmul.f32 %v9253_v53, %v4257_v12  ;;  %v11540_v54 = vld [vmem:[#allocation24_spill] sm:$0xff] }
 0x482   : > { %v4274_v9 = vmul.f32 %v9263_v39, %v4258_v19  ;;  %v4275_v17 = vmul.f32 %v9272_v28, %v4259_v5  ;;  %v4284_v6 = vadd.f32 1.0, %v4268_v35  ;;  %v4276_v14 = vmul.f32 %v9281_v56, %v4260_v22  ;;  %v11541_v12 = vld [vmem:[#allocation108_spill] sm:$0xff]  ;;  %v11542_v19 = vld [vmem:[#allocation25_spill] sm:$0xff] }
 0x483   : > { %v4277_v59 = vmul.f32 %v9289_v52, %v4261_v42  ;;  %v4285_v16 = vadd.f32 1.0, %v4269_v1  ;;  %v4278_v11 = vmul.f32 %v9299_v46, %v4262_v61  ;;  %v4279_v23 = vmul.f32 %v9304_v40, %v4263_v27  ;;  %v11543_v22 = vld [vmem:[#allocation84_spill] sm:$0xff]  ;;  %v11544_v42 = vld [vmem:[#allocation26_spill] sm:$0xff] }
 0x484   : > { %v4286_v33 = vadd.f32 1.0, %v4270_v13  ;;  %vm4301_vm2 = vcmp.gt.f32.partialorder %v8641_v62, 1.0  ;;  %v4280_v53 = vmul.f32 %v9309_v57, %v4264_v8  ;;  %v4287_v39 = vadd.f32 1.0, %v4271_v3  ;;  %v11533_v57 = vld [vmem:[#allocation78_spill] sm:$0xff]  ;;  %v11545_v27 = vld [vmem:[#allocation80_spill] sm:$0xff]  ;;  %v11546_v8 = vld [vmem:[#allocation27_spill] sm:$0xff] }
 0x485   : > { %vm4302_vm3 = vcmp.gt.f32.partialorder %v8648_v7, 1.0  ;;  %v4331_v28 = vsel %vm4299_vm0, %v4283_v38, %v9235_v24  ;;  %v4281_v56 = vmul.f32 %v9315_v48, %v4265_v34  ;;  %v4288_v52 = vadd.f32 1.0, %v4272_v36  ;;  %v11535_v24 = vld [vmem:[#allocation83_spill] sm:$0xff]  ;;  %v11536_v48 = vld [vmem:[#allocation22_spill] sm:$0xff]  ;;  %v11548_v3 = vld [vmem:[#allocation144_spill] sm:$0xff] }
 0x486   : > { %vm4303_vm4 = vcmp.gt.f32.partialorder %v8655_v30, 1.0  ;;  %v4332_v46 = vsel %vm4300_vm1, %v4284_v6, %v9237_v10  ;;  %v4282_v40 = vmul.f32 %v9320_v4, %v4266_v0  ;;  %v4289_v63 = vadd.f32 1.0, %v4273_v49  ;;  %v11538_v10 = vld [vmem:[#allocation23_spill] sm:$0xff]  ;;  %v11547_v0 = vld [vmem:[#allocation66_spill] sm:$0xff]  ;;  %v11549_v49 = vld [vmem:[#allocation76_spill] sm:$0xff] }
 0x487   : > { %vm4304_vm5 = vcmp.gt.f32.partialorder %v11533_v57, 1.0  ;;  %v4333_v15 = vsel %vm4301_vm2, %v4285_v16, %v11534_v50  ;;  %v4290_v37 = vadd.f32 1.0, %v4274_v9  ;;  %vm4305_vm6 = vcmp.gt.f32.partialorder %v11535_v24, 1.0  ;;  %v11550_v9 = vld [vmem:[#allocation145_spill] sm:$0xff]  ;;  %v11558_v50 = vld [vmem:[#allocation58_spill] sm:$0xff] }
 0x488   : > { %v4334_v32 = vsel %vm4302_vm3, %v4286_v33, %v11536_v48  ;;  %5392 = vrcp.f32 %v4331_v28  ;;  %v4291_v47 = vadd.f32 1.0, %v4275_v17  ;;  %vm4306_vm7 = vcmp.gt.f32.partialorder %v11537_v51, 1.0 }
 0x489   : > { %v4335_v4 = vsel %vm4303_vm4, %v4287_v39, %v11538_v10  ;;  %5394 = vrcp.f32 %v4332_v46  ;;  %v4292_v41 = vadd.f32 1.0, %v4276_v14  ;;  %vm4307_vm8 = vcmp.gt.f32.partialorder %v11539_v18, 1.0  ;;  %v11551_v14 = vld [vmem:[#allocation105_spill] sm:$0xff] }
 0x48a   : > { %v4336_v58 = vsel %vm4304_vm5, %v4288_v52, %v11540_v54  ;;  %5396 = vrcp.f32 %v4333_v15  ;;  %v4293_v20 = vadd.f32 1.0, %v4277_v59  ;;  %vm4308_vm9 = vcmp.gt.f32.partialorder %v11541_v12, 1.0  ;;  %v11552_v59 = vld [vmem:[#allocation146_spill] sm:$0xff] }
 0x48b   : > { %v4337_v5 = vsel %vm4305_vm6, %v4289_v63, %v11542_v19  ;;  %5398 = vrcp.f32 %v4334_v32  ;;  %v4294_v35 = vadd.f32 1.0, %v4278_v11  ;;  %vm4309_vm10 = vcmp.gt.f32.partialorder %v11543_v22, 1.0  ;;  %v11553_v11 = vld [vmem:[#allocation54_spill] sm:$0xff] }
 0x48c   : > { %v4338_v61 = vsel %vm4306_vm7, %v4290_v37, %v11544_v42  ;;  %5400 = vrcp.f32 %v4335_v4  ;;  %v4295_v1 = vadd.f32 1.0, %v4279_v23  ;;  %vm4310_vm11 = vcmp.gt.f32.partialorder %v11545_v27, 1.0  ;;  %v11554_v23 = vld [vmem:[#allocation111_spill] sm:$0xff]  ;;  %v11556_v52 = vld [vmem:[#allocation62_spill] sm:$0xff]  ;;  %v11559_v37 = vld [vmem:[#allocation149_spill] sm:$0xff] }
 0x48d   : > { %v4339_v34 = vsel %vm4307_vm8, %v4291_v47, %v11546_v8  ;;  %5402 = vrcp.f32 %v4336_v58  ;;  %v4296_v13 = vadd.f32 1.0, %v4280_v53  ;;  %vm4311_vm12 = vcmp.gt.f32.partialorder %v11547_v0, 1.0  ;;  %v11555_v53 = vld [vmem:[#allocation147_spill] sm:$0xff]  ;;  %v11561_v32 = vld [vmem:[#allocation150_spill] sm:$0xff]  ;;  %v11564_v58 = vld [vmem:[#allocation156_spill] sm:$0xff] }
 0x48e   : > { %v4340_v36 = vsel %vm4308_vm9, %v4292_v41, %v11548_v3  ;;  %5404 = vrcp.f32 %v4337_v5  ;;  %v4297_v38 = vadd.f32 1.0, %v4281_v56  ;;  %vm4312_vm13 = vcmp.gt.f32.partialorder %v11549_v49, 1.0  ;;  %v11566_v42 = vld [vmem:[#allocation65_spill] sm:$0xff]  ;;  %v11569_v3 = vld [vmem:[#allocation28_spill] sm:$0xff] }
 0x48f   : > { %v4341_v17 = vsel %vm4309_vm10, %v4293_v20, %v11550_v9  ;;  %5406 = vrcp.f32 %v4338_v61  ;;  %v4298_v6 = vadd.f32 1.0, %v4282_v40  ;;  %vm4313_vm14 = vcmp.gt.f32.partialorder %v11551_v14, 1.0  ;;  %v11557_v40 = vld [vmem:[#allocation148_spill] sm:$0xff] }
 0x490   : > { %v4342_v16 = vsel %vm4310_vm11, %v4294_v35, %v11552_v59  ;;  %5408 = vrcp.f32 %v4339_v34  ;;  %vm4314_vm15 = vcmp.gt.f32.partialorder %v11553_v11, 1.0  ;;  %v4315_v33 = vsel %vm4299_vm0, %v9489_v21, %v11554_v23  ;;  %v11565_v35 = vld [vmem:[#allocation82_spill] sm:$0xff] }
 0x491   : > { %v4343_v39 = vsel %vm4311_vm12, %v4295_v1, %v11555_v53  ;;  %5410 = vrcp.f32 %v4340_v36  ;;  %v4033_v56 = vadd.f32 1.0, %v9460_v29  ;;  %v4316_v46 = vsel %vm4300_vm1, %v9491_v26, %v11556_v52  ;;  %v11560_v26 = vld [vmem:[#allocation85_spill] sm:$0xff]  ;;  %v11567_v1 = vld [vmem:[#allocation44_spill] sm:$0xff]  ;;  %v11573_v53 = vld [vmem:[#allocation154_spill] sm:$0xff] }
 0x492   : > { %v5393_v28 = vpop.eup %5392  ;;  %v4344_v63 = vsel %vm4312_vm13, %v4296_v13, %v11557_v40  ;;  %5412 = vrcp.f32 %v4341_v17  ;;  %v4034_v21 = vadd.f32 1.0, %v9463_v55  ;;  %v4317_v15 = vsel %vm4301_vm2, %v9493_v60, %v11558_v50  ;;  %v11562_v60 = vld [vmem:[#allocation112_spill] sm:$0xff] }
 0x493   : > { %v5395_v44 = vpop.eup %5394  ;;  %v4345_v29 = vsel %vm4313_vm14, %v4297_v38, %v11559_v37  ;;  %5414 = vrcp.f32 %v4342_v16  ;;  %v4318_v48 = vsel %vm4302_vm3, %v9495_v31, %v11560_v26  ;;  %v4346_v55 = vsel %vm4314_vm15, %v4298_v6, %v11561_v32  ;;  %v11563_v31 = vld [vmem:[#allocation86_spill] sm:$0xff]  ;;  %v11570_v38 = vld [vmem:[#allocation97_spill] sm:$0xff]  ;;  %v11577_v50 = vld [vmem:[#allocation104_spill] sm:$0xff] }
 0x494   : > { %v5397_v43 = vpop.eup %5396  ;;  %v4348_v47 = vmul.f32 %v5393_v28, %v4315_v33  ;;  %5416 = vrcp.f32 %v4343_v39  ;;  %v4035_v62 = vadd.f32 1.0, %v9466_v45  ;;  %v4319_v4 = vsel %vm4303_vm4, %v9497_v2, %v11562_v60  ;;  %v11571_v6 = vld [vmem:[#allocation29_spill] sm:$0xff]  ;;  %v11574_v28 = vld [vmem:[#allocation67_spill] sm:$0xff] }
 0x495   : > { %v5399_v10 = vpop.eup %5398  ;;  %v4350_v41 = vmul.f32 %v5395_v44, %v4316_v46  ;;  %5418 = vrcp.f32 %v4344_v63  ;;  %v4036_v7 = vadd.f32 1.0, %v9469_v25  ;;  %v4320_v20 = vsel %vm4304_vm5, %v11564_v58, %v11563_v31  ;;  %v11568_v25 = vld [vmem:[#allocation12_spill] sm:$0xff]  ;;  %v11572_v16 = vld [vmem:[#allocation13_spill] sm:$0xff]  ;;  %v11575_v46 = vld [vmem:[#allocation155_spill] sm:$0xff] }
 0x496   : > { %v5401_v54 = vpop.eup %5400  ;;  %v4352_v19 = vmul.f32 %v5397_v43, %v4317_v15  ;;  %5420 = vrcp.f32 %v4345_v29  ;;  %v4037_v45 = vadd.f32 1.0, %v11565_v35  ;;  %v4321_v30 = vsel %vm4305_vm6, %v4033_v56, %v11566_v42  ;;  %v11576_v63 = vld [vmem:[#allocation14_spill] sm:$0xff]  ;;  %v11578_v15 = vld [vmem:[#allocation81_spill] sm:$0xff]  ;;  %v11579_v29 = vld [vmem:[#allocation15_spill] sm:$0xff] }
 0x497   : > { %v5403_v5 = vpop.eup %5402  ;;  %v4354_v2 = vmul.f32 %v5399_v10, %v4318_v48  ;;  %5422 = vrcp.f32 %v4346_v55  ;;  %v4038_v8 = vadd.f32 1.0, %v11567_v1  ;;  %v4322_v34 = vsel %vm4306_vm7, %v4034_v21, %v11568_v25  ;;  %v11580_v48 = vld [vmem:[#allocation153_spill] sm:$0xff]  ;;  %v11581_v55 = vld [vmem:[#allocation72_spill] sm:$0xff]  ;;  %v11583_v60 = vld [vmem:[#allocation51_spill] sm:$0xff] }
 0x498   : > { %v5405_v61 = vpop.eup %5404  ;;  %v4356_v57 = vmul.f32 %v5401_v54, %v4319_v4  ;;  %5424 = vlog2.f32 %v4348_v47  ;;  %v4039_v36 = vadd.f32 1.0, %v11569_v3  ;;  %v4323_v9 = vsel %vm4307_vm8, %v4035_v62, %v11570_v38  ;;  %v11582_v62 = vld [vmem:[#allocation55_spill] sm:$0xff]  ;;  %v11587_v35 = vld [vmem:[#allocation89_spill] sm:$0xff]  ;;  %v11593_v3 = vld [vmem:[#allocation96_spill] sm:$0xff] }
 0x499   : > { %v5407_v13 = vpop.eup %5406  ;;  %v4358_v24 = vmul.f32 %v5403_v5, %v4320_v20  ;;  %5426 = vlog2.f32 %v4350_v41  ;;  %v4040_v59 = vadd.f32 1.0, %v11571_v6  ;;  %v4324_v23 = vsel %vm4308_vm9, %v4036_v7, %v11572_v16  ;;  %v11584_v41 = vld [vmem:[#allocation103_spill] sm:$0xff]  ;;  %v11586_v20 = vld [vmem:[#allocation17_spill] sm:$0xff] }
 0x49a   : > { %v5409_v17 = vpop.eup %5408  ;;  %v4360_v51 = vmul.f32 %v5405_v61, %v4321_v30  ;;  %5428 = vlog2.f32 %v4352_v19  ;;  %v4041_v39 = vadd.f32 1.0, %v11573_v53  ;;  %v4325_v56 = vsel %vm4309_vm10, %v4037_v45, %v11574_v28  ;;  %v11585_v31 = vld [vmem:[#allocation95_spill] sm:$0xff]  ;;  %v11589_v30 = vld [vmem:[#allocation93_spill] sm:$0xff] }
 0x49b   : > { %v5411_v33 = vpop.eup %5410  ;;  %v4362_v18 = vmul.f32 %v5407_v13, %v4322_v34  ;;  %5430 = vlog2.f32 %v4354_v2  ;;  %v4042_v40 = vadd.f32 1.0, %v11575_v46  ;;  %v4326_v44 = vsel %vm4310_vm11, %v4038_v8, %v11576_v63  ;;  %v11588_v45 = vld [vmem:[#allocation43_spill] sm:$0xff]  ;;  %v11590_v2 = vld [vmem:[#allocation138_spill] sm:$0xff] }
 0x49c   : > { %v5413_v52 = vpop.eup %5412  ;;  %v4364_v12 = vmul.f32 %v5409_v17, %v4323_v9  ;;  %5432 = vlog2.f32 %v4356_v57  ;;  %v3235_v37 = vsub.f32 %v11578_v15, %v11577_v50  ;;  %v4327_v22 = vsel %vm4311_vm12, %v4039_v36, %v11579_v29  ;;  %v11591_v8 = vld [vmem:[#allocation102_spill] sm:$0xff]  ;;  %v11594_v36 = vld [vmem:[#allocation92_spill] sm:$0xff]  ;;  %v11597_v28 = vld [vmem:[#allocation63_spill] sm:$0xff] }
 0x49d   : > { %v5415_v21 = vpop.eup %5414  ;;  %v4366_v43 = vmul.f32 %v5411_v33, %v4324_v23  ;;  %5434 = vlog2.f32 %v4358_v24  ;;  %v3194_v32 = vmul.f32 0.6931472, %v11580_v48  ;;  %v4328_v27 = vsel %vm4312_vm13, %v4040_v59, %v11581_v55  ;;  %v11592_v34 = vld [vmem:[#allocation90_spill] sm:$0xff]  ;;  %v11595_v59 = vld [vmem:[#allocation59_spill] sm:$0xff]  ;;  %v11605_v55 = vld [vmem:[#allocation124_spill] sm:$0xff] }
 0x49e   : > { %v5417_v26 = vpop.eup %5416  ;;  %v4368_v47 = vmul.f32 %v5413_v52, %v4325_v56  ;;  %5436 = vlog2.f32 %v4360_v51  ;;  %v3208_v4 = vmul.f32 %v11583_v60, %v11582_v62  ;;  %v4329_v0 = vsel %vm4313_vm14, %v4041_v39, %v11584_v41  ;;  %v11596_v39 = vld [vmem:[#allocation47_spill] sm:$0xff]  ;;  %v11599_v63 = vld [vmem:[#allocation118_spill] sm:$0xff]  ;;  %v11606_v62 = vld [vmem:[#allocation37_spill] sm:$0xff] }
 0x49f   : > { %v5419_v10 = vpop.eup %5418  ;;  %v4370_v54 = vmul.f32 %v5415_v21, %v4326_v44  ;;  %5438 = vlog2.f32 %v4362_v18  ;;  %v9764_v58 = vadd.f32 0.9189385, %v11585_v31  ;;  %v4330_v49 = vsel %vm4314_vm15, %v4042_v40, %v11586_v20  ;;  %v11600_v44 = vld [vmem:[#allocation115_spill] sm:$0xff]  ;;  %v11642_v50 = vld [vmem:[#allocation109_spill] sm:$0xff] }
 0x4a0   : > { %v5421_v7 = vpop.eup %5420  ;;  %v4372_v19 = vmul.f32 %v5417_v26, %v4327_v22  ;;  %5440 = vlog2.f32 %v4364_v12  ;;  %v3209_v42 = vmul.f32 %v11588_v45, %v11587_v35  ;;  %v3236_v14 = vsub.f32 %v11590_v2, %v11589_v30  ;;  %v11603_v26 = vld [vmem:[#allocation119_spill] sm:$0xff]  ;;  %v11616_v35 = vld [vmem:[#allocation126_spill] sm:$0xff] }
 0x4a1   : > { %v5423_v5 = vpop.eup %5422  ;;  %v4374_v61 = vmul.f32 %v5419_v10, %v4328_v27  ;;  %5442 = vlog2.f32 %v4366_v43  ;;  %v3210_v25 = vmul.f32 %v3194_v32, %v11591_v8  ;;  %v9775_v57 = vadd.f32 0.9189385, %v11592_v34  ;;  %v11602_v43 = vld [vmem:[#allocation106_spill] sm:$0xff]  ;;  %v11607_v60 = vld [vmem:[#allocation91_spill] sm:$0xff]  ;;  %v11674_v27 = vld [vmem:[#allocation41_spill] sm:$0xff] }
 0x4a2   : > { %v5425_v1 = vpop.eup %5424  ;;  %v4376_v13 = vmul.f32 %v5421_v7, %v4329_v0  ;;  %5444 = vlog2.f32 %v4368_v47  ;;  %v3237_v38 = vsub.f32 %v11594_v36, %v11593_v3  ;;  %v4378_v9 = vmul.f32 %v5423_v5, %v4330_v49  ;;  %v11610_v0 = vld [vmem:[#allocation98_spill] sm:$0xff]  ;;  %v11612_v20 = vld [vmem:[#allocation107_spill] sm:$0xff]  ;;  %v11613_v49 = vld [vmem:[#allocation116_spill] sm:$0xff] }
 0x4a3   : > { %v5427_v11 = vpop.eup %5426  ;;  %v4380_v24 = vmul.f32 0.6931472, %v5425_v1  ;;  %5446 = vlog2.f32 %v4370_v54  ;;  %v9779_v6 = vadd.f32 0.9189385, %v3208_v4  ;;  %v3238_v16 = vsub.f32 %v9764_v58, %v11595_v59  ;;  %v11611_v7 = vld [vmem:[#allocation30_spill] sm:$0xff]  ;;  %v11623_v36 = vld [vmem:[#allocation32_spill] sm:$0xff] }
 0x4a4   : > { %v5429_v17 = vpop.eup %5428  ;;  %v4382_v23 = vmul.f32 0.6931472, %v5427_v11  ;;  %5448 = vlog2.f32 %v4372_v19  ;;  %v9783_v33 = vadd.f32 0.9189385, %v3209_v42  ;;  %v11598_v56 = vsub.f32 %v11596_v39, %v11597_v28  ;;  %v11617_v42 = vld [vmem:[#allocation31_spill] sm:$0xff]  ;;  %v11618_v8 = vld [vmem:[#allocation50_spill] sm:$0xff] }
 0x4a5   : > { %v5431_v51 = vpop.eup %5430  ;;  %v4384_v53 = vmul.f32 0.6931472, %v5429_v17  ;;  %5450 = vlog2.f32 %v4374_v61  ;;  %v9790_v46 = vadd.f32 0.9189385, %v3210_v25  ;;  %v11601_v12 = vsub.f32 %v11599_v63, %v11600_v44  ;;  %v11619_v25 = vld [vmem:[#allocation52_spill] sm:$0xff]  ;;  %v11629_v28 = vld [vmem:[#allocation33_spill] sm:$0xff] }
 0x4a6   : > { %v9788_v18 = vadd.f32 %v4380_v24, %v11598_v56  ;;  %v5433_v52 = vpop.eup %5432  ;;  %v4386_v40 = vmul.f32 0.6931472, %v5431_v51  ;;  %5452 = vlog2.f32 %v4376_v13  ;;  %v11604_v48 = vsub.f32 %v11602_v43, %v11603_v26  ;;  %v11624_v17 = vld [vmem:[#allocation40_spill] sm:$0xff]  ;;  %v11631_v44 = vld [vmem:[#allocation137_spill] sm:$0xff]  ;;  %v11669_v26 = vld [vmem:[#allocation38_spill] sm:$0xff] }
 0x4a7   : > { %v9795_v21 = vadd.f32 %v4382_v23, %v11601_v12  ;;  %v5435_v29 = vpop.eup %5434  ;;  %v4388_v22 = vmul.f32 0.6931472, %v5433_v52  ;;  %5454 = vlog2.f32 %v4378_v9  ;;  %v11608_v4 = vsub.f32 %v11606_v62, %v11607_v60  ;;  %v11625_v59 = vld [vmem:[#allocation120_spill] sm:$0xff]  ;;  %v11630_v52 = vld [vmem:[#allocation117_spill] sm:$0xff]  ;;  %v11673_v45 = vld [vmem:[#allocation39_spill] sm:$0xff] }
 0x4a8   : > { %v9800_v32 = vadd.f32 %v4384_v53, %v11604_v48  ;;  %v5437_v47 = vpop.eup %5436  ;;  %v4390_v10 = vmul.f32 0.6931472, %v5435_v29  ;;  %5456 = vrcp.f32 %v11611_v7  ;;  %v11614_v19 = vsub.f32 %v11612_v20, %v11613_v49  ;;  %v11632_v12 = vld [vmem:[#allocation56_spill] sm:$0xff] }
 0x4a9   : > { %v9807_v41 = vadd.f32 %v4386_v40, %v11608_v4  ;;  %v5439_v31 = vpop.eup %5438  ;;  %v4392_v58 = vmul.f32 0.6931472, %v5437_v47  ;;  %5458 = vrcp.f32 %v11617_v42  ;;  %v11620_v34 = vsub.f32 %v11618_v8, %v11619_v25  ;;  %v11636_v47 = vld [vmem:[#allocation94_spill] sm:$0xff] }
 0x4aa   : > { %v9815_v5 = vadd.f32 %v4388_v22, %v11614_v19  ;;  %v5441_v61 = vpop.eup %5440  ;;  %v4394_v1 = vmul.f32 0.6931472, %v5439_v31  ;;  %5460 = vrcp.f32 %v11623_v36  ;;  %v11626_v23 = vsub.f32 %v11624_v17, %v11625_v59  ;;  %v11639_v31 = vld [vmem:[#allocation75_spill] sm:$0xff]  ;;  %v11668_v19 = vld [vmem:[#allocation158_spill] sm:$0xff]  ;;  %v325_v17 = vld [vmem:[%s5948_s26 + $0x50] sm:$0xff] }
 0x4ab   : > { %11609 = vst [vmem:[#allocation78_spill] sm:$0xff] %v9807_v41  ;;  %v9823_v13 = vadd.f32 %v4390_v10, %v11620_v34  ;;  %v5443_v9 = vpop.eup %5442  ;;  %v4396_v24 = vmul.f32 0.6931472, %v5441_v61  ;;  %5462 = vrcp.f32 %v11629_v28  ;;  %v3239_v40 = vsub.f32 %v9775_v57, %v11630_v52  ;;  %v11647_v34 = vld [vmem:[#allocation34_spill] sm:$0xff] }
 0x4ac   : > { %11615 = vst [vmem:[#allocation21_spill] sm:$0xff] %v9815_v5  ;;  %v9831_v51 = vadd.f32 %v4392_v58, %v11626_v23  ;;  %v5445_v56 = vpop.eup %5444  ;;  %v4398_v63 = vmul.f32 0.6931472, %v5443_v9  ;;  %v11633_v29 = vsub.f32 %v11631_v44, %v11632_v12  ;;  %v3240_v10 = vsub.f32 %v9779_v6, %v11636_v47  ;;  %v11648_v9 = vld [vmem:[#allocation79_spill] sm:$0xff]  ;;  %v11655_v47 = vld [vmem:[#allocation110_spill] sm:$0xff] }
 0x4ad   : > { %11621 = vst [vmem:[#allocation83_spill] sm:$0xff] %v9823_v13  ;;  %v5447_v48 = vpop.eup %5446  ;;  %v4400_v62 = vmul.f32 0.6931472, %v5445_v56  ;;  %v9850_v60 = vadd.f32 %v4396_v24, %v3235_v37  ;;  %v3241_v58 = vsub.f32 %v9783_v33, %v11639_v31  ;;  %v3242_v15 = vsub.f32 %v9790_v46, %v11642_v50  ;;  %v11653_v44 = vld [vmem:[#allocation35_spill] sm:$0xff]  ;;  %v318_v50 = vld [vmem:[%s5948_s26 + $0x18] sm:$0xff]  ;;  %v11663_v31 = vld [vmem:[#allocation88_spill] sm:$0xff] }
 0x4ae   : > { %11627 = vst [vmem:[#allocation22_spill] sm:$0xff] %v9831_v51  ;;  %v9841_v22 = vadd.f32 %v4394_v1, %v11633_v29  ;;  %v5449_v7 = vpop.eup %5448  ;;  %v4402_v20 = vmul.f32 0.6931472, %v5447_v48  ;;  %v9859_v49 = vadd.f32 %v4398_v63, %v3236_v14  ;;  %5464 = vrcp.f32 %v11647_v34  ;;  %v316_v29 = vld [vmem:[%s5948_s26 + $0x8] sm:$0xff]  ;;  %v11665_v14 = vld [vmem:[#allocation157_spill] sm:$0xff] }
 0x4af   : > { %11637 = vst [vmem:[#allocation23_spill] sm:$0xff] %v9850_v60  ;;  %v5451_v42 = vpop.eup %5450  ;;  %v4404_v37 = vmul.f32 0.6931472, %v5449_v7  ;;  %v9865_v61 = vadd.f32 %v4400_v62, %v3237_v38  ;;  %v9875_v24 = vmul.f32 0.6931472, %v11648_v9  ;;  %5466 = vrcp.f32 %v11653_v44  ;;  %v11661_v9 = vld [vmem:[#allocation36_spill] sm:$0xff] }
 0x4b0   : > { %11634 = vst [vmem:[#allocation77_spill] sm:$0xff] %v9841_v22  ;;  %11640 = vst [vmem:[#allocation143_spill] sm:$0xff] %v9859_v49  ;;  %v5453_v8 = vpop.eup %5452  ;;  %v4406_v25 = vmul.f32 0.6931472, %v5451_v42  ;;  %v9869_v30 = vadd.f32 %v4402_v20, %v3238_v16  ;;  %v315_v16 = vld [vmem:[%s5948_s26] sm:$0xff]  ;;  %v317_v42 = vld [vmem:[%s5948_s26 + $0x10] sm:$0xff]  ;;  %5468 = vrcp.f32 %v11661_v9  ;;  %v4446_v4 = vmul.f32 %v11668_v19, %v316_v29 }
 0x4b1   : > { %11643 = vst [vmem:[#allocation24_spill] sm:$0xff] %v9865_v61  ;;  %v5455_v36 = vpop.eup %5454  ;;  %v4408_v46 = vmul.f32 0.6931472, %v5453_v8  ;;  %v9877_v38 = vadd.f32 %v4404_v37, %v3239_v40  ;;  %v11654_v40 = vld [vmem:[#allocation87_spill] sm:$0xff]  ;;  %v9892_v62 = vmul.f32 0.6931472, %v11655_v47  ;;  %5470 = vrcp.f32 %v11669_v26 }
 0x4b2   : > { %11645 = vst [vmem:[#allocation108_spill] sm:$0xff] %v9869_v30  ;;  %v5457_v23 = vpop.eup %5456  ;;  %v4410_v28 = vmul.f32 0.6931472, %v5455_v36  ;;  %v9882_v56 = vadd.f32 %v4406_v25, %v3240_v10  ;;  %v9889_v48 = vmul.f32 0.6931472, %v11654_v40  ;;  %v11658_v37 = vld [vmem:[#allocation48_spill] sm:$0xff]  ;;  %5472 = vrcp.f32 %v11673_v45 }
 0x4b3   : > { %11649 = vst [vmem:[#allocation25_spill] sm:$0xff] %v9877_v38  ;;  %v5459_v12 = vpop.eup %5458  ;;  %v9894_v7 = vadd.f32 %v4408_v46, %v3241_v58  ;;  %v9901_v8 = vmul.f32 0.6931472, %v11658_v37  ;;  %v319_v40 = vld [vmem:[%s5948_s26 + $0x20] sm:$0xff]  ;;  %v320_v58 = vld [vmem:[%s5948_s26 + $0x28] sm:$0xff]  ;;  %v11662_v46 = vld [vmem:[#allocation53_spill] sm:$0xff]  ;;  %v4448_v37 = vmul.f32 %v5457_v23, %v317_v42  ;;  %5474 = vrcp.f32 %v11674_v27 }
 0x4b4   : > { %11651 = vst [vmem:[#allocation84_spill] sm:$0xff] %v9882_v56  ;;  %v5461_v20 = vpop.eup %5460  ;;  %v9903_v25 = vadd.f32 %v4410_v28, %v3242_v15  ;;  %v9911_v47 = vmul.f32 0.6931472, %v11662_v46  ;;  %v9914_v63 = vmul.f32 0.6931472, %v11663_v31  ;;  %v4444_v15 = vmul.f32 %v11665_v14, %v315_v16  ;;  %v11666_v28 = vld [vmem:[#allocation57_spill] sm:$0xff] }
 0x4b5   : > { %11656 = vst [vmem:[#allocation26_spill] sm:$0xff] %v9894_v7  ;;  %v5463_v44 = vpop.eup %5462  ;;  %v9920_v33 = vmul.f32 0.6931472, %v11666_v28  ;;  %v11670_v46 = vld [vmem:[#allocation139_spill] sm:$0xff]  ;;  %v11671_v31 = vld [vmem:[#allocation16_spill] sm:$0xff]  ;;  %v4450_v14 = vmul.f32 %v5459_v12, %v318_v50  ;;  %v4452_v28 = vmul.f32 %v5461_v20, %v319_v40  ;;  %v11675_v9 = vld [vmem:[#allocation73_spill] sm:$0xff]  ;;  %v9997_v51 = vstv %s4969_s23 }
 0x4b6   : > { %11659 = vst [vmem:[#allocation80_spill] sm:$0xff] %v9903_v25  ;;  %v9927_v39 = vmul.f32 0.6931472, %v11670_v46  ;;  %v9930_v3 = vmul.f32 0.6931472, %v11671_v31  ;;  %v4454_v54 = vmul.f32 %v5463_v44, %v320_v58  ;;  %v11677_v19 = vld [vmem:[#allocation18_spill] sm:$0xff] }
 0x4b7   : > { %v9935_v25 = vmul.f32 0.6931472, %v11675_v9  ;;  %v9938_v26 = vmul.f32 0.6931472, %v11677_v19  ;;  %v11679_v46 = vld [vmem:[#allocation42_spill] sm:$0xff]  ;;  %v4475_v36 = vadd.f32 1.0, %v4444_v15 }
 0x4b8   : > { %11672 = vst [vmem:[#allocation27_spill] sm:$0xff] %v9930_v3  ;;  %5476 = vrcp.f32 %v11679_v46  ;;  %v5465_v31 = vpop.eup %5464  ;;  %v321_v23 = vld [vmem:[%s5948_s26 + $0x30] sm:$0xff]  ;;  %v11680_v7 = vld [vmem:[#allocation19_spill] sm:$0xff]  ;;  %v11682_v12 = vld [vmem:[#allocation20_spill] sm:$0xff]  ;;  %v4476_v44 = vadd.f32 1.0, %v4446_v4  ;;  %v4477_v46 = vadd.f32 1.0, %v4448_v37 }
 0x4b9   : > { %11676 = vst [vmem:[#allocation66_spill] sm:$0xff] %v9935_v25  ;;  %11678 = vst [vmem:[#allocation144_spill] sm:$0xff] %v9938_v26  ;;  %v9943_v45 = vmul.f32 0.6931472, %v11680_v7  ;;  %v9946_v20 = vmul.f32 0.6931472, %v11682_v12  ;;  %v5467_v34 = vpop.eup %5466 }
 0x4ba   : > { %v11684_v27 = vld [vmem:[#allocation45_spill] sm:$0xff]  ;;  %v11685_v9 = vld [vmem:[#allocation151_spill] sm:$0xff]  ;;  %v11687_v19 = vld [vmem:[#allocation152_spill] sm:$0xff]  ;;  %v4478_v12 = vadd.f32 1.0, %v4450_v14  ;;  %v4480_v4 = vadd.f32 1.0, %v4454_v54 }
 0x4bb   : > { %11681 = vst [vmem:[#allocation76_spill] sm:$0xff] %v9943_v45  ;;  %11683 = vst [vmem:[#allocation145_spill] sm:$0xff] %v9946_v20  ;;  %5478 = vrcp.f32 %v11684_v27  ;;  %v9950_v59 = vmul.f32 0.6931472, %v11685_v9  ;;  %v9953_v56 = vmul.f32 0.6931472, %v11687_v19  ;;  %v4456_v9 = vmul.f32 %v5465_v31, %v321_v23  ;;  %v5469_v19 = vpop.eup %5468 }
 0x4bc   : > { %v11689_v15 = vld [vmem:[#allocation46_spill] sm:$0xff]  ;;  %v11690_v38 = vld [vmem:[#allocation49_spill] sm:$0xff]  ;;  %v4479_v27 = vadd.f32 1.0, %v4452_v28  ;;  %v323_v10 = vld [vmem:[%s5948_s26 + $0x40] sm:$0xff]  ;;  %v4539_v30 = vadd.f32 1e-10, %v315_v16 }
 0x4bd   : > { %11686 = vst [vmem:[#allocation105_spill] sm:$0xff] %v9950_v59  ;;  %11688 = vst [vmem:[#allocation146_spill] sm:$0xff] %v9953_v56  ;;  %5480 = vrcp.f32 %v11689_v15  ;;  %v322_v7 = vld [vmem:[%s5948_s26 + $0x38] sm:$0xff]  ;;  %v4540_v52 = vadd.f32 1e-10, %v316_v29  ;;  %v324_v61 = vld [vmem:[%s5948_s26 + $0x48] sm:$0xff] }
 0x4be   : > { %5482 = vrcp.f32 %v11690_v38  ;;  %v4541_v37 = vadd.f32 1e-10, %v317_v42  ;;  %v4542_v15 = vadd.f32 1e-10, %v318_v50  ;;  %v4651_v38 = vlaneseq  ;;  %v326_v49 = vld [vmem:[%s5948_s26 + $0x58] sm:$0xff]  ;;  %v327_v14 = vld [vmem:[%s5948_s26 + $0x60] sm:$0xff] }
 0x4bf   : > { %5484 = vlog2.f32 %v4475_v36  ;;  %v4458_v2 = vmul.f32 %v5467_v34, %v322_v7  ;;  %v4543_v54 = vadd.f32 1e-10, %v319_v40  ;;  %v9963_v28 = vadd.f32 1e-10, %v320_v58  ;;  %v5471_v36 = vpop.eup %5470  ;;  %v328_v50 = vld [vmem:[%s5948_s26 + $0x68] sm:$0xff]  ;;  %v9976_v56 = vld [vmem:[%s5948_s26 + $0x78] sm:$0xff] }
 0x4c0   : > { %5486 = vlog2.f32 %v4476_v44  ;;  %v9965_v16 = vadd.f32 1e-10, %v321_v23  ;;  %v9967_v29 = vadd.f32 1e-10, %v322_v7  ;;  %v9969_v31 = vadd.f32 1e-10, %v323_v10  ;;  %v5473_v42 = vpop.eup %5472 }
 0x4c1   : > { %5488 = vlog2.f32 %v4477_v46  ;;  %v9973_v44 = vld [vmem:[%s5948_s26 + $0x70] sm:$0xff]  ;;  %v4460_v34 = vmul.f32 %v5469_v19, %v323_v10  ;;  %v4481_v46 = vadd.f32 1.0, %v4456_v9  ;;  %v9978_v40 = vadd.f32 1e-10, %v324_v61  ;;  %v5475_v58 = vpop.eup %5474 }
 0x4c2   : > { %5490 = vlog2.f32 %v4478_v12  ;;  %v9980_v23 = vadd.f32 1e-10, %v325_v17  ;;  %v9982_v12 = vadd.f32 1e-10, %v326_v49  ;;  %v9984_v7 = vand.u32 127, %v4651_v38  ;;  %v5477_v60 = vpop.eup %5476 }
 0x4c3   : > { %5492 = vlog2.f32 %v4479_v27  ;;  %v4462_v1 = vmul.f32 %v5471_v36, %v324_v61  ;;  %v4482_v59 = vadd.f32 1.0, %v4458_v2  ;;  %v9987_v22 = vadd.f32 1e-10, %v327_v14 }
 0x4c4   : > { %5494 = vlog2.f32 %v4480_v4  ;;  %11691 = vst [vmem:[#allocation54_spill] sm:$0xff] %v9984_v7  ;;  %v9989_v9 = vadd.f32 1e-10, %v328_v50  ;;  %v9992_v27 = vadd.f32 1e-10, %v9973_v44  ;;  %v4464_v6 = vmul.f32 %v5473_v42, %v325_v17 }
 0x4c5   : > { %5496 = vlog2.f32 %v4539_v30  ;;  %v5479_v10 = vpop.eup %5478  ;;  %v9995_v4 = vadd.f32 1e-10, %v9976_v56  ;;  %v4483_v20 = vadd.f32 1.0, %v4460_v34  ;;  %v9999_v2 = vshrl.u32 %v4651_v38, 7 }
 0x4c6   : > { %5498 = vlog2.f32 %v4540_v52  ;;  %v4658_v30 = vadd.s32 128, %v9984_v7  ;;  %v4659_v36 = vadd.s32 256, %v9984_v7  ;;  %v4484_v45 = vadd.f32 1.0, %v4462_v1 }
 0x4c7   : > { %v5481_v19 = vpop.eup %5480  ;;  %5500 = vlog2.f32 %v4481_v46  ;;  %v4660_v52 = vadd.s32 384, %v9984_v7  ;;  %v4661_v17 = vadd.s32 512, %v9984_v7  ;;  %v4466_v34 = vmul.f32 %v5475_v58, %v326_v49 }
 0x4c8   : > { %v5483_v61 = vpop.eup %5482  ;;  %5502 = vlog2.f32 %v4541_v37  ;;  %v4662_v46 = vadd.s32 640, %v9984_v7  ;;  %v4663_v37 = vadd.s32 768, %v9984_v7  ;;  %v4468_v13 = vmul.f32 %v5477_v60, %v327_v14 }
 0x4c9   : > { %v10003_v57 = vpop.eup %5484  ;;  %5504 = vlog2.f32 %v4482_v59  ;;  %v4485_v43 = vadd.f32 1.0, %v4464_v6  ;;  %v4664_v26 = vadd.s32 896, %v9984_v7  ;;  %v4665_v59 = vadd.s32 1024, %v9984_v7 }
 0x4ca   : > { %v5487_v42 = vpop.eup %5486  ;;  %5506 = vlog2.f32 %v4542_v15  ;;  %v4666_v5 = vadd.s32 1152, %v9984_v7  ;;  %v4667_v49 = vadd.s32 1280, %v9984_v7  ;;  %v4668_v58 = vadd.s32 1408, %v9984_v7 }
 0x4cb   : > { %v10009_v38 = vpop.eup %5488  ;;  %5508 = vlog2.f32 %v4483_v20  ;;  %v4669_v53 = vadd.s32 1536, %v9984_v7  ;;  %v10020_v60 = vadd.s32 1664, %v9984_v7  ;;  %v4470_v20 = vmul.f32 %v5479_v10, %v328_v50 }
 0x4cc   : > { %v5491_v1 = vpop.eup %5490  ;;  %5510 = vlog2.f32 %v4543_v54  ;;  %v4486_v14 = vadd.f32 1.0, %v4466_v34  ;;  %v10026_v54 = vadd.s32 1792, %v9984_v7  ;;  %v4487_v41 = vadd.f32 1.0, %v4468_v13 }
 0x4cd   : > { %v10015_v15 = vpop.eup %5492  ;;  %5512 = vlog2.f32 %v4484_v45  ;;  %11692 = vst [vmem:[#allocation111_spill] sm:$0xff] %v10020_v60  ;;  %v10029_v45 = vadd.s32 1920, %v9984_v7  ;;  %v10033_v11 = vadd.s32 %v9997_v51, %v9984_v7  ;;  %v4472_v3 = vmul.f32 %v5481_v19, %v9973_v44 }
 0x4ce   : > { %v10022_v6 = vpop.eup %5494  ;;  %5514 = vlog2.f32 %v9963_v28  ;;  %11693 = vst [vmem:[#allocation147_spill] sm:$0xff] %v10026_v54  ;;  %v10038_v28 = vadd.s32 %v9997_v51, %v4658_v30  ;;  %v10041_v50 = vadd.s32 %v9997_v51, %v4659_v36  ;;  %v10050_v10 = vadd.s32 %v9997_v51, %v4661_v17 }
 0x4cf   : > { %v5497_v25 = vpop.eup %5496  ;;  %5516 = vlog2.f32 %v4485_v43  ;;  %11694 = vst [vmem:[#allocation62_spill] sm:$0xff] %v10029_v45  ;;  %v10047_v43 = vadd.s32 %v9997_v51, %v4660_v52  ;;  %v10053_v44 = vadd.s32 %v9997_v51, %v4662_v46  ;;  %v4488_v19 = vadd.f32 1.0, %v4470_v20 }
 0x4d0   : > { %v5499_v60 = vpop.eup %5498  ;;  %5518 = vlog2.f32 %v9965_v16  ;;  %v10056_v30 = vadd.s32 %v9997_v51, %v4663_v37  ;;  %v10059_v36 = vadd.s32 %v9997_v51, %v4664_v26  ;;  %v10064_v17 = vadd.s32 %v9997_v51, %v4665_v59 }
 0x4d1   : > { %v10043_v13 = vpop.eup %5500  ;;  %5520 = vlog2.f32 %v9967_v29  ;;  %v4556_v29 = vmul.f32 0.6931472, %v5497_v25  ;;  %v4558_v52 = vmul.f32 0.6931472, %v5499_v60  ;;  %v4474_v46 = vmul.f32 %v5483_v61, %v9976_v56 }
 0x4d2   : > { %v5503_v16 = vpop.eup %5502  ;;  %5522 = vlog2.f32 %v4486_v14  ;;  %v4489_v45 = vadd.f32 1.0, %v4472_v3  ;;  %v10069_v37 = vadd.s32 %v9997_v51, %v4666_v5  ;;  %v10078_v25 = vadd.s32 %v9997_v51, %v4668_v58 }
 0x4d3   : > { %v10061_v34 = vpop.eup %5504  ;;  %5524 = vlog2.f32 %v4487_v41  ;;  %v4560_v26 = vmul.f32 0.6931472, %v5503_v16  ;;  %v10075_v41 = vadd.s32 %v9997_v51, %v4667_v49  ;;  %v4492_v56 = vmul.f32 0.6931472, %v10003_v57 }
 0x4d4   : > { %v5507_v7 = vpop.eup %5506  ;;  %5526 = vlog2.f32 %v9969_v31  ;;  %v4494_v3 = vmul.f32 0.6931472, %v5487_v42  ;;  %v10082_v31 = vadd.s32 %v9997_v51, %v4669_v53  ;;  %v4588_v49 = vsub.f32 %v9875_v24, %v4558_v52  ;;  %v11696_v42 = vld [vmem:[#allocation130_spill] sm:$0xff] }
 0x4d5   : > { %v10071_v20 = vpop.eup %5508  ;;  %5528 = vlog2.f32 %v9978_v40  ;;  %v4562_v61 = vmul.f32 0.6931472, %v5507_v7  ;;  %v11695_v40 = vld [vmem:[#allocation74_spill] sm:$0xff]  ;;  %v4490_v58 = vadd.f32 1.0, %v4474_v46  ;;  %v4496_v16 = vmul.f32 0.6931472, %v10009_v38 }
 0x4d6   : > { %v5511_v59 = vpop.eup %5510  ;;  %5530 = vlog2.f32 %v4488_v19  ;;  %v4587_v60 = vsub.f32 %v11695_v40, %v4556_v29  ;;  %v4498_v54 = vmul.f32 0.6931472, %v5491_v1  ;;  %vm4691_vm0 = vcmp.lt.s32.totalorder %v9999_v2, 6  ;;  %v11697_v1 = vld [vmem:[#allocation131_spill] sm:$0xff] }
 0x4d7   : > { %v10084_v5 = vpop.eup %5512  ;;  %5532 = vlog2.f32 %v9980_v23  ;;  %vm4692_vm1 = vcmp.lt.s32.totalorder %v10033_v11, 2500  ;;  %v4564_v57 = vmul.f32 0.6931472, %v5511_v59  ;;  %v4589_v23 = vsub.f32 %v9889_v48, %v4560_v26  ;;  %v5564_v46 = vld [vmem:[%s5959_s8] sm:$0xff]  ;;  %v5565_v59 = vld [vmem:[%s5959_s8 + $0x8] sm:$0xff] }
 0x4d8   : > { %v5515_v14 = vpop.eup %5514  ;;  %5534 = vlog2.f32 %v4489_v45  ;;  %vm4693_vm2 = vcmp.lt.s32.totalorder %v10038_v28, 2500  ;;  %v4500_v7 = vmul.f32 0.6931472, %v10015_v15  ;;  %v4523_v38 = vmul.f32 %v4492_v56, %v11696_v42  ;;  %v11698_v56 = vld [vmem:[#allocation132_spill] sm:$0xff]  ;;  %vm10146_vm8 = vmand %vm4691_vm0, %vm4692_vm1 }
 0x4d9   : > { %v10092_v53 = vpop.eup %5516  ;;  %5536 = vlog2.f32 %v9982_v12  ;;  %v4524_v45 = vmul.f32 %v4494_v3, %v11697_v1  ;;  %v4566_v29 = vmul.f32 0.6931472, %v5515_v14  ;;  %v4590_v52 = vsub.f32 %v9892_v62, %v4562_v61  ;;  %v11699_v3 = vld [vmem:[#allocation133_spill] sm:$0xff]  ;;  %vm10157_vm9 = vmand %vm4691_vm0, %vm4693_vm2 }
 0x4da   : > { %v5519_v24 = vpop.eup %5518  ;;  %5538 = vlog2.f32 %v9987_v22  ;;  %v4603_v12 = vmul.f32 %v5564_v46, %v4587_v60  ;;  %v4604_v48 = vmul.f32 %v5565_v59, %v4588_v49  ;;  %vm4694_vm3 = vcmp.lt.s32.totalorder %v10041_v50, 2500  ;;  %v5566_v61 = vld [vmem:[%s5959_s8 + $0x10] sm:$0xff]  ;;  %v5567_v46 = vld [vmem:[%s5959_s8 + $0x18] sm:$0xff] }
 0x4db   : > { %v5521_v19 = vpop.eup %5520  ;;  %v4502_v15 = vmul.f32 0.6931472, %v10022_v6  ;;  %5540 = vlog2.f32 %v4490_v58  ;;  %v4525_v40 = vmul.f32 %v4496_v16, %v11698_v56  ;;  %v4526_v22 = vmul.f32 %v4498_v54, %v11699_v3  ;;  %v11700_v58 = vld [vmem:[#allocation134_spill] sm:$0xff]  ;;  %v5569_v3 = vld [vmem:[%s5959_s8 + $0x28] sm:$0xff]  ;;  %vm10175_vm11 = vmand %vm4691_vm0, %vm4694_vm3 }
 0x4dc   : > { %v5523_v26 = vpop.eup %5522  ;;  %v4568_v14 = vmul.f32 0.6931472, %v5519_v24  ;;  %5542 = vlog2.f32 %v9989_v9  ;;  %v4591_v62 = vsub.f32 %v9901_v8, %v4564_v57  ;;  %v4605_v60 = vmul.f32 %v5566_v61, %v4589_v23 }
 0x4dd   : > { %v10108_v42 = vpop.eup %5524  ;;  %vm4695_vm4 = vcmp.lt.s32.totalorder %v10047_v43, 2500  ;;  %v4504_v6 = vmul.f32 0.6931472, %v10043_v13  ;;  %v4527_v1 = vmul.f32 %v4500_v7, %v11700_v58  ;;  %v4570_v16 = vmul.f32 0.6931472, %v5521_v19  ;;  %v11701_v7 = vld [vmem:[#allocation135_spill] sm:$0xff] }
 0x4de   : > { %v5527_v49 = vpop.eup %5526  ;;  %5544 = vlog2.f32 %v9992_v27  ;;  %v4592_v24 = vsub.f32 %v9911_v47, %v4566_v29  ;;  %v4606_v9 = vmul.f32 %v5567_v46, %v4590_v52  ;;  %v4619_v59 = vadd.f32 %v4603_v12, %v4523_v38  ;;  %v5568_v29 = vld [vmem:[%s5959_s8 + $0x20] sm:$0xff]  ;;  %v11702_v12 = vld [vmem:[#allocation136_spill] sm:$0xff]  ;;  %v5570_v58 = vld [vmem:[%s5959_s8 + $0x30] sm:$0xff] }
 0x4df   : > { %v5529_v54 = vpop.eup %5528  ;;  %v4620_v8 = vadd.f32 %v4604_v48, %v4524_v45  ;;  %vm4696_vm5 = vcmp.lt.s32.totalorder %v10050_v10, 2500  ;;  %v4506_v23 = vmul.f32 0.6931472, %v10061_v34  ;;  %v4508_v13 = vmul.f32 0.6931472, %v10071_v20  ;;  %vm10194_vm13 = vmand %vm4691_vm0, %vm4695_vm4  ;;  %v11725_v43 = vld [vmem:[#allocation140_spill] sm:$0xff] }
 0x4e0   : > { %v10120_v57 = vpop.eup %5530  ;;  %v4528_v19 = vmul.f32 %v4502_v15, %v11701_v7  ;;  %5546 = vlog2.f32 %v9995_v4  ;;  %v4572_v56 = vmul.f32 0.6931472, %v5527_v49  ;;  %v4593_v47 = vsub.f32 %v9914_v63, %v4568_v14  ;;  %v11716_v7 = vld [vmem:[#allocation78_spill] sm:$0xff]  ;;  %vm10211_vm15 = vmand %vm4691_vm0, %vm4696_vm5 }
 0x4e1   : > { %v5533_v27 = vpop.eup %5532  ;;  %v4607_v38 = vmul.f32 %v5568_v29, %v4591_v62  ;;  %v4621_v45 = vadd.f32 %v4605_v60, %v4525_v40  ;;  %vm4697_vm6 = vcmp.lt.s32.totalorder %v10053_v44, 2500  ;;  %v4510_v34 = vmul.f32 0.6931472, %v10084_v5  ;;  %v11708_v60 = vld [vmem:[#allocation125_spill] sm:$0xff] }
 0x4e2   : > { %v10129_v52 = vpop.eup %5534  ;;  %v4529_v20 = vmul.f32 %v4504_v6, %v11702_v12  ;;  %v4574_v48 = vmul.f32 0.6931472, %v5529_v54  ;;  %v4594_v15 = vsub.f32 %v9920_v33, %v4570_v16  ;;  %v4608_v61 = vmul.f32 %v5569_v3, %v4592_v24  ;;  %vm10228_vm2 = vmand %vm4691_vm0, %vm4697_vm6 }
 0x4e3   : > { %v5537_v4 = vpop.eup %5536  ;;  %v4622_v49 = vadd.f32 %v4606_v9, %v4526_v22  ;;  %v11703_v63 = vsub.f32 %v11605_v55, %v9788_v18  ;;  %v11704_v14 = vsub.f32 %v11610_v0, %v9795_v21  ;;  %vm4698_vm7 = vcmp.lt.s32.totalorder %v10056_v30, 2500  ;;  %v11707_v18 = vld [vmem:[#allocation60_spill] sm:$0xff] }
 0x4e4   : > { %v5539_v5 = vpop.eup %5538  ;;  %v4512_v22 = vmul.f32 0.6931472, %v10092_v53  ;;  %v4530_v55 = vmul.f32 %v4506_v23, %v11707_v18  ;;  %v4531_v6 = vmul.f32 %v4508_v13, %v11708_v60  ;;  %v4576_v21 = vmul.f32 0.6931472, %v5533_v27  ;;  %v5571_v23 = vld [vmem:[%s5959_s8 + $0x38] sm:$0xff]  ;;  %vm10244_vm3 = vmand %vm4691_vm0, %vm4698_vm7 }
 0x4e5   : > { %v4635_v40 = vadd.f32 %v4619_v59, %v11703_v63  ;;  %v4636_v62 = vadd.f32 %v4620_v8, %v11704_v14  ;;  %v4595_v11 = vsub.f32 %v9927_v39, %v4572_v56  ;;  %v4609_v16 = vmul.f32 %v5570_v58, %v4593_v47  ;;  %v10167_v46 = vpop.eup %5540  ;;  %v11712_v59 = vld [vmem:[#allocation27_spill] sm:$0xff]  ;;  %v11723_v63 = vld [vmem:[#allocation21_spill] sm:$0xff] }
 0x4e6   : > { %v4623_v54 = vadd.f32 %v4607_v38, %v4527_v1  ;;  %v11711_v53 = vsub.f32 %v11616_v35, %v9800_v32  ;;  %vm4699_vm10 = vcmp.lt.s32.totalorder %v10059_v36, 2500  ;;  %v4514_v28 = vmul.f32 0.6931472, %v5523_v26  ;;  %v5543_v32 = vpop.eup %5542  ;;  %v11715_v1 = vld [vmem:[#allocation68_spill] sm:$0xff]  ;;  %v11718_v38 = vld [vmem:[#allocation113_spill] sm:$0xff]  ;;  %v11729_v58 = vld [vmem:[#allocation99_spill] sm:$0xff] }
 0x4e7   : > { %v4578_v9 = vmul.f32 0.6931472, %v5537_v4  ;;  %v4596_v8 = vsub.f32 %v11712_v59, %v4574_v48  ;;  %v4610_v13 = vmul.f32 %v5571_v23, %v4594_v15  ;;  %v4624_v35 = vadd.f32 %v4608_v61, %v4528_v19  ;;  %v11719_v19 = vld [vmem:[#allocation66_spill] sm:$0xff]  ;;  %v5572_v4 = vld [vmem:[%s5959_s8 + $0x40] sm:$0xff]  ;;  %v5574_v23 = vld [vmem:[%s5959_s8 + $0x50] sm:$0xff] }
 0x4e8   : > { %v4637_v24 = vadd.f32 %v4621_v45, %v11711_v53  ;;  %v11717_v27 = vsub.f32 %v11715_v1, %v11716_v7  ;;  %vm4700_vm12 = vcmp.lt.s32.totalorder %v10064_v17, 2500  ;;  %v4724_v56 = vsel %vm10146_vm8, %v4635_v40, 0.0  ;;  %v5545_v47 = vpop.eup %5544  ;;  %v11743_v15 = vld [vmem:[#allocation77_spill] sm:$0xff]  ;;  %vm10261_vm4 = vmand %vm4691_vm0, %vm4699_vm10 }
 0x4e9   : > { %v4725_v50 = vsel %vm10157_vm9, %v4636_v62, 0.0  ;;  %v4516_v29 = vmul.f32 0.6931472, %v10108_v42  ;;  %v4532_v45 = vmul.f32 %v4510_v34, %v11718_v38  ;;  %v4580_v12 = vmul.f32 0.6931472, %v5539_v5  ;;  %v11726_v5 = vld [vmem:[#allocation144_spill] sm:$0xff]  ;;  %vm10278_vm5 = vmand %vm4691_vm0, %vm4700_vm12 }
 0x4ea   : > { %v4638_v26 = vadd.f32 %v4622_v49, %v11717_v27  ;;  %v4597_v48 = vsub.f32 %v11719_v19, %v4576_v21  ;;  %v4611_v3 = vmul.f32 %v5572_v4, %v4595_v11  ;;  %v4625_v61 = vadd.f32 %v4609_v16, %v4529_v20  ;;  %v11722_v49 = vld [vmem:[#allocation127_spill] sm:$0xff]  ;;  %v5547_v14 = vpop.eup %5546  ;;  %v5573_v21 = vld [vmem:[%s5959_s8 + $0x48] sm:$0xff]  ;;  %v11738_v27 = vld [vmem:[#allocation61_spill] sm:$0xff] }
 0x4eb   : > { %v11724_v42 = vsub.f32 %v11722_v49, %v11723_v63  ;;  %vm4701_vm14 = vcmp.lt.s32.totalorder %v10069_v37, 2500  ;;  %v4726_v34 = vsel %vm10175_vm11, %v4637_v24, 0.0  ;;  %v4533_v62 = vmul.f32 %v4512_v22, %v11725_v43  ;;  %v11730_v16 = vld [vmem:[#allocation83_spill] sm:$0xff]  ;;  %v5575_v38 = vld [vmem:[%s5959_s8 + $0x58] sm:$0xff]  ;;  %v11746_v63 = vld [vmem:[#allocation105_spill] sm:$0xff] }
 0x4ec   : > { %v4582_v33 = vmul.f32 0.6931472, %v5543_v32  ;;  %v4598_v18 = vsub.f32 %v11726_v5, %v4578_v9  ;;  %v4740_v60 = vadd.f32 %v4725_v50, %v4724_v56  ;;  %v4612_v0 = vmul.f32 %v5573_v21, %v4596_v8  ;;  %v11732_v9 = vld [vmem:[#allocation76_spill] sm:$0xff]  ;;  %v11739_v56 = vld [vmem:[#allocation145_spill] sm:$0xff]  ;;  %v11750_v5 = vld [vmem:[#allocation23_spill] sm:$0xff] }
 0x4ed   : > { %v4639_v40 = vadd.f32 %v4623_v54, %v11724_v42  ;;  %v4626_v11 = vadd.f32 %v4610_v13, %v4530_v55  ;;  %v11731_v54 = vsub.f32 %v11729_v58, %v11730_v16  ;;  %vm4702_vm1 = vcmp.lt.s32.totalorder %v10075_v41, 2500  ;;  %v11735_v32 = vld [vmem:[#allocation128_spill] sm:$0xff]  ;;  %v11752_v20 = vld [vmem:[#allocation114_spill] sm:$0xff]  ;;  %vm10296_vm7 = vmand %vm4691_vm0, %vm4701_vm14 }
 0x4ee   : > { %v4727_v53 = vsel %vm10194_vm13, %v4638_v26, 0.0  ;;  %v4518_v10 = vmul.f32 0.6931472, %v10120_v57  ;;  %v4584_v24 = vmul.f32 0.6931472, %v5545_v47  ;;  %v4599_v59 = vsub.f32 %v11732_v9, %v4580_v12  ;;  %v11753_v21 = vld [vmem:[#allocation146_spill] sm:$0xff]  ;;  %vm10314_vm9 = vmand %vm4691_vm0, %vm4702_vm1 }
 0x4ef   : > { %v4640_v22 = vadd.f32 %v4624_v35, %v11731_v54  ;;  %v4741_v8 = vadd.f32 %v4740_v60, %v4726_v34  ;;  %v4613_v13 = vmul.f32 %v5574_v23, %v4597_v48  ;;  %v4627_v39 = vadd.f32 %v4611_v3, %v4531_v6  ;;  %v11736_v35 = vld [vmem:[#allocation22_spill] sm:$0xff]  ;;  %v11742_v48 = vld [vmem:[#allocation69_spill] sm:$0xff]  ;;  %v5576_v34 = vld [vmem:[%s5959_s8 + $0x60] sm:$0xff] }
 0x4f0   : > { %v11737_v1 = vsub.f32 %v11735_v32, %v11736_v35  ;;  %v4728_v57 = vsel %vm10211_vm15, %v4639_v40, 0.0  ;;  %v4534_v44 = vmul.f32 %v4514_v28, %v11738_v27  ;;  %v4586_v26 = vmul.f32 0.6931472, %v5547_v14  ;;  %v5577_v58 = vld [vmem:[%s5959_s8 + $0x68] sm:$0xff]  ;;  %v11759_v9 = vld [vmem:[#allocation142_spill] sm:$0xff]  ;;  %v11767_v37 = vld [vmem:[#allocation147_spill] sm:$0xff] }
 0x4f1   : > { %v4600_v50 = vsub.f32 %v11739_v56, %v4582_v33  ;;  %v4742_v6 = vadd.f32 %v4741_v8, %v4727_v53  ;;  %v4614_v12 = vmul.f32 %v5575_v38, %v4598_v18  ;;  %v4628_v19 = vadd.f32 %v4612_v0, %v4532_v45  ;;  %v11749_v33 = vld [vmem:[#allocation129_spill] sm:$0xff]  ;;  %v11757_v53 = vld [vmem:[#allocation143_spill] sm:$0xff]  ;;  %v11763_v35 = vld [vmem:[#allocation70_spill] sm:$0xff] }
 0x4f2   : > { %v4641_v7 = vadd.f32 %v4625_v61, %v11737_v1  ;;  %v11744_v4 = vsub.f32 %v11742_v48, %v11743_v15  ;;  %v4729_v28 = vsel %vm10228_vm2, %v4640_v22, 0.0  ;;  %v4520_v30 = vmul.f32 0.6931472, %v10129_v52  ;;  %v11745_v61 = vld [vmem:[#allocation141_spill] sm:$0xff]  ;;  %v11756_v22 = vld [vmem:[#allocation100_spill] sm:$0xff] }
 0x4f3   : > { %v4535_v49 = vmul.f32 %v4516_v29, %v11745_v61  ;;  %v4601_v42 = vsub.f32 %v11746_v63, %v4584_v24  ;;  %v4743_v40 = vadd.f32 %v4742_v6, %v4728_v57  ;;  %v4615_v14 = vmul.f32 %v5576_v34, %v4599_v59  ;;  %v11760_v59 = vld [vmem:[#allocation111_spill] sm:$0xff]  ;;  %v11764_v1 = vld [vmem:[#allocation24_spill] sm:$0xff]  ;;  %v5579_v6 = vld [vmem:[%s5959_s8 + $0x78] sm:$0xff] }
 0x4f4   : > { %v4642_v3 = vadd.f32 %v4626_v11, %v11744_v4  ;;  %v4629_v43 = vadd.f32 %v4613_v13, %v4533_v62  ;;  %v11751_v18 = vsub.f32 %v11749_v33, %v11750_v5  ;;  %v4730_v29 = vsel %vm10244_vm3, %v4641_v7, 0.0  ;;  %v5578_v13 = vld [vmem:[%s5959_s8 + $0x70] sm:$0xff]  ;;  %v11771_v48 = vld [vmem:[#allocation108_spill] sm:$0xff]  ;;  %v11776_v63 = vld [vmem:[#allocation71_spill] sm:$0xff] }
 0x4f5   : > { %v4522_v36 = vmul.f32 0.6931472, %v10167_v46  ;;  %v4536_v60 = vmul.f32 %v4518_v10, %v11752_v20  ;;  %v4602_v0 = vsub.f32 %v11753_v21, %v4586_v26  ;;  %v4744_v11 = vadd.f32 %v4743_v40, %v4729_v28  ;;  %v11773_v28 = vld [vmem:[#allocation62_spill] sm:$0xff]  ;;  %v11782_v33 = vld [vmem:[#allocation84_spill] sm:$0xff]  ;;  %v11787_v62 = vld [vmem:[#allocation123_spill] sm:$0xff] }
 0x4f6   : > { %v4643_v52 = vadd.f32 %v4627_v39, %v11751_v18  ;;  %v4616_v16 = vmul.f32 %v5577_v58, %v4600_v50  ;;  %v4630_v54 = vadd.f32 %v4614_v12, %v4534_v44  ;;  %v11758_v24 = vsub.f32 %v11756_v22, %v11757_v53  ;;  %v11766_v44 = vld [vmem:[#allocation64_spill] sm:$0xff] }
 0x4f7   : > { %v4731_v10 = vsel %vm10261_vm4, %v4642_v3, 0.0  ;;  %v4537_v17 = vmul.f32 %v4520_v30, %v11759_v9  ;;  %v4688_v55 = vadd.s32 %v9997_v51, %v11760_v59  ;;  %vm4703_vm6 = vcmp.lt.s32.totalorder %v10078_v25, 2500 }
 0x4f8   : > { %v4644_v46 = vadd.f32 %v4628_v19, %v11758_v24  ;;  %v4745_v23 = vadd.f32 %v4744_v11, %v4730_v29  ;;  %v4617_v39 = vmul.f32 %v5578_v13, %v4601_v42  ;;  %v4631_v32 = vadd.f32 %v4615_v14, %v4535_v49  ;;  %v11770_v19 = vld [vmem:[#allocation101_spill] sm:$0xff]  ;;  %vm10330_vm10 = vmand %vm4691_vm0, %vm4703_vm6  ;;  %v11784_v29 = vld [vmem:[#allocation122_spill] sm:$0xff] }
 0x4f9   : > { %v11765_v7 = vsub.f32 %v11763_v35, %v11764_v1  ;;  %v4732_v27 = vsel %vm10278_vm5, %v4643_v52, 0.0  ;;  %v4538_v26 = vmul.f32 %v4522_v36, %v11766_v44  ;;  %v4689_v56 = vadd.s32 %v9997_v51, %v11767_v37  ;;  %v11777_v42 = vld [vmem:[#allocation25_spill] sm:$0xff]  ;;  %v11785_v36 = vld [vmem:[#allocation26_spill] sm:$0xff]  ;;  %v11788_v11 = vld [vmem:[#allocation80_spill] sm:$0xff] }
 0x4fa   : > { %vm4704_vm8 = vcmp.lt.s32.totalorder %v10082_v31, 2500  ;;  %v4746_v47 = vadd.f32 %v4745_v23, %v4731_v10  ;;  %v4618_v38 = vmul.f32 %v5579_v6, %v4602_v0  ;;  %v4632_v12 = vadd.f32 %v4616_v16, %v4536_v60  ;;  %v11790_v13 = vld [vmem:[#allocation54_spill] sm:$0xff]  ;;  %v4763_v35 = vld [vmem:[#allocation8] sm:$0xff] }
 0x4fb   : > { %v4645_v57 = vadd.f32 %v4629_v43, %v11765_v7  ;;  %v11772_v15 = vsub.f32 %v11770_v19, %v11771_v48  ;;  %v4733_v3 = vsel %vm10296_vm7, %v4644_v46, 0.0  ;;  %v4690_v41 = vadd.s32 %v9997_v51, %v11773_v28  ;;  %vm10343_vm12 = vmand %vm4691_vm0, %vm4704_vm8  ;;  %v11781_v43 = vld [vmem:[#allocation121_spill] sm:$0xff] }
 0x4fc   : > { %v4747_v61 = vadd.f32 %v4746_v47, %v4732_v27  ;;  %v4633_v49 = vadd.f32 %v4617_v39, %v4537_v17  ;;  %v11778_v45 = vsub.f32 %v11776_v63, %v11777_v42  ;;  %vm4705_vm11 = vcmp.lt.s32.totalorder %v4688_v55, 2500 }
 0x4fd   : > { %v4646_v4 = vadd.f32 %v4630_v54, %v11772_v15  ;;  %v4734_v34 = vsel %vm10314_vm9, %v4645_v57, 0.0  ;;  %v4634_v14 = vadd.f32 %v4618_v38, %v4538_v26  ;;  %v11783_v5 = vsub.f32 %v11781_v43, %v11782_v33  ;;  %vm4721_vm14 = vmand %vm4691_vm0, %vm4705_vm11 }
 0x4fe   : > { %v4647_v40 = vadd.f32 %v4631_v32, %v11778_v45  ;;  %v4748_v25 = vadd.f32 %v4747_v61, %v4733_v3  ;;  %vm4706_vm13 = vcmp.lt.s32.totalorder %v4689_v56, 2500  ;;  %v11786_v20 = vsub.f32 %v11784_v29, %v11785_v36 }
 0x4ff   : > { %v4648_v18 = vadd.f32 %v4632_v12, %v11783_v5  ;;  %v4735_v52 = vsel %vm10330_vm10, %v4646_v4, 0.0  ;;  %vm4707_vm15 = vcmp.lt.s32.totalorder %v4690_v41, 2500  ;;  %vm4722_vm1 = vmand %vm4691_vm0, %vm4706_vm13  ;;  %v11789_v58 = vsub.f32 %v11787_v62, %v11788_v11 }
 0x500   : > { %v4749_v31 = vadd.f32 %v4748_v25, %v4734_v34  ;;  %v4649_v60 = vadd.f32 %v4633_v49, %v11786_v20  ;;  %v4736_v21 = vsel %vm10343_vm12, %v4647_v40, 0.0  ;;  %vm4723_vm2 = vmand %vm4691_vm0, %vm4707_vm15  ;;  %vm4764_vm3 = vcmp.eq.s32.totalorder %v9999_v2, 0 }
 0x501   : > { %v4650_v16 = vadd.f32 %v4634_v14, %v11789_v58  ;;  %v4737_v54 = vsel %vm4721_vm14, %v4648_v18, 0.0  ;;  %vm4765_vm4 = vcmp.eq.s32.totalorder %v11790_v13, 0 }
 0x502   : > { %v4750_v0 = vadd.f32 %v4749_v31, %v4735_v52  ;;  %v4738_v53 = vsel %vm4722_vm1, %v4649_v60, 0.0  ;;  %vm4766_vm0 = vmand %vm4764_vm3, %vm4765_vm4 }
 0x503   : > { %v4739_v46 = vsel %vm4723_vm2, %v4650_v16, 0.0 }
 0x504   : > { %v4751_v22 = vadd.f32 %v4750_v0, %v4736_v21 }
 0x506   : > { %v4752_v24 = vadd.f32 %v4751_v22, %v4737_v54 }
 0x508   : > { %v4753_v10 = vadd.f32 %v4752_v24, %v4738_v53 }
 0x50a   : > { %v4754_v9 = vadd.f32 %v4753_v10, %v4739_v46 }
 0x50c   : > { %4755 = vadd.xlane.f32.xlu0 %v4754_v9 }
 0x599   : > { %v4756_v17 = vpop.xlane.xlu0 %4755 }
 0x59a   : > { %v4757_v59 = vrot.slane %v4756_v17, 4 }
 0x59c   : > { %v4758_v55 = vadd.f32 %v4757_v59, %v4756_v17 }
 0x59e   : > { %v4759_v8 = vrot.slane %v4758_v55, 2 }
 0x5a0   : > { %v4760_v23 = vadd.f32 %v4759_v8, %v4758_v55 }
 0x5a2   : > { %v4761_v39 = vrot.slane %v4760_v23, 1 }
 0x5a4   : > { %v4762_v32 = vadd.f32 %v4761_v39, %v4760_v23 }
 0x5a6   : > { %v4767_v1 = vsel %vm4766_vm0, %v4762_v32, 0.0 }
 0x5a7   : > { %v4768_v7 = vadd.f32 %v4767_v1, %v4763_v35 }
 0x5a9   : > { %4769 = vst [vmem:[#allocation8] sm:$0xff] %v4768_v7 }
 0x5aa   : > { %5677 = shalt.err (!%p5674_p8)
}
 0x5ab   : > { %s5678_s4 = scalar_lea.hbm %s10412_s3, 128 }
 0x5ac   : > { %p5679_p11 = scmp.ne.s32.totalorder %s10412_s3, %s5678_s4  ;;  %p5684_p0 = scmp.lt.u32.totalorder %s5678_s4, %s10412_s3 }
 0x5ae   : > { %p5680_p9 = pnand %p5679_p11, %p4984_p3 }
 0x5b0   : > { %p5681_p12 = pneg %p5680_p9 }
 0x5b2   : > { %p5686_p13 = pnand %p5684_p0, %p5681_p12 }
 0x5b4   : > { %5689 = shalt.err (!%p5686_p13)
}
 0x5b5   : > { %4981 = dma.vmem_to_hbm [thread:$0]  (%p4984_p3), %s4780_s11, 128, %s10412_s3, [#allocation4]  }
 0x5b6   : > { %5723 = dma.done.wait (%p4984_p3), [#allocation4], 128  }
 0x5b7   : > { %5725 = vsyncadd (%p4984_p3), [#allocation4], 4294967168 }
 0x5b8 PF: > { %s20_s17 = sadd.s32 1, %s5748_s17   ;;  %s11791_s12 = smov %s5732_s13 }
 0x5b9   : > { %p17_p7 = scmp.ge.s32.totalorder %s20_s17, 4   ;;  %s11792_s13 = smov %s5736_s14 }
 0x5ba   : > { %s11793_s14 = smov %s5826_s24  ;;  %s11794_s15 = smov %s5744_s16 }
 0x5bb   : > { %s11795_s16 = smov %s11797_s19  ;;  %19 = sbr.rel (!%p17_p7) target bundleno = 7 (0x7), region = 98 }
 0x5c2   :  { %4792 = vsyncpa [#allocation3], 1 }
 0x5c3   :  { %4794 = vsyncpa [#allocation3 + $0x1], 1 }
 0x5c4   :  { %4795 = vsyncpa [#allocation6], 1 }
 0x5c5   :  { %4797 = vsyncpa [#allocation6 + $0x1], 1 }
 0x5c6   :  { %4798 = vsyncpa [#allocation4], 1 }
 0x5c7   :  { %4800 = vsyncpa [#allocation4 + $0x1], 1 }

</bundles_post_ra>
